<compile_context>
chip_gen: v7x
topology: tpu7x:2x2x1
jax: 0.10.0
libtpu: 0.0.40
codegen_flags: <defaults>
</compile_context>

<pallas_src>
import functools
import math
from collections import namedtuple

import jax
import jax.numpy as jnp
from jax.experimental import pallas as pl
from jax.experimental.pallas import tpu as pltpu  # noqa: F401  (kept for TPU backend)

# ------------------------- config (__C) -------------------------
HIDDEN = 32        # __C.HIDDEN_SIZE
NHEAD = 4          # __C.MULTI_HEAD
DH = HIDDEN // NHEAD
FF = 4 * HIDDEN    # __C.FF_SIZE
ATT_STEP = 2       # __C.ATT_STEP
ATT_LAYER = 2      # __C.ATT_LAYER
LN_EPS = 1e-5      # PyTorch nn.LayerNorm default
SCALE = 1.0 / math.sqrt(DH)

Genotype = namedtuple("Genotype", ["img_gene", "que_gene"])

PFFN_KEYS = ("w1", "b1", "w2", "b2", "g", "b")
MHA_KEYS = ("wq", "bq", "wk", "bk", "wv", "bv", "wo", "bo", "g", "b")


# ============================ parameters ============================

def _dense(key, din, dout):
    w = jax.random.normal(key, (din, dout), jnp.float32) * (1.0 / math.sqrt(din))
    return w, jnp.zeros((1, dout), jnp.float32)


def _pffn_params(key):
    k1, k2 = jax.random.split(key)
    w1, b1 = _dense(k1, HIDDEN, FF)
    w2, b2 = _dense(k2, FF, HIDDEN)
    return {"w1": w1, "b1": b1, "w2": w2, "b2": b2,
            "g": jnp.ones((1, HIDDEN), jnp.float32),
            "b": jnp.zeros((1, HIDDEN), jnp.float32)}


def _mha_params(key):
    ks = jax.random.split(key, 4)
    wq, bq = _dense(ks[0], HIDDEN, HIDDEN)
    wk, bk = _dense(ks[1], HIDDEN, HIDDEN)
    wv, bv = _dense(ks[2], HIDDEN, HIDDEN)
    wo, bo = _dense(ks[3], HIDDEN, HIDDEN)
    # Natural (H,H) orientation; head h owns output columns [h*DH, (h+1)*DH).
    return {"wq": wq, "bq": bq, "wk": wk, "bk": bk, "wv": wv, "bv": bv,
            "wo": wo, "bo": bo,
            "g": jnp.ones((1, HIDDEN), jnp.float32),
            "b": jnp.zeros((1, HIDDEN), jnp.float32)}


class ParamBank:
    """Collects op params and stacks them per type into a few big arrays."""

    def __init__(self):
        self._pffn, self._mha = [], []

    def add(self, op, key):
        if op == "ffn":
            self._pffn.append(_pffn_params(key))
            return len(self._pffn) - 1
        self._mha.append(_mha_params(key))
        return len(self._mha) - 1

    def add_pffn(self, key):
        return self.add("ffn", key)

    def stacked(self):
        pffn = {k: jnp.stack([p[k] for p in self._pffn]) for k in PFFN_KEYS}
        mha = {k: jnp.stack([p[k] for p in self._mha]) for k in MHA_KEYS}
        return {"pffn": pffn, "mha": mha}


def init_backbone(key, genotype):
    """Returns (arch, params): arch is a static Python structure of op names and
    bank indices; params are the stacked numeric arrays."""
    bank = ParamBank()
    ks = jax.random.split(key, ATT_LAYER + 2)
    cells = []
    for c in range(ATT_LAYER):
        ck = jax.random.split(ks[c], 4 + ATT_STEP)
        cell = {
            "pre0": [bank.add_pffn(ck[0]), bank.add_pffn(ck[1])],
            "pre1": [bank.add_pffn(ck[2]), bank.add_pffn(ck[3])],
            "steps": [],
        }
        for s in range(ATT_STEP):
            i_op, i_idx = genotype.img_gene[s]
            q_op, q_idx = genotype.que_gene[s]
            sk_i, sk_q = jax.random.split(ck[4 + s])
            cell["steps"].append({
                "i_op": i_op, "i_idx": i_idx, "i_param": bank.add(i_op, sk_i),
                "q_op": q_op, "q_idx": q_idx, "q_param": bank.add(q_op, sk_q),
            })
        cells.append(cell)
    decoders = [bank.add_pffn(ks[ATT_LAYER]), bank.add_pffn(ks[ATT_LAYER + 1])]
    arch = {"cells": cells, "decoders": decoders}
    return arch, bank.stacked()


# ============================ fused Pallas kernel ============================

def _make_backbone_kernel(arch):
    n_p, n_m = len(PFFN_KEYS), len(MHA_KEYS)

    def kernel(*refs):
        xi_ref, xq_ref = refs[0], refs[1]
        # Pre-packed additive attention biases (batch block-diag + key padding),
        # already tiled over heads along lanes: shape (Lq_tot, NH*Lk_tot).
        bias_refs = {("i", "i"): refs[2], ("i", "q"): refs[3],
                     ("q", "q"): refs[4], ("q", "i"): refs[5]}
        # Head-block indicator: (NH*Lk_tot, H), 1 where row-block head == column head.
        hb_refs = {"i": refs[6], "q": refs[7]}
        pfr = dict(zip(PFFN_KEYS, refs[8:8 + n_p]))
        mhr = dict(zip(MHA_KEYS, refs[8 + n_p:8 + n_p + n_m]))
        o_img_ref, o_que_ref = refs[8 + n_p + n_m:]

        def dot(a, b):
            return jnp.dot(a, b, preferred_element_type=jnp.float32)

        def dot_tb(a, b):  # a @ b.T without materialising a transpose
            return jax.lax.dot_general(
                a, b, (((1,), (1,)), ((), ())),
                preferred_element_type=jnp.float32)

        def layer_norm(x, g, b):
            # Single-pass: sum(x) and sum(x*x) are independent reductions.
            mu = jnp.mean(x, axis=-1, keepdims=True)
            ms = jnp.mean(x * x, axis=-1, keepdims=True)
            var = ms - mu * mu
            return (x - mu) * jax.lax.rsqrt(var + LN_EPS) * g + b

        def pffn(idx, x):
            # Linear -> ReLU -> Linear -> residual -> LayerNorm
            h = jnp.maximum(dot(x, pfr["w1"][idx]) + pfr["b1"][idx], 0.0)
            y = dot(h, pfr["w2"][idx]) + pfr["b2"][idx]
            return layer_norm(x + y, pfr["g"][idx], pfr["b"][idx])

        def mha(idx, xq, xkv, q_side, k_side):
            # Head-packed multi-head attention (7 MXU pushes total):
            #   kb[h*Lk+j, r] = K_h[j, r]   if column r belongs to head h else 0
            #   s = q2 @ kb^T gives all heads' scores lane-packed: (Lq, NH*Lk)
            #   e @ hb  -> per-head softmax denominators, head-major (Lq, H)
            #   e @ vb  -> per-head contexts already merged head-major (Lq, H)
            bias = bias_refs[(q_side, k_side)][...]                 # (Lq, NH*Lk)
            hb = hb_refs[k_side][...]                               # (NH*Lk, H)

            q2 = dot(xq, mhr["wq"][idx]) + mhr["bq"][idx]           # (Lq, H)
            xt = jnp.concatenate([xkv] * NHEAD, axis=0)             # (NH*Lk, H)
            kb = (dot(xt, mhr["wk"][idx]) + mhr["bk"][idx]) * hb    # (NH*Lk, H)
            vb = (dot(xt, mhr["wv"][idx]) + mhr["bv"][idx]) * hb    # (NH*Lk, H)

            s = dot_tb(q2, kb) * SCALE - bias                       # (Lq, NH*Lk)
            # Per-row max over ALL packed lanes: constant within each head's
            # segment, so the per-head softmax is unchanged.
            e = jnp.exp(s - jnp.max(s, axis=-1, keepdims=True))
            denom = dot(e, hb)                                      # (Lq, H)
            ctx = dot(e, vb) * pl.reciprocal(denom, approx=True)    # (Lq, H)
            att = dot(ctx, mhr["wo"][idx]) + mhr["bo"][idx]
            return layer_norm(xq + att, mhr["g"][idx], mhr["b"][idx])

        def apply_op(op, idx, pair, sides):
            if op == "ffn":
                return pffn(idx, pair[0])
            if op == "sa":
                return mha(idx, pair[0], pair[0], sides[0], sides[0])
            return mha(idx, pair[0], pair[1], sides[0], sides[1])   # "ga"

        x_img = xi_ref[...]                   # (B*L_IMG, H) batch-folded
        x_que = xq_ref[...]                   # (B*L_QUE, H)

        fts_0 = [x_img, x_que]
        fts_1 = [x_img, x_que]
        for cell in arch["cells"]:
            f_pre_prev = [pffn(i, x) for i, x in zip(cell["pre0"], fts_0)]
            f_prev = [pffn(i, x) for i, x in zip(cell["pre1"], fts_1)]
            # feats_mean over the two preprocessed pairs
            states = [[(a + b) * 0.5 for a, b in zip(f_pre_prev, f_prev)]]
            for st in cell["steps"]:
                i_out = apply_op(st["i_op"], st["i_param"],
                                 states[st["i_idx"]], ("i", "q"))
                q_pair = list(states[st["q_idx"]])[::-1]
                q_out = apply_op(st["q_op"], st["q_param"],
                                 q_pair, ("q", "i"))
                states.append([i_out, q_out])
            last = states[-ATT_STEP:]
            c_out = [sum(s[k] for s in last) / float(ATT_STEP) for k in range(2)]
            fts_0, fts_1 = fts_1, c_out

        o_img_ref[...] = pffn(arch["decoders"][0], fts_1[0]).astype(o_img_ref.dtype)
        o_que_ref[...] = pffn(arch["decoders"][1], fts_1[1]).astype(o_que_ref.dtype)

    return kernel


def backbone_forward(arch, params, img, que, img_mask, que_mask):
    B, L_IMG, H = img.shape
    L_QUE = que.shape[1]
    # Batch folding: both batch elements share every matmul.
    x_img = img.reshape(B * L_IMG, H)
    x_que = que.reshape(B * L_QUE, H)

    def packed_bias(q_len, k_len, k_mask):
        # Additive bias: 1e9 where the key is padded or belongs to another
        # batch element; tiled over heads along lanes -> (B*q_len, NH*B*k_len).
        q_batch = jnp.repeat(jnp.arange(B), q_len)
        k_batch = jnp.repeat(jnp.arange(B), k_len)
        same = q_batch[:, None] == k_batch[None, :]
        key_ok = k_mask.reshape(1, B * k_len) == 0
        bias = jnp.where(same & key_ok, 0.0, 1e9).astype(jnp.float32)
        return jnp.tile(bias, (1, NHEAD))

    bias_ii = packed_bias(L_IMG, L_IMG, img_mask)
    bias_iq = packed_bias(L_IMG, L_QUE, que_mask)
    bias_qq = packed_bias(L_QUE, L_QUE, que_mask)
    bias_qi = packed_bias(L_QUE, L_IMG, img_mask)

    def head_block(k_tot):
        # (NH*k_tot, H): 1 where the row's head block matches the column's head.
        row_head = jnp.arange(NHEAD * k_tot) // k_tot
        col_head = jnp.arange(HIDDEN) // DH
        return (row_head[:, None] == col_head[None, :]).astype(jnp.float32)

    hb_i = head_block(B * L_IMG)
    hb_q = head_block(B * L_QUE)

    weights = ([params["pffn"][k] for k in PFFN_KEYS]
               + [params["mha"][k] for k in MHA_KEYS])

    # Single pallas_call, no grid: the whole working set (<1 MiB) lives in VMEM,
    # all inputs/outputs use the default whole-array VMEM placement.
    out_img, out_que = pl.pallas_call(
        _make_backbone_kernel(arch),
        out_shape=[jax.ShapeDtypeStruct((B * L_IMG, H), jnp.float32),
                   jax.ShapeDtypeStruct((B * L_QUE, H), jnp.float32)],
    )(x_img, x_que, bias_ii, bias_iq, bias_qq, bias_qi, hb_i, hb_q, *weights)

    return out_img.reshape(B, L_IMG, H), out_que.reshape(B, L_QUE, H)


# ============================ main ============================

if __name__ == "__main__":
    key = jax.random.PRNGKey(0)
    k_img, k_que, k_params = jax.random.split(key, 3)

    B, L_IMG, L_QUE = 2, 16, 8
    img = jax.random.normal(k_img, (B, L_IMG, HIDDEN), jnp.float32)
    que = jax.random.normal(k_que, (B, L_QUE, HIDDEN), jnp.float32)
    # 1.0 marks padded positions
    img_mask = jnp.zeros((B, L_IMG), jnp.float32).at[0, 12:].set(1.0)
    que_mask = jnp.zeros((B, L_QUE), jnp.float32).at[0, 6:].set(1.0)

    genotype = Genotype(
        img_gene=[("sa", 0), ("ga", 1)],
        que_gene=[("sa", 0), ("ffn", 1)],
    )

    arch, params = init_backbone(k_params, genotype)
    fwd = jax.jit(functools.partial(backbone_forward, arch))
    out_img, out_que = fwd(params, img, que, img_mask, que_mask)
    jax.block_until_ready((out_img, out_que))

    assert out_img.shape == (B, L_IMG, HIDDEN)
    assert out_que.shape == (B, L_QUE, HIDDEN)
    assert bool(jnp.all(jnp.isfinite(out_img)))
    assert bool(jnp.all(jnp.isfinite(out_que)))
    print("KERNEL_OK")
</pallas_src>

<mosaic_0001>
module attributes {stable_mosaic.version = 11 : i64} {
  func.func @kernel(%arg0: memref<32x32xf32, #tpu.memory_space<vmem>>, %arg1: memref<16x32xf32, #tpu.memory_space<vmem>>, %arg2: memref<32x128xf32, #tpu.memory_space<vmem>>, %arg3: memref<32x64xf32, #tpu.memory_space<vmem>>, %arg4: memref<16x64xf32, #tpu.memory_space<vmem>>, %arg5: memref<16x128xf32, #tpu.memory_space<vmem>>, %arg6: memref<128x32xf32, #tpu.memory_space<vmem>>, %arg7: memref<64x32xf32, #tpu.memory_space<vmem>>, %arg8: memref<12x32x128xf32, #tpu.memory_space<vmem>>, %arg9: memref<12x1x128xf32, #tpu.memory_space<vmem>>, %arg10: memref<12x128x32xf32, #tpu.memory_space<vmem>>, %arg11: memref<12x1x32xf32, #tpu.memory_space<vmem>>, %arg12: memref<12x1x32xf32, #tpu.memory_space<vmem>>, %arg13: memref<12x1x32xf32, #tpu.memory_space<vmem>>, %arg14: memref<6x32x32xf32, #tpu.memory_space<vmem>>, %arg15: memref<6x1x32xf32, #tpu.memory_space<vmem>>, %arg16: memref<6x32x32xf32, #tpu.memory_space<vmem>>, %arg17: memref<6x1x32xf32, #tpu.memory_space<vmem>>, %arg18: memref<6x32x32xf32, #tpu.memory_space<vmem>>, %arg19: memref<6x1x32xf32, #tpu.memory_space<vmem>>, %arg20: memref<6x32x32xf32, #tpu.memory_space<vmem>>, %arg21: memref<6x1x32xf32, #tpu.memory_space<vmem>>, %arg22: memref<6x1x32xf32, #tpu.memory_space<vmem>>, %arg23: memref<6x1x32xf32, #tpu.memory_space<vmem>>, %arg24: memref<32x32xf32, #tpu.memory_space<vmem>>, %arg25: memref<16x32xf32, #tpu.memory_space<vmem>>) attributes {dimension_semantics = [], scalar_prefetch = 0 : i64, scratch_operands = 0 : i64, tpu.core_type = #tpu.core_type<tc>} {
    %c0 = arith.constant 0 : index
    %c0_0 = arith.constant 0 : index
    %0 = vector.load %arg0[%c0, %c0_0] : memref<32x32xf32, #tpu.memory_space<vmem>>, vector<32x32xf32>
    %c0_1 = arith.constant 0 : index
    %c0_2 = arith.constant 0 : index
    %1 = vector.load %arg1[%c0_1, %c0_2] : memref<16x32xf32, #tpu.memory_space<vmem>>, vector<16x32xf32>
    %c0_3 = arith.constant 0 : index
    %c0_4 = arith.constant 0 : index
    %c0_5 = arith.constant 0 : index
    %2 = vector.load %arg8[%c0_3, %c0_4, %c0_5] : memref<12x32x128xf32, #tpu.memory_space<vmem>>, vector<1x32x128xf32>
    %3 = vector.shape_cast %2 : vector<1x32x128xf32> to vector<32x128xf32>
    %cst = arith.constant dense<0.000000e+00> : vector<32x128xf32>
    %4 = tpu.matmul %0, %3, %cst {dimension_numbers = #tpu.dot_dimension_numbers<[1], [0], [0], [1], [0, 0, 1, 1], [], []>} : vector<32x32xf32>, vector<32x128xf32>, vector<32x128xf32> -> vector<32x128xf32>
    %c0_6 = arith.constant 0 : index
    %c0_7 = arith.constant 0 : index
    %c0_8 = arith.constant 0 : index
    %5 = vector.load %arg9[%c0_6, %c0_7, %c0_8] : memref<12x1x128xf32, #tpu.memory_space<vmem>>, vector<1x1x128xf32>
    %6 = vector.shape_cast %5 : vector<1x1x128xf32> to vector<1x128xf32>
    %7 = vector.broadcast %6 : vector<1x128xf32> to vector<32x128xf32>
    %8 = arith.addf %4, %7 : vector<32x128xf32>
    %cst_9 = arith.constant 0.000000e+00 : f32
    %9 = vector.broadcast %cst_9 : f32 to vector<32x128xf32>
    %10 = arith.maximumf %8, %9 : vector<32x128xf32>
    %c0_10 = arith.constant 0 : index
    %c0_11 = arith.constant 0 : index
    %c0_12 = arith.constant 0 : index
    %11 = vector.load %arg10[%c0_10, %c0_11, %c0_12] : memref<12x128x32xf32, #tpu.memory_space<vmem>>, vector<1x128x32xf32>
    %12 = vector.shape_cast %11 : vector<1x128x32xf32> to vector<128x32xf32>
    %cst_13 = arith.constant dense<0.000000e+00> : vector<32x32xf32>
    %13 = tpu.matmul %10, %12, %cst_13 {dimension_numbers = #tpu.dot_dimension_numbers<[1], [0], [0], [1], [0, 0, 1, 1], [], []>} : vector<32x128xf32>, vector<128x32xf32>, vector<32x32xf32> -> vector<32x32xf32>
    %c0_14 = arith.constant 0 : index
    %c0_15 = arith.constant 0 : index
    %c0_16 = arith.constant 0 : index
    %14 = vector.load %arg11[%c0_14, %c0_15, %c0_16] : memref<12x1x32xf32, #tpu.memory_space<vmem>>, vector<1x1x32xf32>
    %15 = vector.shape_cast %14 : vector<1x1x32xf32> to vector<1x32xf32>
    %16 = vector.broadcast %15 : vector<1x32xf32> to vector<32x32xf32>
    %17 = arith.addf %13, %16 : vector<32x32xf32>
    %18 = arith.addf %0, %17 : vector<32x32xf32>
    %c0_17 = arith.constant 0 : index
    %c0_18 = arith.constant 0 : index
    %c0_19 = arith.constant 0 : index
    %19 = vector.load %arg12[%c0_17, %c0_18, %c0_19] : memref<12x1x32xf32, #tpu.memory_space<vmem>>, vector<1x1x32xf32>
    %20 = vector.shape_cast %19 : vector<1x1x32xf32> to vector<1x32xf32>
    %c0_20 = arith.constant 0 : index
    %c0_21 = arith.constant 0 : index
    %c0_22 = arith.constant 0 : index
    %21 = vector.load %arg13[%c0_20, %c0_21, %c0_22] : memref<12x1x32xf32, #tpu.memory_space<vmem>>, vector<1x1x32xf32>
    %22 = vector.shape_cast %21 : vector<1x1x32xf32> to vector<1x32xf32>
    %cst_23 = arith.constant dense<0.000000e+00> : vector<32xf32>
    %23 = vector.multi_reduction <add>, %18, %cst_23 [1] : vector<32x32xf32> to vector<32xf32>
    %24 = vector.shape_cast %23 : vector<32xf32> to vector<32x1xf32>
    %cst_24 = arith.constant 3.200000e+01 : f32
    %25 = vector.broadcast %cst_24 : f32 to vector<32x1xf32>
    %26 = arith.divf %24, %25 : vector<32x1xf32>
    %27 = arith.mulf %18, %18 : vector<32x32xf32>
    %cst_25 = arith.constant dense<0.000000e+00> : vector<32xf32>
    %28 = vector.multi_reduction <add>, %27, %cst_25 [1] : vector<32x32xf32> to vector<32xf32>
    %29 = vector.shape_cast %28 : vector<32xf32> to vector<32x1xf32>
    %cst_26 = arith.constant 3.200000e+01 : f32
    %30 = vector.broadcast %cst_26 : f32 to vector<32x1xf32>
    %31 = arith.divf %29, %30 : vector<32x1xf32>
    %32 = arith.mulf %26, %26 : vector<32x1xf32>
    %33 = arith.subf %31, %32 : vector<32x1xf32>
    %34 = vector.broadcast %26 : vector<32x1xf32> to vector<32x32xf32>
    %35 = arith.subf %18, %34 : vector<32x32xf32>
    %cst_27 = arith.constant 9.99999974E-6 : f32
    %36 = vector.broadcast %cst_27 : f32 to vector<32x1xf32>
    %37 = arith.addf %33, %36 : vector<32x1xf32>
    %38 = math.rsqrt %37 : vector<32x1xf32>
    %39 = vector.broadcast %38 : vector<32x1xf32> to vector<32x32xf32>
    %40 = arith.mulf %35, %39 : vector<32x32xf32>
    %41 = vector.broadcast %20 : vector<1x32xf32> to vector<32x32xf32>
    %42 = arith.mulf %40, %41 : vector<32x32xf32>
    %43 = vector.broadcast %22 : vector<1x32xf32> to vector<32x32xf32>
    %44 = arith.addf %42, %43 : vector<32x32xf32>
    %c1 = arith.constant 1 : index
    %c0_28 = arith.constant 0 : index
    %c0_29 = arith.constant 0 : index
    %45 = vector.load %arg8[%c1, %c0_28, %c0_29] : memref<12x32x128xf32, #tpu.memory_space<vmem>>, vector<1x32x128xf32>
    %46 = vector.shape_cast %45 : vector<1x32x128xf32> to vector<32x128xf32>
    %cst_30 = arith.constant dense<0.000000e+00> : vector<16x128xf32>
    %47 = tpu.matmul %1, %46, %cst_30 {dimension_numbers = #tpu.dot_dimension_numbers<[1], [0], [0], [1], [0, 0, 1, 1], [], []>} : vector<16x32xf32>, vector<32x128xf32>, vector<16x128xf32> -> vector<16x128xf32>
    %c1_31 = arith.constant 1 : index
    %c0_32 = arith.constant 0 : index
    %c0_33 = arith.constant 0 : index
    %48 = vector.load %arg9[%c1_31, %c0_32, %c0_33] : memref<12x1x128xf32, #tpu.memory_space<vmem>>, vector<1x1x128xf32>
    %49 = vector.shape_cast %48 : vector<1x1x128xf32> to vector<1x128xf32>
    %50 = vector.broadcast %49 : vector<1x128xf32> to vector<16x128xf32>
    %51 = arith.addf %47, %50 : vector<16x128xf32>
    %cst_34 = arith.constant 0.000000e+00 : f32
    %52 = vector.broadcast %cst_34 : f32 to vector<16x128xf32>
    %53 = arith.maximumf %51, %52 : vector<16x128xf32>
    %c1_35 = arith.constant 1 : index
    %c0_36 = arith.constant 0 : index
    %c0_37 = arith.constant 0 : index
    %54 = vector.load %arg10[%c1_35, %c0_36, %c0_37] : memref<12x128x32xf32, #tpu.memory_space<vmem>>, vector<1x128x32xf32>
    %55 = vector.shape_cast %54 : vector<1x128x32xf32> to vector<128x32xf32>
    %cst_38 = arith.constant dense<0.000000e+00> : vector<16x32xf32>
    %56 = tpu.matmul %53, %55, %cst_38 {dimension_numbers = #tpu.dot_dimension_numbers<[1], [0], [0], [1], [0, 0, 1, 1], [], []>} : vector<16x128xf32>, vector<128x32xf32>, vector<16x32xf32> -> vector<16x32xf32>
    %c1_39 = arith.constant 1 : index
    %c0_40 = arith.constant 0 : index
    %c0_41 = arith.constant 0 : index
    %57 = vector.load %arg11[%c1_39, %c0_40, %c0_41] : memref<12x1x32xf32, #tpu.memory_space<vmem>>, vector<1x1x32xf32>
    %58 = vector.shape_cast %57 : vector<1x1x32xf32> to vector<1x32xf32>
    %59 = vector.broadcast %58 : vector<1x32xf32> to vector<16x32xf32>
    %60 = arith.addf %56, %59 : vector<16x32xf32>
    %61 = arith.addf %1, %60 : vector<16x32xf32>
    %c1_42 = arith.constant 1 : index
    %c0_43 = arith.constant 0 : index
    %c0_44 = arith.constant 0 : index
    %62 = vector.load %arg12[%c1_42, %c0_43, %c0_44] : memref<12x1x32xf32, #tpu.memory_space<vmem>>, vector<1x1x32xf32>
    %63 = vector.shape_cast %62 : vector<1x1x32xf32> to vector<1x32xf32>
    %c1_45 = arith.constant 1 : index
    %c0_46 = arith.constant 0 : index
    %c0_47 = arith.constant 0 : index
    %64 = vector.load %arg13[%c1_45, %c0_46, %c0_47] : memref<12x1x32xf32, #tpu.memory_space<vmem>>, vector<1x1x32xf32>
    %65 = vector.shape_cast %64 : vector<1x1x32xf32> to vector<1x32xf32>
    %cst_48 = arith.constant dense<0.000000e+00> : vector<16xf32>
    %66 = vector.multi_reduction <add>, %61, %cst_48 [1] : vector<16x32xf32> to vector<16xf32>
    %67 = vector.shape_cast %66 : vector<16xf32> to vector<16x1xf32>
    %cst_49 = arith.constant 3.200000e+01 : f32
    %68 = vector.broadcast %cst_49 : f32 to vector<16x1xf32>
    %69 = arith.divf %67, %68 : vector<16x1xf32>
    %70 = arith.mulf %61, %61 : vector<16x32xf32>
    %cst_50 = arith.constant dense<0.000000e+00> : vector<16xf32>
    %71 = vector.multi_reduction <add>, %70, %cst_50 [1] : vector<16x32xf32> to vector<16xf32>
    %72 = vector.shape_cast %71 : vector<16xf32> to vector<16x1xf32>
    %cst_51 = arith.constant 3.200000e+01 : f32
    %73 = vector.broadcast %cst_51 : f32 to vector<16x1xf32>
    %74 = arith.divf %72, %73 : vector<16x1xf32>
    %75 = arith.mulf %69, %69 : vector<16x1xf32>
    %76 = arith.subf %74, %75 : vector<16x1xf32>
    %77 = vector.broadcast %69 : vector<16x1xf32> to vector<16x32xf32>
    %78 = arith.subf %61, %77 : vector<16x32xf32>
    %cst_52 = arith.constant 9.99999974E-6 : f32
    %79 = vector.broadcast %cst_52 : f32 to vector<16x1xf32>
    %80 = arith.addf %76, %79 : vector<16x1xf32>
    %81 = math.rsqrt %80 : vector<16x1xf32>
    %82 = vector.broadcast %81 : vector<16x1xf32> to vector<16x32xf32>
    %83 = arith.mulf %78, %82 : vector<16x32xf32>
    %84 = vector.broadcast %63 : vector<1x32xf32> to vector<16x32xf32>
    %85 = arith.mulf %83, %84 : vector<16x32xf32>
    %86 = vector.broadcast %65 : vector<1x32xf32> to vector<16x32xf32>
    %87 = arith.addf %85, %86 : vector<16x32xf32>
    %c2 = arith.constant 2 : index
    %c0_53 = arith.constant 0 : index
    %c0_54 = arith.constant 0 : index
    %88 = vector.load %arg8[%c2, %c0_53, %c0_54] : memref<12x32x128xf32, #tpu.memory_space<vmem>>, vector<1x32x128xf32>
    %89 = vector.shape_cast %88 : vector<1x32x128xf32> to vector<32x128xf32>
    %cst_55 = arith.constant dense<0.000000e+00> : vector<32x128xf32>
    %90 = tpu.matmul %0, %89, %cst_55 {dimension_numbers = #tpu.dot_dimension_numbers<[1], [0], [0], [1], [0, 0, 1, 1], [], []>} : vector<32x32xf32>, vector<32x128xf32>, vector<32x128xf32> -> vector<32x128xf32>
    %c2_56 = arith.constant 2 : index
    %c0_57 = arith.constant 0 : index
    %c0_58 = arith.constant 0 : index
    %91 = vector.load %arg9[%c2_56, %c0_57, %c0_58] : memref<12x1x128xf32, #tpu.memory_space<vmem>>, vector<1x1x128xf32>
    %92 = vector.shape_cast %91 : vector<1x1x128xf32> to vector<1x128xf32>
    %93 = vector.broadcast %92 : vector<1x128xf32> to vector<32x128xf32>
    %94 = arith.addf %90, %93 : vector<32x128xf32>
    %cst_59 = arith.constant 0.000000e+00 : f32
    %95 = vector.broadcast %cst_59 : f32 to vector<32x128xf32>
    %96 = arith.maximumf %94, %95 : vector<32x128xf32>
    %c2_60 = arith.constant 2 : index
    %c0_61 = arith.constant 0 : index
    %c0_62 = arith.constant 0 : index
    %97 = vector.load %arg10[%c2_60, %c0_61, %c0_62] : memref<12x128x32xf32, #tpu.memory_space<vmem>>, vector<1x128x32xf32>
    %98 = vector.shape_cast %97 : vector<1x128x32xf32> to vector<128x32xf32>
    %cst_63 = arith.constant dense<0.000000e+00> : vector<32x32xf32>
    %99 = tpu.matmul %96, %98, %cst_63 {dimension_numbers = #tpu.dot_dimension_numbers<[1], [0], [0], [1], [0, 0, 1, 1], [], []>} : vector<32x128xf32>, vector<128x32xf32>, vector<32x32xf32> -> vector<32x32xf32>
    %c2_64 = arith.constant 2 : index
    %c0_65 = arith.constant 0 : index
    %c0_66 = arith.constant 0 : index
    %100 = vector.load %arg11[%c2_64, %c0_65, %c0_66] : memref<12x1x32xf32, #tpu.memory_space<vmem>>, vector<1x1x32xf32>
    %101 = vector.shape_cast %100 : vector<1x1x32xf32> to vector<1x32xf32>
    %102 = vector.broadcast %101 : vector<1x32xf32> to vector<32x32xf32>
    %103 = arith.addf %99, %102 : vector<32x32xf32>
    %104 = arith.addf %0, %103 : vector<32x32xf32>
    %c2_67 = arith.constant 2 : index
    %c0_68 = arith.constant 0 : index
    %c0_69 = arith.constant 0 : index
    %105 = vector.load %arg12[%c2_67, %c0_68, %c0_69] : memref<12x1x32xf32, #tpu.memory_space<vmem>>, vector<1x1x32xf32>
    %106 = vector.shape_cast %105 : vector<1x1x32xf32> to vector<1x32xf32>
    %c2_70 = arith.constant 2 : index
    %c0_71 = arith.constant 0 : index
    %c0_72 = arith.constant 0 : index
    %107 = vector.load %arg13[%c2_70, %c0_71, %c0_72] : memref<12x1x32xf32, #tpu.memory_space<vmem>>, vector<1x1x32xf32>
    %108 = vector.shape_cast %107 : vector<1x1x32xf32> to vector<1x32xf32>
    %cst_73 = arith.constant dense<0.000000e+00> : vector<32xf32>
    %109 = vector.multi_reduction <add>, %104, %cst_73 [1] : vector<32x32xf32> to vector<32xf32>
    %110 = vector.shape_cast %109 : vector<32xf32> to vector<32x1xf32>
    %cst_74 = arith.constant 3.200000e+01 : f32
    %111 = vector.broadcast %cst_74 : f32 to vector<32x1xf32>
    %112 = arith.divf %110, %111 : vector<32x1xf32>
    %113 = arith.mulf %104, %104 : vector<32x32xf32>
    %cst_75 = arith.constant dense<0.000000e+00> : vector<32xf32>
    %114 = vector.multi_reduction <add>, %113, %cst_75 [1] : vector<32x32xf32> to vector<32xf32>
    %115 = vector.shape_cast %114 : vector<32xf32> to vector<32x1xf32>
    %cst_76 = arith.constant 3.200000e+01 : f32
    %116 = vector.broadcast %cst_76 : f32 to vector<32x1xf32>
    %117 = arith.divf %115, %116 : vector<32x1xf32>
    %118 = arith.mulf %112, %112 : vector<32x1xf32>
    %119 = arith.subf %117, %118 : vector<32x1xf32>
    %120 = vector.broadcast %112 : vector<32x1xf32> to vector<32x32xf32>
    %121 = arith.subf %104, %120 : vector<32x32xf32>
    %cst_77 = arith.constant 9.99999974E-6 : f32
    %122 = vector.broadcast %cst_77 : f32 to vector<32x1xf32>
    %123 = arith.addf %119, %122 : vector<32x1xf32>
    %124 = math.rsqrt %123 : vector<32x1xf32>
    %125 = vector.broadcast %124 : vector<32x1xf32> to vector<32x32xf32>
    %126 = arith.mulf %121, %125 : vector<32x32xf32>
    %127 = vector.broadcast %106 : vector<1x32xf32> to vector<32x32xf32>
    %128 = arith.mulf %126, %127 : vector<32x32xf32>
    %129 = vector.broadcast %108 : vector<1x32xf32> to vector<32x32xf32>
    %130 = arith.addf %128, %129 : vector<32x32xf32>
    %c3 = arith.constant 3 : index
    %c0_78 = arith.constant 0 : index
    %c0_79 = arith.constant 0 : index
    %131 = vector.load %arg8[%c3, %c0_78, %c0_79] : memref<12x32x128xf32, #tpu.memory_space<vmem>>, vector<1x32x128xf32>
    %132 = vector.shape_cast %131 : vector<1x32x128xf32> to vector<32x128xf32>
    %cst_80 = arith.constant dense<0.000000e+00> : vector<16x128xf32>
    %133 = tpu.matmul %1, %132, %cst_80 {dimension_numbers = #tpu.dot_dimension_numbers<[1], [0], [0], [1], [0, 0, 1, 1], [], []>} : vector<16x32xf32>, vector<32x128xf32>, vector<16x128xf32> -> vector<16x128xf32>
    %c3_81 = arith.constant 3 : index
    %c0_82 = arith.constant 0 : index
    %c0_83 = arith.constant 0 : index
    %134 = vector.load %arg9[%c3_81, %c0_82, %c0_83] : memref<12x1x128xf32, #tpu.memory_space<vmem>>, vector<1x1x128xf32>
    %135 = vector.shape_cast %134 : vector<1x1x128xf32> to vector<1x128xf32>
    %136 = vector.broadcast %135 : vector<1x128xf32> to vector<16x128xf32>
    %137 = arith.addf %133, %136 : vector<16x128xf32>
    %cst_84 = arith.constant 0.000000e+00 : f32
    %138 = vector.broadcast %cst_84 : f32 to vector<16x128xf32>
    %139 = arith.maximumf %137, %138 : vector<16x128xf32>
    %c3_85 = arith.constant 3 : index
    %c0_86 = arith.constant 0 : index
    %c0_87 = arith.constant 0 : index
    %140 = vector.load %arg10[%c3_85, %c0_86, %c0_87] : memref<12x128x32xf32, #tpu.memory_space<vmem>>, vector<1x128x32xf32>
    %141 = vector.shape_cast %140 : vector<1x128x32xf32> to vector<128x32xf32>
    %cst_88 = arith.constant dense<0.000000e+00> : vector<16x32xf32>
    %142 = tpu.matmul %139, %141, %cst_88 {dimension_numbers = #tpu.dot_dimension_numbers<[1], [0], [0], [1], [0, 0, 1, 1], [], []>} : vector<16x128xf32>, vector<128x32xf32>, vector<16x32xf32> -> vector<16x32xf32>
    %c3_89 = arith.constant 3 : index
    %c0_90 = arith.constant 0 : index
    %c0_91 = arith.constant 0 : index
    %143 = vector.load %arg11[%c3_89, %c0_90, %c0_91] : memref<12x1x32xf32, #tpu.memory_space<vmem>>, vector<1x1x32xf32>
    %144 = vector.shape_cast %143 : vector<1x1x32xf32> to vector<1x32xf32>
    %145 = vector.broadcast %144 : vector<1x32xf32> to vector<16x32xf32>
    %146 = arith.addf %142, %145 : vector<16x32xf32>
    %147 = arith.addf %1, %146 : vector<16x32xf32>
    %c3_92 = arith.constant 3 : index
    %c0_93 = arith.constant 0 : index
    %c0_94 = arith.constant 0 : index
    %148 = vector.load %arg12[%c3_92, %c0_93, %c0_94] : memref<12x1x32xf32, #tpu.memory_space<vmem>>, vector<1x1x32xf32>
    %149 = vector.shape_cast %148 : vector<1x1x32xf32> to vector<1x32xf32>
    %c3_95 = arith.constant 3 : index
    %c0_96 = arith.constant 0 : index
    %c0_97 = arith.constant 0 : index
    %150 = vector.load %arg13[%c3_95, %c0_96, %c0_97] : memref<12x1x32xf32, #tpu.memory_space<vmem>>, vector<1x1x32xf32>
    %151 = vector.shape_cast %150 : vector<1x1x32xf32> to vector<1x32xf32>
    %cst_98 = arith.constant dense<0.000000e+00> : vector<16xf32>
    %152 = vector.multi_reduction <add>, %147, %cst_98 [1] : vector<16x32xf32> to vector<16xf32>
    %153 = vector.shape_cast %152 : vector<16xf32> to vector<16x1xf32>
    %cst_99 = arith.constant 3.200000e+01 : f32
    %154 = vector.broadcast %cst_99 : f32 to vector<16x1xf32>
    %155 = arith.divf %153, %154 : vector<16x1xf32>
    %156 = arith.mulf %147, %147 : vector<16x32xf32>
    %cst_100 = arith.constant dense<0.000000e+00> : vector<16xf32>
    %157 = vector.multi_reduction <add>, %156, %cst_100 [1] : vector<16x32xf32> to vector<16xf32>
    %158 = vector.shape_cast %157 : vector<16xf32> to vector<16x1xf32>
    %cst_101 = arith.constant 3.200000e+01 : f32
    %159 = vector.broadcast %cst_101 : f32 to vector<16x1xf32>
    %160 = arith.divf %158, %159 : vector<16x1xf32>
    %161 = arith.mulf %155, %155 : vector<16x1xf32>
    %162 = arith.subf %160, %161 : vector<16x1xf32>
    %163 = vector.broadcast %155 : vector<16x1xf32> to vector<16x32xf32>
    %164 = arith.subf %147, %163 : vector<16x32xf32>
    %cst_102 = arith.constant 9.99999974E-6 : f32
    %165 = vector.broadcast %cst_102 : f32 to vector<16x1xf32>
    %166 = arith.addf %162, %165 : vector<16x1xf32>
    %167 = math.rsqrt %166 : vector<16x1xf32>
    %168 = vector.broadcast %167 : vector<16x1xf32> to vector<16x32xf32>
    %169 = arith.mulf %164, %168 : vector<16x32xf32>
    %170 = vector.broadcast %149 : vector<1x32xf32> to vector<16x32xf32>
    %171 = arith.mulf %169, %170 : vector<16x32xf32>
    %172 = vector.broadcast %151 : vector<1x32xf32> to vector<16x32xf32>
    %173 = arith.addf %171, %172 : vector<16x32xf32>
    %174 = arith.addf %44, %130 : vector<32x32xf32>
    %cst_103 = arith.constant 5.000000e-01 : f32
    %175 = vector.broadcast %cst_103 : f32 to vector<32x32xf32>
    %176 = arith.mulf %174, %175 : vector<32x32xf32>
    %177 = arith.addf %87, %173 : vector<16x32xf32>
    %cst_104 = arith.constant 5.000000e-01 : f32
    %178 = vector.broadcast %cst_104 : f32 to vector<16x32xf32>
    %179 = arith.mulf %177, %178 : vector<16x32xf32>
    %c0_105 = arith.constant 0 : index
    %c0_106 = arith.constant 0 : index
    %180 = vector.load %arg2[%c0_105, %c0_106] : memref<32x128xf32, #tpu.memory_space<vmem>>, vector<32x128xf32>
    %c0_107 = arith.constant 0 : index
    %c0_108 = arith.constant 0 : index
    %181 = vector.load %arg6[%c0_107, %c0_108] : memref<128x32xf32, #tpu.memory_space<vmem>>, vector<128x32xf32>
    %c0_109 = arith.constant 0 : index
    %c0_110 = arith.constant 0 : index
    %c0_111 = arith.constant 0 : index
    %182 = vector.load %arg14[%c0_109, %c0_110, %c0_111] : memref<6x32x32xf32, #tpu.memory_space<vmem>>, vector<1x32x32xf32>
    %183 = vector.shape_cast %182 : vector<1x32x32xf32> to vector<32x32xf32>
    %cst_112 = arith.constant dense<0.000000e+00> : vector<32x32xf32>
    %184 = tpu.matmul %176, %183, %cst_112 {dimension_numbers = #tpu.dot_dimension_numbers<[1], [0], [0], [1], [0, 0, 1, 1], [], []>} : vector<32x32xf32>, vector<32x32xf32>, vector<32x32xf32> -> vector<32x32xf32>
    %c0_113 = arith.constant 0 : index
    %c0_114 = arith.constant 0 : index
    %c0_115 = arith.constant 0 : index
    %185 = vector.load %arg15[%c0_113, %c0_114, %c0_115] : memref<6x1x32xf32, #tpu.memory_space<vmem>>, vector<1x1x32xf32>
    %186 = vector.shape_cast %185 : vector<1x1x32xf32> to vector<1x32xf32>
    %187 = vector.broadcast %186 : vector<1x32xf32> to vector<32x32xf32>
    %188 = arith.addf %184, %187 : vector<32x32xf32>
    %189 = tpu.concatenate %176, %176, %176, %176 in 0 : vector<32x32xf32>, vector<32x32xf32>, vector<32x32xf32>, vector<32x32xf32> -> vector<128x32xf32>
    %c0_116 = arith.constant 0 : index
    %c0_117 = arith.constant 0 : index
    %c0_118 = arith.constant 0 : index
    %190 = vector.load %arg16[%c0_116, %c0_117, %c0_118] : memref<6x32x32xf32, #tpu.memory_space<vmem>>, vector<1x32x32xf32>
    %191 = vector.shape_cast %190 : vector<1x32x32xf32> to vector<32x32xf32>
    %cst_119 = arith.constant dense<0.000000e+00> : vector<128x32xf32>
    %192 = tpu.matmul %189, %191, %cst_119 {dimension_numbers = #tpu.dot_dimension_numbers<[1], [0], [0], [1], [0, 0, 1, 1], [], []>} : vector<128x32xf32>, vector<32x32xf32>, vector<128x32xf32> -> vector<128x32xf32>
    %c0_120 = arith.constant 0 : index
    %c0_121 = arith.constant 0 : index
    %c0_122 = arith.constant 0 : index
    %193 = vector.load %arg17[%c0_120, %c0_121, %c0_122] : memref<6x1x32xf32, #tpu.memory_space<vmem>>, vector<1x1x32xf32>
    %194 = vector.shape_cast %193 : vector<1x1x32xf32> to vector<1x32xf32>
    %195 = vector.broadcast %194 : vector<1x32xf32> to vector<128x32xf32>
    %196 = arith.addf %192, %195 : vector<128x32xf32>
    %197 = arith.mulf %196, %181 : vector<128x32xf32>
    %c0_123 = arith.constant 0 : index
    %c0_124 = arith.constant 0 : index
    %c0_125 = arith.constant 0 : index
    %198 = vector.load %arg18[%c0_123, %c0_124, %c0_125] : memref<6x32x32xf32, #tpu.memory_space<vmem>>, vector<1x32x32xf32>
    %199 = vector.shape_cast %198 : vector<1x32x32xf32> to vector<32x32xf32>
    %cst_126 = arith.constant dense<0.000000e+00> : vector<128x32xf32>
    %200 = tpu.matmul %189, %199, %cst_126 {dimension_numbers = #tpu.dot_dimension_numbers<[1], [0], [0], [1], [0, 0, 1, 1], [], []>} : vector<128x32xf32>, vector<32x32xf32>, vector<128x32xf32> -> vector<128x32xf32>
    %c0_127 = arith.constant 0 : index
    %c0_128 = arith.constant 0 : index
    %c0_129 = arith.constant 0 : index
    %201 = vector.load %arg19[%c0_127, %c0_128, %c0_129] : memref<6x1x32xf32, #tpu.memory_space<vmem>>, vector<1x1x32xf32>
    %202 = vector.shape_cast %201 : vector<1x1x32xf32> to vector<1x32xf32>
    %203 = vector.broadcast %202 : vector<1x32xf32> to vector<128x32xf32>
    %204 = arith.addf %200, %203 : vector<128x32xf32>
    %205 = arith.mulf %204, %181 : vector<128x32xf32>
    %cst_130 = arith.constant dense<0.000000e+00> : vector<32x128xf32>
    %206 = tpu.matmul %188, %197, %cst_130 {dimension_numbers = #tpu.dot_dimension_numbers<[1], [1], [0], [0], [0, 0, 1, 0], [], []>} : vector<32x32xf32>, vector<128x32xf32>, vector<32x128xf32> -> vector<32x128xf32>
    %cst_131 = arith.constant 0.353553385 : f32
    %207 = vector.broadcast %cst_131 : f32 to vector<32x128xf32>
    %208 = arith.mulf %206, %207 : vector<32x128xf32>
    %209 = arith.subf %208, %180 : vector<32x128xf32>
    %cst_132 = arith.constant dense<0xFF800000> : vector<32xf32>
    %210 = vector.multi_reduction <maximumf>, %209, %cst_132 [1] : vector<32x128xf32> to vector<32xf32>
    %211 = vector.shape_cast %210 : vector<32xf32> to vector<32x1xf32>
    %212 = vector.broadcast %211 : vector<32x1xf32> to vector<32x128xf32>
    %213 = arith.subf %209, %212 : vector<32x128xf32>
    %214 = math.exp %213 : vector<32x128xf32>
    %cst_133 = arith.constant dense<0.000000e+00> : vector<32x32xf32>
    %215 = tpu.matmul %214, %181, %cst_133 {dimension_numbers = #tpu.dot_dimension_numbers<[1], [0], [0], [1], [0, 0, 1, 1], [], []>} : vector<32x128xf32>, vector<128x32xf32>, vector<32x32xf32> -> vector<32x32xf32>
    %cst_134 = arith.constant dense<0.000000e+00> : vector<32x32xf32>
    %216 = tpu.matmul %214, %205, %cst_134 {dimension_numbers = #tpu.dot_dimension_numbers<[1], [0], [0], [1], [0, 0, 1, 1], [], []>} : vector<32x128xf32>, vector<128x32xf32>, vector<32x32xf32> -> vector<32x32xf32>
    %217 = tpu.reciprocal %215 {approx = true} : vector<32x32xf32> -> vector<32x32xf32>
    %218 = arith.mulf %216, %217 : vector<32x32xf32>
    %c0_135 = arith.constant 0 : index
    %c0_136 = arith.constant 0 : index
    %c0_137 = arith.constant 0 : index
    %219 = vector.load %arg20[%c0_135, %c0_136, %c0_137] : memref<6x32x32xf32, #tpu.memory_space<vmem>>, vector<1x32x32xf32>
    %220 = vector.shape_cast %219 : vector<1x32x32xf32> to vector<32x32xf32>
    %cst_138 = arith.constant dense<0.000000e+00> : vector<32x32xf32>
    %221 = tpu.matmul %218, %220, %cst_138 {dimension_numbers = #tpu.dot_dimension_numbers<[1], [0], [0], [1], [0, 0, 1, 1], [], []>} : vector<32x32xf32>, vector<32x32xf32>, vector<32x32xf32> -> vector<32x32xf32>
    %c0_139 = arith.constant 0 : index
    %c0_140 = arith.constant 0 : index
    %c0_141 = arith.constant 0 : index
    %222 = vector.load %arg21[%c0_139, %c0_140, %c0_141] : memref<6x1x32xf32, #tpu.memory_space<vmem>>, vector<1x1x32xf32>
    %223 = vector.shape_cast %222 : vector<1x1x32xf32> to vector<1x32xf32>
    %224 = vector.broadcast %223 : vector<1x32xf32> to vector<32x32xf32>
    %225 = arith.addf %221, %224 : vector<32x32xf32>
    %226 = arith.addf %176, %225 : vector<32x32xf32>
    %c0_142 = arith.constant 0 : index
    %c0_143 = arith.constant 0 : index
    %c0_144 = arith.constant 0 : index
    %227 = vector.load %arg22[%c0_142, %c0_143, %c0_144] : memref<6x1x32xf32, #tpu.memory_space<vmem>>, vector<1x1x32xf32>
    %228 = vector.shape_cast %227 : vector<1x1x32xf32> to vector<1x32xf32>
    %c0_145 = arith.constant 0 : index
    %c0_146 = arith.constant 0 : index
    %c0_147 = arith.constant 0 : index
    %229 = vector.load %arg23[%c0_145, %c0_146, %c0_147] : memref<6x1x32xf32, #tpu.memory_space<vmem>>, vector<1x1x32xf32>
    %230 = vector.shape_cast %229 : vector<1x1x32xf32> to vector<1x32xf32>
    %cst_148 = arith.constant dense<0.000000e+00> : vector<32xf32>
    %231 = vector.multi_reduction <add>, %226, %cst_148 [1] : vector<32x32xf32> to vector<32xf32>
    %232 = vector.shape_cast %231 : vector<32xf32> to vector<32x1xf32>
    %cst_149 = arith.constant 3.200000e+01 : f32
    %233 = vector.broadcast %cst_149 : f32 to vector<32x1xf32>
    %234 = arith.divf %232, %233 : vector<32x1xf32>
    %235 = arith.mulf %226, %226 : vector<32x32xf32>
    %cst_150 = arith.constant dense<0.000000e+00> : vector<32xf32>
    %236 = vector.multi_reduction <add>, %235, %cst_150 [1] : vector<32x32xf32> to vector<32xf32>
    %237 = vector.shape_cast %236 : vector<32xf32> to vector<32x1xf32>
    %cst_151 = arith.constant 3.200000e+01 : f32
    %238 = vector.broadcast %cst_151 : f32 to vector<32x1xf32>
    %239 = arith.divf %237, %238 : vector<32x1xf32>
    %240 = arith.mulf %234, %234 : vector<32x1xf32>
    %241 = arith.subf %239, %240 : vector<32x1xf32>
    %242 = vector.broadcast %234 : vector<32x1xf32> to vector<32x32xf32>
    %243 = arith.subf %226, %242 : vector<32x32xf32>
    %cst_152 = arith.constant 9.99999974E-6 : f32
    %244 = vector.broadcast %cst_152 : f32 to vector<32x1xf32>
    %245 = arith.addf %241, %244 : vector<32x1xf32>
    %246 = math.rsqrt %245 : vector<32x1xf32>
    %247 = vector.broadcast %246 : vector<32x1xf32> to vector<32x32xf32>
    %248 = arith.mulf %243, %247 : vector<32x32xf32>
    %249 = vector.broadcast %228 : vector<1x32xf32> to vector<32x32xf32>
    %250 = arith.mulf %248, %249 : vector<32x32xf32>
    %251 = vector.broadcast %230 : vector<1x32xf32> to vector<32x32xf32>
    %252 = arith.addf %250, %251 : vector<32x32xf32>
    %c0_153 = arith.constant 0 : index
    %c0_154 = arith.constant 0 : index
    %253 = vector.load %arg4[%c0_153, %c0_154] : memref<16x64xf32, #tpu.memory_space<vmem>>, vector<16x64xf32>
    %c0_155 = arith.constant 0 : index
    %c0_156 = arith.constant 0 : index
    %254 = vector.load %arg7[%c0_155, %c0_156] : memref<64x32xf32, #tpu.memory_space<vmem>>, vector<64x32xf32>
    %c1_157 = arith.constant 1 : index
    %c0_158 = arith.constant 0 : index
    %c0_159 = arith.constant 0 : index
    %255 = vector.load %arg14[%c1_157, %c0_158, %c0_159] : memref<6x32x32xf32, #tpu.memory_space<vmem>>, vector<1x32x32xf32>
    %256 = vector.shape_cast %255 : vector<1x32x32xf32> to vector<32x32xf32>
    %cst_160 = arith.constant dense<0.000000e+00> : vector<16x32xf32>
    %257 = tpu.matmul %179, %256, %cst_160 {dimension_numbers = #tpu.dot_dimension_numbers<[1], [0], [0], [1], [0, 0, 1, 1], [], []>} : vector<16x32xf32>, vector<32x32xf32>, vector<16x32xf32> -> vector<16x32xf32>
    %c1_161 = arith.constant 1 : index
    %c0_162 = arith.constant 0 : index
    %c0_163 = arith.constant 0 : index
    %258 = vector.load %arg15[%c1_161, %c0_162, %c0_163] : memref<6x1x32xf32, #tpu.memory_space<vmem>>, vector<1x1x32xf32>
    %259 = vector.shape_cast %258 : vector<1x1x32xf32> to vector<1x32xf32>
    %260 = vector.broadcast %259 : vector<1x32xf32> to vector<16x32xf32>
    %261 = arith.addf %257, %260 : vector<16x32xf32>
    %262 = tpu.concatenate %179, %179, %179, %179 in 0 : vector<16x32xf32>, vector<16x32xf32>, vector<16x32xf32>, vector<16x32xf32> -> vector<64x32xf32>
    %c1_164 = arith.constant 1 : index
    %c0_165 = arith.constant 0 : index
    %c0_166 = arith.constant 0 : index
    %263 = vector.load %arg16[%c1_164, %c0_165, %c0_166] : memref<6x32x32xf32, #tpu.memory_space<vmem>>, vector<1x32x32xf32>
    %264 = vector.shape_cast %263 : vector<1x32x32xf32> to vector<32x32xf32>
    %cst_167 = arith.constant dense<0.000000e+00> : vector<64x32xf32>
    %265 = tpu.matmul %262, %264, %cst_167 {dimension_numbers = #tpu.dot_dimension_numbers<[1], [0], [0], [1], [0, 0, 1, 1], [], []>} : vector<64x32xf32>, vector<32x32xf32>, vector<64x32xf32> -> vector<64x32xf32>
    %c1_168 = arith.constant 1 : index
    %c0_169 = arith.constant 0 : index
    %c0_170 = arith.constant 0 : index
    %266 = vector.load %arg17[%c1_168, %c0_169, %c0_170] : memref<6x1x32xf32, #tpu.memory_space<vmem>>, vector<1x1x32xf32>
    %267 = vector.shape_cast %266 : vector<1x1x32xf32> to vector<1x32xf32>
    %268 = vector.broadcast %267 : vector<1x32xf32> to vector<64x32xf32>
    %269 = arith.addf %265, %268 : vector<64x32xf32>
    %270 = arith.mulf %269, %254 : vector<64x32xf32>
    %c1_171 = arith.constant 1 : index
    %c0_172 = arith.constant 0 : index
    %c0_173 = arith.constant 0 : index
    %271 = vector.load %arg18[%c1_171, %c0_172, %c0_173] : memref<6x32x32xf32, #tpu.memory_space<vmem>>, vector<1x32x32xf32>
    %272 = vector.shape_cast %271 : vector<1x32x32xf32> to vector<32x32xf32>
    %cst_174 = arith.constant dense<0.000000e+00> : vector<64x32xf32>
    %273 = tpu.matmul %262, %272, %cst_174 {dimension_numbers = #tpu.dot_dimension_numbers<[1], [0], [0], [1], [0, 0, 1, 1], [], []>} : vector<64x32xf32>, vector<32x32xf32>, vector<64x32xf32> -> vector<64x32xf32>
    %c1_175 = arith.constant 1 : index
    %c0_176 = arith.constant 0 : index
    %c0_177 = arith.constant 0 : index
    %274 = vector.load %arg19[%c1_175, %c0_176, %c0_177] : memref<6x1x32xf32, #tpu.memory_space<vmem>>, vector<1x1x32xf32>
    %275 = vector.shape_cast %274 : vector<1x1x32xf32> to vector<1x32xf32>
    %276 = vector.broadcast %275 : vector<1x32xf32> to vector<64x32xf32>
    %277 = arith.addf %273, %276 : vector<64x32xf32>
    %278 = arith.mulf %277, %254 : vector<64x32xf32>
    %cst_178 = arith.constant dense<0.000000e+00> : vector<16x64xf32>
    %279 = tpu.matmul %261, %270, %cst_178 {dimension_numbers = #tpu.dot_dimension_numbers<[1], [1], [0], [0], [0, 0, 1, 0], [], []>} : vector<16x32xf32>, vector<64x32xf32>, vector<16x64xf32> -> vector<16x64xf32>
    %cst_179 = arith.constant 0.353553385 : f32
    %280 = vector.broadcast %cst_179 : f32 to vector<16x64xf32>
    %281 = arith.mulf %279, %280 : vector<16x64xf32>
    %282 = arith.subf %281, %253 : vector<16x64xf32>
    %cst_180 = arith.constant dense<0xFF800000> : vector<16xf32>
    %283 = vector.multi_reduction <maximumf>, %282, %cst_180 [1] : vector<16x64xf32> to vector<16xf32>
    %284 = vector.shape_cast %283 : vector<16xf32> to vector<16x1xf32>
    %285 = vector.broadcast %284 : vector<16x1xf32> to vector<16x64xf32>
    %286 = arith.subf %282, %285 : vector<16x64xf32>
    %287 = math.exp %286 : vector<16x64xf32>
    %cst_181 = arith.constant dense<0.000000e+00> : vector<16x32xf32>
    %288 = tpu.matmul %287, %254, %cst_181 {dimension_numbers = #tpu.dot_dimension_numbers<[1], [0], [0], [1], [0, 0, 1, 1], [], []>} : vector<16x64xf32>, vector<64x32xf32>, vector<16x32xf32> -> vector<16x32xf32>
    %cst_182 = arith.constant dense<0.000000e+00> : vector<16x32xf32>
    %289 = tpu.matmul %287, %278, %cst_182 {dimension_numbers = #tpu.dot_dimension_numbers<[1], [0], [0], [1], [0, 0, 1, 1], [], []>} : vector<16x64xf32>, vector<64x32xf32>, vector<16x32xf32> -> vector<16x32xf32>
    %290 = tpu.reciprocal %288 {approx = true} : vector<16x32xf32> -> vector<16x32xf32>
    %291 = arith.mulf %289, %290 : vector<16x32xf32>
    %c1_183 = arith.constant 1 : index
    %c0_184 = arith.constant 0 : index
    %c0_185 = arith.constant 0 : index
    %292 = vector.load %arg20[%c1_183, %c0_184, %c0_185] : memref<6x32x32xf32, #tpu.memory_space<vmem>>, vector<1x32x32xf32>
    %293 = vector.shape_cast %292 : vector<1x32x32xf32> to vector<32x32xf32>
    %cst_186 = arith.constant dense<0.000000e+00> : vector<16x32xf32>
    %294 = tpu.matmul %291, %293, %cst_186 {dimension_numbers = #tpu.dot_dimension_numbers<[1], [0], [0], [1], [0, 0, 1, 1], [], []>} : vector<16x32xf32>, vector<32x32xf32>, vector<16x32xf32> -> vector<16x32xf32>
    %c1_187 = arith.constant 1 : index
    %c0_188 = arith.constant 0 : index
    %c0_189 = arith.constant 0 : index
    %295 = vector.load %arg21[%c1_187, %c0_188, %c0_189] : memref<6x1x32xf32, #tpu.memory_space<vmem>>, vector<1x1x32xf32>
    %296 = vector.shape_cast %295 : vector<1x1x32xf32> to vector<1x32xf32>
    %297 = vector.broadcast %296 : vector<1x32xf32> to vector<16x32xf32>
    %298 = arith.addf %294, %297 : vector<16x32xf32>
    %299 = arith.addf %179, %298 : vector<16x32xf32>
    %c1_190 = arith.constant 1 : index
    %c0_191 = arith.constant 0 : index
    %c0_192 = arith.constant 0 : index
    %300 = vector.load %arg22[%c1_190, %c0_191, %c0_192] : memref<6x1x32xf32, #tpu.memory_space<vmem>>, vector<1x1x32xf32>
    %301 = vector.shape_cast %300 : vector<1x1x32xf32> to vector<1x32xf32>
    %c1_193 = arith.constant 1 : index
    %c0_194 = arith.constant 0 : index
    %c0_195 = arith.constant 0 : index
    %302 = vector.load %arg23[%c1_193, %c0_194, %c0_195] : memref<6x1x32xf32, #tpu.memory_space<vmem>>, vector<1x1x32xf32>
    %303 = vector.shape_cast %302 : vector<1x1x32xf32> to vector<1x32xf32>
    %cst_196 = arith.constant dense<0.000000e+00> : vector<16xf32>
    %304 = vector.multi_reduction <add>, %299, %cst_196 [1] : vector<16x32xf32> to vector<16xf32>
    %305 = vector.shape_cast %304 : vector<16xf32> to vector<16x1xf32>
    %cst_197 = arith.constant 3.200000e+01 : f32
    %306 = vector.broadcast %cst_197 : f32 to vector<16x1xf32>
    %307 = arith.divf %305, %306 : vector<16x1xf32>
    %308 = arith.mulf %299, %299 : vector<16x32xf32>
    %cst_198 = arith.constant dense<0.000000e+00> : vector<16xf32>
    %309 = vector.multi_reduction <add>, %308, %cst_198 [1] : vector<16x32xf32> to vector<16xf32>
    %310 = vector.shape_cast %309 : vector<16xf32> to vector<16x1xf32>
    %cst_199 = arith.constant 3.200000e+01 : f32
    %311 = vector.broadcast %cst_199 : f32 to vector<16x1xf32>
    %312 = arith.divf %310, %311 : vector<16x1xf32>
    %313 = arith.mulf %307, %307 : vector<16x1xf32>
    %314 = arith.subf %312, %313 : vector<16x1xf32>
    %315 = vector.broadcast %307 : vector<16x1xf32> to vector<16x32xf32>
    %316 = arith.subf %299, %315 : vector<16x32xf32>
    %cst_200 = arith.constant 9.99999974E-6 : f32
    %317 = vector.broadcast %cst_200 : f32 to vector<16x1xf32>
    %318 = arith.addf %314, %317 : vector<16x1xf32>
    %319 = math.rsqrt %318 : vector<16x1xf32>
    %320 = vector.broadcast %319 : vector<16x1xf32> to vector<16x32xf32>
    %321 = arith.mulf %316, %320 : vector<16x32xf32>
    %322 = vector.broadcast %301 : vector<1x32xf32> to vector<16x32xf32>
    %323 = arith.mulf %321, %322 : vector<16x32xf32>
    %324 = vector.broadcast %303 : vector<1x32xf32> to vector<16x32xf32>
    %325 = arith.addf %323, %324 : vector<16x32xf32>
    %c0_201 = arith.constant 0 : index
    %c0_202 = arith.constant 0 : index
    %326 = vector.load %arg3[%c0_201, %c0_202] : memref<32x64xf32, #tpu.memory_space<vmem>>, vector<32x64xf32>
    %c0_203 = arith.constant 0 : index
    %c0_204 = arith.constant 0 : index
    %327 = vector.load %arg7[%c0_203, %c0_204] : memref<64x32xf32, #tpu.memory_space<vmem>>, vector<64x32xf32>
    %c2_205 = arith.constant 2 : index
    %c0_206 = arith.constant 0 : index
    %c0_207 = arith.constant 0 : index
    %328 = vector.load %arg14[%c2_205, %c0_206, %c0_207] : memref<6x32x32xf32, #tpu.memory_space<vmem>>, vector<1x32x32xf32>
    %329 = vector.shape_cast %328 : vector<1x32x32xf32> to vector<32x32xf32>
    %cst_208 = arith.constant dense<0.000000e+00> : vector<32x32xf32>
    %330 = tpu.matmul %252, %329, %cst_208 {dimension_numbers = #tpu.dot_dimension_numbers<[1], [0], [0], [1], [0, 0, 1, 1], [], []>} : vector<32x32xf32>, vector<32x32xf32>, vector<32x32xf32> -> vector<32x32xf32>
    %c2_209 = arith.constant 2 : index
    %c0_210 = arith.constant 0 : index
    %c0_211 = arith.constant 0 : index
    %331 = vector.load %arg15[%c2_209, %c0_210, %c0_211] : memref<6x1x32xf32, #tpu.memory_space<vmem>>, vector<1x1x32xf32>
    %332 = vector.shape_cast %331 : vector<1x1x32xf32> to vector<1x32xf32>
    %333 = vector.broadcast %332 : vector<1x32xf32> to vector<32x32xf32>
    %334 = arith.addf %330, %333 : vector<32x32xf32>
    %335 = tpu.concatenate %325, %325, %325, %325 in 0 : vector<16x32xf32>, vector<16x32xf32>, vector<16x32xf32>, vector<16x32xf32> -> vector<64x32xf32>
    %c2_212 = arith.constant 2 : index
    %c0_213 = arith.constant 0 : index
    %c0_214 = arith.constant 0 : index
    %336 = vector.load %arg16[%c2_212, %c0_213, %c0_214] : memref<6x32x32xf32, #tpu.memory_space<vmem>>, vector<1x32x32xf32>
    %337 = vector.shape_cast %336 : vector<1x32x32xf32> to vector<32x32xf32>
    %cst_215 = arith.constant dense<0.000000e+00> : vector<64x32xf32>
    %338 = tpu.matmul %335, %337, %cst_215 {dimension_numbers = #tpu.dot_dimension_numbers<[1], [0], [0], [1], [0, 0, 1, 1], [], []>} : vector<64x32xf32>, vector<32x32xf32>, vector<64x32xf32> -> vector<64x32xf32>
    %c2_216 = arith.constant 2 : index
    %c0_217 = arith.constant 0 : index
    %c0_218 = arith.constant 0 : index
    %339 = vector.load %arg17[%c2_216, %c0_217, %c0_218] : memref<6x1x32xf32, #tpu.memory_space<vmem>>, vector<1x1x32xf32>
    %340 = vector.shape_cast %339 : vector<1x1x32xf32> to vector<1x32xf32>
    %341 = vector.broadcast %340 : vector<1x32xf32> to vector<64x32xf32>
    %342 = arith.addf %338, %341 : vector<64x32xf32>
    %343 = arith.mulf %342, %327 : vector<64x32xf32>
    %c2_219 = arith.constant 2 : index
    %c0_220 = arith.constant 0 : index
    %c0_221 = arith.constant 0 : index
    %344 = vector.load %arg18[%c2_219, %c0_220, %c0_221] : memref<6x32x32xf32, #tpu.memory_space<vmem>>, vector<1x32x32xf32>
    %345 = vector.shape_cast %344 : vector<1x32x32xf32> to vector<32x32xf32>
    %cst_222 = arith.constant dense<0.000000e+00> : vector<64x32xf32>
    %346 = tpu.matmul %335, %345, %cst_222 {dimension_numbers = #tpu.dot_dimension_numbers<[1], [0], [0], [1], [0, 0, 1, 1], [], []>} : vector<64x32xf32>, vector<32x32xf32>, vector<64x32xf32> -> vector<64x32xf32>
    %c2_223 = arith.constant 2 : index
    %c0_224 = arith.constant 0 : index
    %c0_225 = arith.constant 0 : index
    %347 = vector.load %arg19[%c2_223, %c0_224, %c0_225] : memref<6x1x32xf32, #tpu.memory_space<vmem>>, vector<1x1x32xf32>
    %348 = vector.shape_cast %347 : vector<1x1x32xf32> to vector<1x32xf32>
    %349 = vector.broadcast %348 : vector<1x32xf32> to vector<64x32xf32>
    %350 = arith.addf %346, %349 : vector<64x32xf32>
    %351 = arith.mulf %350, %327 : vector<64x32xf32>
    %cst_226 = arith.constant dense<0.000000e+00> : vector<32x64xf32>
    %352 = tpu.matmul %334, %343, %cst_226 {dimension_numbers = #tpu.dot_dimension_numbers<[1], [1], [0], [0], [0, 0, 1, 0], [], []>} : vector<32x32xf32>, vector<64x32xf32>, vector<32x64xf32> -> vector<32x64xf32>
    %cst_227 = arith.constant 0.353553385 : f32
    %353 = vector.broadcast %cst_227 : f32 to vector<32x64xf32>
    %354 = arith.mulf %352, %353 : vector<32x64xf32>
    %355 = arith.subf %354, %326 : vector<32x64xf32>
    %cst_228 = arith.constant dense<0xFF800000> : vector<32xf32>
    %356 = vector.multi_reduction <maximumf>, %355, %cst_228 [1] : vector<32x64xf32> to vector<32xf32>
    %357 = vector.shape_cast %356 : vector<32xf32> to vector<32x1xf32>
    %358 = vector.broadcast %357 : vector<32x1xf32> to vector<32x64xf32>
    %359 = arith.subf %355, %358 : vector<32x64xf32>
    %360 = math.exp %359 : vector<32x64xf32>
    %cst_229 = arith.constant dense<0.000000e+00> : vector<32x32xf32>
    %361 = tpu.matmul %360, %327, %cst_229 {dimension_numbers = #tpu.dot_dimension_numbers<[1], [0], [0], [1], [0, 0, 1, 1], [], []>} : vector<32x64xf32>, vector<64x32xf32>, vector<32x32xf32> -> vector<32x32xf32>
    %cst_230 = arith.constant dense<0.000000e+00> : vector<32x32xf32>
    %362 = tpu.matmul %360, %351, %cst_230 {dimension_numbers = #tpu.dot_dimension_numbers<[1], [0], [0], [1], [0, 0, 1, 1], [], []>} : vector<32x64xf32>, vector<64x32xf32>, vector<32x32xf32> -> vector<32x32xf32>
    %363 = tpu.reciprocal %361 {approx = true} : vector<32x32xf32> -> vector<32x32xf32>
    %364 = arith.mulf %362, %363 : vector<32x32xf32>
    %c2_231 = arith.constant 2 : index
    %c0_232 = arith.constant 0 : index
    %c0_233 = arith.constant 0 : index
    %365 = vector.load %arg20[%c2_231, %c0_232, %c0_233] : memref<6x32x32xf32, #tpu.memory_space<vmem>>, vector<1x32x32xf32>
    %366 = vector.shape_cast %365 : vector<1x32x32xf32> to vector<32x32xf32>
    %cst_234 = arith.constant dense<0.000000e+00> : vector<32x32xf32>
    %367 = tpu.matmul %364, %366, %cst_234 {dimension_numbers = #tpu.dot_dimension_numbers<[1], [0], [0], [1], [0, 0, 1, 1], [], []>} : vector<32x32xf32>, vector<32x32xf32>, vector<32x32xf32> -> vector<32x32xf32>
    %c2_235 = arith.constant 2 : index
    %c0_236 = arith.constant 0 : index
    %c0_237 = arith.constant 0 : index
    %368 = vector.load %arg21[%c2_235, %c0_236, %c0_237] : memref<6x1x32xf32, #tpu.memory_space<vmem>>, vector<1x1x32xf32>
    %369 = vector.shape_cast %368 : vector<1x1x32xf32> to vector<1x32xf32>
    %370 = vector.broadcast %369 : vector<1x32xf32> to vector<32x32xf32>
    %371 = arith.addf %367, %370 : vector<32x32xf32>
    %372 = arith.addf %252, %371 : vector<32x32xf32>
    %c2_238 = arith.constant 2 : index
    %c0_239 = arith.constant 0 : index
    %c0_240 = arith.constant 0 : index
    %373 = vector.load %arg22[%c2_238, %c0_239, %c0_240] : memref<6x1x32xf32, #tpu.memory_space<vmem>>, vector<1x1x32xf32>
    %374 = vector.shape_cast %373 : vector<1x1x32xf32> to vector<1x32xf32>
    %c2_241 = arith.constant 2 : index
    %c0_242 = arith.constant 0 : index
    %c0_243 = arith.constant 0 : index
    %375 = vector.load %arg23[%c2_241, %c0_242, %c0_243] : memref<6x1x32xf32, #tpu.memory_space<vmem>>, vector<1x1x32xf32>
    %376 = vector.shape_cast %375 : vector<1x1x32xf32> to vector<1x32xf32>
    %cst_244 = arith.constant dense<0.000000e+00> : vector<32xf32>
    %377 = vector.multi_reduction <add>, %372, %cst_244 [1] : vector<32x32xf32> to vector<32xf32>
    %378 = vector.shape_cast %377 : vector<32xf32> to vector<32x1xf32>
    %cst_245 = arith.constant 3.200000e+01 : f32
    %379 = vector.broadcast %cst_245 : f32 to vector<32x1xf32>
    %380 = arith.divf %378, %379 : vector<32x1xf32>
    %381 = arith.mulf %372, %372 : vector<32x32xf32>
    %cst_246 = arith.constant dense<0.000000e+00> : vector<32xf32>
    %382 = vector.multi_reduction <add>, %381, %cst_246 [1] : vector<32x32xf32> to vector<32xf32>
    %383 = vector.shape_cast %382 : vector<32xf32> to vector<32x1xf32>
    %cst_247 = arith.constant 3.200000e+01 : f32
    %384 = vector.broadcast %cst_247 : f32 to vector<32x1xf32>
    %385 = arith.divf %383, %384 : vector<32x1xf32>
    %386 = arith.mulf %380, %380 : vector<32x1xf32>
    %387 = arith.subf %385, %386 : vector<32x1xf32>
    %388 = vector.broadcast %380 : vector<32x1xf32> to vector<32x32xf32>
    %389 = arith.subf %372, %388 : vector<32x32xf32>
    %cst_248 = arith.constant 9.99999974E-6 : f32
    %390 = vector.broadcast %cst_248 : f32 to vector<32x1xf32>
    %391 = arith.addf %387, %390 : vector<32x1xf32>
    %392 = math.rsqrt %391 : vector<32x1xf32>
    %393 = vector.broadcast %392 : vector<32x1xf32> to vector<32x32xf32>
    %394 = arith.mulf %389, %393 : vector<32x32xf32>
    %395 = vector.broadcast %374 : vector<1x32xf32> to vector<32x32xf32>
    %396 = arith.mulf %394, %395 : vector<32x32xf32>
    %397 = vector.broadcast %376 : vector<1x32xf32> to vector<32x32xf32>
    %398 = arith.addf %396, %397 : vector<32x32xf32>
    %c4 = arith.constant 4 : index
    %c0_249 = arith.constant 0 : index
    %c0_250 = arith.constant 0 : index
    %399 = vector.load %arg8[%c4, %c0_249, %c0_250] : memref<12x32x128xf32, #tpu.memory_space<vmem>>, vector<1x32x128xf32>
    %400 = vector.shape_cast %399 : vector<1x32x128xf32> to vector<32x128xf32>
    %cst_251 = arith.constant dense<0.000000e+00> : vector<16x128xf32>
    %401 = tpu.matmul %325, %400, %cst_251 {dimension_numbers = #tpu.dot_dimension_numbers<[1], [0], [0], [1], [0, 0, 1, 1], [], []>} : vector<16x32xf32>, vector<32x128xf32>, vector<16x128xf32> -> vector<16x128xf32>
    %c4_252 = arith.constant 4 : index
    %c0_253 = arith.constant 0 : index
    %c0_254 = arith.constant 0 : index
    %402 = vector.load %arg9[%c4_252, %c0_253, %c0_254] : memref<12x1x128xf32, #tpu.memory_space<vmem>>, vector<1x1x128xf32>
    %403 = vector.shape_cast %402 : vector<1x1x128xf32> to vector<1x128xf32>
    %404 = vector.broadcast %403 : vector<1x128xf32> to vector<16x128xf32>
    %405 = arith.addf %401, %404 : vector<16x128xf32>
    %cst_255 = arith.constant 0.000000e+00 : f32
    %406 = vector.broadcast %cst_255 : f32 to vector<16x128xf32>
    %407 = arith.maximumf %405, %406 : vector<16x128xf32>
    %c4_256 = arith.constant 4 : index
    %c0_257 = arith.constant 0 : index
    %c0_258 = arith.constant 0 : index
    %408 = vector.load %arg10[%c4_256, %c0_257, %c0_258] : memref<12x128x32xf32, #tpu.memory_space<vmem>>, vector<1x128x32xf32>
    %409 = vector.shape_cast %408 : vector<1x128x32xf32> to vector<128x32xf32>
    %cst_259 = arith.constant dense<0.000000e+00> : vector<16x32xf32>
    %410 = tpu.matmul %407, %409, %cst_259 {dimension_numbers = #tpu.dot_dimension_numbers<[1], [0], [0], [1], [0, 0, 1, 1], [], []>} : vector<16x128xf32>, vector<128x32xf32>, vector<16x32xf32> -> vector<16x32xf32>
    %c4_260 = arith.constant 4 : index
    %c0_261 = arith.constant 0 : index
    %c0_262 = arith.constant 0 : index
    %411 = vector.load %arg11[%c4_260, %c0_261, %c0_262] : memref<12x1x32xf32, #tpu.memory_space<vmem>>, vector<1x1x32xf32>
    %412 = vector.shape_cast %411 : vector<1x1x32xf32> to vector<1x32xf32>
    %413 = vector.broadcast %412 : vector<1x32xf32> to vector<16x32xf32>
    %414 = arith.addf %410, %413 : vector<16x32xf32>
    %415 = arith.addf %325, %414 : vector<16x32xf32>
    %c4_263 = arith.constant 4 : index
    %c0_264 = arith.constant 0 : index
    %c0_265 = arith.constant 0 : index
    %416 = vector.load %arg12[%c4_263, %c0_264, %c0_265] : memref<12x1x32xf32, #tpu.memory_space<vmem>>, vector<1x1x32xf32>
    %417 = vector.shape_cast %416 : vector<1x1x32xf32> to vector<1x32xf32>
    %c4_266 = arith.constant 4 : index
    %c0_267 = arith.constant 0 : index
    %c0_268 = arith.constant 0 : index
    %418 = vector.load %arg13[%c4_266, %c0_267, %c0_268] : memref<12x1x32xf32, #tpu.memory_space<vmem>>, vector<1x1x32xf32>
    %419 = vector.shape_cast %418 : vector<1x1x32xf32> to vector<1x32xf32>
    %cst_269 = arith.constant dense<0.000000e+00> : vector<16xf32>
    %420 = vector.multi_reduction <add>, %415, %cst_269 [1] : vector<16x32xf32> to vector<16xf32>
    %421 = vector.shape_cast %420 : vector<16xf32> to vector<16x1xf32>
    %cst_270 = arith.constant 3.200000e+01 : f32
    %422 = vector.broadcast %cst_270 : f32 to vector<16x1xf32>
    %423 = arith.divf %421, %422 : vector<16x1xf32>
    %424 = arith.mulf %415, %415 : vector<16x32xf32>
    %cst_271 = arith.constant dense<0.000000e+00> : vector<16xf32>
    %425 = vector.multi_reduction <add>, %424, %cst_271 [1] : vector<16x32xf32> to vector<16xf32>
    %426 = vector.shape_cast %425 : vector<16xf32> to vector<16x1xf32>
    %cst_272 = arith.constant 3.200000e+01 : f32
    %427 = vector.broadcast %cst_272 : f32 to vector<16x1xf32>
    %428 = arith.divf %426, %427 : vector<16x1xf32>
    %429 = arith.mulf %423, %423 : vector<16x1xf32>
    %430 = arith.subf %428, %429 : vector<16x1xf32>
    %431 = vector.broadcast %423 : vector<16x1xf32> to vector<16x32xf32>
    %432 = arith.subf %415, %431 : vector<16x32xf32>
    %cst_273 = arith.constant 9.99999974E-6 : f32
    %433 = vector.broadcast %cst_273 : f32 to vector<16x1xf32>
    %434 = arith.addf %430, %433 : vector<16x1xf32>
    %435 = math.rsqrt %434 : vector<16x1xf32>
    %436 = vector.broadcast %435 : vector<16x1xf32> to vector<16x32xf32>
    %437 = arith.mulf %432, %436 : vector<16x32xf32>
    %438 = vector.broadcast %417 : vector<1x32xf32> to vector<16x32xf32>
    %439 = arith.mulf %437, %438 : vector<16x32xf32>
    %440 = vector.broadcast %419 : vector<1x32xf32> to vector<16x32xf32>
    %441 = arith.addf %439, %440 : vector<16x32xf32>
    %cst_274 = arith.constant 0.000000e+00 : f32
    %442 = vector.broadcast %cst_274 : f32 to vector<32x32xf32>
    %443 = arith.addf %442, %252 : vector<32x32xf32>
    %444 = arith.addf %443, %398 : vector<32x32xf32>
    %cst_275 = arith.constant 2.000000e+00 : f32
    %445 = vector.broadcast %cst_275 : f32 to vector<32x32xf32>
    %446 = arith.divf %444, %445 : vector<32x32xf32>
    %cst_276 = arith.constant 0.000000e+00 : f32
    %447 = vector.broadcast %cst_276 : f32 to vector<16x32xf32>
    %448 = arith.addf %447, %325 : vector<16x32xf32>
    %449 = arith.addf %448, %441 : vector<16x32xf32>
    %cst_277 = arith.constant 2.000000e+00 : f32
    %450 = vector.broadcast %cst_277 : f32 to vector<16x32xf32>
    %451 = arith.divf %449, %450 : vector<16x32xf32>
    %c5 = arith.constant 5 : index
    %c0_278 = arith.constant 0 : index
    %c0_279 = arith.constant 0 : index
    %452 = vector.load %arg8[%c5, %c0_278, %c0_279] : memref<12x32x128xf32, #tpu.memory_space<vmem>>, vector<1x32x128xf32>
    %453 = vector.shape_cast %452 : vector<1x32x128xf32> to vector<32x128xf32>
    %cst_280 = arith.constant dense<0.000000e+00> : vector<32x128xf32>
    %454 = tpu.matmul %0, %453, %cst_280 {dimension_numbers = #tpu.dot_dimension_numbers<[1], [0], [0], [1], [0, 0, 1, 1], [], []>} : vector<32x32xf32>, vector<32x128xf32>, vector<32x128xf32> -> vector<32x128xf32>
    %c5_281 = arith.constant 5 : index
    %c0_282 = arith.constant 0 : index
    %c0_283 = arith.constant 0 : index
    %455 = vector.load %arg9[%c5_281, %c0_282, %c0_283] : memref<12x1x128xf32, #tpu.memory_space<vmem>>, vector<1x1x128xf32>
    %456 = vector.shape_cast %455 : vector<1x1x128xf32> to vector<1x128xf32>
    %457 = vector.broadcast %456 : vector<1x128xf32> to vector<32x128xf32>
    %458 = arith.addf %454, %457 : vector<32x128xf32>
    %cst_284 = arith.constant 0.000000e+00 : f32
    %459 = vector.broadcast %cst_284 : f32 to vector<32x128xf32>
    %460 = arith.maximumf %458, %459 : vector<32x128xf32>
    %c5_285 = arith.constant 5 : index
    %c0_286 = arith.constant 0 : index
    %c0_287 = arith.constant 0 : index
    %461 = vector.load %arg10[%c5_285, %c0_286, %c0_287] : memref<12x128x32xf32, #tpu.memory_space<vmem>>, vector<1x128x32xf32>
    %462 = vector.shape_cast %461 : vector<1x128x32xf32> to vector<128x32xf32>
    %cst_288 = arith.constant dense<0.000000e+00> : vector<32x32xf32>
    %463 = tpu.matmul %460, %462, %cst_288 {dimension_numbers = #tpu.dot_dimension_numbers<[1], [0], [0], [1], [0, 0, 1, 1], [], []>} : vector<32x128xf32>, vector<128x32xf32>, vector<32x32xf32> -> vector<32x32xf32>
    %c5_289 = arith.constant 5 : index
    %c0_290 = arith.constant 0 : index
    %c0_291 = arith.constant 0 : index
    %464 = vector.load %arg11[%c5_289, %c0_290, %c0_291] : memref<12x1x32xf32, #tpu.memory_space<vmem>>, vector<1x1x32xf32>
    %465 = vector.shape_cast %464 : vector<1x1x32xf32> to vector<1x32xf32>
    %466 = vector.broadcast %465 : vector<1x32xf32> to vector<32x32xf32>
    %467 = arith.addf %463, %466 : vector<32x32xf32>
    %468 = arith.addf %0, %467 : vector<32x32xf32>
    %c5_292 = arith.constant 5 : index
    %c0_293 = arith.constant 0 : index
    %c0_294 = arith.constant 0 : index
    %469 = vector.load %arg12[%c5_292, %c0_293, %c0_294] : memref<12x1x32xf32, #tpu.memory_space<vmem>>, vector<1x1x32xf32>
    %470 = vector.shape_cast %469 : vector<1x1x32xf32> to vector<1x32xf32>
    %c5_295 = arith.constant 5 : index
    %c0_296 = arith.constant 0 : index
    %c0_297 = arith.constant 0 : index
    %471 = vector.load %arg13[%c5_295, %c0_296, %c0_297] : memref<12x1x32xf32, #tpu.memory_space<vmem>>, vector<1x1x32xf32>
    %472 = vector.shape_cast %471 : vector<1x1x32xf32> to vector<1x32xf32>
    %cst_298 = arith.constant dense<0.000000e+00> : vector<32xf32>
    %473 = vector.multi_reduction <add>, %468, %cst_298 [1] : vector<32x32xf32> to vector<32xf32>
    %474 = vector.shape_cast %473 : vector<32xf32> to vector<32x1xf32>
    %cst_299 = arith.constant 3.200000e+01 : f32
    %475 = vector.broadcast %cst_299 : f32 to vector<32x1xf32>
    %476 = arith.divf %474, %475 : vector<32x1xf32>
    %477 = arith.mulf %468, %468 : vector<32x32xf32>
    %cst_300 = arith.constant dense<0.000000e+00> : vector<32xf32>
    %478 = vector.multi_reduction <add>, %477, %cst_300 [1] : vector<32x32xf32> to vector<32xf32>
    %479 = vector.shape_cast %478 : vector<32xf32> to vector<32x1xf32>
    %cst_301 = arith.constant 3.200000e+01 : f32
    %480 = vector.broadcast %cst_301 : f32 to vector<32x1xf32>
    %481 = arith.divf %479, %480 : vector<32x1xf32>
    %482 = arith.mulf %476, %476 : vector<32x1xf32>
    %483 = arith.subf %481, %482 : vector<32x1xf32>
    %484 = vector.broadcast %476 : vector<32x1xf32> to vector<32x32xf32>
    %485 = arith.subf %468, %484 : vector<32x32xf32>
    %cst_302 = arith.constant 9.99999974E-6 : f32
    %486 = vector.broadcast %cst_302 : f32 to vector<32x1xf32>
    %487 = arith.addf %483, %486 : vector<32x1xf32>
    %488 = math.rsqrt %487 : vector<32x1xf32>
    %489 = vector.broadcast %488 : vector<32x1xf32> to vector<32x32xf32>
    %490 = arith.mulf %485, %489 : vector<32x32xf32>
    %491 = vector.broadcast %470 : vector<1x32xf32> to vector<32x32xf32>
    %492 = arith.mulf %490, %491 : vector<32x32xf32>
    %493 = vector.broadcast %472 : vector<1x32xf32> to vector<32x32xf32>
    %494 = arith.addf %492, %493 : vector<32x32xf32>
    %c6 = arith.constant 6 : index
    %c0_303 = arith.constant 0 : index
    %c0_304 = arith.constant 0 : index
    %495 = vector.load %arg8[%c6, %c0_303, %c0_304] : memref<12x32x128xf32, #tpu.memory_space<vmem>>, vector<1x32x128xf32>
    %496 = vector.shape_cast %495 : vector<1x32x128xf32> to vector<32x128xf32>
    %cst_305 = arith.constant dense<0.000000e+00> : vector<16x128xf32>
    %497 = tpu.matmul %1, %496, %cst_305 {dimension_numbers = #tpu.dot_dimension_numbers<[1], [0], [0], [1], [0, 0, 1, 1], [], []>} : vector<16x32xf32>, vector<32x128xf32>, vector<16x128xf32> -> vector<16x128xf32>
    %c6_306 = arith.constant 6 : index
    %c0_307 = arith.constant 0 : index
    %c0_308 = arith.constant 0 : index
    %498 = vector.load %arg9[%c6_306, %c0_307, %c0_308] : memref<12x1x128xf32, #tpu.memory_space<vmem>>, vector<1x1x128xf32>
    %499 = vector.shape_cast %498 : vector<1x1x128xf32> to vector<1x128xf32>
    %500 = vector.broadcast %499 : vector<1x128xf32> to vector<16x128xf32>
    %501 = arith.addf %497, %500 : vector<16x128xf32>
    %cst_309 = arith.constant 0.000000e+00 : f32
    %502 = vector.broadcast %cst_309 : f32 to vector<16x128xf32>
    %503 = arith.maximumf %501, %502 : vector<16x128xf32>
    %c6_310 = arith.constant 6 : index
    %c0_311 = arith.constant 0 : index
    %c0_312 = arith.constant 0 : index
    %504 = vector.load %arg10[%c6_310, %c0_311, %c0_312] : memref<12x128x32xf32, #tpu.memory_space<vmem>>, vector<1x128x32xf32>
    %505 = vector.shape_cast %504 : vector<1x128x32xf32> to vector<128x32xf32>
    %cst_313 = arith.constant dense<0.000000e+00> : vector<16x32xf32>
    %506 = tpu.matmul %503, %505, %cst_313 {dimension_numbers = #tpu.dot_dimension_numbers<[1], [0], [0], [1], [0, 0, 1, 1], [], []>} : vector<16x128xf32>, vector<128x32xf32>, vector<16x32xf32> -> vector<16x32xf32>
    %c6_314 = arith.constant 6 : index
    %c0_315 = arith.constant 0 : index
    %c0_316 = arith.constant 0 : index
    %507 = vector.load %arg11[%c6_314, %c0_315, %c0_316] : memref<12x1x32xf32, #tpu.memory_space<vmem>>, vector<1x1x32xf32>
    %508 = vector.shape_cast %507 : vector<1x1x32xf32> to vector<1x32xf32>
    %509 = vector.broadcast %508 : vector<1x32xf32> to vector<16x32xf32>
    %510 = arith.addf %506, %509 : vector<16x32xf32>
    %511 = arith.addf %1, %510 : vector<16x32xf32>
    %c6_317 = arith.constant 6 : index
    %c0_318 = arith.constant 0 : index
    %c0_319 = arith.constant 0 : index
    %512 = vector.load %arg12[%c6_317, %c0_318, %c0_319] : memref<12x1x32xf32, #tpu.memory_space<vmem>>, vector<1x1x32xf32>
    %513 = vector.shape_cast %512 : vector<1x1x32xf32> to vector<1x32xf32>
    %c6_320 = arith.constant 6 : index
    %c0_321 = arith.constant 0 : index
    %c0_322 = arith.constant 0 : index
    %514 = vector.load %arg13[%c6_320, %c0_321, %c0_322] : memref<12x1x32xf32, #tpu.memory_space<vmem>>, vector<1x1x32xf32>
    %515 = vector.shape_cast %514 : vector<1x1x32xf32> to vector<1x32xf32>
    %cst_323 = arith.constant dense<0.000000e+00> : vector<16xf32>
    %516 = vector.multi_reduction <add>, %511, %cst_323 [1] : vector<16x32xf32> to vector<16xf32>
    %517 = vector.shape_cast %516 : vector<16xf32> to vector<16x1xf32>
    %cst_324 = arith.constant 3.200000e+01 : f32
    %518 = vector.broadcast %cst_324 : f32 to vector<16x1xf32>
    %519 = arith.divf %517, %518 : vector<16x1xf32>
    %520 = arith.mulf %511, %511 : vector<16x32xf32>
    %cst_325 = arith.constant dense<0.000000e+00> : vector<16xf32>
    %521 = vector.multi_reduction <add>, %520, %cst_325 [1] : vector<16x32xf32> to vector<16xf32>
    %522 = vector.shape_cast %521 : vector<16xf32> to vector<16x1xf32>
    %cst_326 = arith.constant 3.200000e+01 : f32
    %523 = vector.broadcast %cst_326 : f32 to vector<16x1xf32>
    %524 = arith.divf %522, %523 : vector<16x1xf32>
    %525 = arith.mulf %519, %519 : vector<16x1xf32>
    %526 = arith.subf %524, %525 : vector<16x1xf32>
    %527 = vector.broadcast %519 : vector<16x1xf32> to vector<16x32xf32>
    %528 = arith.subf %511, %527 : vector<16x32xf32>
    %cst_327 = arith.constant 9.99999974E-6 : f32
    %529 = vector.broadcast %cst_327 : f32 to vector<16x1xf32>
    %530 = arith.addf %526, %529 : vector<16x1xf32>
    %531 = math.rsqrt %530 : vector<16x1xf32>
    %532 = vector.broadcast %531 : vector<16x1xf32> to vector<16x32xf32>
    %533 = arith.mulf %528, %532 : vector<16x32xf32>
    %534 = vector.broadcast %513 : vector<1x32xf32> to vector<16x32xf32>
    %535 = arith.mulf %533, %534 : vector<16x32xf32>
    %536 = vector.broadcast %515 : vector<1x32xf32> to vector<16x32xf32>
    %537 = arith.addf %535, %536 : vector<16x32xf32>
    %c7 = arith.constant 7 : index
    %c0_328 = arith.constant 0 : index
    %c0_329 = arith.constant 0 : index
    %538 = vector.load %arg8[%c7, %c0_328, %c0_329] : memref<12x32x128xf32, #tpu.memory_space<vmem>>, vector<1x32x128xf32>
    %539 = vector.shape_cast %538 : vector<1x32x128xf32> to vector<32x128xf32>
    %cst_330 = arith.constant dense<0.000000e+00> : vector<32x128xf32>
    %540 = tpu.matmul %446, %539, %cst_330 {dimension_numbers = #tpu.dot_dimension_numbers<[1], [0], [0], [1], [0, 0, 1, 1], [], []>} : vector<32x32xf32>, vector<32x128xf32>, vector<32x128xf32> -> vector<32x128xf32>
    %c7_331 = arith.constant 7 : index
    %c0_332 = arith.constant 0 : index
    %c0_333 = arith.constant 0 : index
    %541 = vector.load %arg9[%c7_331, %c0_332, %c0_333] : memref<12x1x128xf32, #tpu.memory_space<vmem>>, vector<1x1x128xf32>
    %542 = vector.shape_cast %541 : vector<1x1x128xf32> to vector<1x128xf32>
    %543 = vector.broadcast %542 : vector<1x128xf32> to vector<32x128xf32>
    %544 = arith.addf %540, %543 : vector<32x128xf32>
    %cst_334 = arith.constant 0.000000e+00 : f32
    %545 = vector.broadcast %cst_334 : f32 to vector<32x128xf32>
    %546 = arith.maximumf %544, %545 : vector<32x128xf32>
    %c7_335 = arith.constant 7 : index
    %c0_336 = arith.constant 0 : index
    %c0_337 = arith.constant 0 : index
    %547 = vector.load %arg10[%c7_335, %c0_336, %c0_337] : memref<12x128x32xf32, #tpu.memory_space<vmem>>, vector<1x128x32xf32>
    %548 = vector.shape_cast %547 : vector<1x128x32xf32> to vector<128x32xf32>
    %cst_338 = arith.constant dense<0.000000e+00> : vector<32x32xf32>
    %549 = tpu.matmul %546, %548, %cst_338 {dimension_numbers = #tpu.dot_dimension_numbers<[1], [0], [0], [1], [0, 0, 1, 1], [], []>} : vector<32x128xf32>, vector<128x32xf32>, vector<32x32xf32> -> vector<32x32xf32>
    %c7_339 = arith.constant 7 : index
    %c0_340 = arith.constant 0 : index
    %c0_341 = arith.constant 0 : index
    %550 = vector.load %arg11[%c7_339, %c0_340, %c0_341] : memref<12x1x32xf32, #tpu.memory_space<vmem>>, vector<1x1x32xf32>
    %551 = vector.shape_cast %550 : vector<1x1x32xf32> to vector<1x32xf32>
    %552 = vector.broadcast %551 : vector<1x32xf32> to vector<32x32xf32>
    %553 = arith.addf %549, %552 : vector<32x32xf32>
    %554 = arith.addf %446, %553 : vector<32x32xf32>
    %c7_342 = arith.constant 7 : index
    %c0_343 = arith.constant 0 : index
    %c0_344 = arith.constant 0 : index
    %555 = vector.load %arg12[%c7_342, %c0_343, %c0_344] : memref<12x1x32xf32, #tpu.memory_space<vmem>>, vector<1x1x32xf32>
    %556 = vector.shape_cast %555 : vector<1x1x32xf32> to vector<1x32xf32>
    %c7_345 = arith.constant 7 : index
    %c0_346 = arith.constant 0 : index
    %c0_347 = arith.constant 0 : index
    %557 = vector.load %arg13[%c7_345, %c0_346, %c0_347] : memref<12x1x32xf32, #tpu.memory_space<vmem>>, vector<1x1x32xf32>
    %558 = vector.shape_cast %557 : vector<1x1x32xf32> to vector<1x32xf32>
    %cst_348 = arith.constant dense<0.000000e+00> : vector<32xf32>
    %559 = vector.multi_reduction <add>, %554, %cst_348 [1] : vector<32x32xf32> to vector<32xf32>
    %560 = vector.shape_cast %559 : vector<32xf32> to vector<32x1xf32>
    %cst_349 = arith.constant 3.200000e+01 : f32
    %561 = vector.broadcast %cst_349 : f32 to vector<32x1xf32>
    %562 = arith.divf %560, %561 : vector<32x1xf32>
    %563 = arith.mulf %554, %554 : vector<32x32xf32>
    %cst_350 = arith.constant dense<0.000000e+00> : vector<32xf32>
    %564 = vector.multi_reduction <add>, %563, %cst_350 [1] : vector<32x32xf32> to vector<32xf32>
    %565 = vector.shape_cast %564 : vector<32xf32> to vector<32x1xf32>
    %cst_351 = arith.constant 3.200000e+01 : f32
    %566 = vector.broadcast %cst_351 : f32 to vector<32x1xf32>
    %567 = arith.divf %565, %566 : vector<32x1xf32>
    %568 = arith.mulf %562, %562 : vector<32x1xf32>
    %569 = arith.subf %567, %568 : vector<32x1xf32>
    %570 = vector.broadcast %562 : vector<32x1xf32> to vector<32x32xf32>
    %571 = arith.subf %554, %570 : vector<32x32xf32>
    %cst_352 = arith.constant 9.99999974E-6 : f32
    %572 = vector.broadcast %cst_352 : f32 to vector<32x1xf32>
    %573 = arith.addf %569, %572 : vector<32x1xf32>
    %574 = math.rsqrt %573 : vector<32x1xf32>
    %575 = vector.broadcast %574 : vector<32x1xf32> to vector<32x32xf32>
    %576 = arith.mulf %571, %575 : vector<32x32xf32>
    %577 = vector.broadcast %556 : vector<1x32xf32> to vector<32x32xf32>
    %578 = arith.mulf %576, %577 : vector<32x32xf32>
    %579 = vector.broadcast %558 : vector<1x32xf32> to vector<32x32xf32>
    %580 = arith.addf %578, %579 : vector<32x32xf32>
    %c8 = arith.constant 8 : index
    %c0_353 = arith.constant 0 : index
    %c0_354 = arith.constant 0 : index
    %581 = vector.load %arg8[%c8, %c0_353, %c0_354] : memref<12x32x128xf32, #tpu.memory_space<vmem>>, vector<1x32x128xf32>
    %582 = vector.shape_cast %581 : vector<1x32x128xf32> to vector<32x128xf32>
    %cst_355 = arith.constant dense<0.000000e+00> : vector<16x128xf32>
    %583 = tpu.matmul %451, %582, %cst_355 {dimension_numbers = #tpu.dot_dimension_numbers<[1], [0], [0], [1], [0, 0, 1, 1], [], []>} : vector<16x32xf32>, vector<32x128xf32>, vector<16x128xf32> -> vector<16x128xf32>
    %c8_356 = arith.constant 8 : index
    %c0_357 = arith.constant 0 : index
    %c0_358 = arith.constant 0 : index
    %584 = vector.load %arg9[%c8_356, %c0_357, %c0_358] : memref<12x1x128xf32, #tpu.memory_space<vmem>>, vector<1x1x128xf32>
    %585 = vector.shape_cast %584 : vector<1x1x128xf32> to vector<1x128xf32>
    %586 = vector.broadcast %585 : vector<1x128xf32> to vector<16x128xf32>
    %587 = arith.addf %583, %586 : vector<16x128xf32>
    %cst_359 = arith.constant 0.000000e+00 : f32
    %588 = vector.broadcast %cst_359 : f32 to vector<16x128xf32>
    %589 = arith.maximumf %587, %588 : vector<16x128xf32>
    %c8_360 = arith.constant 8 : index
    %c0_361 = arith.constant 0 : index
    %c0_362 = arith.constant 0 : index
    %590 = vector.load %arg10[%c8_360, %c0_361, %c0_362] : memref<12x128x32xf32, #tpu.memory_space<vmem>>, vector<1x128x32xf32>
    %591 = vector.shape_cast %590 : vector<1x128x32xf32> to vector<128x32xf32>
    %cst_363 = arith.constant dense<0.000000e+00> : vector<16x32xf32>
    %592 = tpu.matmul %589, %591, %cst_363 {dimension_numbers = #tpu.dot_dimension_numbers<[1], [0], [0], [1], [0, 0, 1, 1], [], []>} : vector<16x128xf32>, vector<128x32xf32>, vector<16x32xf32> -> vector<16x32xf32>
    %c8_364 = arith.constant 8 : index
    %c0_365 = arith.constant 0 : index
    %c0_366 = arith.constant 0 : index
    %593 = vector.load %arg11[%c8_364, %c0_365, %c0_366] : memref<12x1x32xf32, #tpu.memory_space<vmem>>, vector<1x1x32xf32>
    %594 = vector.shape_cast %593 : vector<1x1x32xf32> to vector<1x32xf32>
    %595 = vector.broadcast %594 : vector<1x32xf32> to vector<16x32xf32>
    %596 = arith.addf %592, %595 : vector<16x32xf32>
    %597 = arith.addf %451, %596 : vector<16x32xf32>
    %c8_367 = arith.constant 8 : index
    %c0_368 = arith.constant 0 : index
    %c0_369 = arith.constant 0 : index
    %598 = vector.load %arg12[%c8_367, %c0_368, %c0_369] : memref<12x1x32xf32, #tpu.memory_space<vmem>>, vector<1x1x32xf32>
    %599 = vector.shape_cast %598 : vector<1x1x32xf32> to vector<1x32xf32>
    %c8_370 = arith.constant 8 : index
    %c0_371 = arith.constant 0 : index
    %c0_372 = arith.constant 0 : index
    %600 = vector.load %arg13[%c8_370, %c0_371, %c0_372] : memref<12x1x32xf32, #tpu.memory_space<vmem>>, vector<1x1x32xf32>
    %601 = vector.shape_cast %600 : vector<1x1x32xf32> to vector<1x32xf32>
    %cst_373 = arith.constant dense<0.000000e+00> : vector<16xf32>
    %602 = vector.multi_reduction <add>, %597, %cst_373 [1] : vector<16x32xf32> to vector<16xf32>
    %603 = vector.shape_cast %602 : vector<16xf32> to vector<16x1xf32>
    %cst_374 = arith.constant 3.200000e+01 : f32
    %604 = vector.broadcast %cst_374 : f32 to vector<16x1xf32>
    %605 = arith.divf %603, %604 : vector<16x1xf32>
    %606 = arith.mulf %597, %597 : vector<16x32xf32>
    %cst_375 = arith.constant dense<0.000000e+00> : vector<16xf32>
    %607 = vector.multi_reduction <add>, %606, %cst_375 [1] : vector<16x32xf32> to vector<16xf32>
    %608 = vector.shape_cast %607 : vector<16xf32> to vector<16x1xf32>
    %cst_376 = arith.constant 3.200000e+01 : f32
    %609 = vector.broadcast %cst_376 : f32 to vector<16x1xf32>
    %610 = arith.divf %608, %609 : vector<16x1xf32>
    %611 = arith.mulf %605, %605 : vector<16x1xf32>
    %612 = arith.subf %610, %611 : vector<16x1xf32>
    %613 = vector.broadcast %605 : vector<16x1xf32> to vector<16x32xf32>
    %614 = arith.subf %597, %613 : vector<16x32xf32>
    %cst_377 = arith.constant 9.99999974E-6 : f32
    %615 = vector.broadcast %cst_377 : f32 to vector<16x1xf32>
    %616 = arith.addf %612, %615 : vector<16x1xf32>
    %617 = math.rsqrt %616 : vector<16x1xf32>
    %618 = vector.broadcast %617 : vector<16x1xf32> to vector<16x32xf32>
    %619 = arith.mulf %614, %618 : vector<16x32xf32>
    %620 = vector.broadcast %599 : vector<1x32xf32> to vector<16x32xf32>
    %621 = arith.mulf %619, %620 : vector<16x32xf32>
    %622 = vector.broadcast %601 : vector<1x32xf32> to vector<16x32xf32>
    %623 = arith.addf %621, %622 : vector<16x32xf32>
    %624 = arith.addf %494, %580 : vector<32x32xf32>
    %cst_378 = arith.constant 5.000000e-01 : f32
    %625 = vector.broadcast %cst_378 : f32 to vector<32x32xf32>
    %626 = arith.mulf %624, %625 : vector<32x32xf32>
    %627 = arith.addf %537, %623 : vector<16x32xf32>
    %cst_379 = arith.constant 5.000000e-01 : f32
    %628 = vector.broadcast %cst_379 : f32 to vector<16x32xf32>
    %629 = arith.mulf %627, %628 : vector<16x32xf32>
    %c0_380 = arith.constant 0 : index
    %c0_381 = arith.constant 0 : index
    %630 = vector.load %arg2[%c0_380, %c0_381] : memref<32x128xf32, #tpu.memory_space<vmem>>, vector<32x128xf32>
    %c0_382 = arith.constant 0 : index
    %c0_383 = arith.constant 0 : index
    %631 = vector.load %arg6[%c0_382, %c0_383] : memref<128x32xf32, #tpu.memory_space<vmem>>, vector<128x32xf32>
    %c3_384 = arith.constant 3 : index
    %c0_385 = arith.constant 0 : index
    %c0_386 = arith.constant 0 : index
    %632 = vector.load %arg14[%c3_384, %c0_385, %c0_386] : memref<6x32x32xf32, #tpu.memory_space<vmem>>, vector<1x32x32xf32>
    %633 = vector.shape_cast %632 : vector<1x32x32xf32> to vector<32x32xf32>
    %cst_387 = arith.constant dense<0.000000e+00> : vector<32x32xf32>
    %634 = tpu.matmul %626, %633, %cst_387 {dimension_numbers = #tpu.dot_dimension_numbers<[1], [0], [0], [1], [0, 0, 1, 1], [], []>} : vector<32x32xf32>, vector<32x32xf32>, vector<32x32xf32> -> vector<32x32xf32>
    %c3_388 = arith.constant 3 : index
    %c0_389 = arith.constant 0 : index
    %c0_390 = arith.constant 0 : index
    %635 = vector.load %arg15[%c3_388, %c0_389, %c0_390] : memref<6x1x32xf32, #tpu.memory_space<vmem>>, vector<1x1x32xf32>
    %636 = vector.shape_cast %635 : vector<1x1x32xf32> to vector<1x32xf32>
    %637 = vector.broadcast %636 : vector<1x32xf32> to vector<32x32xf32>
    %638 = arith.addf %634, %637 : vector<32x32xf32>
    %639 = tpu.concatenate %626, %626, %626, %626 in 0 : vector<32x32xf32>, vector<32x32xf32>, vector<32x32xf32>, vector<32x32xf32> -> vector<128x32xf32>
    %c3_391 = arith.constant 3 : index
    %c0_392 = arith.constant 0 : index
    %c0_393 = arith.constant 0 : index
    %640 = vector.load %arg16[%c3_391, %c0_392, %c0_393] : memref<6x32x32xf32, #tpu.memory_space<vmem>>, vector<1x32x32xf32>
    %641 = vector.shape_cast %640 : vector<1x32x32xf32> to vector<32x32xf32>
    %cst_394 = arith.constant dense<0.000000e+00> : vector<128x32xf32>
    %642 = tpu.matmul %639, %641, %cst_394 {dimension_numbers = #tpu.dot_dimension_numbers<[1], [0], [0], [1], [0, 0, 1, 1], [], []>} : vector<128x32xf32>, vector<32x32xf32>, vector<128x32xf32> -> vector<128x32xf32>
    %c3_395 = arith.constant 3 : index
    %c0_396 = arith.constant 0 : index
    %c0_397 = arith.constant 0 : index
    %643 = vector.load %arg17[%c3_395, %c0_396, %c0_397] : memref<6x1x32xf32, #tpu.memory_space<vmem>>, vector<1x1x32xf32>
    %644 = vector.shape_cast %643 : vector<1x1x32xf32> to vector<1x32xf32>
    %645 = vector.broadcast %644 : vector<1x32xf32> to vector<128x32xf32>
    %646 = arith.addf %642, %645 : vector<128x32xf32>
    %647 = arith.mulf %646, %631 : vector<128x32xf32>
    %c3_398 = arith.constant 3 : index
    %c0_399 = arith.constant 0 : index
    %c0_400 = arith.constant 0 : index
    %648 = vector.load %arg18[%c3_398, %c0_399, %c0_400] : memref<6x32x32xf32, #tpu.memory_space<vmem>>, vector<1x32x32xf32>
    %649 = vector.shape_cast %648 : vector<1x32x32xf32> to vector<32x32xf32>
    %cst_401 = arith.constant dense<0.000000e+00> : vector<128x32xf32>
    %650 = tpu.matmul %639, %649, %cst_401 {dimension_numbers = #tpu.dot_dimension_numbers<[1], [0], [0], [1], [0, 0, 1, 1], [], []>} : vector<128x32xf32>, vector<32x32xf32>, vector<128x32xf32> -> vector<128x32xf32>
    %c3_402 = arith.constant 3 : index
    %c0_403 = arith.constant 0 : index
    %c0_404 = arith.constant 0 : index
    %651 = vector.load %arg19[%c3_402, %c0_403, %c0_404] : memref<6x1x32xf32, #tpu.memory_space<vmem>>, vector<1x1x32xf32>
    %652 = vector.shape_cast %651 : vector<1x1x32xf32> to vector<1x32xf32>
    %653 = vector.broadcast %652 : vector<1x32xf32> to vector<128x32xf32>
    %654 = arith.addf %650, %653 : vector<128x32xf32>
    %655 = arith.mulf %654, %631 : vector<128x32xf32>
    %cst_405 = arith.constant dense<0.000000e+00> : vector<32x128xf32>
    %656 = tpu.matmul %638, %647, %cst_405 {dimension_numbers = #tpu.dot_dimension_numbers<[1], [1], [0], [0], [0, 0, 1, 0], [], []>} : vector<32x32xf32>, vector<128x32xf32>, vector<32x128xf32> -> vector<32x128xf32>
    %cst_406 = arith.constant 0.353553385 : f32
    %657 = vector.broadcast %cst_406 : f32 to vector<32x128xf32>
    %658 = arith.mulf %656, %657 : vector<32x128xf32>
    %659 = arith.subf %658, %630 : vector<32x128xf32>
    %cst_407 = arith.constant dense<0xFF800000> : vector<32xf32>
    %660 = vector.multi_reduction <maximumf>, %659, %cst_407 [1] : vector<32x128xf32> to vector<32xf32>
    %661 = vector.shape_cast %660 : vector<32xf32> to vector<32x1xf32>
    %662 = vector.broadcast %661 : vector<32x1xf32> to vector<32x128xf32>
    %663 = arith.subf %659, %662 : vector<32x128xf32>
    %664 = math.exp %663 : vector<32x128xf32>
    %cst_408 = arith.constant dense<0.000000e+00> : vector<32x32xf32>
    %665 = tpu.matmul %664, %631, %cst_408 {dimension_numbers = #tpu.dot_dimension_numbers<[1], [0], [0], [1], [0, 0, 1, 1], [], []>} : vector<32x128xf32>, vector<128x32xf32>, vector<32x32xf32> -> vector<32x32xf32>
    %cst_409 = arith.constant dense<0.000000e+00> : vector<32x32xf32>
    %666 = tpu.matmul %664, %655, %cst_409 {dimension_numbers = #tpu.dot_dimension_numbers<[1], [0], [0], [1], [0, 0, 1, 1], [], []>} : vector<32x128xf32>, vector<128x32xf32>, vector<32x32xf32> -> vector<32x32xf32>
    %667 = tpu.reciprocal %665 {approx = true} : vector<32x32xf32> -> vector<32x32xf32>
    %668 = arith.mulf %666, %667 : vector<32x32xf32>
    %c3_410 = arith.constant 3 : index
    %c0_411 = arith.constant 0 : index
    %c0_412 = arith.constant 0 : index
    %669 = vector.load %arg20[%c3_410, %c0_411, %c0_412] : memref<6x32x32xf32, #tpu.memory_space<vmem>>, vector<1x32x32xf32>
    %670 = vector.shape_cast %669 : vector<1x32x32xf32> to vector<32x32xf32>
    %cst_413 = arith.constant dense<0.000000e+00> : vector<32x32xf32>
    %671 = tpu.matmul %668, %670, %cst_413 {dimension_numbers = #tpu.dot_dimension_numbers<[1], [0], [0], [1], [0, 0, 1, 1], [], []>} : vector<32x32xf32>, vector<32x32xf32>, vector<32x32xf32> -> vector<32x32xf32>
    %c3_414 = arith.constant 3 : index
    %c0_415 = arith.constant 0 : index
    %c0_416 = arith.constant 0 : index
    %672 = vector.load %arg21[%c3_414, %c0_415, %c0_416] : memref<6x1x32xf32, #tpu.memory_space<vmem>>, vector<1x1x32xf32>
    %673 = vector.shape_cast %672 : vector<1x1x32xf32> to vector<1x32xf32>
    %674 = vector.broadcast %673 : vector<1x32xf32> to vector<32x32xf32>
    %675 = arith.addf %671, %674 : vector<32x32xf32>
    %676 = arith.addf %626, %675 : vector<32x32xf32>
    %c3_417 = arith.constant 3 : index
    %c0_418 = arith.constant 0 : index
    %c0_419 = arith.constant 0 : index
    %677 = vector.load %arg22[%c3_417, %c0_418, %c0_419] : memref<6x1x32xf32, #tpu.memory_space<vmem>>, vector<1x1x32xf32>
    %678 = vector.shape_cast %677 : vector<1x1x32xf32> to vector<1x32xf32>
    %c3_420 = arith.constant 3 : index
    %c0_421 = arith.constant 0 : index
    %c0_422 = arith.constant 0 : index
    %679 = vector.load %arg23[%c3_420, %c0_421, %c0_422] : memref<6x1x32xf32, #tpu.memory_space<vmem>>, vector<1x1x32xf32>
    %680 = vector.shape_cast %679 : vector<1x1x32xf32> to vector<1x32xf32>
    %cst_423 = arith.constant dense<0.000000e+00> : vector<32xf32>
    %681 = vector.multi_reduction <add>, %676, %cst_423 [1] : vector<32x32xf32> to vector<32xf32>
    %682 = vector.shape_cast %681 : vector<32xf32> to vector<32x1xf32>
    %cst_424 = arith.constant 3.200000e+01 : f32
    %683 = vector.broadcast %cst_424 : f32 to vector<32x1xf32>
    %684 = arith.divf %682, %683 : vector<32x1xf32>
    %685 = arith.mulf %676, %676 : vector<32x32xf32>
    %cst_425 = arith.constant dense<0.000000e+00> : vector<32xf32>
    %686 = vector.multi_reduction <add>, %685, %cst_425 [1] : vector<32x32xf32> to vector<32xf32>
    %687 = vector.shape_cast %686 : vector<32xf32> to vector<32x1xf32>
    %cst_426 = arith.constant 3.200000e+01 : f32
    %688 = vector.broadcast %cst_426 : f32 to vector<32x1xf32>
    %689 = arith.divf %687, %688 : vector<32x1xf32>
    %690 = arith.mulf %684, %684 : vector<32x1xf32>
    %691 = arith.subf %689, %690 : vector<32x1xf32>
    %692 = vector.broadcast %684 : vector<32x1xf32> to vector<32x32xf32>
    %693 = arith.subf %676, %692 : vector<32x32xf32>
    %cst_427 = arith.constant 9.99999974E-6 : f32
    %694 = vector.broadcast %cst_427 : f32 to vector<32x1xf32>
    %695 = arith.addf %691, %694 : vector<32x1xf32>
    %696 = math.rsqrt %695 : vector<32x1xf32>
    %697 = vector.broadcast %696 : vector<32x1xf32> to vector<32x32xf32>
    %698 = arith.mulf %693, %697 : vector<32x32xf32>
    %699 = vector.broadcast %678 : vector<1x32xf32> to vector<32x32xf32>
    %700 = arith.mulf %698, %699 : vector<32x32xf32>
    %701 = vector.broadcast %680 : vector<1x32xf32> to vector<32x32xf32>
    %702 = arith.addf %700, %701 : vector<32x32xf32>
    %c0_428 = arith.constant 0 : index
    %c0_429 = arith.constant 0 : index
    %703 = vector.load %arg4[%c0_428, %c0_429] : memref<16x64xf32, #tpu.memory_space<vmem>>, vector<16x64xf32>
    %c0_430 = arith.constant 0 : index
    %c0_431 = arith.constant 0 : index
    %704 = vector.load %arg7[%c0_430, %c0_431] : memref<64x32xf32, #tpu.memory_space<vmem>>, vector<64x32xf32>
    %c4_432 = arith.constant 4 : index
    %c0_433 = arith.constant 0 : index
    %c0_434 = arith.constant 0 : index
    %705 = vector.load %arg14[%c4_432, %c0_433, %c0_434] : memref<6x32x32xf32, #tpu.memory_space<vmem>>, vector<1x32x32xf32>
    %706 = vector.shape_cast %705 : vector<1x32x32xf32> to vector<32x32xf32>
    %cst_435 = arith.constant dense<0.000000e+00> : vector<16x32xf32>
    %707 = tpu.matmul %629, %706, %cst_435 {dimension_numbers = #tpu.dot_dimension_numbers<[1], [0], [0], [1], [0, 0, 1, 1], [], []>} : vector<16x32xf32>, vector<32x32xf32>, vector<16x32xf32> -> vector<16x32xf32>
    %c4_436 = arith.constant 4 : index
    %c0_437 = arith.constant 0 : index
    %c0_438 = arith.constant 0 : index
    %708 = vector.load %arg15[%c4_436, %c0_437, %c0_438] : memref<6x1x32xf32, #tpu.memory_space<vmem>>, vector<1x1x32xf32>
    %709 = vector.shape_cast %708 : vector<1x1x32xf32> to vector<1x32xf32>
    %710 = vector.broadcast %709 : vector<1x32xf32> to vector<16x32xf32>
    %711 = arith.addf %707, %710 : vector<16x32xf32>
    %712 = tpu.concatenate %629, %629, %629, %629 in 0 : vector<16x32xf32>, vector<16x32xf32>, vector<16x32xf32>, vector<16x32xf32> -> vector<64x32xf32>
    %c4_439 = arith.constant 4 : index
    %c0_440 = arith.constant 0 : index
    %c0_441 = arith.constant 0 : index
    %713 = vector.load %arg16[%c4_439, %c0_440, %c0_441] : memref<6x32x32xf32, #tpu.memory_space<vmem>>, vector<1x32x32xf32>
    %714 = vector.shape_cast %713 : vector<1x32x32xf32> to vector<32x32xf32>
    %cst_442 = arith.constant dense<0.000000e+00> : vector<64x32xf32>
    %715 = tpu.matmul %712, %714, %cst_442 {dimension_numbers = #tpu.dot_dimension_numbers<[1], [0], [0], [1], [0, 0, 1, 1], [], []>} : vector<64x32xf32>, vector<32x32xf32>, vector<64x32xf32> -> vector<64x32xf32>
    %c4_443 = arith.constant 4 : index
    %c0_444 = arith.constant 0 : index
    %c0_445 = arith.constant 0 : index
    %716 = vector.load %arg17[%c4_443, %c0_444, %c0_445] : memref<6x1x32xf32, #tpu.memory_space<vmem>>, vector<1x1x32xf32>
    %717 = vector.shape_cast %716 : vector<1x1x32xf32> to vector<1x32xf32>
    %718 = vector.broadcast %717 : vector<1x32xf32> to vector<64x32xf32>
    %719 = arith.addf %715, %718 : vector<64x32xf32>
    %720 = arith.mulf %719, %704 : vector<64x32xf32>
    %c4_446 = arith.constant 4 : index
    %c0_447 = arith.constant 0 : index
    %c0_448 = arith.constant 0 : index
    %721 = vector.load %arg18[%c4_446, %c0_447, %c0_448] : memref<6x32x32xf32, #tpu.memory_space<vmem>>, vector<1x32x32xf32>
    %722 = vector.shape_cast %721 : vector<1x32x32xf32> to vector<32x32xf32>
    %cst_449 = arith.constant dense<0.000000e+00> : vector<64x32xf32>
    %723 = tpu.matmul %712, %722, %cst_449 {dimension_numbers = #tpu.dot_dimension_numbers<[1], [0], [0], [1], [0, 0, 1, 1], [], []>} : vector<64x32xf32>, vector<32x32xf32>, vector<64x32xf32> -> vector<64x32xf32>
    %c4_450 = arith.constant 4 : index
    %c0_451 = arith.constant 0 : index
    %c0_452 = arith.constant 0 : index
    %724 = vector.load %arg19[%c4_450, %c0_451, %c0_452] : memref<6x1x32xf32, #tpu.memory_space<vmem>>, vector<1x1x32xf32>
    %725 = vector.shape_cast %724 : vector<1x1x32xf32> to vector<1x32xf32>
    %726 = vector.broadcast %725 : vector<1x32xf32> to vector<64x32xf32>
    %727 = arith.addf %723, %726 : vector<64x32xf32>
    %728 = arith.mulf %727, %704 : vector<64x32xf32>
    %cst_453 = arith.constant dense<0.000000e+00> : vector<16x64xf32>
    %729 = tpu.matmul %711, %720, %cst_453 {dimension_numbers = #tpu.dot_dimension_numbers<[1], [1], [0], [0], [0, 0, 1, 0], [], []>} : vector<16x32xf32>, vector<64x32xf32>, vector<16x64xf32> -> vector<16x64xf32>
    %cst_454 = arith.constant 0.353553385 : f32
    %730 = vector.broadcast %cst_454 : f32 to vector<16x64xf32>
    %731 = arith.mulf %729, %730 : vector<16x64xf32>
    %732 = arith.subf %731, %703 : vector<16x64xf32>
    %cst_455 = arith.constant dense<0xFF800000> : vector<16xf32>
    %733 = vector.multi_reduction <maximumf>, %732, %cst_455 [1] : vector<16x64xf32> to vector<16xf32>
    %734 = vector.shape_cast %733 : vector<16xf32> to vector<16x1xf32>
    %735 = vector.broadcast %734 : vector<16x1xf32> to vector<16x64xf32>
    %736 = arith.subf %732, %735 : vector<16x64xf32>
    %737 = math.exp %736 : vector<16x64xf32>
    %cst_456 = arith.constant dense<0.000000e+00> : vector<16x32xf32>
    %738 = tpu.matmul %737, %704, %cst_456 {dimension_numbers = #tpu.dot_dimension_numbers<[1], [0], [0], [1], [0, 0, 1, 1], [], []>} : vector<16x64xf32>, vector<64x32xf32>, vector<16x32xf32> -> vector<16x32xf32>
    %cst_457 = arith.constant dense<0.000000e+00> : vector<16x32xf32>
    %739 = tpu.matmul %737, %728, %cst_457 {dimension_numbers = #tpu.dot_dimension_numbers<[1], [0], [0], [1], [0, 0, 1, 1], [], []>} : vector<16x64xf32>, vector<64x32xf32>, vector<16x32xf32> -> vector<16x32xf32>
    %740 = tpu.reciprocal %738 {approx = true} : vector<16x32xf32> -> vector<16x32xf32>
    %741 = arith.mulf %739, %740 : vector<16x32xf32>
    %c4_458 = arith.constant 4 : index
    %c0_459 = arith.constant 0 : index
    %c0_460 = arith.constant 0 : index
    %742 = vector.load %arg20[%c4_458, %c0_459, %c0_460] : memref<6x32x32xf32, #tpu.memory_space<vmem>>, vector<1x32x32xf32>
    %743 = vector.shape_cast %742 : vector<1x32x32xf32> to vector<32x32xf32>
    %cst_461 = arith.constant dense<0.000000e+00> : vector<16x32xf32>
    %744 = tpu.matmul %741, %743, %cst_461 {dimension_numbers = #tpu.dot_dimension_numbers<[1], [0], [0], [1], [0, 0, 1, 1], [], []>} : vector<16x32xf32>, vector<32x32xf32>, vector<16x32xf32> -> vector<16x32xf32>
    %c4_462 = arith.constant 4 : index
    %c0_463 = arith.constant 0 : index
    %c0_464 = arith.constant 0 : index
    %745 = vector.load %arg21[%c4_462, %c0_463, %c0_464] : memref<6x1x32xf32, #tpu.memory_space<vmem>>, vector<1x1x32xf32>
    %746 = vector.shape_cast %745 : vector<1x1x32xf32> to vector<1x32xf32>
    %747 = vector.broadcast %746 : vector<1x32xf32> to vector<16x32xf32>
    %748 = arith.addf %744, %747 : vector<16x32xf32>
    %749 = arith.addf %629, %748 : vector<16x32xf32>
    %c4_465 = arith.constant 4 : index
    %c0_466 = arith.constant 0 : index
    %c0_467 = arith.constant 0 : index
    %750 = vector.load %arg22[%c4_465, %c0_466, %c0_467] : memref<6x1x32xf32, #tpu.memory_space<vmem>>, vector<1x1x32xf32>
    %751 = vector.shape_cast %750 : vector<1x1x32xf32> to vector<1x32xf32>
    %c4_468 = arith.constant 4 : index
    %c0_469 = arith.constant 0 : index
    %c0_470 = arith.constant 0 : index
    %752 = vector.load %arg23[%c4_468, %c0_469, %c0_470] : memref<6x1x32xf32, #tpu.memory_space<vmem>>, vector<1x1x32xf32>
    %753 = vector.shape_cast %752 : vector<1x1x32xf32> to vector<1x32xf32>
    %cst_471 = arith.constant dense<0.000000e+00> : vector<16xf32>
    %754 = vector.multi_reduction <add>, %749, %cst_471 [1] : vector<16x32xf32> to vector<16xf32>
    %755 = vector.shape_cast %754 : vector<16xf32> to vector<16x1xf32>
    %cst_472 = arith.constant 3.200000e+01 : f32
    %756 = vector.broadcast %cst_472 : f32 to vector<16x1xf32>
    %757 = arith.divf %755, %756 : vector<16x1xf32>
    %758 = arith.mulf %749, %749 : vector<16x32xf32>
    %cst_473 = arith.constant dense<0.000000e+00> : vector<16xf32>
    %759 = vector.multi_reduction <add>, %758, %cst_473 [1] : vector<16x32xf32> to vector<16xf32>
    %760 = vector.shape_cast %759 : vector<16xf32> to vector<16x1xf32>
    %cst_474 = arith.constant 3.200000e+01 : f32
    %761 = vector.broadcast %cst_474 : f32 to vector<16x1xf32>
    %762 = arith.divf %760, %761 : vector<16x1xf32>
    %763 = arith.mulf %757, %757 : vector<16x1xf32>
    %764 = arith.subf %762, %763 : vector<16x1xf32>
    %765 = vector.broadcast %757 : vector<16x1xf32> to vector<16x32xf32>
    %766 = arith.subf %749, %765 : vector<16x32xf32>
    %cst_475 = arith.constant 9.99999974E-6 : f32
    %767 = vector.broadcast %cst_475 : f32 to vector<16x1xf32>
    %768 = arith.addf %764, %767 : vector<16x1xf32>
    %769 = math.rsqrt %768 : vector<16x1xf32>
    %770 = vector.broadcast %769 : vector<16x1xf32> to vector<16x32xf32>
    %771 = arith.mulf %766, %770 : vector<16x32xf32>
    %772 = vector.broadcast %751 : vector<1x32xf32> to vector<16x32xf32>
    %773 = arith.mulf %771, %772 : vector<16x32xf32>
    %774 = vector.broadcast %753 : vector<1x32xf32> to vector<16x32xf32>
    %775 = arith.addf %773, %774 : vector<16x32xf32>
    %c0_476 = arith.constant 0 : index
    %c0_477 = arith.constant 0 : index
    %776 = vector.load %arg3[%c0_476, %c0_477] : memref<32x64xf32, #tpu.memory_space<vmem>>, vector<32x64xf32>
    %c0_478 = arith.constant 0 : index
    %c0_479 = arith.constant 0 : index
    %777 = vector.load %arg7[%c0_478, %c0_479] : memref<64x32xf32, #tpu.memory_space<vmem>>, vector<64x32xf32>
    %c5_480 = arith.constant 5 : index
    %c0_481 = arith.constant 0 : index
    %c0_482 = arith.constant 0 : index
    %778 = vector.load %arg14[%c5_480, %c0_481, %c0_482] : memref<6x32x32xf32, #tpu.memory_space<vmem>>, vector<1x32x32xf32>
    %779 = vector.shape_cast %778 : vector<1x32x32xf32> to vector<32x32xf32>
    %cst_483 = arith.constant dense<0.000000e+00> : vector<32x32xf32>
    %780 = tpu.matmul %702, %779, %cst_483 {dimension_numbers = #tpu.dot_dimension_numbers<[1], [0], [0], [1], [0, 0, 1, 1], [], []>} : vector<32x32xf32>, vector<32x32xf32>, vector<32x32xf32> -> vector<32x32xf32>
    %c5_484 = arith.constant 5 : index
    %c0_485 = arith.constant 0 : index
    %c0_486 = arith.constant 0 : index
    %781 = vector.load %arg15[%c5_484, %c0_485, %c0_486] : memref<6x1x32xf32, #tpu.memory_space<vmem>>, vector<1x1x32xf32>
    %782 = vector.shape_cast %781 : vector<1x1x32xf32> to vector<1x32xf32>
    %783 = vector.broadcast %782 : vector<1x32xf32> to vector<32x32xf32>
    %784 = arith.addf %780, %783 : vector<32x32xf32>
    %785 = tpu.concatenate %775, %775, %775, %775 in 0 : vector<16x32xf32>, vector<16x32xf32>, vector<16x32xf32>, vector<16x32xf32> -> vector<64x32xf32>
    %c5_487 = arith.constant 5 : index
    %c0_488 = arith.constant 0 : index
    %c0_489 = arith.constant 0 : index
    %786 = vector.load %arg16[%c5_487, %c0_488, %c0_489] : memref<6x32x32xf32, #tpu.memory_space<vmem>>, vector<1x32x32xf32>
    %787 = vector.shape_cast %786 : vector<1x32x32xf32> to vector<32x32xf32>
    %cst_490 = arith.constant dense<0.000000e+00> : vector<64x32xf32>
    %788 = tpu.matmul %785, %787, %cst_490 {dimension_numbers = #tpu.dot_dimension_numbers<[1], [0], [0], [1], [0, 0, 1, 1], [], []>} : vector<64x32xf32>, vector<32x32xf32>, vector<64x32xf32> -> vector<64x32xf32>
    %c5_491 = arith.constant 5 : index
    %c0_492 = arith.constant 0 : index
    %c0_493 = arith.constant 0 : index
    %789 = vector.load %arg17[%c5_491, %c0_492, %c0_493] : memref<6x1x32xf32, #tpu.memory_space<vmem>>, vector<1x1x32xf32>
    %790 = vector.shape_cast %789 : vector<1x1x32xf32> to vector<1x32xf32>
    %791 = vector.broadcast %790 : vector<1x32xf32> to vector<64x32xf32>
    %792 = arith.addf %788, %791 : vector<64x32xf32>
    %793 = arith.mulf %792, %777 : vector<64x32xf32>
    %c5_494 = arith.constant 5 : index
    %c0_495 = arith.constant 0 : index
    %c0_496 = arith.constant 0 : index
    %794 = vector.load %arg18[%c5_494, %c0_495, %c0_496] : memref<6x32x32xf32, #tpu.memory_space<vmem>>, vector<1x32x32xf32>
    %795 = vector.shape_cast %794 : vector<1x32x32xf32> to vector<32x32xf32>
    %cst_497 = arith.constant dense<0.000000e+00> : vector<64x32xf32>
    %796 = tpu.matmul %785, %795, %cst_497 {dimension_numbers = #tpu.dot_dimension_numbers<[1], [0], [0], [1], [0, 0, 1, 1], [], []>} : vector<64x32xf32>, vector<32x32xf32>, vector<64x32xf32> -> vector<64x32xf32>
    %c5_498 = arith.constant 5 : index
    %c0_499 = arith.constant 0 : index
    %c0_500 = arith.constant 0 : index
    %797 = vector.load %arg19[%c5_498, %c0_499, %c0_500] : memref<6x1x32xf32, #tpu.memory_space<vmem>>, vector<1x1x32xf32>
    %798 = vector.shape_cast %797 : vector<1x1x32xf32> to vector<1x32xf32>
    %799 = vector.broadcast %798 : vector<1x32xf32> to vector<64x32xf32>
    %800 = arith.addf %796, %799 : vector<64x32xf32>
    %801 = arith.mulf %800, %777 : vector<64x32xf32>
    %cst_501 = arith.constant dense<0.000000e+00> : vector<32x64xf32>
    %802 = tpu.matmul %784, %793, %cst_501 {dimension_numbers = #tpu.dot_dimension_numbers<[1], [1], [0], [0], [0, 0, 1, 0], [], []>} : vector<32x32xf32>, vector<64x32xf32>, vector<32x64xf32> -> vector<32x64xf32>
    %cst_502 = arith.constant 0.353553385 : f32
    %803 = vector.broadcast %cst_502 : f32 to vector<32x64xf32>
    %804 = arith.mulf %802, %803 : vector<32x64xf32>
    %805 = arith.subf %804, %776 : vector<32x64xf32>
    %cst_503 = arith.constant dense<0xFF800000> : vector<32xf32>
    %806 = vector.multi_reduction <maximumf>, %805, %cst_503 [1] : vector<32x64xf32> to vector<32xf32>
    %807 = vector.shape_cast %806 : vector<32xf32> to vector<32x1xf32>
    %808 = vector.broadcast %807 : vector<32x1xf32> to vector<32x64xf32>
    %809 = arith.subf %805, %808 : vector<32x64xf32>
    %810 = math.exp %809 : vector<32x64xf32>
    %cst_504 = arith.constant dense<0.000000e+00> : vector<32x32xf32>
    %811 = tpu.matmul %810, %777, %cst_504 {dimension_numbers = #tpu.dot_dimension_numbers<[1], [0], [0], [1], [0, 0, 1, 1], [], []>} : vector<32x64xf32>, vector<64x32xf32>, vector<32x32xf32> -> vector<32x32xf32>
    %cst_505 = arith.constant dense<0.000000e+00> : vector<32x32xf32>
    %812 = tpu.matmul %810, %801, %cst_505 {dimension_numbers = #tpu.dot_dimension_numbers<[1], [0], [0], [1], [0, 0, 1, 1], [], []>} : vector<32x64xf32>, vector<64x32xf32>, vector<32x32xf32> -> vector<32x32xf32>
    %813 = tpu.reciprocal %811 {approx = true} : vector<32x32xf32> -> vector<32x32xf32>
    %814 = arith.mulf %812, %813 : vector<32x32xf32>
    %c5_506 = arith.constant 5 : index
    %c0_507 = arith.constant 0 : index
    %c0_508 = arith.constant 0 : index
    %815 = vector.load %arg20[%c5_506, %c0_507, %c0_508] : memref<6x32x32xf32, #tpu.memory_space<vmem>>, vector<1x32x32xf32>
    %816 = vector.shape_cast %815 : vector<1x32x32xf32> to vector<32x32xf32>
    %cst_509 = arith.constant dense<0.000000e+00> : vector<32x32xf32>
    %817 = tpu.matmul %814, %816, %cst_509 {dimension_numbers = #tpu.dot_dimension_numbers<[1], [0], [0], [1], [0, 0, 1, 1], [], []>} : vector<32x32xf32>, vector<32x32xf32>, vector<32x32xf32> -> vector<32x32xf32>
    %c5_510 = arith.constant 5 : index
    %c0_511 = arith.constant 0 : index
    %c0_512 = arith.constant 0 : index
    %818 = vector.load %arg21[%c5_510, %c0_511, %c0_512] : memref<6x1x32xf32, #tpu.memory_space<vmem>>, vector<1x1x32xf32>
    %819 = vector.shape_cast %818 : vector<1x1x32xf32> to vector<1x32xf32>
    %820 = vector.broadcast %819 : vector<1x32xf32> to vector<32x32xf32>
    %821 = arith.addf %817, %820 : vector<32x32xf32>
    %822 = arith.addf %702, %821 : vector<32x32xf32>
    %c5_513 = arith.constant 5 : index
    %c0_514 = arith.constant 0 : index
    %c0_515 = arith.constant 0 : index
    %823 = vector.load %arg22[%c5_513, %c0_514, %c0_515] : memref<6x1x32xf32, #tpu.memory_space<vmem>>, vector<1x1x32xf32>
    %824 = vector.shape_cast %823 : vector<1x1x32xf32> to vector<1x32xf32>
    %c5_516 = arith.constant 5 : index
    %c0_517 = arith.constant 0 : index
    %c0_518 = arith.constant 0 : index
    %825 = vector.load %arg23[%c5_516, %c0_517, %c0_518] : memref<6x1x32xf32, #tpu.memory_space<vmem>>, vector<1x1x32xf32>
    %826 = vector.shape_cast %825 : vector<1x1x32xf32> to vector<1x32xf32>
    %cst_519 = arith.constant dense<0.000000e+00> : vector<32xf32>
    %827 = vector.multi_reduction <add>, %822, %cst_519 [1] : vector<32x32xf32> to vector<32xf32>
    %828 = vector.shape_cast %827 : vector<32xf32> to vector<32x1xf32>
    %cst_520 = arith.constant 3.200000e+01 : f32
    %829 = vector.broadcast %cst_520 : f32 to vector<32x1xf32>
    %830 = arith.divf %828, %829 : vector<32x1xf32>
    %831 = arith.mulf %822, %822 : vector<32x32xf32>
    %cst_521 = arith.constant dense<0.000000e+00> : vector<32xf32>
    %832 = vector.multi_reduction <add>, %831, %cst_521 [1] : vector<32x32xf32> to vector<32xf32>
    %833 = vector.shape_cast %832 : vector<32xf32> to vector<32x1xf32>
    %cst_522 = arith.constant 3.200000e+01 : f32
    %834 = vector.broadcast %cst_522 : f32 to vector<32x1xf32>
    %835 = arith.divf %833, %834 : vector<32x1xf32>
    %836 = arith.mulf %830, %830 : vector<32x1xf32>
    %837 = arith.subf %835, %836 : vector<32x1xf32>
    %838 = vector.broadcast %830 : vector<32x1xf32> to vector<32x32xf32>
    %839 = arith.subf %822, %838 : vector<32x32xf32>
    %cst_523 = arith.constant 9.99999974E-6 : f32
    %840 = vector.broadcast %cst_523 : f32 to vector<32x1xf32>
    %841 = arith.addf %837, %840 : vector<32x1xf32>
    %842 = math.rsqrt %841 : vector<32x1xf32>
    %843 = vector.broadcast %842 : vector<32x1xf32> to vector<32x32xf32>
    %844 = arith.mulf %839, %843 : vector<32x32xf32>
    %845 = vector.broadcast %824 : vector<1x32xf32> to vector<32x32xf32>
    %846 = arith.mulf %844, %845 : vector<32x32xf32>
    %847 = vector.broadcast %826 : vector<1x32xf32> to vector<32x32xf32>
    %848 = arith.addf %846, %847 : vector<32x32xf32>
    %c9 = arith.constant 9 : index
    %c0_524 = arith.constant 0 : index
    %c0_525 = arith.constant 0 : index
    %849 = vector.load %arg8[%c9, %c0_524, %c0_525] : memref<12x32x128xf32, #tpu.memory_space<vmem>>, vector<1x32x128xf32>
    %850 = vector.shape_cast %849 : vector<1x32x128xf32> to vector<32x128xf32>
    %cst_526 = arith.constant dense<0.000000e+00> : vector<16x128xf32>
    %851 = tpu.matmul %775, %850, %cst_526 {dimension_numbers = #tpu.dot_dimension_numbers<[1], [0], [0], [1], [0, 0, 1, 1], [], []>} : vector<16x32xf32>, vector<32x128xf32>, vector<16x128xf32> -> vector<16x128xf32>
    %c9_527 = arith.constant 9 : index
    %c0_528 = arith.constant 0 : index
    %c0_529 = arith.constant 0 : index
    %852 = vector.load %arg9[%c9_527, %c0_528, %c0_529] : memref<12x1x128xf32, #tpu.memory_space<vmem>>, vector<1x1x128xf32>
    %853 = vector.shape_cast %852 : vector<1x1x128xf32> to vector<1x128xf32>
    %854 = vector.broadcast %853 : vector<1x128xf32> to vector<16x128xf32>
    %855 = arith.addf %851, %854 : vector<16x128xf32>
    %cst_530 = arith.constant 0.000000e+00 : f32
    %856 = vector.broadcast %cst_530 : f32 to vector<16x128xf32>
    %857 = arith.maximumf %855, %856 : vector<16x128xf32>
    %c9_531 = arith.constant 9 : index
    %c0_532 = arith.constant 0 : index
    %c0_533 = arith.constant 0 : index
    %858 = vector.load %arg10[%c9_531, %c0_532, %c0_533] : memref<12x128x32xf32, #tpu.memory_space<vmem>>, vector<1x128x32xf32>
    %859 = vector.shape_cast %858 : vector<1x128x32xf32> to vector<128x32xf32>
    %cst_534 = arith.constant dense<0.000000e+00> : vector<16x32xf32>
    %860 = tpu.matmul %857, %859, %cst_534 {dimension_numbers = #tpu.dot_dimension_numbers<[1], [0], [0], [1], [0, 0, 1, 1], [], []>} : vector<16x128xf32>, vector<128x32xf32>, vector<16x32xf32> -> vector<16x32xf32>
    %c9_535 = arith.constant 9 : index
    %c0_536 = arith.constant 0 : index
    %c0_537 = arith.constant 0 : index
    %861 = vector.load %arg11[%c9_535, %c0_536, %c0_537] : memref<12x1x32xf32, #tpu.memory_space<vmem>>, vector<1x1x32xf32>
    %862 = vector.shape_cast %861 : vector<1x1x32xf32> to vector<1x32xf32>
    %863 = vector.broadcast %862 : vector<1x32xf32> to vector<16x32xf32>
    %864 = arith.addf %860, %863 : vector<16x32xf32>
    %865 = arith.addf %775, %864 : vector<16x32xf32>
    %c9_538 = arith.constant 9 : index
    %c0_539 = arith.constant 0 : index
    %c0_540 = arith.constant 0 : index
    %866 = vector.load %arg12[%c9_538, %c0_539, %c0_540] : memref<12x1x32xf32, #tpu.memory_space<vmem>>, vector<1x1x32xf32>
    %867 = vector.shape_cast %866 : vector<1x1x32xf32> to vector<1x32xf32>
    %c9_541 = arith.constant 9 : index
    %c0_542 = arith.constant 0 : index
    %c0_543 = arith.constant 0 : index
    %868 = vector.load %arg13[%c9_541, %c0_542, %c0_543] : memref<12x1x32xf32, #tpu.memory_space<vmem>>, vector<1x1x32xf32>
    %869 = vector.shape_cast %868 : vector<1x1x32xf32> to vector<1x32xf32>
    %cst_544 = arith.constant dense<0.000000e+00> : vector<16xf32>
    %870 = vector.multi_reduction <add>, %865, %cst_544 [1] : vector<16x32xf32> to vector<16xf32>
    %871 = vector.shape_cast %870 : vector<16xf32> to vector<16x1xf32>
    %cst_545 = arith.constant 3.200000e+01 : f32
    %872 = vector.broadcast %cst_545 : f32 to vector<16x1xf32>
    %873 = arith.divf %871, %872 : vector<16x1xf32>
    %874 = arith.mulf %865, %865 : vector<16x32xf32>
    %cst_546 = arith.constant dense<0.000000e+00> : vector<16xf32>
    %875 = vector.multi_reduction <add>, %874, %cst_546 [1] : vector<16x32xf32> to vector<16xf32>
    %876 = vector.shape_cast %875 : vector<16xf32> to vector<16x1xf32>
    %cst_547 = arith.constant 3.200000e+01 : f32
    %877 = vector.broadcast %cst_547 : f32 to vector<16x1xf32>
    %878 = arith.divf %876, %877 : vector<16x1xf32>
    %879 = arith.mulf %873, %873 : vector<16x1xf32>
    %880 = arith.subf %878, %879 : vector<16x1xf32>
    %881 = vector.broadcast %873 : vector<16x1xf32> to vector<16x32xf32>
    %882 = arith.subf %865, %881 : vector<16x32xf32>
    %cst_548 = arith.constant 9.99999974E-6 : f32
    %883 = vector.broadcast %cst_548 : f32 to vector<16x1xf32>
    %884 = arith.addf %880, %883 : vector<16x1xf32>
    %885 = math.rsqrt %884 : vector<16x1xf32>
    %886 = vector.broadcast %885 : vector<16x1xf32> to vector<16x32xf32>
    %887 = arith.mulf %882, %886 : vector<16x32xf32>
    %888 = vector.broadcast %867 : vector<1x32xf32> to vector<16x32xf32>
    %889 = arith.mulf %887, %888 : vector<16x32xf32>
    %890 = vector.broadcast %869 : vector<1x32xf32> to vector<16x32xf32>
    %891 = arith.addf %889, %890 : vector<16x32xf32>
    %cst_549 = arith.constant 0.000000e+00 : f32
    %892 = vector.broadcast %cst_549 : f32 to vector<32x32xf32>
    %893 = arith.addf %892, %702 : vector<32x32xf32>
    %894 = arith.addf %893, %848 : vector<32x32xf32>
    %cst_550 = arith.constant 2.000000e+00 : f32
    %895 = vector.broadcast %cst_550 : f32 to vector<32x32xf32>
    %896 = arith.divf %894, %895 : vector<32x32xf32>
    %cst_551 = arith.constant 0.000000e+00 : f32
    %897 = vector.broadcast %cst_551 : f32 to vector<16x32xf32>
    %898 = arith.addf %897, %775 : vector<16x32xf32>
    %899 = arith.addf %898, %891 : vector<16x32xf32>
    %cst_552 = arith.constant 2.000000e+00 : f32
    %900 = vector.broadcast %cst_552 : f32 to vector<16x32xf32>
    %901 = arith.divf %899, %900 : vector<16x32xf32>
    %c10 = arith.constant 10 : index
    %c0_553 = arith.constant 0 : index
    %c0_554 = arith.constant 0 : index
    %902 = vector.load %arg8[%c10, %c0_553, %c0_554] : memref<12x32x128xf32, #tpu.memory_space<vmem>>, vector<1x32x128xf32>
    %903 = vector.shape_cast %902 : vector<1x32x128xf32> to vector<32x128xf32>
    %cst_555 = arith.constant dense<0.000000e+00> : vector<32x128xf32>
    %904 = tpu.matmul %896, %903, %cst_555 {dimension_numbers = #tpu.dot_dimension_numbers<[1], [0], [0], [1], [0, 0, 1, 1], [], []>} : vector<32x32xf32>, vector<32x128xf32>, vector<32x128xf32> -> vector<32x128xf32>
    %c10_556 = arith.constant 10 : index
    %c0_557 = arith.constant 0 : index
    %c0_558 = arith.constant 0 : index
    %905 = vector.load %arg9[%c10_556, %c0_557, %c0_558] : memref<12x1x128xf32, #tpu.memory_space<vmem>>, vector<1x1x128xf32>
    %906 = vector.shape_cast %905 : vector<1x1x128xf32> to vector<1x128xf32>
    %907 = vector.broadcast %906 : vector<1x128xf32> to vector<32x128xf32>
    %908 = arith.addf %904, %907 : vector<32x128xf32>
    %cst_559 = arith.constant 0.000000e+00 : f32
    %909 = vector.broadcast %cst_559 : f32 to vector<32x128xf32>
    %910 = arith.maximumf %908, %909 : vector<32x128xf32>
    %c10_560 = arith.constant 10 : index
    %c0_561 = arith.constant 0 : index
    %c0_562 = arith.constant 0 : index
    %911 = vector.load %arg10[%c10_560, %c0_561, %c0_562] : memref<12x128x32xf32, #tpu.memory_space<vmem>>, vector<1x128x32xf32>
    %912 = vector.shape_cast %911 : vector<1x128x32xf32> to vector<128x32xf32>
    %cst_563 = arith.constant dense<0.000000e+00> : vector<32x32xf32>
    %913 = tpu.matmul %910, %912, %cst_563 {dimension_numbers = #tpu.dot_dimension_numbers<[1], [0], [0], [1], [0, 0, 1, 1], [], []>} : vector<32x128xf32>, vector<128x32xf32>, vector<32x32xf32> -> vector<32x32xf32>
    %c10_564 = arith.constant 10 : index
    %c0_565 = arith.constant 0 : index
    %c0_566 = arith.constant 0 : index
    %914 = vector.load %arg11[%c10_564, %c0_565, %c0_566] : memref<12x1x32xf32, #tpu.memory_space<vmem>>, vector<1x1x32xf32>
    %915 = vector.shape_cast %914 : vector<1x1x32xf32> to vector<1x32xf32>
    %916 = vector.broadcast %915 : vector<1x32xf32> to vector<32x32xf32>
    %917 = arith.addf %913, %916 : vector<32x32xf32>
    %918 = arith.addf %896, %917 : vector<32x32xf32>
    %c10_567 = arith.constant 10 : index
    %c0_568 = arith.constant 0 : index
    %c0_569 = arith.constant 0 : index
    %919 = vector.load %arg12[%c10_567, %c0_568, %c0_569] : memref<12x1x32xf32, #tpu.memory_space<vmem>>, vector<1x1x32xf32>
    %920 = vector.shape_cast %919 : vector<1x1x32xf32> to vector<1x32xf32>
    %c10_570 = arith.constant 10 : index
    %c0_571 = arith.constant 0 : index
    %c0_572 = arith.constant 0 : index
    %921 = vector.load %arg13[%c10_570, %c0_571, %c0_572] : memref<12x1x32xf32, #tpu.memory_space<vmem>>, vector<1x1x32xf32>
    %922 = vector.shape_cast %921 : vector<1x1x32xf32> to vector<1x32xf32>
    %cst_573 = arith.constant dense<0.000000e+00> : vector<32xf32>
    %923 = vector.multi_reduction <add>, %918, %cst_573 [1] : vector<32x32xf32> to vector<32xf32>
    %924 = vector.shape_cast %923 : vector<32xf32> to vector<32x1xf32>
    %cst_574 = arith.constant 3.200000e+01 : f32
    %925 = vector.broadcast %cst_574 : f32 to vector<32x1xf32>
    %926 = arith.divf %924, %925 : vector<32x1xf32>
    %927 = arith.mulf %918, %918 : vector<32x32xf32>
    %cst_575 = arith.constant dense<0.000000e+00> : vector<32xf32>
    %928 = vector.multi_reduction <add>, %927, %cst_575 [1] : vector<32x32xf32> to vector<32xf32>
    %929 = vector.shape_cast %928 : vector<32xf32> to vector<32x1xf32>
    %cst_576 = arith.constant 3.200000e+01 : f32
    %930 = vector.broadcast %cst_576 : f32 to vector<32x1xf32>
    %931 = arith.divf %929, %930 : vector<32x1xf32>
    %932 = arith.mulf %926, %926 : vector<32x1xf32>
    %933 = arith.subf %931, %932 : vector<32x1xf32>
    %934 = vector.broadcast %926 : vector<32x1xf32> to vector<32x32xf32>
    %935 = arith.subf %918, %934 : vector<32x32xf32>
    %cst_577 = arith.constant 9.99999974E-6 : f32
    %936 = vector.broadcast %cst_577 : f32 to vector<32x1xf32>
    %937 = arith.addf %933, %936 : vector<32x1xf32>
    %938 = math.rsqrt %937 : vector<32x1xf32>
    %939 = vector.broadcast %938 : vector<32x1xf32> to vector<32x32xf32>
    %940 = arith.mulf %935, %939 : vector<32x32xf32>
    %941 = vector.broadcast %920 : vector<1x32xf32> to vector<32x32xf32>
    %942 = arith.mulf %940, %941 : vector<32x32xf32>
    %943 = vector.broadcast %922 : vector<1x32xf32> to vector<32x32xf32>
    %944 = arith.addf %942, %943 : vector<32x32xf32>
    %c0_578 = arith.constant 0 : index
    %c0_579 = arith.constant 0 : index
    %945 = vector.load %arg24[%c0_578, %c0_579] : memref<32x32xf32, #tpu.memory_space<vmem>>, vector<32x32xf32>
    tpu.vector_store %arg24[%c0_578, %c0_579], %944 {strides = array<i32>} : memref<32x32xf32, #tpu.memory_space<vmem>>, vector<32x32xf32>,
    %c11 = arith.constant 11 : index
    %c0_580 = arith.constant 0 : index
    %c0_581 = arith.constant 0 : index
    %946 = vector.load %arg8[%c11, %c0_580, %c0_581] : memref<12x32x128xf32, #tpu.memory_space<vmem>>, vector<1x32x128xf32>
    %947 = vector.shape_cast %946 : vector<1x32x128xf32> to vector<32x128xf32>
    %cst_582 = arith.constant dense<0.000000e+00> : vector<16x128xf32>
    %948 = tpu.matmul %901, %947, %cst_582 {dimension_numbers = #tpu.dot_dimension_numbers<[1], [0], [0], [1], [0, 0, 1, 1], [], []>} : vector<16x32xf32>, vector<32x128xf32>, vector<16x128xf32> -> vector<16x128xf32>
    %c11_583 = arith.constant 11 : index
    %c0_584 = arith.constant 0 : index
    %c0_585 = arith.constant 0 : index
    %949 = vector.load %arg9[%c11_583, %c0_584, %c0_585] : memref<12x1x128xf32, #tpu.memory_space<vmem>>, vector<1x1x128xf32>
    %950 = vector.shape_cast %949 : vector<1x1x128xf32> to vector<1x128xf32>
    %951 = vector.broadcast %950 : vector<1x128xf32> to vector<16x128xf32>
    %952 = arith.addf %948, %951 : vector<16x128xf32>
    %cst_586 = arith.constant 0.000000e+00 : f32
    %953 = vector.broadcast %cst_586 : f32 to vector<16x128xf32>
    %954 = arith.maximumf %952, %953 : vector<16x128xf32>
    %c11_587 = arith.constant 11 : index
    %c0_588 = arith.constant 0 : index
    %c0_589 = arith.constant 0 : index
    %955 = vector.load %arg10[%c11_587, %c0_588, %c0_589] : memref<12x128x32xf32, #tpu.memory_space<vmem>>, vector<1x128x32xf32>
    %956 = vector.shape_cast %955 : vector<1x128x32xf32> to vector<128x32xf32>
    %cst_590 = arith.constant dense<0.000000e+00> : vector<16x32xf32>
    %957 = tpu.matmul %954, %956, %cst_590 {dimension_numbers = #tpu.dot_dimension_numbers<[1], [0], [0], [1], [0, 0, 1, 1], [], []>} : vector<16x128xf32>, vector<128x32xf32>, vector<16x32xf32> -> vector<16x32xf32>
    %c11_591 = arith.constant 11 : index
    %c0_592 = arith.constant 0 : index
    %c0_593 = arith.constant 0 : index
    %958 = vector.load %arg11[%c11_591, %c0_592, %c0_593] : memref<12x1x32xf32, #tpu.memory_space<vmem>>, vector<1x1x32xf32>
    %959 = vector.shape_cast %958 : vector<1x1x32xf32> to vector<1x32xf32>
    %960 = vector.broadcast %959 : vector<1x32xf32> to vector<16x32xf32>
    %961 = arith.addf %957, %960 : vector<16x32xf32>
    %962 = arith.addf %901, %961 : vector<16x32xf32>
    %c11_594 = arith.constant 11 : index
    %c0_595 = arith.constant 0 : index
    %c0_596 = arith.constant 0 : index
    %963 = vector.load %arg12[%c11_594, %c0_595, %c0_596] : memref<12x1x32xf32, #tpu.memory_space<vmem>>, vector<1x1x32xf32>
    %964 = vector.shape_cast %963 : vector<1x1x32xf32> to vector<1x32xf32>
    %c11_597 = arith.constant 11 : index
    %c0_598 = arith.constant 0 : index
    %c0_599 = arith.constant 0 : index
    %965 = vector.load %arg13[%c11_597, %c0_598, %c0_599] : memref<12x1x32xf32, #tpu.memory_space<vmem>>, vector<1x1x32xf32>
    %966 = vector.shape_cast %965 : vector<1x1x32xf32> to vector<1x32xf32>
    %cst_600 = arith.constant dense<0.000000e+00> : vector<16xf32>
    %967 = vector.multi_reduction <add>, %962, %cst_600 [1] : vector<16x32xf32> to vector<16xf32>
    %968 = vector.shape_cast %967 : vector<16xf32> to vector<16x1xf32>
    %cst_601 = arith.constant 3.200000e+01 : f32
    %969 = vector.broadcast %cst_601 : f32 to vector<16x1xf32>
    %970 = arith.divf %968, %969 : vector<16x1xf32>
    %971 = arith.mulf %962, %962 : vector<16x32xf32>
    %cst_602 = arith.constant dense<0.000000e+00> : vector<16xf32>
    %972 = vector.multi_reduction <add>, %971, %cst_602 [1] : vector<16x32xf32> to vector<16xf32>
    %973 = vector.shape_cast %972 : vector<16xf32> to vector<16x1xf32>
    %cst_603 = arith.constant 3.200000e+01 : f32
    %974 = vector.broadcast %cst_603 : f32 to vector<16x1xf32>
    %975 = arith.divf %973, %974 : vector<16x1xf32>
    %976 = arith.mulf %970, %970 : vector<16x1xf32>
    %977 = arith.subf %975, %976 : vector<16x1xf32>
    %978 = vector.broadcast %970 : vector<16x1xf32> to vector<16x32xf32>
    %979 = arith.subf %962, %978 : vector<16x32xf32>
    %cst_604 = arith.constant 9.99999974E-6 : f32
    %980 = vector.broadcast %cst_604 : f32 to vector<16x1xf32>
    %981 = arith.addf %977, %980 : vector<16x1xf32>
    %982 = math.rsqrt %981 : vector<16x1xf32>
    %983 = vector.broadcast %982 : vector<16x1xf32> to vector<16x32xf32>
    %984 = arith.mulf %979, %983 : vector<16x32xf32>
    %985 = vector.broadcast %964 : vector<1x32xf32> to vector<16x32xf32>
    %986 = arith.mulf %984, %985 : vector<16x32xf32>
    %987 = vector.broadcast %966 : vector<1x32xf32> to vector<16x32xf32>
    %988 = arith.addf %986, %987 : vector<16x32xf32>
    %c0_605 = arith.constant 0 : index
    %c0_606 = arith.constant 0 : index
    %989 = vector.load %arg25[%c0_605, %c0_606] : memref<16x32xf32, #tpu.memory_space<vmem>>, vector<16x32xf32>
    tpu.vector_store %arg25[%c0_605, %c0_606], %988 {strides = array<i32>} : memref<16x32xf32, #tpu.memory_space<vmem>>, vector<16x32xf32>,
    return
  }
}

</mosaic_0001>

<bundles_post_ra>
// kernel: tile.39
= control target key start
LH: loop header
LB: loop body
LE: loop exit
PB: predicated region body
PF: predicated region fallthrough
CT: control target
= control target key end

     0   :  { %vm82_vm0 = vcmask 1047556   ;;  %vm84_vm1 = vcmask 261120   ;;  %s195_s9 = smov 96   ;;  %s196_s14 = smov 32   ;;  %vm103_vm2 = vcmask 1048320   ;;  %vm124_vm3 = vcmask 785920   ;;  %s289_s0 = inlined_call_operand.vmem [shape: f32[16,4,32], index: 0, kind: input, shape index: {}]   ;;  %s290_s1 = inlined_call_operand.vmem [shape: f32[16,128], index: 1, kind: output, shape index: {}]  }
   0x1   :  { %v180_v0 = vld [vmem:[%s289_s0 + $0x1c] sm:$0xf]  ;;  %v181_v1 = vld [vmem:[%s289_s0 + $0x18] sm:$0xf]  ;;  %v182_v2 = vld [vmem:[%s289_s0 + $0x14] sm:$0xf] }
   0x2   :  { %48 = vst [vmem:[#allocation0 + $0x38] sm:$0xf] %v180_v0  ;;  %53 = vst [vmem:[#allocation0 + $0x30] sm:$0xf] %v181_v1  ;;  %v183_v3 = vld [vmem:[%s289_s0 + $0x10] sm:$0xf] }
   0x3   :  { %58 = vst [vmem:[#allocation0 + $0x28] sm:$0xf] %v182_v2  ;;  %v184_v4 = vld [vmem:[%s289_s0 + $0xc] sm:$0xf]  ;;  %v185_v5 = vld [vmem:[%s289_s0 + $0x8] sm:$0xf] }
   0x4   :  { %63 = vst [vmem:[#allocation0 + $0x20] sm:$0xf] %v183_v3  ;;  %68 = vst [vmem:[#allocation0 + $0x18] sm:$0xf] %v184_v4  ;;  %v186_v6 = vld [vmem:[%s289_s0 + $0x4] sm:$0xf] }
   0x5   :  { %73 = vst [vmem:[#allocation0 + $0x10] sm:$0xf] %v185_v5  ;;  %v78_v7 = vld [vmem:[%s289_s0] sm:$0xf]  ;;  %77 = vst [vmem:[#allocation0 + $0x8] sm:$0xf] %v186_v6 }
   0x6   :  { %79 = vst [vmem:[#allocation0] sm:$0xf] %v78_v7  ;;  %v172_v8 = vld [vmem:[%s289_s0 + $0x3c] sm:$0xf]  ;;  %v173_v9 = vld [vmem:[%s289_s0 + $0x38] sm:$0xf] }
   0x7   :  { %8 = vst [vmem:[#allocation0 + $0x78] sm:$0xf] %v172_v8  ;;  %13 = vst [vmem:[#allocation0 + $0x70] sm:$0xf] %v173_v9  ;;  %v174_v10 = vld [vmem:[%s289_s0 + $0x34] sm:$0xf] }
   0x8   :  { %v175_v11 = vld [vmem:[%s289_s0 + $0x30] sm:$0xf]  ;;  %v176_v12 = vld [vmem:[%s289_s0 + $0x2c] sm:$0xf]  ;;  %18 = vst [vmem:[#allocation0 + $0x68] sm:$0xf] %v174_v10 }
   0x9   :  { %23 = vst [vmem:[#allocation0 + $0x60] sm:$0xf] %v175_v11  ;;  %28 = vst [vmem:[#allocation0 + $0x58] sm:$0xf] %v176_v12  ;;  %v177_v13 = vld [vmem:[%s289_s0 + $0x28] sm:$0xf] }
   0xa   :  { %v178_v14 = vld [vmem:[%s289_s0 + $0x24] sm:$0xf]  ;;  %v179_v15 = vld [vmem:[%s289_s0 + $0x20] sm:$0xf]  ;;  %33 = vst [vmem:[#allocation0 + $0x50] sm:$0xf] %v177_v13 }
   0xb   :  { %38 = vst [vmem:[#allocation0 + $0x48] sm:$0xf] %v178_v14  ;;  %43 = vst [vmem:[#allocation0 + $0x40] sm:$0xf] %v179_v15  ;;  %s194_s0 = smov 64   ;;  %vm145_vm4 = vcmask 523520  }
   0xc   :  { %v119_v16 = vld [vmem:[#allocation0 + $0x2] ss:$8 sm:$0xf0]   ;;  %v98_v17 = vld [vmem:[#allocation0 + $0x3] ss:$8 sm:$0xf0]  }
   0xd   :  { %v117_v18 = vld [vmem:[#allocation0 + $0x2] ss:$8 sm:$0xf]   ;;  %v96_v19 = vld [vmem:[#allocation0 + $0x3] ss:$8 sm:$0xf]  }
   0xe   :  { %v121_v20 = vsel %vm82_vm0, %v119_v16, %v117_v18  ;;  %v100_v21 = vsel %vm82_vm0, %v98_v17, %v96_v19  ;;  %v138_v24 = vld [vmem:[#allocation0 + $0x1] ss:$8 sm:$0xf]   ;;  %v80_v32 = vld [vmem:[#allocation0] ss:$8 sm:$0xf]  }
   0xf   :  { %122 = vrot.lane.b32.xlu1 %v121_v20, %s194_s0  ;;  %101 = vrot.lane.b32.xlu0 %v100_v21, %s195_s9  ;;  %v140_v25 = vld [vmem:[#allocation0 + $0x1] ss:$8 sm:$0xf0]   ;;  %v81_v33 = vld [vmem:[#allocation0] ss:$8 sm:$0xf0]  }
  0x10   :  { %v129_v22 = vld [vmem:[#allocation0 + $0x42] ss:$8 sm:$0xf0]   ;;  %v108_v23 = vld [vmem:[#allocation0 + $0x43] ss:$8 sm:$0xf0]   ;;  %v83_v34 = vsel %vm82_vm0, %v81_v33, %v80_v32  ;;  %v142_v38 = vsel %vm82_vm0, %v140_v25, %v138_v24 }
  0x11   :  { %v150_v31 = vld [vmem:[#allocation0 + $0x41] ss:$8 sm:$0xf0]   ;;  %v89_v36 = vld [vmem:[#allocation0 + $0x40] ss:$8 sm:$0xf0]  }
  0x12   :  { %v127_v26 = vld [vmem:[#allocation0 + $0x42] ss:$8 sm:$0xf]   ;;  %v106_v27 = vld [vmem:[#allocation0 + $0x43] ss:$8 sm:$0xf]  }
  0x13   :  { %v131_v28 = vsel %vm82_vm0, %v129_v22, %v127_v26  ;;  %v110_v29 = vsel %vm82_vm0, %v108_v23, %v106_v27  ;;  %v148_v30 = vld [vmem:[#allocation0 + $0x41] ss:$8 sm:$0xf]   ;;  %v87_v35 = vld [vmem:[#allocation0 + $0x40] ss:$8 sm:$0xf]  }
  0x14   :  { %132 = vrot.lane.b32.xlu1 %v131_v28, %s194_s0  ;;  %111 = vrot.lane.b32.xlu0 %v110_v29, %s195_s9  ;;  %v152_v37 = vsel %vm82_vm0, %v150_v31, %v148_v30  ;;  %85 = vst.msk [vmem:[%s290_s1] sm:$0xff] %vm84_vm1, %v83_v34   ;;  %v91_v39 = vsel %vm82_vm0, %v89_v36, %v87_v35 }
  0x15   :  { %187 = vst.msk [vmem:[%s290_s1 + $0x8] sm:$0xff] %vm84_vm1, %v91_v39  }
  0x18   :  { %153 = vrot.lane.b32.xlu1 %v152_v37, %s196_s14  ;;  %143 = vrot.lane.b32.xlu0 %v142_v38, %s196_s14 }
  0x81   :  { %v123_v40 = vpop.permute.xlu1 %122   ;;  %v102_v41 = vpop.permute.xlu0 %101  }
  0x82   :  { %104 = vst.msk [vmem:[%s290_s1] sm:$0xff] %vm103_vm2, %v102_v41  }
  0x83   :  { %125 = vst.msk [vmem:[%s290_s1] sm:$0xff] %vm124_vm3, %v123_v40  }
  0x86   :  { %v133_v42 = vpop.permute.xlu1 %132   ;;  %v112_v43 = vpop.permute.xlu0 %111  }
  0x87   :  { %188 = vst.msk [vmem:[%s290_s1 + $0x8] sm:$0xff] %vm103_vm2, %v112_v43  }
  0x88   :  { %189 = vst.msk [vmem:[%s290_s1 + $0x8] sm:$0xff] %vm124_vm3, %v133_v42  }
  0x8a   :  { %v154_v44 = vpop.permute.xlu1 %153   ;;  %v144_v45 = vpop.permute.xlu0 %143  }
  0x8b   :  { %190 = vst.msk [vmem:[%s290_s1 + $0x8] sm:$0xff] %vm145_vm4, %v154_v44   ;;  %146 = vst.msk [vmem:[%s290_s1] sm:$0xff] %vm145_vm4, %v144_v45  }

// kernel: tile.34
= control target key start
LH: loop header
LB: loop body
LE: loop exit
PB: predicated region body
PF: predicated region fallthrough
CT: control target
= control target key end

     0   :  { %vm82_vm0 = vcmask 1047556   ;;  %vm84_vm1 = vcmask 130048   ;;  %s195_s9 = smov 48   ;;  %s196_s14 = smov 16   ;;  %vm103_vm2 = vcmask 523648   ;;  %vm124_vm3 = vcmask 392448   ;;  %s289_s0 = inlined_call_operand.vmem [shape: f32[16,4,16], index: 0, kind: input, shape index: {}]   ;;  %s290_s1 = inlined_call_operand.vmem [shape: f32[16,64], index: 1, kind: output, shape index: {}]  }
   0x1   :  { %v180_v0 = vld [vmem:[%s289_s0 + $0x1c] sm:$0xf]  ;;  %v181_v1 = vld [vmem:[%s289_s0 + $0x18] sm:$0xf]  ;;  %v182_v2 = vld [vmem:[%s289_s0 + $0x14] sm:$0xf] }
   0x2   :  { %48 = vst [vmem:[#allocation0 + $0x38] sm:$0xf] %v180_v0  ;;  %53 = vst [vmem:[#allocation0 + $0x30] sm:$0xf] %v181_v1  ;;  %v183_v3 = vld [vmem:[%s289_s0 + $0x10] sm:$0xf] }
   0x3   :  { %58 = vst [vmem:[#allocation0 + $0x28] sm:$0xf] %v182_v2  ;;  %v184_v4 = vld [vmem:[%s289_s0 + $0xc] sm:$0xf]  ;;  %v185_v5 = vld [vmem:[%s289_s0 + $0x8] sm:$0xf] }
   0x4   :  { %63 = vst [vmem:[#allocation0 + $0x20] sm:$0xf] %v183_v3  ;;  %68 = vst [vmem:[#allocation0 + $0x18] sm:$0xf] %v184_v4  ;;  %v186_v6 = vld [vmem:[%s289_s0 + $0x4] sm:$0xf] }
   0x5   :  { %73 = vst [vmem:[#allocation0 + $0x10] sm:$0xf] %v185_v5  ;;  %v78_v7 = vld [vmem:[%s289_s0] sm:$0xf]  ;;  %77 = vst [vmem:[#allocation0 + $0x8] sm:$0xf] %v186_v6 }
   0x6   :  { %79 = vst [vmem:[#allocation0] sm:$0xf] %v78_v7  ;;  %v172_v8 = vld [vmem:[%s289_s0 + $0x3c] sm:$0xf]  ;;  %v173_v9 = vld [vmem:[%s289_s0 + $0x38] sm:$0xf] }
   0x7   :  { %8 = vst [vmem:[#allocation0 + $0x78] sm:$0xf] %v172_v8  ;;  %13 = vst [vmem:[#allocation0 + $0x70] sm:$0xf] %v173_v9  ;;  %v174_v10 = vld [vmem:[%s289_s0 + $0x34] sm:$0xf] }
   0x8   :  { %v175_v11 = vld [vmem:[%s289_s0 + $0x30] sm:$0xf]  ;;  %v176_v12 = vld [vmem:[%s289_s0 + $0x2c] sm:$0xf]  ;;  %18 = vst [vmem:[#allocation0 + $0x68] sm:$0xf] %v174_v10 }
   0x9   :  { %23 = vst [vmem:[#allocation0 + $0x60] sm:$0xf] %v175_v11  ;;  %28 = vst [vmem:[#allocation0 + $0x58] sm:$0xf] %v176_v12  ;;  %v177_v13 = vld [vmem:[%s289_s0 + $0x28] sm:$0xf] }
   0xa   :  { %v178_v14 = vld [vmem:[%s289_s0 + $0x24] sm:$0xf]  ;;  %v179_v15 = vld [vmem:[%s289_s0 + $0x20] sm:$0xf]  ;;  %33 = vst [vmem:[#allocation0 + $0x50] sm:$0xf] %v177_v13 }
   0xb   :  { %38 = vst [vmem:[#allocation0 + $0x48] sm:$0xf] %v178_v14  ;;  %43 = vst [vmem:[#allocation0 + $0x40] sm:$0xf] %v179_v15  ;;  %s194_s0 = smov 32   ;;  %vm145_vm4 = vcmask 261248  }
   0xc   :  { %v119_v16 = vld [vmem:[#allocation0 + $0x2] ss:$8 sm:$0xf0]   ;;  %v98_v17 = vld [vmem:[#allocation0 + $0x3] ss:$8 sm:$0xf0]  }
   0xd   :  { %v117_v18 = vld [vmem:[#allocation0 + $0x2] ss:$8 sm:$0xf]   ;;  %v96_v19 = vld [vmem:[#allocation0 + $0x3] ss:$8 sm:$0xf]  }
   0xe   :  { %v121_v20 = vsel %vm82_vm0, %v119_v16, %v117_v18  ;;  %v100_v21 = vsel %vm82_vm0, %v98_v17, %v96_v19  ;;  %v138_v24 = vld [vmem:[#allocation0 + $0x1] ss:$8 sm:$0xf]   ;;  %v80_v32 = vld [vmem:[#allocation0] ss:$8 sm:$0xf]  }
   0xf   :  { %122 = vrot.lane.b32.xlu1 %v121_v20, %s194_s0  ;;  %101 = vrot.lane.b32.xlu0 %v100_v21, %s195_s9  ;;  %v140_v25 = vld [vmem:[#allocation0 + $0x1] ss:$8 sm:$0xf0]   ;;  %v81_v33 = vld [vmem:[#allocation0] ss:$8 sm:$0xf0]  }
  0x10   :  { %v129_v22 = vld [vmem:[#allocation0 + $0x42] ss:$8 sm:$0xf0]   ;;  %v108_v23 = vld [vmem:[#allocation0 + $0x43] ss:$8 sm:$0xf0]   ;;  %v83_v34 = vsel %vm82_vm0, %v81_v33, %v80_v32  ;;  %v142_v38 = vsel %vm82_vm0, %v140_v25, %v138_v24 }
  0x11   :  { %v150_v31 = vld [vmem:[#allocation0 + $0x41] ss:$8 sm:$0xf0]   ;;  %v89_v36 = vld [vmem:[#allocation0 + $0x40] ss:$8 sm:$0xf0]  }
  0x12   :  { %v127_v26 = vld [vmem:[#allocation0 + $0x42] ss:$8 sm:$0xf]   ;;  %v106_v27 = vld [vmem:[#allocation0 + $0x43] ss:$8 sm:$0xf]  }
  0x13   :  { %v131_v28 = vsel %vm82_vm0, %v129_v22, %v127_v26  ;;  %v110_v29 = vsel %vm82_vm0, %v108_v23, %v106_v27  ;;  %v148_v30 = vld [vmem:[#allocation0 + $0x41] ss:$8 sm:$0xf]   ;;  %v87_v35 = vld [vmem:[#allocation0 + $0x40] ss:$8 sm:$0xf]  }
  0x14   :  { %132 = vrot.lane.b32.xlu1 %v131_v28, %s194_s0  ;;  %111 = vrot.lane.b32.xlu0 %v110_v29, %s195_s9  ;;  %v152_v37 = vsel %vm82_vm0, %v150_v31, %v148_v30  ;;  %85 = vst.msk [vmem:[%s290_s1] sm:$0xff] %vm84_vm1, %v83_v34   ;;  %v91_v39 = vsel %vm82_vm0, %v89_v36, %v87_v35 }
  0x15   :  { %187 = vst.msk [vmem:[%s290_s1 + $0x8] sm:$0xff] %vm84_vm1, %v91_v39  }
  0x18   :  { %153 = vrot.lane.b32.xlu1 %v152_v37, %s196_s14  ;;  %143 = vrot.lane.b32.xlu0 %v142_v38, %s196_s14 }
  0x81   :  { %v123_v40 = vpop.permute.xlu1 %122   ;;  %v102_v41 = vpop.permute.xlu0 %101  }
  0x82   :  { %104 = vst.msk [vmem:[%s290_s1] sm:$0xff] %vm103_vm2, %v102_v41  }
  0x83   :  { %125 = vst.msk [vmem:[%s290_s1] sm:$0xff] %vm124_vm3, %v123_v40  }
  0x86   :  { %v133_v42 = vpop.permute.xlu1 %132   ;;  %v112_v43 = vpop.permute.xlu0 %111  }
  0x87   :  { %188 = vst.msk [vmem:[%s290_s1 + $0x8] sm:$0xff] %vm103_vm2, %v112_v43  }
  0x88   :  { %189 = vst.msk [vmem:[%s290_s1 + $0x8] sm:$0xff] %vm124_vm3, %v133_v42  }
  0x8a   :  { %v154_v44 = vpop.permute.xlu1 %153   ;;  %v144_v45 = vpop.permute.xlu0 %143  }
  0x8b   :  { %190 = vst.msk [vmem:[%s290_s1 + $0x8] sm:$0xff] %vm145_vm4, %v154_v44   ;;  %146 = vst.msk [vmem:[%s290_s1] sm:$0xff] %vm145_vm4, %v144_v45  }

// kernel: tile.24
= control target key start
LH: loop header
LB: loop body
LE: loop exit
PB: predicated region body
PF: predicated region fallthrough
CT: control target
= control target key end

     0   :  { %vm162_vm0 = vcmask 1047556   ;;  %s398_s10 = smov 96   ;;  %vm164_vm1 = vcmask 261120   ;;  %s400_s21 = smov 32   ;;  %vm201_vm2 = vcmask 1048320   ;;  %vm244_vm3 = vcmask 785920   ;;  %s579_s0 = inlined_call_operand.vmem [shape: f32[32,4,32], index: 0, kind: input, shape index: {}]   ;;  %s580_s1 = inlined_call_operand.vmem [shape: f32[32,128], index: 1, kind: output, shape index: {}]  }
   0x1   :  { %v376_v0 = vld [vmem:[%s579_s0 + $0x1c] sm:$0xf]  ;;  %v377_v1 = vld [vmem:[%s579_s0 + $0x18] sm:$0xf]  ;;  %v378_v2 = vld [vmem:[%s579_s0 + $0x14] sm:$0xf] }
   0x2   :  { %128 = vst [vmem:[#allocation0 + $0x38] sm:$0xf] %v376_v0  ;;  %133 = vst [vmem:[#allocation0 + $0x30] sm:$0xf] %v377_v1  ;;  %v379_v3 = vld [vmem:[%s579_s0 + $0x10] sm:$0xf] }
   0x3   :  { %138 = vst [vmem:[#allocation0 + $0x28] sm:$0xf] %v378_v2  ;;  %v380_v4 = vld [vmem:[%s579_s0 + $0xc] sm:$0xf]  ;;  %v381_v5 = vld [vmem:[%s579_s0 + $0x8] sm:$0xf] }
   0x4   :  { %143 = vst [vmem:[#allocation0 + $0x20] sm:$0xf] %v379_v3  ;;  %148 = vst [vmem:[#allocation0 + $0x18] sm:$0xf] %v380_v4  ;;  %v382_v6 = vld [vmem:[%s579_s0 + $0x4] sm:$0xf] }
   0x5   :  { %153 = vst [vmem:[#allocation0 + $0x10] sm:$0xf] %v381_v5  ;;  %v158_v7 = vld [vmem:[%s579_s0] sm:$0xf]  ;;  %157 = vst [vmem:[#allocation0 + $0x8] sm:$0xf] %v382_v6 }
   0x6   :  { %159 = vst [vmem:[#allocation0] sm:$0xf] %v158_v7  ;;  %v360_v8 = vld [vmem:[%s579_s0 + $0x5c] sm:$0xf]  ;;  %v361_v9 = vld [vmem:[%s579_s0 + $0x58] sm:$0xf] }
   0x7   :  { %v362_v10 = vld [vmem:[%s579_s0 + $0x54] sm:$0xf]  ;;  %48 = vst [vmem:[#allocation0 + $0xb8] sm:$0xf] %v360_v8  ;;  %53 = vst [vmem:[#allocation0 + $0xb0] sm:$0xf] %v361_v9 }
   0x8   :  { %58 = vst [vmem:[#allocation0 + $0xa8] sm:$0xf] %v362_v10  ;;  %v363_v11 = vld [vmem:[%s579_s0 + $0x50] sm:$0xf]  ;;  %v364_v12 = vld [vmem:[%s579_s0 + $0x4c] sm:$0xf] }
   0x9   :  { %v365_v13 = vld [vmem:[%s579_s0 + $0x48] sm:$0xf]  ;;  %63 = vst [vmem:[#allocation0 + $0xa0] sm:$0xf] %v363_v11  ;;  %68 = vst [vmem:[#allocation0 + $0x98] sm:$0xf] %v364_v12 }
   0xa   :  { %73 = vst [vmem:[#allocation0 + $0x90] sm:$0xf] %v365_v13  ;;  %v366_v14 = vld [vmem:[%s579_s0 + $0x44] sm:$0xf]  ;;  %v367_v15 = vld [vmem:[%s579_s0 + $0x40] sm:$0xf] }
   0xb   :  { %v368_v16 = vld [vmem:[%s579_s0 + $0x3c] sm:$0xf]  ;;  %78 = vst [vmem:[#allocation0 + $0x88] sm:$0xf] %v366_v14  ;;  %83 = vst [vmem:[#allocation0 + $0x80] sm:$0xf] %v367_v15 }
   0xc   :  { %88 = vst [vmem:[#allocation0 + $0x78] sm:$0xf] %v368_v16  ;;  %v369_v17 = vld [vmem:[%s579_s0 + $0x38] sm:$0xf]  ;;  %v370_v18 = vld [vmem:[%s579_s0 + $0x34] sm:$0xf] }
   0xd   :  { %v371_v19 = vld [vmem:[%s579_s0 + $0x30] sm:$0xf]  ;;  %93 = vst [vmem:[#allocation0 + $0x70] sm:$0xf] %v369_v17  ;;  %98 = vst [vmem:[#allocation0 + $0x68] sm:$0xf] %v370_v18 }
   0xe   :  { %103 = vst [vmem:[#allocation0 + $0x60] sm:$0xf] %v371_v19  ;;  %v372_v20 = vld [vmem:[%s579_s0 + $0x2c] sm:$0xf]  ;;  %v373_v21 = vld [vmem:[%s579_s0 + $0x28] sm:$0xf] }
   0xf   :  { %v374_v22 = vld [vmem:[%s579_s0 + $0x24] sm:$0xf]  ;;  %108 = vst [vmem:[#allocation0 + $0x58] sm:$0xf] %v372_v20  ;;  %113 = vst [vmem:[#allocation0 + $0x50] sm:$0xf] %v373_v21 }
  0x10   :  { %118 = vst [vmem:[#allocation0 + $0x48] sm:$0xf] %v374_v22  ;;  %v375_v23 = vld [vmem:[%s579_s0 + $0x20] sm:$0xf]  ;;  %v352_v24 = vld [vmem:[%s579_s0 + $0x7c] sm:$0xf] }
  0x11   :  { %v353_v25 = vld [vmem:[%s579_s0 + $0x78] sm:$0xf]  ;;  %123 = vst [vmem:[#allocation0 + $0x40] sm:$0xf] %v375_v23  ;;  %8 = vst [vmem:[#allocation0 + $0xf8] sm:$0xf] %v352_v24 }
  0x12   :  { %v196_v26 = vld [vmem:[#allocation0 + $0x3] ss:$8 sm:$0xf0]   ;;  %13 = vst [vmem:[#allocation0 + $0xf0] sm:$0xf] %v353_v25  ;;  %vm287_vm4 = vcmask 523520  }
  0x13   :  { %v354_v27 = vld [vmem:[%s579_s0 + $0x74] sm:$0xf]  ;;  %v194_v28 = vld [vmem:[#allocation0 + $0x3] ss:$8 sm:$0xf]  }
  0x14   :  { %18 = vst [vmem:[#allocation0 + $0xe8] sm:$0xf] %v354_v27  ;;  %v355_v29 = vld [vmem:[%s579_s0 + $0x70] sm:$0xf]  ;;  %v198_v30 = vsel %vm162_vm0, %v196_v26, %v194_v28  ;;  %v356_v31 = vld [vmem:[%s579_s0 + $0x6c] sm:$0xf] }
  0x15   :  { %23 = vst [vmem:[#allocation0 + $0xe0] sm:$0xf] %v355_v29  ;;  %v357_v32 = vld [vmem:[%s579_s0 + $0x68] sm:$0xf]  ;;  %v358_v33 = vld [vmem:[%s579_s0 + $0x64] sm:$0xf]  ;;  %199 = vrot.lane.b32.xlu0 %v198_v30, %s398_s10 }
  0x16   :  { %v217_v34 = vld [vmem:[#allocation0 + $0x83] ss:$8 sm:$0xf0]   ;;  %28 = vst [vmem:[#allocation0 + $0xd8] sm:$0xf] %v356_v31 }
  0x17   :  { %33 = vst [vmem:[#allocation0 + $0xd0] sm:$0xf] %v357_v32  ;;  %38 = vst [vmem:[#allocation0 + $0xc8] sm:$0xf] %v358_v33  ;;  %v359_v35 = vld [vmem:[%s579_s0 + $0x60] sm:$0xf] }
  0x18   :  { %v215_v36 = vld [vmem:[#allocation0 + $0x83] ss:$8 sm:$0xf]   ;;  %43 = vst [vmem:[#allocation0 + $0xc0] sm:$0xf] %v359_v35  ;;  %s399_s0 = smov 64  }
  0x19   :  { %v219_v37 = vsel %vm162_vm0, %v217_v34, %v215_v36  ;;  %v206_v38 = vld [vmem:[#allocation0 + $0x43] ss:$8 sm:$0xf0]   ;;  %v237_v39 = vld [vmem:[#allocation0 + $0x2] ss:$8 sm:$0xf]  }
  0x1a   :  { %220 = vrot.lane.b32.xlu1 %v219_v37, %s398_s10  ;;  %v204_v40 = vld [vmem:[#allocation0 + $0x43] ss:$8 sm:$0xf]   ;;  %v239_v41 = vld [vmem:[#allocation0 + $0x2] ss:$8 sm:$0xf0]  }
  0x1b   :  { %v208_v42 = vsel %vm162_vm0, %v206_v38, %v204_v40  ;;  %v249_v44 = vld [vmem:[#allocation0 + $0x42] ss:$8 sm:$0xf0]   ;;  %v241_v45 = vsel %vm162_vm0, %v239_v41, %v237_v39  ;;  %v280_v52 = vld [vmem:[#allocation0 + $0x1] ss:$8 sm:$0xf]  }
  0x1c   :  { %209 = vrot.lane.b32.xlu0 %v208_v42, %s398_s10  ;;  %v228_v43 = vld [vmem:[#allocation0 + $0xc3] ss:$8 sm:$0xf0]   ;;  %v247_v46 = vld [vmem:[#allocation0 + $0x42] ss:$8 sm:$0xf]  }
  0x1d   :  { %v258_v47 = vld [vmem:[#allocation0 + $0x82] ss:$8 sm:$0xf]   ;;  %v251_v53 = vsel %vm162_vm0, %v249_v44, %v247_v46  ;;  %v282_v55 = vld [vmem:[#allocation0 + $0x1] ss:$8 sm:$0xf0]  }
  0x1e   :  { %v260_v49 = vld [vmem:[#allocation0 + $0x82] ss:$8 sm:$0xf0]   ;;  %v160_v56 = vld [vmem:[#allocation0] ss:$8 sm:$0xf]   ;;  %v284_v4 = vsel %vm162_vm0, %v282_v55, %v280_v52 }
  0x1f   :  { %v226_v48 = vld [vmem:[#allocation0 + $0xc3] ss:$8 sm:$0xf]   ;;  %v271_v51 = vld [vmem:[#allocation0 + $0xc2] ss:$8 sm:$0xf0]   ;;  %v262_v54 = vsel %vm162_vm0, %v260_v49, %v258_v47 }
  0x20   :  { %v230_v50 = vsel %vm162_vm0, %v228_v43, %v226_v48  ;;  %242 = vrot.lane.b32.xlu0 %v241_v45, %s399_s0  ;;  %v269_v57 = vld [vmem:[#allocation0 + $0xc2] ss:$8 sm:$0xf]   ;;  %v161_v58 = vld [vmem:[#allocation0] ss:$8 sm:$0xf0]  }
  0x21   :  { %231 = vrot.lane.b32.xlu1 %v230_v50, %s398_s10  ;;  %v163_v59 = vsel %vm162_vm0, %v161_v58, %v160_v56  ;;  %v176_v60 = vld [vmem:[#allocation0 + $0x80] ss:$8 sm:$0xf]   ;;  %v290_v62 = vld [vmem:[#allocation0 + $0x41] ss:$8 sm:$0xf]   ;;  %v273_v3 = vsel %vm162_vm0, %v271_v51, %v269_v57 }
  0x22   :  { %v178_v61 = vld [vmem:[#allocation0 + $0x80] ss:$8 sm:$0xf0]   ;;  %v292_v63 = vld [vmem:[#allocation0 + $0x41] ss:$8 sm:$0xf0]  }
  0x23   :  { %165 = vst.msk [vmem:[%s580_s1] sm:$0xff] %vm164_vm1, %v163_v59   ;;  %v180_v0 = vsel %vm162_vm0, %v178_v61, %v176_v60  ;;  %v167_v1 = vld [vmem:[#allocation0 + $0x40] ss:$8 sm:$0xf]   ;;  %v294_v11 = vsel %vm162_vm0, %v292_v63, %v290_v62 }
  0x24   :  { %263 = vrot.lane.b32.xlu0 %v262_v54, %s399_s0  ;;  %v169_v2 = vld [vmem:[#allocation0 + $0x40] ss:$8 sm:$0xf0]   ;;  %384 = vst.msk [vmem:[%s580_s1 + $0x10] sm:$0xff] %vm164_vm1, %v180_v0  }
  0x25   :  { %252 = vrot.lane.b32.xlu1 %v251_v53, %s399_s0  ;;  %v171_v5 = vsel %vm162_vm0, %v169_v2, %v167_v1  ;;  %v185_v6 = vld [vmem:[#allocation0 + $0xc0] ss:$8 sm:$0xf]   ;;  %v301_v8 = vld [vmem:[#allocation0 + $0x81] ss:$8 sm:$0xf]  }
  0x26   :  { %v187_v7 = vld [vmem:[#allocation0 + $0xc0] ss:$8 sm:$0xf0]   ;;  %v303_v9 = vld [vmem:[#allocation0 + $0x81] ss:$8 sm:$0xf0]  }
  0x27   :  { %383 = vst.msk [vmem:[%s580_s1 + $0x8] sm:$0xff] %vm164_vm1, %v171_v5   ;;  %v189_v10 = vsel %vm162_vm0, %v187_v7, %v185_v6  ;;  %v305_v12 = vsel %vm162_vm0, %v303_v9, %v301_v8  ;;  %v312_v13 = vld [vmem:[#allocation0 + $0xc1] ss:$8 sm:$0xf]  }
  0x28   :  { %385 = vst.msk [vmem:[%s580_s1 + $0x18] sm:$0xff] %vm164_vm1, %v189_v10   ;;  %285 = vrot.lane.b32.xlu0 %v284_v4, %s400_s21  ;;  %v314_v14 = vld [vmem:[#allocation0 + $0xc1] ss:$8 sm:$0xf0]  }
  0x29   :  { %274 = vrot.lane.b32.xlu1 %v273_v3, %s399_s0  ;;  %v316_v15 = vsel %vm162_vm0, %v314_v14, %v312_v13 }
  0x2c   :  { %306 = vrot.lane.b32.xlu0 %v305_v12, %s400_s21 }
  0x2d   :  { %295 = vrot.lane.b32.xlu1 %v294_v11, %s400_s21 }
  0x31   :  { %317 = vrot.lane.b32.xlu1 %v316_v15, %s400_s21 }
  0x87   :  { %v200_v16 = vpop.permute.xlu0 %199  }
  0x88   :  { %202 = vst.msk [vmem:[%s580_s1] sm:$0xff] %vm201_vm2, %v200_v16  }
  0x8c   :  { %v221_v17 = vpop.permute.xlu1 %220  }
  0x8d   :  { %387 = vst.msk [vmem:[%s580_s1 + $0x10] sm:$0xff] %vm201_vm2, %v221_v17  }
  0x8e   :  { %v210_v18 = vpop.permute.xlu0 %209  }
  0x8f   :  { %386 = vst.msk [vmem:[%s580_s1 + $0x8] sm:$0xff] %vm201_vm2, %v210_v18  }
  0x92   :  { %v243_v20 = vpop.permute.xlu0 %242  }
  0x93   :  { %v232_v19 = vpop.permute.xlu1 %231   ;;  %245 = vst.msk [vmem:[%s580_s1] sm:$0xff] %vm244_vm3, %v243_v20  }
  0x94   :  { %388 = vst.msk [vmem:[%s580_s1 + $0x18] sm:$0xff] %vm201_vm2, %v232_v19  }
  0x96   :  { %v264_v22 = vpop.permute.xlu0 %263  }
  0x97   :  { %v253_v21 = vpop.permute.xlu1 %252   ;;  %390 = vst.msk [vmem:[%s580_s1 + $0x10] sm:$0xff] %vm244_vm3, %v264_v22  }
  0x98   :  { %389 = vst.msk [vmem:[%s580_s1 + $0x8] sm:$0xff] %vm244_vm3, %v253_v21  }
  0x9a   :  { %v286_v24 = vpop.permute.xlu0 %285  }
  0x9b   :  { %v275_v23 = vpop.permute.xlu1 %274   ;;  %288 = vst.msk [vmem:[%s580_s1] sm:$0xff] %vm287_vm4, %v286_v24  }
  0x9c   :  { %391 = vst.msk [vmem:[%s580_s1 + $0x18] sm:$0xff] %vm244_vm3, %v275_v23  }
  0x9e   :  { %v307_v26 = vpop.permute.xlu0 %306  }
  0x9f   :  { %v296_v25 = vpop.permute.xlu1 %295   ;;  %393 = vst.msk [vmem:[%s580_s1 + $0x10] sm:$0xff] %vm287_vm4, %v307_v26  }
  0xa0   :  { %392 = vst.msk [vmem:[%s580_s1 + $0x8] sm:$0xff] %vm287_vm4, %v296_v25  }
  0xa3   :  { %v318_v27 = vpop.permute.xlu1 %317  }
  0xa4   :  { %394 = vst.msk [vmem:[%s580_s1 + $0x18] sm:$0xff] %vm287_vm4, %v318_v27  }

// kernel: backbone_forward.1
= control target key start
LH: loop header
LB: loop body
LE: loop exit
PB: predicated region body
PF: predicated region fallthrough
CT: control target
= control target key end

     0   :  { %s16869_s0 = inlined_call_operand.vmem [shape: f32[32,32], index: 0, kind: input, shape index: {}]   ;;  %s16870_s1 = inlined_call_operand.vmem [shape: f32[16,32], index: 1, kind: input, shape index: {}]   ;;  %s16871_s2 = inlined_call_operand.vmem [shape: f32[32,128], index: 2, kind: input, shape index: {}]   ;;  %s16872_s3 = inlined_call_operand.vmem [shape: f32[32,64], index: 3, kind: input, shape index: {}]   ;;  %s16873_s4 = inlined_call_operand.vmem [shape: f32[16,64], index: 4, kind: input, shape index: {}]   ;;  %s16874_s5 = inlined_call_operand.vmem [shape: f32[16,128], index: 5, kind: input, shape index: {}]   ;;  %s16875_s6 = inlined_call_operand.vmem [shape: f32[128,32], index: 6, kind: input, shape index: {}]   ;;  %s16876_s7 = inlined_call_operand.vmem [shape: f32[64,32], index: 7, kind: input, shape index: {}]   ;;  %s16877_s8 = inlined_call_operand.vmem [shape: f32[12,32,128], index: 8, kind: input, shape index: {}]   ;;  %s16878_s9 = inlined_call_operand.vmem [shape: f32[12,1,128], index: 9, kind: input, shape index: {}]   ;;  %s16879_s10 = inlined_call_operand.vmem [shape: f32[12,128,32], index: 10, kind: input, shape index: {}]   ;;  %s16880_s11 = inlined_call_operand.vmem [shape: f32[12,1,32], index: 11, kind: input, shape index: {}]   ;;  %s16881_s12 = inlined_call_operand.vmem [shape: f32[12,1,32], index: 12, kind: input, shape index: {}]   ;;  %s16882_s13 = inlined_call_operand.vmem [shape: f32[12,1,32], index: 13, kind: input, shape index: {}]   ;;  %s16883_s14 = inlined_call_operand.vmem [shape: f32[6,32,32], index: 14, kind: input, shape index: {}]   ;;  %s16884_s15 = inlined_call_operand.vmem [shape: f32[6,1,32], index: 15, kind: input, shape index: {}]   ;;  %s16885_s16 = inlined_call_operand.vmem [shape: f32[6,32,32], index: 16, kind: input, shape index: {}]   ;;  %s16886_s17 = inlined_call_operand.vmem [shape: f32[6,1,32], index: 17, kind: input, shape index: {}]   ;;  %s16887_s18 = inlined_call_operand.vmem [shape: f32[6,32,32], index: 18, kind: input, shape index: {}]   ;;  %s16888_s19 = inlined_call_operand.vmem [shape: f32[6,1,32], index: 19, kind: input, shape index: {}]   ;;  %s16889_s20 = inlined_call_operand.vmem [shape: f32[6,32,32], index: 20, kind: input, shape index: {}]   ;;  %s16890_s21 = inlined_call_operand.vmem [shape: f32[6,1,32], index: 21, kind: input, shape index: {}]   ;;  %s16891_s22 = inlined_call_operand.vmem [shape: f32[6,1,32], index: 22, kind: input, shape index: {}]   ;;  %s16892_s23 = inlined_call_operand.vmem [shape: f32[6,1,32], index: 23, kind: input, shape index: {}]   ;;  %s16893_s24 = inlined_call_operand.hbm [shape: f32[32,32], index: 24, kind: output, shape index: {0}]   ;;  %s16894_s25 = inlined_call_operand.hbm [shape: f32[16,32], index: 25, kind: output, shape index: {1}]  }
   0x1   :  { %16907 = sst [smem:[#allocation8_spill]] %s16869_s0 }
   0x2   :  { %16908 = sst [smem:[#allocation9_spill]] %s16870_s1 }
   0x3   :  { %16909 = sst [smem:[#allocation10_spill]] %s16871_s2 }
   0x4   :  { %16910 = sst [smem:[#allocation11_spill]] %s16872_s3 }
   0x5   :  { %16911 = sst [smem:[#allocation12_spill]] %s16873_s4 }
   0x6   :  { %16912 = sst [smem:[#allocation13_spill]] %s16875_s6 }
   0x7   :  { %16913 = sst [smem:[#allocation14_spill]] %s16876_s7 }
   0x8   :  { %16914 = sst [smem:[#allocation15_spill]] %s16877_s8 }
   0x9   :  { %16915 = sst [smem:[#allocation16_spill]] %s16878_s9 }
   0xa   :  { %16916 = sst [smem:[#allocation17_spill]] %s16893_s24 }
   0xb   :  { %16917 = sst [smem:[#allocation18_spill]] %s16894_s25 }
   0xc   :  { %31 = vsyncpa [#allocation3], 0  ;;  %s16918_s6 = sld [smem:[#allocation15_spill]]  ;;  %vm98_vm0 = vcmask 261120   ;;  %s16919_s28 = sld [smem:[#allocation8_spill]]  ;;  %v200_v7 = vld [vmem:[%s16879_s10] sm:$0xff] }
   0xd   :  { %v201_v8 = vld [vmem:[%s16879_s10 + $0x8] sm:$0xff]  ;;  %v202_v9 = vld [vmem:[%s16879_s10 + $0x10] sm:$0xff]  ;;  %v203_v10 = vld [vmem:[%s16879_s10 + $0x18] sm:$0xff] }
   0xe   :  { %v11933_v11 = vpack.c.bf16 %v201_v8, %v200_v7  ;;  %v11937_v12 = vpack.c.bf16 %v203_v10, %v202_v9  ;;  %v204_v13 = vld [vmem:[%s16879_s10 + $0x20] sm:$0xff]  ;;  %v205_v14 = vld [vmem:[%s16879_s10 + $0x28] sm:$0xff] }
  0x10   :  { %11934 = vmatprep.subr.bf16.mxu1 %v11933_v11 }
  0x11   :  { %11936 = vmatpush3.bf16.msra.mxu1 %v11933_v11 }
  0x12   :  { %v87_v0 = vld [vmem:[%s16918_s6] sm:$0xff]  ;;  %v88_v1 = vld [vmem:[%s16918_s6 + $0x8] sm:$0xff]  ;;  %v89_v2 = vld [vmem:[%s16918_s6 + $0x10] sm:$0xff] }
  0x13   :  { %v11925_v3 = vpack.c.bf16 %v88_v1, %v87_v0  ;;  %v90_v4 = vld [vmem:[%s16918_s6 + $0x18] sm:$0xff]  ;;  %v13478_v5 = vld [vmem:[%s16919_s28] sm:$0xff] }
  0x14   :  { %v11929_v6 = vpack.c.bf16 %v90_v4, %v89_v2  ;;  %10433 = vmatprep.mubr.msk.f32.mxu0 %vm98_vm0, %v13478_v5 }
  0x15   :  { %11926 = vmatprep.subr.bf16.mxu0 %v11925_v3 }
  0x16   :  { %11928 = vmatpush3.bf16.msra.mxu0 %v11925_v3 }
  0x17   :  { %11930 = vmatprep.subr.bf16.mxu0 %v11929_v6 }
  0x18   :  { %32 = vsyncpa [#allocation5], 0  ;;  %v13503_v15 = vld [vmem:[%s16919_s28 + $0x8] sm:$0xff]  ;;  %11938 = vmatprep.subr.bf16.mxu1 %v11937_v12  ;;  %v11941_v16 = vpack.c.bf16 %v205_v14, %v204_v13  ;;  %v13508_v17 = vld [vmem:[%s16919_s28 + $0x10] sm:$0xff]  ;;  %s16920_s9 = sld [smem:[#allocation9_spill]]  ;;  %s16921_s30 = sld [smem:[#allocation16_spill]] }
  0x19   :  { %v206_v18 = vld [vmem:[%s16879_s10 + $0x30] sm:$0xff]  ;;  %v207_v19 = vld [vmem:[%s16879_s10 + $0x38] sm:$0xff]  ;;  %11940 = vmatpush3.bf16.msra.mxu1 %v11937_v12  ;;  %v208_v22 = vld [vmem:[%s16879_s10 + $0x40] sm:$0xff]  ;;  %s16922_s5 = sld [smem:[#allocation13_spill]]  ;;  %s16925_s7 = sld [smem:[#allocation10_spill]]  ;;  %vm2679_vm2 = vcmask 523264  }
  0x1a   :  { %11932 = vmatpush3.bf16.msra.mxu0 %v11929_v6  ;;  %v13523_v20 = vld [vmem:[%s16919_s28 + $0x18] sm:$0xff]  ;;  %11942 = vmatprep.subr.bf16.mxu1 %v11941_v16  ;;  %v11945_v21 = vpack.c.bf16 %v207_v19, %v206_v18  ;;  %v209_v23 = vld [vmem:[%s16879_s10 + $0x48] sm:$0xff]  ;;  %v210_v25 = vld [vmem:[%s16879_s10 + $0x50] sm:$0xff]  ;;  %s16926_s27 = sld [smem:[#allocation14_spill]]  ;;  %s16927_s29 = sld [smem:[#allocation12_spill]] }
  0x1b   :  { %v11949_v24 = vpack.c.bf16 %v209_v23, %v208_v22  ;;  %v211_v26 = vld [vmem:[%s16879_s10 + $0x58] sm:$0xff]  ;;  %v212_v28 = vld [vmem:[%s16879_s10 + $0x60] sm:$0xff]  ;;  %v213_v29 = vld [vmem:[%s16879_s10 + $0x68] sm:$0xff]  ;;  %s16928_s4 = sld [smem:[#allocation11_spill]] }
  0x1c   :  { %v11953_v27 = vpack.c.bf16 %v211_v26, %v210_v25  ;;  %v11957_v30 = vpack.c.bf16 %v213_v29, %v212_v28  ;;  %v214_v31 = vld [vmem:[%s16879_s10 + $0x70] sm:$0xff]  ;;  %v215_v32 = vld [vmem:[%s16879_s10 + $0x78] sm:$0xff]  ;;  %v8871_v34 = vld [vmem:[%s16918_s6 + $0x40] sm:$0xff] }
  0x1d   :  { %10434 = vmatmul.mubr.msk.f32.vlgmr.msra.gmra.mrb[0].mxu0 %vm98_vm0, %v13503_v15  ;;  %11944 = vmatpush3.bf16.msra.mxu1 %v11941_v16  ;;  %v11961_v33 = vpack.c.bf16 %v215_v32, %v214_v31  ;;  %v8872_v35 = vld [vmem:[%s16918_s6 + $0x48] sm:$0xff]  ;;  %v8841_v37 = vld [vmem:[%s16918_s6 + $0x20] sm:$0xff]  ;;  %v8843_v39 = vld [vmem:[%s16918_s6 + $0x30] sm:$0xff] }
  0x1e   :  { %10436 = vmatprep.mubr.msk.f32.mxu0 %vm98_vm0, %v13508_v17  ;;  %11946 = vmatprep.subr.bf16.mxu1 %v11945_v21  ;;  %v12005_v36 = vpack.c.bf16 %v8872_v35, %v8871_v34  ;;  %v8842_v38 = vld [vmem:[%s16918_s6 + $0x28] sm:$0xff]  ;;  %v8844_v41 = vld [vmem:[%s16918_s6 + $0x38] sm:$0xff]  ;;  %v13572_v42 = vld [vmem:[%s16920_s9] sm:$0xff] }
  0x1f   :  { %v11965_v40 = vpack.c.bf16 %v8842_v38, %v8841_v37  ;;  %v11969_v43 = vpack.c.bf16 %v8844_v41, %v8843_v39  ;;  %v13579_v44 = vld [vmem:[%s16920_s9 + $0x8] sm:$0xff]  ;;  %v8833_v45 = vld [vmem:[%s16921_s30] ss:$0 sm:$0xff]  ;;  %v8873_v50 = vld [vmem:[%s16918_s6 + $0x50] sm:$0xff] }
  0x20   :  { %v8874_v51 = vld [vmem:[%s16918_s6 + $0x58] sm:$0xff]  ;;  %v8881_v59 = vld [vmem:[%s16879_s10 + $0x100] sm:$0xff]  ;;  %v8882_v60 = vld [vmem:[%s16879_s10 + $0x108] sm:$0xff] }
  0x21   :  { %10437 = vmatmul.mubr.msk.f32.gmra.mrb[2].mxu0 %vm98_vm0, %v13523_v20  ;;  %11948 = vmatpush3.bf16.msra.mxu1 %v11945_v21  ;;  %v12009_v57 = vpack.c.bf16 %v8874_v51, %v8873_v50  ;;  %v12013_v63 = vpack.c.bf16 %v8882_v60, %v8881_v59  ;;  %v8883_v0 = vld [vmem:[%s16879_s10 + $0x110] sm:$0xff]  ;;  %v8884_v1 = vld [vmem:[%s16879_s10 + $0x118] sm:$0xff]  ;;  %v8885_v3 = vld [vmem:[%s16879_s10 + $0x120] sm:$0xff] }
  0x22   :  { %11950 = vmatprep.subr.bf16.mxu1 %v11949_v24  ;;  %10485 = vmatprep.mubr.msk.f32.mxu0 %vm98_vm0, %v13572_v42  ;;  %v12017_v2 = vpack.c.bf16 %v8884_v1, %v8883_v0  ;;  %v8886_v4 = vld [vmem:[%s16879_s10 + $0x128] sm:$0xff]  ;;  %v8887_v7 = vld [vmem:[%s16879_s10 + $0x130] sm:$0xff]  ;;  %v8888_v8 = vld [vmem:[%s16879_s10 + $0x138] sm:$0xff] }
  0x23   :  { %11966 = vmatprep.subr.bf16.mxu0 %v11965_v40  ;;  %v12021_v6 = vpack.c.bf16 %v8886_v4, %v8885_v3  ;;  %v12025_v9 = vpack.c.bf16 %v8888_v8, %v8887_v7  ;;  %v8889_v10 = vld [vmem:[%s16879_s10 + $0x140] sm:$0xff]  ;;  %v8890_v11 = vld [vmem:[%s16879_s10 + $0x148] sm:$0xff]  ;;  %v8891_v13 = vld [vmem:[%s16879_s10 + $0x150] sm:$0xff] }
  0x24   :  { %11968 = vmatpush3.bf16.msra.mxu0 %v11965_v40  ;;  %v12029_v12 = vpack.c.bf16 %v8890_v11, %v8889_v10  ;;  %v8892_v14 = vld [vmem:[%s16879_s10 + $0x158] sm:$0xff]  ;;  %v8893_v18 = vld [vmem:[%s16879_s10 + $0x160] sm:$0xff]  ;;  %v8894_v19 = vld [vmem:[%s16879_s10 + $0x168] sm:$0xff] }
  0x25   :  { %11952 = vmatpush3.bf16.msra.mxu1 %v11949_v24  ;;  %11970 = vmatprep.subr.bf16.mxu0 %v11969_v43  ;;  %v12033_v16 = vpack.c.bf16 %v8892_v14, %v8891_v13  ;;  %v12037_v21 = vpack.c.bf16 %v8894_v19, %v8893_v18  ;;  %v8895_v22 = vld [vmem:[%s16879_s10 + $0x170] sm:$0xff]  ;;  %v8896_v23 = vld [vmem:[%s16879_s10 + $0x178] sm:$0xff]  ;;  %v8849_v25 = vld [vmem:[%s16879_s10 + $0x80] sm:$0xff] }
  0x26   :  { %11954 = vmatprep.subr.bf16.mxu1 %v11953_v27  ;;  %v12041_v24 = vpack.c.bf16 %v8896_v23, %v8895_v22  ;;  %v8850_v26 = vld [vmem:[%s16879_s10 + $0x88] sm:$0xff]  ;;  %v8838_v28 = vld [vmem:[%s16880_s11] ss:$0 sm:$0xff]  ;;  %v8876_v39 = vld [vmem:[%s16921_s30 + $0x2] ss:$0 sm:$0xff] }
  0x27   :  { %v8852_v0 = vld [vmem:[%s16879_s10 + $0x98] sm:$0xff]  ;;  %v8853_v3 = vld [vmem:[%s16879_s10 + $0xa0] sm:$0xff]  ;;  %v8854_v4 = vld [vmem:[%s16879_s10 + $0xa8] sm:$0xff] }
  0x28   :  { %11972 = vmatpush3.bf16.msra.mxu0 %v11969_v43  ;;  %v8855_v7 = vld [vmem:[%s16879_s10 + $0xb0] sm:$0xff]  ;;  %v8856_v8 = vld [vmem:[%s16879_s10 + $0xb8] sm:$0xff]  ;;  %v8857_v10 = vld [vmem:[%s16879_s10 + $0xc0] sm:$0xff] }
  0x29   :  { %11956 = vmatpush3.bf16.msra.mxu1 %v11953_v27  ;;  %v11973_v27 = vpack.c.bf16 %v8850_v26, %v8849_v25  ;;  %v8858_v11 = vld [vmem:[%s16879_s10 + $0xc8] sm:$0xff]  ;;  %v8859_v13 = vld [vmem:[%s16879_s10 + $0xd0] sm:$0xff]  ;;  %v8860_v14 = vld [vmem:[%s16879_s10 + $0xd8] sm:$0xff] }
  0x2a   :  { %11958 = vmatprep.subr.bf16.mxu1 %v11957_v30  ;;  %v8861_v18 = vld [vmem:[%s16879_s10 + $0xe0] sm:$0xff]  ;;  %v8862_v19 = vld [vmem:[%s16879_s10 + $0xe8] sm:$0xff]  ;;  %v8863_v22 = vld [vmem:[%s16879_s10 + $0xf0] sm:$0xff] }
  0x2b   :  { %10486 = vmatmul.mubr.msk.f32.vlgmr.msra.gmra.mrb[4].mxu0 %vm98_vm0, %v13579_v44  ;;  %11974 = vmatprep.subr.bf16.mxu0 %v11973_v27  ;;  %v8864_v23 = vld [vmem:[%s16879_s10 + $0xf8] sm:$0xff]  ;;  %v8846_v26 = vld [vmem:[%s16921_s30 + $0x1] ss:$0 sm:$0xff]  ;;  %vm14198_vm1 = vmpackc.low %vm98_vm0, %vm98_vm0 }
  0x2c   :  { %11976 = vmatpush3.bf16.msra.mxu0 %v11973_v27  ;;  %v12001_v25 = vpack.c.bf16 %v8864_v23, %v8863_v22  ;;  %v8921_v22 = vld [vmem:[%s16879_s10 + $0x1d0] sm:$0xff]  ;;  %v8922_v23 = vld [vmem:[%s16879_s10 + $0x1d8] sm:$0xff] }
  0x2d   :  { %11960 = vmatpush3.bf16.msra.mxu1 %v11957_v30 }
  0x2e   :  { %11962 = vmatprep.subr.bf16.mxu1 %v11961_v33 }
  0x31   :  { %11964 = vmatpush3.bf16.msra.mxu1 %v11961_v33 }
  0x32   :  { %12006 = vmatprep.subr.bf16.mxu1 %v12005_v36 }
  0xf0   :  { %v10435_v46 = vpop.f32.mrb[0].mxu0 }
  0xf1   :  { %v183_v47 = vadd.f32 %v10435_v46, %v8833_v45  ;;  %v177_v48 = vpop.f32.mrb[1].mxu0 }
  0xf2   :  { %v178_v49 = vadd.f32 %v8833_v45, %v177_v48 }
  0xf3   :  { %v197_v54 = vmax.f32 %v183_v47, 0.0 }
  0xf4   :  { %v10438_v52 = vpop.f32.mrb[2].mxu0  ;;  %v196_v53 = vmax.f32 %v178_v49, 0.0 }
  0xf5   :  { %v193_v55 = vadd.f32 %v10438_v52, %v8833_v45  ;;  %v187_v56 = vpop.f32.mrb[3].mxu0 }
  0xf6   :  { %v188_v58 = vadd.f32 %v8833_v45, %v187_v56  ;;  %10471 = vmatprep.mubr.f32.mxu1 %v196_v53 }
  0xf7   :  { %10472 = vmatmul.mubr.f32.vlgmr.msra.gmra.mrb[0].mxu1 %v197_v54  ;;  %v199_v62 = vmax.f32 %v193_v55, 0.0 }
  0xf8   :  { %v198_v61 = vmax.f32 %v188_v58, 0.0  ;;  %12008 = vmatpush3.bf16.msra.mxu1 %v12005_v36 }
  0xf9   :  { %12010 = vmatprep.subr.bf16.mxu1 %v12009_v57 }
  0xfa   :  { %10474 = vmatprep.mubr.f32.mxu1 %v198_v61 }
  0xfb   :  { %10475 = vmatmul.mubr.f32.gmra.mrb[2].mxu1 %v199_v62 }
  0xfc   :  { %12012 = vmatpush3.bf16.msra.mxu1 %v12009_v57  ;;  %10531 = vmatprep.mubr.msk.f32.mxu1 %vm98_vm0, %v13478_v5 }
  0xfd   :  { %12014 = vmatprep.subr.bf16.mxu1 %v12013_v63 }
  0xff   :  { %10532 = vmatmul.mubr.msk.f32.vlgmr.msra.gmra.mrb[4].mxu1 %vm98_vm0, %v13503_v15 }
 0x100   :  { %10534 = vmatprep.mubr.msk.f32.mxu1 %vm98_vm0, %v13508_v17  ;;  %12016 = vmatpush3.bf16.msra.mxu1 %v12013_v63  ;;  %v8851_v63 = vld [vmem:[%s16879_s10 + $0x90] sm:$0xff] }
 0x101   :  { %12018 = vmatprep.subr.bf16.mxu1 %v12017_v2  ;;  %v11977_v1 = vpack.c.bf16 %v8852_v0, %v8851_v63 }
 0x103   :  { %10535 = vmatmul.mubr.msk.f32.gmra.mrb[6].mxu1 %vm98_vm0, %v13523_v20  ;;  %11978 = vmatprep.subr.bf16.mxu0 %v11977_v1 }
 0x104   :  { %12020 = vmatpush3.bf16.msra.mxu1 %v12017_v2  ;;  %11980 = vmatpush3.bf16.msra.mxu0 %v11977_v1 }
 0x105   :  { %12022 = vmatprep.subr.bf16.mxu1 %v12021_v6 }
 0x108   :  { %12024 = vmatpush3.bf16.msra.mxu1 %v12021_v6  ;;  %v11981_v6 = vpack.c.bf16 %v8854_v4, %v8853_v3  ;;  %v8913_v3 = vld [vmem:[%s16879_s10 + $0x190] sm:$0xff] }
 0x109   :  { %12026 = vmatprep.subr.bf16.mxu1 %v12025_v9 }
 0x10a   :  { %11982 = vmatprep.subr.bf16.mxu0 %v11981_v6 }
 0x10b   :  { %11984 = vmatpush3.bf16.msra.mxu0 %v11981_v6 }
 0x10c   :  { %12028 = vmatpush3.bf16.msra.mxu1 %v12025_v9  ;;  %v11985_v9 = vpack.c.bf16 %v8856_v8, %v8855_v7  ;;  %v8915_v7 = vld [vmem:[%s16879_s10 + $0x1a0] sm:$0xff]  ;;  %v8916_v8 = vld [vmem:[%s16879_s10 + $0x1a8] sm:$0xff] }
 0x10d   :  { %12030 = vmatprep.subr.bf16.mxu1 %v12029_v12 }
 0x10e   :  { %11986 = vmatprep.subr.bf16.mxu0 %v11985_v9 }
 0x10f   :  { %11988 = vmatpush3.bf16.msra.mxu0 %v11985_v9  ;;  %v12061_v9 = vpack.c.bf16 %v8916_v8, %v8915_v7 }
 0x110   :  { %12032 = vmatpush3.bf16.msra.mxu1 %v12029_v12  ;;  %v11989_v12 = vpack.c.bf16 %v8858_v11, %v8857_v10 }
 0x111   :  { %12034 = vmatprep.subr.bf16.mxu1 %v12033_v16 }
 0x112   :  { %11990 = vmatprep.subr.bf16.mxu0 %v11989_v12 }
 0x113   :  { %11992 = vmatpush3.bf16.msra.mxu0 %v11989_v12  ;;  %v8917_v12 = vld [vmem:[%s16879_s10 + $0x1b0] sm:$0xff] }
 0x114   :  { %12036 = vmatpush3.bf16.msra.mxu1 %v12033_v16  ;;  %v11993_v16 = vpack.c.bf16 %v8860_v14, %v8859_v13  ;;  %v8918_v13 = vld [vmem:[%s16879_s10 + $0x1b8] sm:$0xff] }
 0x115   :  { %12038 = vmatprep.subr.bf16.mxu1 %v12037_v21  ;;  %v12065_v14 = vpack.c.bf16 %v8918_v13, %v8917_v12 }
 0x116   :  { %11994 = vmatprep.subr.bf16.mxu0 %v11993_v16 }
 0x117   :  { %11996 = vmatpush3.bf16.msra.mxu0 %v11993_v16 }
 0x118   :  { %12040 = vmatpush3.bf16.msra.mxu1 %v12037_v21  ;;  %v11997_v21 = vpack.c.bf16 %v8862_v19, %v8861_v18  ;;  %v8919_v18 = vld [vmem:[%s16879_s10 + $0x1c0] sm:$0xff]  ;;  %v8920_v19 = vld [vmem:[%s16879_s10 + $0x1c8] sm:$0xff] }
 0x119   :  { %12042 = vmatprep.subr.bf16.mxu1 %v12041_v24 }
 0x11a   :  { %11998 = vmatprep.subr.bf16.mxu0 %v11997_v21 }
 0x11b   :  { %12000 = vmatpush3.bf16.msra.mxu0 %v11997_v21  ;;  %v12069_v21 = vpack.c.bf16 %v8920_v19, %v8919_v18 }
 0x11c   :  { %12044 = vmatpush3.bf16.msra.mxu1 %v12041_v24  ;;  %v10487_v24 = vpop.f32.mrb[4].mxu0  ;;  %12002 = vmatprep.subr.bf16.mxu0 %v12001_v25 }
 0x11d   :  { %v480_v27 = vpop.f32.mrb[5].mxu0 }
 0x11f   :  { %12004 = vmatpush3.bf16.msra.mxu0 %v12001_v25  ;;  %v8923_v25 = vld [vmem:[%s16879_s10 + $0x1e0] sm:$0xff] }
 0x1ca   :  { %v10473_v29 = vpop.f32.mrb[0].mxu1 }
 0x1cb   :  { %v295_v30 = vadd.f32 %v10473_v29, %v8838_v28  ;;  %v289_v31 = vpop.f32.mrb[1].mxu1  ;;  %v486_v29 = vadd.f32 %v10487_v24, %v8846_v26  ;;  %v12073_v24 = vpack.c.bf16 %v8922_v23, %v8921_v22 }
 0x1cc   :  { %v290_v32 = vadd.f32 %v8838_v28, %v289_v31  ;;  %v8904_v31 = vld [vmem:[%s16918_s6 + $0x68] sm:$0xff] }
 0x1cd   :  { %v13658_v33 = vadd.f32 %v295_v30, %v13503_v15  ;;  %v8903_v30 = vld [vmem:[%s16918_s6 + $0x60] sm:$0xff] }
 0x1ce   :  { %v13661_v34 = vadd.f32 %v290_v32, %v13478_v5  ;;  %v10476_v35 = vpop.f32.mrb[2].mxu1 }
 0x1cf   :  { %v299_v36 = vpop.f32.mrb[3].mxu1  ;;  %v317_v37 = vsel %vm98_vm0, %v13658_v33, 0.0  ;;  %v332_v40 = vmul.f32 %v13658_v33, %v13658_v33  ;;  %v305_v46 = vadd.f32 %v10476_v35, %v8838_v28  ;;  %v12045_v35 = vpack.c.bf16 %v8904_v31, %v8903_v30  ;;  %v8925_v30 = vld [vmem:[%s16879_s10 + $0x1f0] sm:$0xff]  ;;  %v8926_v31 = vld [vmem:[%s16879_s10 + $0x1f8] sm:$0xff] }
 0x1d0   :  { %318 = vadd.xlane.f32.xlu1 %v317_v37  ;;  %v314_v38 = vsel %vm98_vm0, %v13661_v34, 0.0  ;;  %v331_v49 = vmul.f32 %v13661_v34, %v13661_v34  ;;  %v300_v56 = vadd.f32 %v8838_v28, %v299_v36  ;;  %v481_v28 = vadd.f32 %v8846_v26, %v480_v27  ;;  %v8905_v37 = vld [vmem:[%s16918_s6 + $0x70] sm:$0xff]  ;;  %v8924_v26 = vld [vmem:[%s16879_s10 + $0x1e8] sm:$0xff] }
 0x1d1   :  { %315 = vadd.xlane.f32.xlu0 %v314_v38  ;;  %v338_v48 = vsel %vm98_vm0, %v332_v40, 0.0  ;;  %v13676_v55 = vadd.f32 %v305_v46, %v13523_v20  ;;  %v490_v36 = vmax.f32 %v486_v29, 0.0  ;;  %12046 = vmatprep.subr.bf16.mxu0 %v12045_v35  ;;  %v8906_v38 = vld [vmem:[%s16918_s6 + $0x78] sm:$0xff]  ;;  %v8911_v40 = vld [vmem:[%s16879_s10 + $0x180] sm:$0xff]  ;;  %v12077_v27 = vpack.c.bf16 %v8924_v26, %v8923_v25 }
 0x1d2   :  { %v10533_v41 = vpop.f32.mrb[4].mxu1  ;;  %v335_v57 = vsel %vm98_vm0, %v331_v49, 0.0  ;;  %v13680_v61 = vadd.f32 %v300_v56, %v13508_v17  ;;  %v489_v32 = vmax.f32 %v481_v28, 0.0 }
 0x1d3   :  { %v728_v43 = vadd.f32 %v10533_v41, %v8876_v39  ;;  %v722_v45 = vpop.f32.mrb[5].mxu1  ;;  %v323_v62 = vsel %vm98_vm0, %v13676_v55, 0.0  ;;  %v8912_v41 = vld [vmem:[%s16879_s10 + $0x188] sm:$0xff] }
 0x1d4   :  { %v723_v47 = vadd.f32 %v8876_v39, %v722_v45  ;;  %v320_v2 = vsel %vm98_vm0, %v13680_v61, 0.0  ;;  %10520 = vmatprep.mubr.f32.mxu0 %v489_v32  ;;  %v333_v56 = vmul.f32 %v13680_v61, %v13680_v61  ;;  %v12081_v32 = vpack.c.bf16 %v8926_v31, %v8925_v30 }
 0x1d5   :  { %339 = vadd.xlane.f32.xlu0 %v338_v48  ;;  %v742_v52 = vmax.f32 %v728_v43, 0.0  ;;  %10521 = vmatmul.mubr.f32.vlgmr.msra.gmra.mrb[6].mxu0 %v490_v36  ;;  %v12053_v43 = vpack.c.bf16 %v8912_v41, %v8911_v40  ;;  %v8908_v36 = vld [vmem:[%s16921_s30 + $0x3] ss:$0 sm:$0xff]  ;;  %v1218_v41 = vld [vmem:[%s16883_s14 + $0x8] sm:$0xff] }
 0x1d6   :  { %v741_v50 = vmax.f32 %v723_v47, 0.0  ;;  %v10536_v51 = vpop.f32.mrb[6].mxu1  ;;  %12048 = vmatpush3.bf16.msra.mxu0 %v12045_v35  ;;  %10583 = vmatprep.mubr.msk.f32.mxu0 %vm98_vm0, %v13572_v42  ;;  %v8898_v42 = vld [vmem:[%s16880_s11 + $0x2] ss:$0 sm:$0xff] }
 0x1d7   :  { %v738_v53 = vadd.f32 %v10536_v51, %v8876_v39  ;;  %v732_v54 = vpop.f32.mrb[7].mxu1  ;;  %v1217_v40 = vld [vmem:[%s16883_s14] sm:$0xff] }
 0x1d8   :  { %10569 = vmatprep.mubr.f32.mxu1 %v741_v50  ;;  %v733_v58 = vadd.f32 %v8876_v39, %v732_v54  ;;  %v12049_v39 = vpack.c.bf16 %v8906_v38, %v8905_v37 }
 0x1d9   :  { %10570 = vmatmul.mubr.f32.vlgmr.msra.gmra.mrb[8].mxu1 %v742_v52  ;;  %336 = vadd.xlane.f32.xlu0 %v335_v57  ;;  %v744_v59 = vmax.f32 %v738_v53, 0.0 }
 0x1da   :  { %v743_v60 = vmax.f32 %v733_v58, 0.0  ;;  %12050 = vmatprep.subr.bf16.mxu0 %v12049_v39  ;;  %v341_v58 = vsel %vm98_vm0, %v333_v56, 0.0 }
 0x1db   :  { %12052 = vmatpush3.bf16.msra.mxu0 %v12049_v39 }
 0x1dc   :  { %10572 = vmatprep.mubr.f32.mxu1 %v743_v60  ;;  %12054 = vmatprep.subr.bf16.mxu0 %v12053_v43 }
 0x1dd   :  { %324 = vadd.xlane.f32.xlu0 %v323_v62  ;;  %10573 = vmatmul.mubr.f32.gmra.mrb[10].mxu1 %v744_v59  ;;  %v334_v59 = vmul.f32 %v13676_v55, %v13676_v55 }
 0x1de   :  { %10584 = vmatmul.mubr.msk.f32.vlgmr.msra.gmra.mrb[8].mxu0 %vm98_vm0, %v13579_v44 }
 0x1df   :  { %12056 = vmatpush3.bf16.msra.mxu0 %v12053_v43  ;;  %v344_v0 = vsel %vm98_vm0, %v334_v59, 0.0  ;;  %v1497_v43 = vld [vmem:[%s16887_s18] sm:$0xff]  ;;  %v13884_v59 = vld [vmem:[%s16922_s5 + $0x8] sm:$0xff] }
 0x1e1   :  { %321 = vadd.xlane.f32.xlu0 %v320_v2 }
 0x2a8   :  { %v13830_v28 = vpop.f32.mrb[6].mxu0 }
 0x2a9   :  { %v13832_v29 = vpop.f32.mrb[7].mxu0 }
 0x2ac   :  { %v10571_v45 = vpop.f32.mrb[8].mxu1 }
 0x2ad   :  { %v842_v46 = vadd.f32 %v10571_v45, %v8898_v42  ;;  %v836_v47 = vpop.f32.mrb[9].mxu1  ;;  %v1498_v45 = vld [vmem:[%s16887_s18 + $0x8] sm:$0xff] }
 0x2ae   :  { %v837_v48 = vadd.f32 %v8898_v42, %v836_v47 }
 0x2af   :  { %v13757_v44 = vadd.f32 %v842_v46, %v13503_v15 }
 0x2b0   :  { %v13760_v49 = vadd.f32 %v837_v48, %v13478_v5  ;;  %v10574_v50 = vpop.f32.mrb[10].mxu1  ;;  %v12101_v48 = vpack.c.bf16 %v1498_v45, %v1497_v43 }
 0x2b1   :  { %v866_v51 = vsel %vm98_vm0, %v13757_v44, 0.0  ;;  %v880_v52 = vmul.f32 %v13757_v44, %v13757_v44  ;;  %v846_v53 = vpop.f32.mrb[11].mxu1  ;;  %v852_v15 = vadd.f32 %v10574_v50, %v8898_v42  ;;  %v10585_v35 = vpop.f32.mrb[8].mxu0  ;;  %v1219_v50 = vld [vmem:[%s16883_s14 + $0x10] sm:$0xff] }
 0x2b2   :  { %867 = vadd.xlane.f32.xlu1 %v866_v51  ;;  %v863_v54 = vsel %vm98_vm0, %v13760_v49, 0.0  ;;  %v879_v57 = vmul.f32 %v13760_v49, %v13760_v49  ;;  %v847_v62 = vadd.f32 %v8898_v42, %v846_v53  ;;  %v1022_v37 = vpop.f32.mrb[9].mxu0  ;;  %v1028_v38 = vadd.f32 %v10585_v35, %v8908_v36  ;;  %v1220_v51 = vld [vmem:[%s16883_s14 + $0x18] sm:$0xff] }
 0x2b3   :  { %864 = vadd.xlane.f32.xlu0 %v863_v54  ;;  %v886_v5 = vsel %vm98_vm0, %v880_v52, 0.0  ;;  %v13777_v60 = vadd.f32 %v852_v15, %v13523_v20  ;;  %v8914_v20 = vld [vmem:[%s16879_s10 + $0x198] sm:$0xff]  ;;  %v1023_v39 = vadd.f32 %v8908_v36, %v1022_v37  ;;  %v12085_v42 = vpack.c.bf16 %v1218_v41, %v1217_v40  ;;  %v1499_v52 = vld [vmem:[%s16887_s18 + $0x10] sm:$0xff]  ;;  %v1325_v15 = vld [vmem:[%s16885_s16] sm:$0xff] }
 0x2b4   :  { %v883_v63 = vsel %vm98_vm0, %v879_v57, 0.0  ;;  %v13782_v1 = vadd.f32 %v847_v62, %v13508_v17  ;;  %v12057_v4 = vpack.c.bf16 %v8914_v20, %v8913_v3  ;;  %v1032_v46 = vmax.f32 %v1028_v38, 0.0  ;;  %v1500_v54 = vld [vmem:[%s16887_s18 + $0x18] sm:$0xff]  ;;  %v319_v3 = vpop.xlane.xlu1 %318 }
 0x2b5   :  { %v872_v2 = vsel %vm98_vm0, %v13777_v60, 0.0  ;;  %v882_v11 = vmul.f32 %v13777_v60, %v13777_v60  ;;  %v1031_v47 = vmax.f32 %v1023_v39, 0.0  ;;  %12086 = vmatprep.subr.bf16.mxu1 %v12085_v42  ;;  %v12089_v53 = vpack.c.bf16 %v1220_v51, %v1219_v50 }
 0x2b6   :  { %887 = vadd.xlane.f32.xlu1 %v886_v5  ;;  %12058 = vmatprep.subr.bf16.mxu0 %v12057_v4  ;;  %v869_v6 = vsel %vm98_vm0, %v13782_v1, 0.0  ;;  %v881_v17 = vmul.f32 %v13782_v1, %v13782_v1  ;;  %v12105_v56 = vpack.c.bf16 %v1500_v54, %v1499_v52  ;;  %v1326_v5 = vld [vmem:[%s16885_s16 + $0x8] sm:$0xff] }
 0x2b7   :  { %342 = vadd.xlane.f32.xlu0 %v341_v58  ;;  %12060 = vmatpush3.bf16.msra.mxu0 %v12057_v4  ;;  %v892_v16 = vsel %vm98_vm0, %v882_v11, 0.0  ;;  %v13873_v57 = vpack.c.bf16 %v1326_v5, %v1325_v15  ;;  %v13879_v58 = vld [vmem:[%s16922_s5] sm:$0xff]  ;;  %v328_v4 = vmul.f32 0.03125, %v319_v3 }
 0x2b8   :  { %12062 = vmatprep.subr.bf16.mxu0 %v12061_v9  ;;  %v889_v10 = vsel %vm98_vm0, %v881_v17, 0.0  ;;  %10618 = vmatprep.mubr.f32.mxu0 %v1031_v47  ;;  %v13888_v62 = vpack.c.bf16 %v13884_v59, %v13879_v58  ;;  %v13906_v15 = vld [vmem:[%s16881_s12] ss:$0 sm:$0xff]  ;;  %v13912_v3 = vld [vmem:[%s16881_s12 + $0x2] ss:$0 sm:$0xff] }
 0x2b9   :  { %12088 = vmatpush3.bf16.msra.mxu1 %v12085_v42  ;;  %v352_v7 = vmul.f32 %v328_v4, %v328_v4 }
 0x2ba   :  { %884 = vadd.xlane.f32.xlu1 %v883_v63  ;;  %12090 = vmatprep.subr.bf16.mxu1 %v12089_v53  ;;  %v316_v63 = vpop.xlane.xlu0 %315 }
 0x2bb   :  { %345 = vadd.xlane.f32.xlu0 %v344_v0  ;;  %12064 = vmatpush3.bf16.msra.mxu0 %v12061_v9 }
 0x2bc   :  { %12066 = vmatprep.subr.bf16.mxu0 %v12065_v14 }
 0x2bd   :  { %12092 = vmatpush3.bf16.msra.mxu1 %v12089_v53  ;;  %v360_v53 = vsub.f32 %v13658_v33, %v328_v4 }
 0x2be   :  { %873 = vadd.xlane.f32.xlu1 %v872_v2  ;;  %12094 = vmatprep.subr.bf16.mxu1 %v13873_v57  ;;  %v340_v0 = vpop.xlane.xlu0 %339 }
 0x2bf   :  { %12068 = vmatpush3.bf16.msra.mxu0 %v12065_v14  ;;  %v348_v17 = vmul.f32 0.03125, %v340_v0 }
 0x2c0   :  { %12070 = vmatprep.subr.bf16.mxu0 %v12069_v21 }
 0x2c1   :  { %v356_v11 = vsub.f32 %v348_v17, %v352_v7 }
 0x2c2   :  { %870 = vadd.xlane.f32.xlu1 %v869_v6  ;;  %v337_v2 = vpop.xlane.xlu0 %336  ;;  %v327_v6 = vmul.f32 0.03125, %v316_v63 }
 0x2c3   :  { %12072 = vmatpush3.bf16.msra.mxu0 %v12069_v21  ;;  %v347_v8 = vmul.f32 0.03125, %v337_v2  ;;  %v364_v18 = vadd.f32 1e-05, %v356_v11 }
 0x2c4   :  { %12074 = vmatprep.subr.bf16.mxu0 %v12073_v24 }
 0x2c5   :  { %13049 = vrsqrt.f32 %v364_v18  ;;  %v8840_v18 = vld [vmem:[%s16882_s13] ss:$0 sm:$0xff] }
 0x2c6   :  { %890 = vadd.xlane.f32.xlu1 %v889_v10  ;;  %v325_v20 = vpop.xlane.xlu0 %324  ;;  %v351_v10 = vmul.f32 %v327_v6, %v327_v6 }
 0x2c7   :  { %12076 = vmatpush3.bf16.msra.mxu0 %v12073_v24  ;;  %v13895_v39 = vmul.f32 0.03125, %v325_v20 }
 0x2c8   :  { %12078 = vmatprep.subr.bf16.mxu0 %v12077_v27  ;;  %v355_v13 = vsub.f32 %v347_v8, %v351_v10 }
 0x2ca   :  { %893 = vadd.xlane.f32.xlu1 %v892_v16  ;;  %v322_v9 = vpop.xlane.xlu0 %321  ;;  %v363_v21 = vadd.f32 1e-05, %v355_v13 }
 0x2cb   :  { %12080 = vmatpush3.bf16.msra.mxu0 %v12077_v27  ;;  %v13891_v26 = vmul.f32 0.03125, %v322_v9  ;;  %v13923_v9 = vld [vmem:[%s16882_s13 + $0x2] ss:$0 sm:$0xff] }
 0x2cc   :  { %12082 = vmatprep.subr.bf16.mxu0 %v12081_v32  ;;  %13051 = vrsqrt.f32 %v363_v21 }
 0x2cd   :  { %v353_v37 = vmul.f32 %v13891_v26, %v13891_v26 }
 0x2cf   :  { %12084 = vmatpush3.bf16.msra.mxu0 %v12081_v32  ;;  %v13050_v50 = vpop.eup %13049 }
 0x2d0   :  { %12102 = vmatprep.subr.bf16.mxu0 %v12101_v48  ;;  %v372_v5 = vmul.f32 %v13050_v50, %v360_v53  ;;  %v13972_v50 = vld [vmem:[%s16922_s5 + $0x20] sm:$0xff] }
 0x2d2   :  { %10619 = vmatmul.mubr.f32.vlgmr.msra.gmra.mrb[10].mxu0 %v1032_v46  ;;  %v354_v46 = vmul.f32 %v13895_v39, %v13895_v39 }
 0x2d3   :  { %12104 = vmatpush3.bf16.msra.mxu0 %v12101_v48 }
 0x2d4   :  { %12106 = vmatprep.subr.bf16.mxu0 %v12105_v56 }
 0x2d6   :  { %v13052_v54 = vpop.eup %13051 }
 0x2d7   :  { %12108 = vmatpush3.bf16.msra.mxu0 %v12105_v56  ;;  %v359_v56 = vsub.f32 %v13661_v34, %v327_v6 }
 0x2d8   :  { %12158 = vmatprep.subr.bf16.mxu0 %v13888_v62 }
 0x2d9   :  { %v371_v6 = vmul.f32 %v13052_v54, %v359_v56 }
 0x33f   :  { %v868_v12 = vpop.xlane.xlu1 %867 }
 0x340   :  { %v876_v14 = vmul.f32 0.03125, %v868_v12  ;;  %v865_v16 = vpop.xlane.xlu0 %864 }
 0x341   :  { %v875_v23 = vmul.f32 0.03125, %v865_v16 }
 0x342   :  { %v900_v22 = vmul.f32 %v876_v14, %v876_v14  ;;  %v908_v63 = vsub.f32 %v13757_v44, %v876_v14  ;;  %v382_v44 = vmul.f32 %v13906_v15, %v372_v5  ;;  %v13997_v5 = vld [vmem:[%s16922_s5 + $0x30] sm:$0xff] }
 0x343   :  { %v888_v19 = vpop.xlane.xlu1 %887  ;;  %v899_v32 = vmul.f32 %v875_v23, %v875_v23  ;;  %v907_v8 = vsub.f32 %v13760_v49, %v875_v23  ;;  %v381_v49 = vmul.f32 %v13906_v15, %v371_v6  ;;  %v14016_v6 = vld [vmem:[%s16922_s5 + $0x40] sm:$0xff] }
 0x344   :  { %v896_v24 = vmul.f32 0.03125, %v888_v19  ;;  %v343_v25 = vpop.xlane.xlu0 %342 }
 0x345   :  { %v349_v30 = vmul.f32 0.03125, %v343_v25 }
 0x346   :  { %v904_v27 = vsub.f32 %v896_v24, %v900_v22  ;;  %v392_v24 = vadd.f32 %v8840_v18, %v382_v44 }
 0x347   :  { %v885_v31 = vpop.xlane.xlu1 %884  ;;  %v357_v41 = vsub.f32 %v349_v30, %v353_v37  ;;  %v391_v30 = vadd.f32 %v8840_v18, %v381_v49 }
 0x348   :  { %v912_v35 = vadd.f32 1e-05, %v904_v27  ;;  %v895_v36 = vmul.f32 0.03125, %v885_v31  ;;  %v346_v38 = vpop.xlane.xlu0 %345 }
 0x349   :  { %v350_v45 = vmul.f32 0.03125, %v346_v38  ;;  %v365_v47 = vadd.f32 1e-05, %v357_v41  ;;  %v1328_v38 = vld [vmem:[%s16885_s16 + $0x18] sm:$0xff] }
 0x34a   :  { %13053 = vrsqrt.f32 %v912_v35  ;;  %v903_v40 = vsub.f32 %v895_v36, %v899_v32  ;;  %v361_v32 = vsub.f32 %v13680_v61, %v13891_v26  ;;  %v1327_v36 = vld [vmem:[%s16885_s16 + $0x10] sm:$0xff]  ;;  %v13951_v61 = vld [vmem:[%s16922_s5 + $0x18] sm:$0xff] }
 0x34b   :  { %v874_v43 = vpop.xlane.xlu1 %873  ;;  %v358_v51 = vsub.f32 %v350_v45, %v354_v46  ;;  %v12097_v45 = vpack.c.bf16 %v1328_v38, %v1327_v36 }
 0x34c   :  { %v911_v42 = vadd.f32 1e-05, %v903_v40  ;;  %v13914_v20 = vmul.f32 0.03125, %v874_v43  ;;  %v13946_v40 = vld [vmem:[%s16922_s5 + $0x10] sm:$0xff] }
 0x34d   :  { %v366_v33 = vadd.f32 1e-05, %v358_v51  ;;  %v13959_v46 = vpack.c.bf16 %v13951_v61, %v13946_v40  ;;  %v13977_v51 = vld [vmem:[%s16922_s5 + $0x28] sm:$0xff] }
 0x34e   :  { %13055 = vrsqrt.f32 %v911_v42  ;;  %v902_v13 = vmul.f32 %v13914_v20, %v13914_v20  ;;  %v13989_v53 = vpack.c.bf16 %v13977_v51, %v13972_v50  ;;  %v910_v54 = vsub.f32 %v13777_v60, %v13914_v20 }
 0x34f   :  { %v871_v48 = vpop.xlane.xlu1 %870  ;;  %13057 = vrsqrt.f32 %v365_v47  ;;  %v362_v47 = vsub.f32 %v13676_v55, %v13895_v39 }
 0x350   :  { %v13899_v52 = vmul.f32 0.03125, %v871_v48  ;;  %13059 = vrsqrt.f32 %v366_v33 }
 0x352   :  { %v901_v34 = vmul.f32 %v13899_v52, %v13899_v52  ;;  %v909_v48 = vsub.f32 %v13782_v1, %v13899_v52 }
 0x353   :  { %v891_v0 = vpop.xlane.xlu1 %890 }
 0x354   :  { %v13054_v2 = vpop.eup %13053  ;;  %v897_v4 = vmul.f32 0.03125, %v891_v0 }
 0x355   :  { %v920_v17 = vmul.f32 %v13054_v2, %v908_v63 }
 0x356   :  { %v905_v7 = vsub.f32 %v897_v4, %v901_v34 }
 0x357   :  { %v930_v10 = vmul.f32 %v13912_v3, %v920_v17  ;;  %v894_v11 = vpop.xlane.xlu1 %893 }
 0x358   :  { %v13056_v12 = vpop.eup %13055  ;;  %v913_v14 = vadd.f32 1e-05, %v905_v7  ;;  %v898_v16 = vmul.f32 0.03125, %v894_v11 }
 0x359   :  { %v919_v19 = vmul.f32 %v13056_v12, %v907_v8  ;;  %v940_v21 = vadd.f32 %v13923_v9, %v930_v10  ;;  %v13058_v27 = vpop.eup %13057  ;;  %v14039_v10 = vld [vmem:[%s16922_s5 + $0x50] sm:$0xff] }
 0x35a   :  { %13061 = vrsqrt.f32 %v913_v14  ;;  %v906_v22 = vsub.f32 %v898_v16, %v902_v13  ;;  %v373_v26 = vmul.f32 %v13058_v27, %v361_v32  ;;  %v13060_v43 = vpop.eup %13059  ;;  %v14124_v16 = vld [vmem:[%s16922_s5 + $0x60] sm:$0xff] }
 0x35b   :  { %v929_v23 = vmul.f32 %v13912_v3, %v919_v19  ;;  %v1186_v35 = vadd.f32 %v940_v21, %v392_v24  ;;  %v374_v1 = vmul.f32 %v13060_v43, %v362_v47  ;;  %v14140_v19 = vld [vmem:[%s16922_s5 + $0x70] sm:$0xff]  ;;  %v14145_v21 = vld [vmem:[%s16922_s5 + $0x78] sm:$0xff]  ;;  %v14159_v24 = vld [vmem:[%s16888_s19] ss:$0 sm:$0xff] }
 0x35c   :  { %v914_v25 = vadd.f32 1e-05, %v906_v22  ;;  %v383_v39 = vmul.f32 %v13906_v15, %v373_v26  ;;  %v14149_v22 = vpack.c.bf16 %v14145_v21, %v14140_v19 }
 0x35d   :  { %v939_v31 = vadd.f32 %v13923_v9, %v929_v23  ;;  %v13955_v42 = vmul.f32 0.5, %v1186_v35  ;;  %v384_v2 = vmul.f32 %v13906_v15, %v374_v1  ;;  %v14021_v15 = vld [vmem:[%s16922_s5 + $0x48] sm:$0xff]  ;;  %v8933_v23 = vld [vmem:[%s16884_s15] ss:$0 sm:$0xff] }
 0x35e   :  { %13063 = vrsqrt.f32 %v914_v25  ;;  %v393_v0 = vadd.f32 %v8840_v18, %v383_v39 }
 0x35f   :  { %v1185_v37 = vadd.f32 %v939_v31, %v391_v30  ;;  %v394_v17 = vadd.f32 %v8840_v18, %v384_v2  ;;  %v14129_v18 = vld [vmem:[%s16922_s5 + $0x68] sm:$0xff] }
 0x360   :  { %v14133_v49 = vpack.c.bf16 %v14129_v18, %v14124_v16 }
 0x361   :  { %v13953_v41 = vmul.f32 0.5, %v1185_v37 }
 0x363   :  { %10629 = vmatprep.mubr.msk.f32.mxu1 %vm98_vm0, %v13953_v41  ;;  %10675 = vmatprep.mubr.msk.f32.mxu0 %vm98_vm0, %v13953_v41 }
 0x364   :  { %v13062_v55 = vpop.eup %13061  ;;  %10630 = vmatmul.mubr.msk.f32.vlgmr.msra.gmra.mrb[12].mxu1 %vm98_vm0, %v13955_v42  ;;  %10676 = vmatmul.mubr.msk.f32.vlgmr.msra.gmra.mrb[12].mxu0 %vm98_vm0, %v13955_v42 }
 0x365   :  { %v921_v52 = vmul.f32 %v13062_v55, %v909_v48  ;;  %12096 = vmatpush3.bf16.msra.mxu1 %v13873_v57  ;;  %12160 = vmatpush3.bf16.msra.mxu0 %v13888_v62  ;;  %v14002_v57 = vld [vmem:[%s16922_s5 + $0x38] sm:$0xff] }
 0x366   :  { %12098 = vmatprep.subr.bf16.mxu1 %v12097_v45  ;;  %12162 = vmatprep.subr.bf16.mxu0 %v13959_v46  ;;  %v14010_v60 = vpack.c.bf16 %v14002_v57, %v13997_v5 }
 0x367   :  { %v931_v56 = vmul.f32 %v13912_v3, %v921_v52 }
 0x368   :  { %v13064_v63 = vpop.eup %13063 }
 0x369   :  { %v941_v33 = vadd.f32 %v13923_v9, %v931_v56  ;;  %v922_v34 = vmul.f32 %v13064_v63, %v910_v54  ;;  %12100 = vmatpush3.bf16.msra.mxu1 %v12097_v45  ;;  %12164 = vmatpush3.bf16.msra.mxu0 %v13959_v46  ;;  %v14180_v56 = vld [vmem:[%s16886_s17] ss:$0 sm:$0xff] }
 0x36a   :  { %12166 = vmatprep.subr.bf16.mxu0 %v13989_v53 }
 0x36b   :  { %v1187_v20 = vadd.f32 %v941_v33, %v393_v0  ;;  %v932_v4 = vmul.f32 %v13912_v3, %v922_v34  ;;  %v14030_v3 = vpack.c.bf16 %v14021_v15, %v14016_v6 }
 0x36d   :  { %v14023_v7 = vmul.f32 0.5, %v1187_v20  ;;  %v942_v44 = vadd.f32 %v13923_v9, %v932_v4  ;;  %12168 = vmatpush3.bf16.msra.mxu0 %v13989_v53  ;;  %v14044_v9 = vld [vmem:[%s16922_s5 + $0x58] sm:$0xff] }
 0x36e   :  { %12170 = vmatprep.subr.bf16.mxu0 %v14010_v60  ;;  %v14052_v12 = vpack.c.bf16 %v14044_v9, %v14039_v10 }
 0x36f   :  { %v1188_v8 = vadd.f32 %v942_v44, %v394_v17  ;;  %10632 = vmatprep.mubr.msk.f32.mxu1 %vm98_vm0, %v14023_v7  ;;  %10678 = vmatprep.mubr.msk.f32.mxu0 %vm98_vm0, %v14023_v7 }
 0x371   :  { %v14046_v11 = vmul.f32 0.5, %v1188_v8  ;;  %12172 = vmatpush3.bf16.msra.mxu0 %v14010_v60 }
 0x372   :  { %12174 = vmatprep.subr.bf16.mxu0 %v14030_v3 }
 0x373   :  { %10633 = vmatmul.mubr.msk.f32.gmra.mrb[14].mxu1 %vm98_vm0, %v14046_v11  ;;  %10679 = vmatmul.mubr.msk.f32.gmra.mrb[14].mxu0 %vm98_vm0, %v14046_v11 }
 0x374   :  { %10643 = vmatprep.mubr.msk.f32.mxu1 %vm98_vm0, %v13953_v41  ;;  %10681 = vmatprep.mubr.msk.f32.mxu0 %vm98_vm0, %v13953_v41 }
 0x375   :  { %12176 = vmatpush3.bf16.msra.mxu0 %v14030_v3 }
 0x376   :  { %12178 = vmatprep.subr.bf16.mxu0 %v14052_v12 }
 0x377   :  { %10644 = vmatmul.mubr.msk.f32.vlgmr.msra.gmra.mrb[16].mxu1 %vm98_vm0, %v13955_v42  ;;  %10682 = vmatmul.mubr.msk.f32.gmra.mrb[16].mxu0 %vm98_vm0, %v13955_v42 }
 0x378   :  { %10646 = vmatprep.mubr.msk.f32.mxu1 %vm98_vm0, %v14023_v7  ;;  %10684 = vmatprep.mubr.msk.f32.mxu0 %vm98_vm0, %v14023_v7 }
 0x379   :  { %12180 = vmatpush3.bf16.msra.mxu0 %v14052_v12 }
 0x37a   :  { %12182 = vmatprep.subr.bf16.mxu0 %v14133_v49 }
 0x37b   :  { %10647 = vmatmul.mubr.msk.f32.gmra.mrb[18].mxu1 %vm98_vm0, %v14046_v11  ;;  %10685 = vmatmul.mubr.msk.f32.gmra.mrb[18].mxu0 %vm98_vm0, %v14046_v11 }
 0x37c   :  { %10649 = vmatprep.mubr.msk.f32.mxu1 %vm98_vm0, %v13953_v41  ;;  %10687 = vmatprep.mubr.msk.f32.mxu0 %vm98_vm0, %v13953_v41 }
 0x37d   :  { %12184 = vmatpush3.bf16.msra.mxu0 %v14133_v49 }
 0x37e   :  { %12186 = vmatprep.subr.bf16.mxu0 %v14149_v22 }
 0x37f   :  { %10650 = vmatmul.mubr.msk.f32.gmra.mrb[20].mxu1 %vm98_vm0, %v13955_v42  ;;  %10688 = vmatmul.mubr.msk.f32.gmra.mrb[20].mxu0 %vm98_vm0, %v13955_v42 }
 0x380   :  { %10652 = vmatprep.mubr.msk.f32.mxu1 %vm98_vm0, %v14023_v7  ;;  %10690 = vmatprep.mubr.msk.f32.mxu0 %vm98_vm0, %v14023_v7 }
 0x381   :  { %12188 = vmatpush3.bf16.msra.mxu0 %v14149_v22 }
 0x383   :  { %10653 = vmatmul.mubr.msk.f32.gmra.mrb[22].mxu1 %vm98_vm0, %v14046_v11  ;;  %10691 = vmatmul.mubr.msk.f32.gmra.mrb[22].mxu0 %vm98_vm0, %v14046_v11 }
 0x384   :  { %10655 = vmatprep.mubr.msk.f32.mxu1 %vm98_vm0, %v13953_v41  ;;  %10693 = vmatprep.mubr.msk.f32.mxu0 %vm98_vm0, %v13953_v41 }
 0x387   :  { %10656 = vmatmul.mubr.msk.f32.gmra.mrb[24].mxu1 %vm98_vm0, %v13955_v42  ;;  %10694 = vmatmul.mubr.msk.f32.gmra.mrb[24].mxu0 %vm98_vm0, %v13955_v42 }
 0x388   :  { %10658 = vmatprep.mubr.msk.f32.mxu1 %vm98_vm0, %v14023_v7  ;;  %10696 = vmatprep.mubr.msk.f32.mxu0 %vm98_vm0, %v14023_v7 }
 0x38b   :  { %10659 = vmatmul.mubr.msk.f32.gmra.mrb[26].mxu1 %vm98_vm0, %v14046_v11  ;;  %10697 = vmatmul.mubr.msk.f32.gmra.mrb[26].mxu0 %vm98_vm0, %v14046_v11 }
 0x38c   :  { %10661 = vmatprep.mubr.msk.f32.mxu1 %vm98_vm0, %v13953_v41 }
 0x38f   :  { %10662 = vmatmul.mubr.msk.f32.gmra.mrb[28].mxu1 %vm98_vm0, %v13955_v42 }
 0x390   :  { %10664 = vmatprep.mubr.msk.f32.mxu1 %vm98_vm0, %v14023_v7 }
 0x393   :  { %10665 = vmatmul.mubr.msk.f32.gmra.mrb[30].mxu1 %vm98_vm0, %v14046_v11 }
 0x3a5   :  { %v14117_v13 = vpop.f32.mrb[10].mxu0 }
 0x3a6   :  { %v14119_v14 = vpop.f32.mrb[11].mxu0 }
 0x437   :  { %v10631_v25 = vpop.f32.mrb[12].mxu1  ;;  %v10677_v27 = vpop.f32.mrb[12].mxu0 }
 0x438   :  { %v14161_v30 = vadd.f32 %v10631_v25, %v8933_v23  ;;  %v1580_v31 = vadd.f32 %v10677_v27, %v14159_v24  ;;  %v1306_v32 = vpop.f32.mrb[13].mxu1  ;;  %v1574_v35 = vpop.f32.mrb[13].mxu0 }
 0x439   :  { %v1307_v36 = vadd.f32 %v8933_v23, %v1306_v32  ;;  %v1575_v37 = vadd.f32 %v14159_v24, %v1574_v35 }
 0x43a   :  { %v1654_v38 = vmul.f32 %v1580_v31, %v13884_v59 }
 0x43b   :  { %v1653_v26 = vmul.f32 %v1575_v37, %v13879_v58  ;;  %10731 = vmatprep.mubr.msk.f32.mxu1 %vm98_vm0, %v1307_v36 }
 0x43d   :  { %v14168_v43 = vpack.c.bf16 %v1654_v38, %v1653_v26 }
 0x43f   :  { %12190 = vmatprep.subr.bf16.mxu0 %v14168_v43 }
 0x446   :  { %v10634_v45 = vpop.f32.mrb[14].mxu1  ;;  %v10680_v47 = vpop.f32.mrb[14].mxu0 }
 0x447   :  { %v14171_v48 = vadd.f32 %v10634_v45, %v8933_v23  ;;  %v1590_v55 = vadd.f32 %v10680_v47, %v14159_v24  ;;  %v1316_v39 = vpop.f32.mrb[15].mxu1  ;;  %v1584_v1 = vpop.f32.mrb[15].mxu0 }
 0x448   :  { %v14174_v52 = vadd.f32 %v8933_v23, %v1316_v39  ;;  %v1585_v54 = vadd.f32 %v14159_v24, %v1584_v1 }
 0x449   :  { %v1656_v63 = vmul.f32 %v1590_v55, %v13951_v61 }
 0x44a   :  { %v1655_v0 = vmul.f32 %v1585_v54, %v13946_v40  ;;  %v10645_v2 = vpop.f32.mrb[16].mxu1  ;;  %v10683_v33 = vpop.f32.mrb[16].mxu0 }
 0x44b   :  { %v1408_v34 = vadd.f32 %v10645_v2, %v14180_v56  ;;  %v1600_v20 = vadd.f32 %v10683_v33, %v14159_v24  ;;  %v1402_v4 = vpop.f32.mrb[17].mxu1  ;;  %v1594_v17 = vpop.f32.mrb[17].mxu0 }
 0x44c   :  { %v1403_v44 = vadd.f32 %v14180_v56, %v1402_v4  ;;  %v1595_v8 = vadd.f32 %v14159_v24, %v1594_v17  ;;  %v14188_v23 = vpack.c.bf16 %v1656_v63, %v1655_v0 }
 0x44d   :  { %v1482_v25 = vmul.f32 %v1408_v34, %v13884_v59  ;;  %v1658_v27 = vmul.f32 %v1600_v20, %v13977_v51 }
 0x44e   :  { %v1481_v31 = vmul.f32 %v1403_v44, %v13879_v58  ;;  %v1657_v32 = vmul.f32 %v1595_v8, %v13972_v50  ;;  %v10648_v35 = vpop.f32.mrb[18].mxu1  ;;  %v10686_v36 = vpop.f32.mrb[18].mxu0 }
 0x44f   :  { %v1418_v37 = vadd.f32 %v10648_v35, %v14180_v56  ;;  %v1610_v38 = vadd.f32 %v10686_v36, %v14159_v24  ;;  %v1412_v26 = vpop.f32.mrb[19].mxu1  ;;  %v1604_v45 = vpop.f32.mrb[19].mxu0 }
 0x450   :  { %v12109_v59 = vpack.c.bf16 %v1482_v25, %v1481_v31  ;;  %v1413_v55 = vadd.f32 %v14180_v56, %v1412_v26  ;;  %v1605_v58 = vadd.f32 %v14159_v24, %v1604_v45  ;;  %v14204_v39 = vpack.c.bf16 %v1658_v27, %v1657_v32 }
 0x451   :  { %v1484_v1 = vmul.f32 %v1418_v37, %v13951_v61  ;;  %v1660_v54 = vmul.f32 %v1610_v38, %v14002_v57 }
 0x452   :  { %v1483_v63 = vmul.f32 %v1413_v55, %v13946_v40  ;;  %v1659_v0 = vmul.f32 %v1605_v58, %v13997_v5  ;;  %v10651_v2 = vpop.f32.mrb[20].mxu1  ;;  %v10689_v33 = vpop.f32.mrb[20].mxu0  ;;  %12111 = vmatprep.subr.msk.bf16.mxu1 %vm14198_vm1, %v12109_v59 }
 0x453   :  { %v1428_v34 = vadd.f32 %v10651_v2, %v14180_v56  ;;  %v1620_v20 = vadd.f32 %v10689_v33, %v14159_v24  ;;  %v1422_v4 = vpop.f32.mrb[21].mxu1  ;;  %v1614_v17 = vpop.f32.mrb[21].mxu0  ;;  %12114 = vmatpush3.bf16.xpose.msk.msra.mxu1 %vm14198_vm1, %v12109_v59 }
 0x454   :  { %v12115_v61 = vpack.c.bf16 %v1484_v1, %v1483_v63  ;;  %v1423_v44 = vadd.f32 %v14180_v56, %v1422_v4  ;;  %v1615_v40 = vadd.f32 %v14159_v24, %v1614_v17  ;;  %v14218_v8 = vpack.c.bf16 %v1660_v54, %v1659_v0 }
 0x455   :  { %v1486_v25 = vmul.f32 %v1428_v34, %v13977_v51  ;;  %v1662_v27 = vmul.f32 %v1620_v20, %v14021_v15 }
 0x456   :  { %v1485_v31 = vmul.f32 %v1423_v44, %v13972_v50  ;;  %v1661_v32 = vmul.f32 %v1615_v40, %v14016_v6  ;;  %v10654_v35 = vpop.f32.mrb[22].mxu1  ;;  %v10692_v36 = vpop.f32.mrb[22].mxu0  ;;  %12117 = vmatprep.subr.msk.bf16.mxu1 %vm14198_vm1, %v12115_v61 }
 0x457   :  { %v1438_v37 = vadd.f32 %v10654_v35, %v14180_v56  ;;  %v1630_v38 = vadd.f32 %v10692_v36, %v14159_v24  ;;  %v1432_v26 = vpop.f32.mrb[23].mxu1  ;;  %v1624_v45 = vpop.f32.mrb[23].mxu0 }
 0x458   :  { %v12121_v59 = vpack.c.bf16 %v1486_v25, %v1485_v31  ;;  %v1433_v51 = vadd.f32 %v14180_v56, %v1432_v26  ;;  %v1625_v55 = vadd.f32 %v14159_v24, %v1624_v45  ;;  %v14230_v58 = vpack.c.bf16 %v1662_v27, %v1661_v32 }
 0x459   :  { %v1488_v50 = vmul.f32 %v1438_v37, %v14002_v57  ;;  %v1664_v1 = vmul.f32 %v1630_v38, %v14044_v9 }
 0x45a   :  { %v1487_v54 = vmul.f32 %v1433_v51, %v13997_v5  ;;  %v1663_v63 = vmul.f32 %v1625_v55, %v14039_v10  ;;  %v10657_v0 = vpop.f32.mrb[24].mxu1  ;;  %v10695_v2 = vpop.f32.mrb[24].mxu0 }
 0x45b   :  { %v1448_v33 = vadd.f32 %v10657_v0, %v14180_v56  ;;  %v1640_v34 = vadd.f32 %v10695_v2, %v14159_v24  ;;  %v1442_v20 = vpop.f32.mrb[25].mxu1  ;;  %v1634_v4 = vpop.f32.mrb[25].mxu0  ;;  %12120 = vmatpush3.bf16.xpose.msk.msra.mxu1 %vm14198_vm1, %v12115_v61 }
 0x45c   :  { %v12127_v17 = vpack.c.bf16 %v1488_v50, %v1487_v54  ;;  %v1443_v57 = vadd.f32 %v14180_v56, %v1442_v20  ;;  %v1635_v44 = vadd.f32 %v14159_v24, %v1634_v4  ;;  %12123 = vmatprep.subr.msk.bf16.mxu1 %vm14198_vm1, %v12121_v59  ;;  %v14244_v5 = vpack.c.bf16 %v1664_v1, %v1663_v63 }
 0x45d   :  { %v1490_v40 = vmul.f32 %v1448_v33, %v14021_v15  ;;  %v1666_v25 = vmul.f32 %v1640_v34, %v14129_v18 }
 0x45e   :  { %v1489_v27 = vmul.f32 %v1443_v57, %v14016_v6  ;;  %v1665_v31 = vmul.f32 %v1635_v44, %v14124_v16  ;;  %v10660_v32 = vpop.f32.mrb[26].mxu1  ;;  %v10698_v61 = vpop.f32.mrb[26].mxu0 }
 0x45f   :  { %v1458_v35 = vadd.f32 %v10660_v32, %v14180_v56  ;;  %v1650_v36 = vadd.f32 %v10698_v61, %v14159_v24  ;;  %v1452_v37 = vpop.f32.mrb[27].mxu1  ;;  %v1644_v38 = vpop.f32.mrb[27].mxu0  ;;  %v1200_v61 = vld [vmem:[%s16925_s7 + $0x18] sm:$0xff] }
 0x460   :  { %v12133_v26 = vpack.c.bf16 %v1490_v40, %v1489_v27  ;;  %v1453_v45 = vadd.f32 %v14180_v56, %v1452_v37  ;;  %v1645_v51 = vadd.f32 %v14159_v24, %v1644_v38  ;;  %v14254_v15 = vpack.c.bf16 %v1666_v25, %v1665_v31  ;;  %v1199_v38 = vld [vmem:[%s16925_s7 + $0x10] sm:$0xff] }
 0x461   :  { %v1492_v55 = vmul.f32 %v1458_v35, %v14044_v9  ;;  %v1668_v6 = vmul.f32 %v1650_v36, %v14145_v21 }
 0x462   :  { %v1491_v50 = vmul.f32 %v1453_v45, %v14039_v10  ;;  %v1667_v1 = vmul.f32 %v1645_v51, %v14140_v19  ;;  %v10663_v54 = vpop.f32.mrb[28].mxu1 }
 0x463   :  { %v1468_v63 = vadd.f32 %v10663_v54, %v14180_v56  ;;  %v1462_v0 = vpop.f32.mrb[29].mxu1  ;;  %12126 = vmatpush3.bf16.xpose.msk.msra.mxu1 %vm14198_vm1, %v12121_v59 }
 0x464   :  { %v12139_v2 = vpack.c.bf16 %v1492_v55, %v1491_v50  ;;  %v1463_v24 = vadd.f32 %v14180_v56, %v1462_v0  ;;  %12129 = vmatprep.subr.msk.bf16.mxu1 %vm14198_vm1, %v12127_v17  ;;  %v14266_v9 = vpack.c.bf16 %v1668_v6, %v1667_v1  ;;  %v13238_v1 = vld [vmem:[%s16920_s9 + $0x8] sm:$0xff] }
 0x465   :  { %v1494_v33 = vmul.f32 %v1468_v63, %v14129_v18 }
 0x466   :  { %v1493_v10 = vmul.f32 %v1463_v24, %v14124_v16  ;;  %v10666_v34 = vpop.f32.mrb[30].mxu1  ;;  %v8928_v16 = vld [vmem:[%s16880_s11 + $0x3] ss:$0 sm:$0xff] }
 0x467   :  { %v1478_v20 = vadd.f32 %v10666_v34, %v14180_v56  ;;  %v1472_v4 = vpop.f32.mrb[31].mxu1 }
 0x468   :  { %v12145_v57 = vpack.c.bf16 %v1494_v33, %v1493_v10  ;;  %v1473_v44 = vadd.f32 %v14180_v56, %v1472_v4 }
 0x469   :  { %v1496_v59 = vmul.f32 %v1478_v20, %v14145_v21 }
 0x46a   :  { %v1495_v40 = vmul.f32 %v1473_v44, %v14140_v19  ;;  %v1198_v19 = vld [vmem:[%s16925_s7 + $0x8] sm:$0xff] }
 0x46b   :  { %12132 = vmatpush3.bf16.xpose.msk.msra.mxu1 %vm14198_vm1, %v12127_v17 }
 0x46c   :  { %v12151_v25 = vpack.c.bf16 %v1496_v59, %v1495_v40  ;;  %12135 = vmatprep.subr.msk.bf16.mxu1 %vm14198_vm1, %v12133_v26 }
 0x473   :  { %12138 = vmatpush3.bf16.xpose.msk.msra.mxu1 %vm14198_vm1, %v12133_v26  ;;  %v1130_v26 = vadd.f32 %v14117_v13, %v8928_v16 }
 0x474   :  { %12141 = vmatprep.subr.msk.bf16.mxu1 %vm14198_vm1, %v12139_v2 }
 0x475   :  { %v14330_v13 = vadd.f32 %v13238_v1, %v1130_v26 }
 0x477   :  { %v1148_v34 = vmul.f32 %v14330_v13, %v14330_v13 }
 0x47b   :  { %12144 = vmatpush3.bf16.xpose.msk.msra.mxu1 %vm14198_vm1, %v12139_v2 }
 0x47c   :  { %12147 = vmatprep.subr.msk.bf16.mxu1 %vm14198_vm1, %v12145_v57 }
 0x483   :  { %12150 = vmatpush3.bf16.xpose.msk.msra.mxu1 %vm14198_vm1, %v12145_v57  ;;  %v1152_v57 = vsel %vm98_vm0, %v1148_v34, 0.0 }
 0x484   :  { %12153 = vmatprep.subr.msk.bf16.mxu1 %vm14198_vm1, %v12151_v25 }
 0x48b   :  { %12156 = vmatpush3.bf16.xpose.msk.msra.mxu1 %vm14198_vm1, %v12151_v25 }
 0x492   :  { %10732 = vmatmul.mubr.msk.f32.vlgmr.msra.gmra.mrb[32].mxu1 %vm98_vm0, %v14161_v30  ;;  %v1197_v30 = vld [vmem:[%s16925_s7] sm:$0xff] }
 0x493   :  { %10734 = vmatprep.mubr.msk.f32.mxu1 %vm98_vm0, %v14174_v52  ;;  %v8866_v52 = vld [vmem:[%s16880_s11 + $0x1] ss:$0 sm:$0xff] }
 0x494   :  { %v583_v35 = vadd.f32 %v8866_v52, %v13832_v29  ;;  %v588_v29 = vadd.f32 %v13830_v28, %v8866_v52  ;;  %v1142_v28 = vsel %vm98_vm0, %v14330_v13, 0.0 }
 0x496   :  { %10735 = vmatmul.mubr.msk.f32.gmra.mrb[34].mxu1 %vm98_vm0, %v14171_v48  ;;  %v1125_v48 = vadd.f32 %v8928_v16, %v14119_v14  ;;  %v13237_v14 = vld [vmem:[%s16920_s9] sm:$0xff]  ;;  %v14334_v63 = vadd.f32 %v13238_v1, %v588_v29 }
 0x497   :  { %v14325_v50 = vadd.f32 %v13237_v14, %v583_v35 }
 0x498   :  { %v14322_v45 = vadd.f32 %v13237_v14, %v1125_v48  ;;  %v600_v24 = vsel %vm98_vm0, %v14334_v63, 0.0  ;;  %v606_v4 = vmul.f32 %v14334_v63, %v14334_v63 }
 0x499   :  { %v597_v0 = vsel %vm98_vm0, %v14325_v50, 0.0  ;;  %v605_v33 = vmul.f32 %v14325_v50, %v14325_v50 }
 0x49a   :  { %v1139_v54 = vsel %vm98_vm0, %v14322_v45, 0.0  ;;  %v1147_v2 = vmul.f32 %v14322_v45, %v14322_v45  ;;  %v610_v44 = vsel %vm98_vm0, %v606_v4, 0.0 }
 0x49b   :  { %v607_v20 = vsel %vm98_vm0, %v605_v33, 0.0 }
 0x49c   :  { %v1149_v10 = vsel %vm98_vm0, %v1147_v2, 0.0 }
 0x565   :  { %v10733_v18 = vpop.f32.mrb[32].mxu1 }
 0x566   :  { %v1815_v21 = vmul.f32 0.35355338, %v10733_v18  ;;  %v1795_v56 = vpop.f32.mrb[33].mxu1 }
 0x567   :  { %v1814_v17 = vmul.f32 0.35355338, %v1795_v56 }
 0x568   :  { %v1819_v27 = vsub.f32 %v1815_v21, %v1198_v19 }
 0x569   :  { %v10736_v31 = vpop.f32.mrb[34].mxu1  ;;  %v1818_v32 = vsub.f32 %v1814_v17, %v1197_v30 }
 0x56a   :  { %v1817_v36 = vmul.f32 0.35355338, %v10736_v31  ;;  %1824 = vmax.xlane.f32.xlu1 %v1819_v27  ;;  %v1805_v37 = vpop.f32.mrb[35].mxu1 }
 0x56b   :  { %v1816_v51 = vmul.f32 0.35355338, %v1805_v37  ;;  %1822 = vmax.xlane.f32.xlu0 %v1818_v32 }
 0x56c   :  { %v1821_v55 = vsub.f32 %v1817_v36, %v1200_v61 }
 0x56d   :  { %v1820_v6 = vsub.f32 %v1816_v51, %v1199_v38 }
 0x56e   :  { %1828 = vmax.xlane.f32.xlu1 %v1821_v55 }
 0x56f   :  { %1826 = vmax.xlane.f32.xlu0 %v1820_v6 }
 0x572   :  { %1140 = vadd.xlane.f32.xlu1 %v1139_v54 }
 0x573   :  { %598 = vadd.xlane.f32.xlu0 %v597_v0 }
 0x576   :  { %1143 = vadd.xlane.f32.xlu1 %v1142_v28 }
 0x577   :  { %601 = vadd.xlane.f32.xlu0 %v600_v24 }
 0x57a   :  { %1150 = vadd.xlane.f32.xlu1 %v1149_v10 }
 0x57b   :  { %608 = vadd.xlane.f32.xlu0 %v607_v20 }
 0x57e   :  { %1153 = vadd.xlane.f32.xlu1 %v1152_v57 }
 0x57f   :  { %611 = vadd.xlane.f32.xlu0 %v610_v44 }
 0x5f7   :  { %v1825_v59 = vpop.xlane.xlu1 %1824 }
 0x5f8   :  { %v1831_v40 = vsub.f32 %v1819_v27, %v1825_v59  ;;  %v1823_v25 = vpop.xlane.xlu0 %1822 }
 0x5f9   :  { %v1830_v16 = vsub.f32 %v1818_v32, %v1823_v25 }
 0x5fa   :  { %v1836_v18 = vmul.f32 1.442695, %v1831_v40 }
 0x5fb   :  { %v1834_v19 = vmul.f32 1.442695, %v1830_v16  ;;  %v1829_v21 = vpop.xlane.xlu1 %1828 }
 0x5fc   :  { %v1833_v56 = vsub.f32 %v1821_v55, %v1829_v21  ;;  %v1827_v30 = vpop.xlane.xlu0 %1826 }
 0x5fd   :  { %13065 = vpow2.f32 %v1834_v19  ;;  %v1832_v52 = vsub.f32 %v1820_v6, %v1827_v30 }
 0x5fe   :  { %13067 = vpow2.f32 %v1836_v18  ;;  %v1840_v48 = vmul.f32 1.442695, %v1833_v56 }
 0x5ff   :  { %v1838_v17 = vmul.f32 1.442695, %v1832_v52  ;;  %v1141_v31 = vpop.xlane.xlu1 %1140 }
 0x600   :  { %v599_v61 = vpop.xlane.xlu0 %598  ;;  %v1145_v36 = vmul.f32 0.03125, %v1141_v31 }
 0x601   :  { %13069 = vpow2.f32 %v1838_v17  ;;  %v603_v27 = vmul.f32 0.03125, %v599_v61  ;;  %v8931_v17 = vld [vmem:[%s16881_s12 + $0x3] ss:$0 sm:$0xff] }
 0x602   :  { %13071 = vpow2.f32 %v1840_v48  ;;  %v1157_v38 = vmul.f32 %v1145_v36, %v1145_v36 }
 0x603   :  { %v1144_v35 = vpop.xlane.xlu1 %1143  ;;  %v615_v29 = vmul.f32 %v603_v27, %v603_v27  ;;  %v619_v21 = vsub.f32 %v14325_v50, %v603_v27 }
 0x604   :  { %v602_v37 = vpop.xlane.xlu0 %601  ;;  %v1146_v51 = vmul.f32 0.03125, %v1144_v35  ;;  %v8932_v35 = vld [vmem:[%s16882_s13 + $0x3] ss:$0 sm:$0xff] }
 0x605   :  { %v604_v1 = vmul.f32 0.03125, %v602_v37 }
 0x606   :  { %v1158_v0 = vmul.f32 %v1146_v51, %v1146_v51  ;;  %v1162_v48 = vsub.f32 %v14330_v13, %v1146_v51  ;;  %v8999_v13 = vld [vmem:[%s16883_s14 + $0x20] sm:$0xff]  ;;  %v9002_v51 = vld [vmem:[%s16883_s14 + $0x38] sm:$0xff] }
 0x607   :  { %v13066_v32 = vpop.eup %13065  ;;  %v1151_v26 = vpop.xlane.xlu1 %1150  ;;  %v616_v57 = vmul.f32 %v604_v1, %v604_v1 }
 0x608   :  { %v14354_v14 = vpop.eup %13067  ;;  %v1155_v55 = vmul.f32 0.03125, %v1151_v26  ;;  %10769 = vmatprep.mubr.f32.mxu0 %v13066_v32  ;;  %v609_v6 = vpop.xlane.xlu0 %608  ;;  %v9001_v26 = vld [vmem:[%s16883_s14 + $0x30] sm:$0xff] }
 0x609   :  { %v613_v54 = vmul.f32 0.03125, %v609_v6  ;;  %10770 = vmatmul.mubr.f32.vlgmr.msra.gmra.mrb[28].mxu0 %v14354_v14 }
 0x60a   :  { %v1159_v28 = vsub.f32 %v1155_v55, %v1157_v38  ;;  %12192 = vmatpush3.bf16.msra.mxu0 %v14168_v43 }
 0x60b   :  { %v14358_v2 = vpop.eup %13069  ;;  %v617_v24 = vsub.f32 %v613_v54, %v615_v29  ;;  %12194 = vmatprep.subr.bf16.mxu0 %v14188_v23  ;;  %v1154_v33 = vpop.xlane.xlu1 %1153  ;;  %v9022_v54 = vld [vmem:[%s16887_s18 + $0x28] sm:$0xff] }
 0x60c   :  { %v14361_v10 = vpop.eup %13071  ;;  %v1163_v34 = vadd.f32 1e-05, %v1159_v28  ;;  %v1156_v20 = vmul.f32 0.03125, %v1154_v33  ;;  %10772 = vmatprep.mubr.f32.mxu0 %v14358_v2  ;;  %v612_v4 = vpop.xlane.xlu0 %611  ;;  %v9024_v33 = vld [vmem:[%s16887_s18 + $0x38] sm:$0xff] }
 0x60d   :  { %v621_v44 = vadd.f32 1e-05, %v617_v24  ;;  %v614_v59 = vmul.f32 0.03125, %v612_v4  ;;  %10773 = vmatmul.mubr.f32.gmra.mrb[30].mxu0 %v14361_v10  ;;  %v9023_v24 = vld [vmem:[%s16887_s18 + $0x30] sm:$0xff] }
 0x60e   :  { %13073 = vrsqrt.f32 %v1163_v34  ;;  %v1160_v43 = vsub.f32 %v1156_v20, %v1158_v0  ;;  %12196 = vmatpush3.bf16.msra.mxu0 %v14188_v23  ;;  %10807 = vmatprep.mubr.f32.mxu0 %v13066_v32  ;;  %v1161_v23 = vsub.f32 %v14322_v45, %v1145_v36  ;;  %v8869_v45 = vld [vmem:[%s16881_s12 + $0x1] ss:$0 sm:$0xff]  ;;  %v2021_v34 = vld [vmem:[%s16889_s20 + $0x8] sm:$0xff]  ;;  %v2022_v4 = vld [vmem:[%s16889_s20 + $0x10] sm:$0xff] }
 0x60f   :  { %13075 = vrsqrt.f32 %v621_v44  ;;  %v618_v40 = vsub.f32 %v614_v59, %v616_v57  ;;  %12198 = vmatprep.subr.bf16.mxu0 %v14204_v39  ;;  %v2023_v57 = vld [vmem:[%s16889_s20 + $0x18] sm:$0xff]  ;;  %v9007_v59 = vld [vmem:[%s16885_s16 + $0x20] sm:$0xff] }
 0x610   :  { %v1164_v25 = vadd.f32 1e-05, %v1160_v43  ;;  %v12225_v44 = vpack.c.bf16 %v2023_v57, %v2022_v4  ;;  %v9008_v43 = vld [vmem:[%s16885_s16 + $0x28] sm:$0xff] }
 0x611   :  { %v622_v16 = vadd.f32 1e-05, %v618_v40  ;;  %v12237_v40 = vpack.c.bf16 %v9008_v43, %v9007_v59 }
 0x612   :  { %13077 = vrsqrt.f32 %v1164_v25  ;;  %12200 = vmatpush3.bf16.msra.mxu0 %v14204_v39 }
 0x613   :  { %13079 = vrsqrt.f32 %v622_v16  ;;  %12202 = vmatprep.subr.bf16.mxu0 %v14218_v8 }
 0x616   :  { %12204 = vmatpush3.bf16.msra.mxu0 %v14218_v8  ;;  %v620_v8 = vsub.f32 %v14334_v63, %v604_v1  ;;  %v9000_v63 = vld [vmem:[%s16883_s14 + $0x28] sm:$0xff]  ;;  %v9021_v1 = vld [vmem:[%s16887_s18 + $0x20] sm:$0xff] }
 0x617   :  { %12206 = vmatprep.subr.bf16.mxu0 %v14230_v58  ;;  %v12229_v27 = vpack.c.bf16 %v9000_v63, %v8999_v13  ;;  %v9004_v63 = vld [vmem:[%s16884_s15 + $0x1] ss:$0 sm:$0xff] }
 0x618   :  { %v13074_v18 = vpop.eup %13073 }
 0x619   :  { %v13076_v19 = vpop.eup %13075  ;;  %v1167_v30 = vmul.f32 %v13074_v18, %v1161_v23 }
 0x61a   :  { %12208 = vmatpush3.bf16.msra.mxu0 %v14230_v58  ;;  %v625_v39 = vmul.f32 %v13076_v19, %v619_v21 }
 0x61b   :  { %12210 = vmatprep.subr.bf16.mxu0 %v14244_v5  ;;  %v1175_v31 = vmul.f32 %v8931_v17, %v1167_v30  ;;  %v9010_v30 = vld [vmem:[%s16885_s16 + $0x38] sm:$0xff] }
 0x61c   :  { %v13078_v56 = vpop.eup %13077  ;;  %v633_v61 = vmul.f32 %v8869_v45, %v625_v39 }
 0x61d   :  { %v13080_v52 = vpop.eup %13079  ;;  %v1168_v58 = vmul.f32 %v13078_v56, %v1162_v48  ;;  %v1183_v38 = vadd.f32 %v8932_v35, %v1175_v31  ;;  %v9009_v56 = vld [vmem:[%s16885_s16 + $0x30] sm:$0xff] }
 0x61e   :  { %12212 = vmatpush3.bf16.msra.mxu0 %v14244_v5  ;;  %v626_v50 = vmul.f32 %v13080_v52, %v620_v8  ;;  %v8870_v5 = vld [vmem:[%s16882_s13 + $0x1] ss:$0 sm:$0xff] }
 0x61f   :  { %12214 = vmatprep.subr.bf16.mxu0 %v14254_v15  ;;  %v1176_v36 = vmul.f32 %v8931_v17, %v1168_v58  ;;  %v641_v32 = vadd.f32 %v8870_v5, %v633_v61  ;;  %v12241_v17 = vpack.c.bf16 %v9010_v30, %v9009_v56 }
 0x620   :  { %v634_v37 = vmul.f32 %v8869_v45, %v626_v50 }
 0x621   :  { %v1184_v55 = vadd.f32 %v8932_v35, %v1176_v36  ;;  %v1193_v29 = vadd.f32 %v1183_v38, %v641_v32 }
 0x622   :  { %12216 = vmatpush3.bf16.msra.mxu0 %v14254_v15  ;;  %v642_v6 = vadd.f32 %v8870_v5, %v634_v37  ;;  %v12233_v15 = vpack.c.bf16 %v9002_v51, %v9001_v26  ;;  %v9026_v37 = vld [vmem:[%s16888_s19 + $0x1] ss:$0 sm:$0xff] }
 0x623   :  { %12218 = vmatprep.subr.bf16.mxu0 %v14266_v9  ;;  %v14414_v28 = vmul.f32 0.5, %v1193_v29  ;;  %v14497_v26 = vld [vmem:[%s16926_s27] sm:$0xff]  ;;  %v14506_v29 = vld [vmem:[%s16926_s27 + $0x18] sm:$0xff] }
 0x624   :  { %v1194_v0 = vadd.f32 %v1184_v55, %v642_v6 }
 0x626   :  { %12220 = vmatpush3.bf16.msra.mxu0 %v14266_v9  ;;  %v12245_v9 = vpack.c.bf16 %v9022_v54, %v9021_v1 }
 0x627   :  { %12230 = vmatprep.subr.bf16.mxu0 %v12229_v27 }
 0x629   :  { %10808 = vmatmul.mubr.f32.vlgmr.msra.gmra.mrb[32].mxu0 %v14354_v14  ;;  %v14425_v14 = vmul.f32 0.5, %v1194_v0  ;;  %v14513_v0 = vld [vmem:[%s16926_s27 + $0x10] sm:$0xff] }
 0x62a   :  { %10810 = vmatprep.mubr.f32.mxu0 %v14358_v2  ;;  %12232 = vmatpush3.bf16.msra.mxu0 %v12229_v27  ;;  %v12249_v2 = vpack.c.bf16 %v9024_v33, %v9023_v24  ;;  %v14490_v27 = vld [vmem:[%s16926_s27 + $0x8] sm:$0xff] }
 0x62b   :  { %12234 = vmatprep.subr.bf16.mxu0 %v12233_v15 }
 0x62d   :  { %10811 = vmatmul.mubr.f32.gmra.mrb[34].mxu0 %v14361_v10  ;;  %v2020_v10 = vld [vmem:[%s16889_s20] sm:$0xff] }
 0x62e   :  { %12236 = vmatpush3.bf16.msra.mxu0 %v12233_v15  ;;  %10835 = vmatprep.mubr.msk.f32.mxu0 %vm98_vm0, %v14414_v28  ;;  %v12221_v20 = vpack.c.bf16 %v2021_v34, %v2020_v10 }
 0x62f   :  { %12246 = vmatprep.subr.bf16.mxu0 %v12245_v9 }
 0x630   :  { %12222 = vmatprep.subr.bf16.mxu1 %v12221_v20 }
 0x631   :  { %10836 = vmatmul.mubr.msk.f32.vlgmr.msra.gmra.mrb[36].mxu0 %vm98_vm0, %v14425_v14  ;;  %12224 = vmatpush3.bf16.msra.mxu1 %v12221_v20  ;;  %v14522_v20 = vld [vmem:[%s16926_s27 + $0x28] sm:$0xff] }
 0x632   :  { %12248 = vmatpush3.bf16.msra.mxu0 %v12245_v9  ;;  %10866 = vmatprep.mubr.msk.f32.mxu0 %vm98_vm0, %v14414_v28 }
 0x633   :  { %12250 = vmatprep.subr.bf16.mxu0 %v12249_v2  ;;  %12226 = vmatprep.subr.bf16.mxu1 %v12225_v44 }
 0x635   :  { %12228 = vmatpush3.bf16.msra.mxu1 %v12225_v44  ;;  %v14529_v44 = vld [vmem:[%s16926_s27 + $0x20] sm:$0xff] }
 0x636   :  { %12252 = vmatpush3.bf16.msra.mxu0 %v12249_v2  ;;  %12238 = vmatprep.subr.bf16.mxu1 %v12237_v40 }
 0x639   :  { %10867 = vmatmul.mubr.msk.f32.vlgmr.msra.gmra.mrb[38].mxu0 %vm98_vm0, %v14425_v14 }
 0x63a   :  { %10869 = vmatprep.mubr.msk.f32.mxu0 %vm98_vm0, %v14414_v28 }
 0x63d   :  { %10870 = vmatmul.mubr.msk.f32.gmra.mrb[40].mxu0 %vm98_vm0, %v14425_v14 }
 0x63e   :  { %10872 = vmatprep.mubr.msk.f32.mxu0 %vm98_vm0, %v14414_v28 }
 0x641   :  { %10873 = vmatmul.mubr.msk.f32.gmra.mrb[42].mxu0 %vm98_vm0, %v14425_v14 }
 0x642   :  { %10875 = vmatprep.mubr.msk.f32.mxu0 %vm98_vm0, %v14414_v28 }
 0x645   :  { %10876 = vmatmul.mubr.msk.f32.gmra.mrb[44].mxu0 %vm98_vm0, %v14425_v14 }
 0x6dc   :  { %v10771_v25 = vpop.f32.mrb[28].mxu0 }
 0x6dd   :  { %v1908_v16 = vpop.f32.mrb[29].mxu0  ;;  %13081 = vrcp.f32 %v10771_v25 }
 0x6de   :  { %13083 = vrcp.f32 %v1908_v16 }
 0x6e0   :  { %v10774_v18 = vpop.f32.mrb[30].mxu0 }
 0x6e1   :  { %v1918_v19 = vpop.f32.mrb[31].mxu0  ;;  %13085 = vrcp.f32 %v10774_v18  ;;  %v14537_v18 = vld [vmem:[%s16926_s27 + $0x38] sm:$0xff] }
 0x6e2   :  { %13087 = vrcp.f32 %v1918_v19 }
 0x6e7   :  { %v13082_v23 = vpop.eup %13081 }
 0x6e8   :  { %v13084_v39 = vpop.eup %13083 }
 0x6eb   :  { %v13086_v45 = vpop.eup %13085 }
 0x6ec   :  { %v13088_v50 = vpop.eup %13087 }
 0x6fc   :  { %v10809_v21 = vpop.f32.mrb[32].mxu0 }
 0x6fd   :  { %v2017_v52 = vmul.f32 %v13082_v23, %v10809_v21  ;;  %v1993_v48 = vpop.f32.mrb[33].mxu0  ;;  %v14542_v21 = vld [vmem:[%s16926_s27 + $0x30] sm:$0xff] }
 0x6fe   :  { %v2016_v8 = vmul.f32 %v13084_v39, %v1993_v48 }
 0x700   :  { %v10812_v58 = vpop.f32.mrb[34].mxu0  ;;  %10821 = vmatprep.mubr.msk.f32.mxu1 %vm98_vm0, %v2016_v8 }
 0x701   :  { %v2019_v31 = vmul.f32 %v13086_v45, %v10812_v58  ;;  %v2003_v61 = vpop.f32.mrb[35].mxu0  ;;  %10822 = vmatmul.mubr.msk.f32.vlgmr.msra.gmra.mrb[36].mxu1 %vm98_vm0, %v2017_v52 }
 0x702   :  { %v2018_v13 = vmul.f32 %v13088_v50, %v2003_v61  ;;  %12240 = vmatpush3.bf16.msra.mxu1 %v12237_v40 }
 0x703   :  { %12242 = vmatprep.subr.bf16.mxu1 %v12241_v17 }
 0x704   :  { %10824 = vmatprep.mubr.msk.f32.mxu1 %vm98_vm0, %v2018_v13  ;;  %v10837_v35 = vpop.f32.mrb[36].mxu0 }
 0x705   :  { %v14475_v5 = vadd.f32 %v10837_v35, %v9004_v63  ;;  %10825 = vmatmul.mubr.msk.f32.gmra.mrb[38].mxu1 %vm98_vm0, %v2019_v31  ;;  %v2309_v36 = vpop.f32.mrb[37].mxu0  ;;  %v9012_v31 = vld [vmem:[%s16886_s17 + $0x1] ss:$0 sm:$0xff] }
 0x706   :  { %12244 = vmatpush3.bf16.msra.mxu1 %v12241_v17  ;;  %10846 = vmatprep.mubr.msk.f32.mxu1 %vm98_vm0, %v14414_v28  ;;  %v2310_v10 = vadd.f32 %v9004_v63, %v2309_v36 }
 0x709   :  { %10847 = vmatmul.mubr.msk.f32.vlgmr.msra.gmra.mrb[40].mxu1 %vm98_vm0, %v14425_v14 }
 0x70a   :  { %10849 = vmatprep.mubr.msk.f32.mxu1 %vm98_vm0, %v14414_v28 }
 0x70c   :  { %v10868_v38 = vpop.f32.mrb[38].mxu0 }
 0x70d   :  { %v2529_v32 = vadd.f32 %v10868_v38, %v9026_v37  ;;  %10850 = vmatmul.mubr.msk.f32.gmra.mrb[42].mxu1 %vm98_vm0, %v14425_v14  ;;  %v2523_v51 = vpop.f32.mrb[39].mxu0 }
 0x70e   :  { %v2524_v55 = vadd.f32 %v9026_v37, %v2523_v51  ;;  %10852 = vmatprep.mubr.msk.f32.mxu1 %vm98_vm0, %v14414_v28 }
 0x70f   :  { %v2563_v6 = vmul.f32 %v2529_v32, %v14490_v27 }
 0x710   :  { %v2562_v15 = vmul.f32 %v2524_v55, %v14497_v26  ;;  %v10871_v1 = vpop.f32.mrb[40].mxu0 }
 0x711   :  { %v2539_v54 = vadd.f32 %v10871_v1, %v9026_v37  ;;  %10853 = vmatmul.mubr.msk.f32.gmra.mrb[44].mxu1 %vm98_vm0, %v14425_v14  ;;  %v2533_v9 = vpop.f32.mrb[41].mxu0 }
 0x712   :  { %v2534_v24 = vadd.f32 %v9026_v37, %v2533_v9  ;;  %10855 = vmatprep.mubr.msk.f32.mxu1 %vm98_vm0, %v14414_v28  ;;  %v12293_v33 = vpack.c.bf16 %v2563_v6, %v2562_v15 }
 0x713   :  { %v2565_v2 = vmul.f32 %v2539_v54, %v14506_v29 }
 0x714   :  { %v2564_v34 = vmul.f32 %v2534_v24, %v14513_v0  ;;  %v10874_v4 = vpop.f32.mrb[42].mxu0  ;;  %12294 = vmatprep.subr.bf16.mxu0 %v12293_v33 }
 0x715   :  { %v2549_v57 = vadd.f32 %v10874_v4, %v9026_v37  ;;  %10856 = vmatmul.mubr.msk.f32.gmra.mrb[46].mxu1 %vm98_vm0, %v14425_v14  ;;  %v2543_v59 = vpop.f32.mrb[43].mxu0  ;;  %12296 = vmatpush3.bf16.msra.mxu0 %v12293_v33 }
 0x716   :  { %v2544_v43 = vadd.f32 %v9026_v37, %v2543_v59  ;;  %10894 = vmatprep.mubr.msk.f32.mxu1 %vm98_vm0, %v2310_v10  ;;  %v12297_v40 = vpack.c.bf16 %v2565_v2, %v2564_v34 }
 0x717   :  { %v2567_v25 = vmul.f32 %v2549_v57, %v14522_v20 }
 0x718   :  { %v2566_v16 = vmul.f32 %v2544_v43, %v14529_v44  ;;  %v10877_v19 = vpop.f32.mrb[44].mxu0  ;;  %12298 = vmatprep.subr.bf16.mxu0 %v12297_v40 }
 0x719   :  { %v2559_v23 = vadd.f32 %v10877_v19, %v9026_v37  ;;  %v2553_v56 = vpop.f32.mrb[45].mxu0  ;;  %12300 = vmatpush3.bf16.msra.mxu0 %v12297_v40 }
 0x71a   :  { %v2554_v30 = vadd.f32 %v9026_v37, %v2553_v56  ;;  %v12301_v39 = vpack.c.bf16 %v2567_v25, %v2566_v16  ;;  %v2215_v56 = vld [vmem:[%s16927_s29 + $0x8] sm:$0xff] }
 0x71b   :  { %v2569_v52 = vmul.f32 %v2559_v23, %v14537_v18 }
 0x71c   :  { %v2568_v48 = vmul.f32 %v2554_v30, %v14542_v21  ;;  %12302 = vmatprep.subr.bf16.mxu0 %v12301_v39 }
 0x71d   :  { %12304 = vmatpush3.bf16.msra.mxu0 %v12301_v39 }
 0x71e   :  { %v12305_v8 = vpack.c.bf16 %v2569_v52, %v2568_v48  ;;  %v2214_v52 = vld [vmem:[%s16927_s29] sm:$0xff] }
 0x720   :  { %12306 = vmatprep.subr.bf16.mxu0 %v12305_v8 }
 0x721   :  { %12308 = vmatpush3.bf16.msra.mxu0 %v12305_v8 }
 0x7d4   :  { %v14546_v17 = vpop.f32.mrb[36].mxu1 }
 0x7d5   :  { %v14548_v45 = vpop.f32.mrb[37].mxu1 }
 0x7d8   :  { %v14550_v58 = vpop.f32.mrb[38].mxu1 }
 0x7d9   :  { %v14552_v50 = vpop.f32.mrb[39].mxu1 }
 0x7dc   :  { %v10848_v61 = vpop.f32.mrb[40].mxu1 }
 0x7dd   :  { %v2403_v13 = vadd.f32 %v10848_v61, %v9012_v31  ;;  %v2397_v63 = vpop.f32.mrb[41].mxu1 }
 0x7de   :  { %v2398_v35 = vadd.f32 %v9012_v31, %v2397_v63  ;;  %v14599_v63 = vpack.c.bf16 %v14506_v29, %v14513_v0 }
 0x7df   :  { %v2437_v36 = vmul.f32 %v2403_v13, %v14490_v27  ;;  %v14593_v13 = vpack.c.bf16 %v14490_v27, %v14497_v26 }
 0x7e0   :  { %v2436_v37 = vmul.f32 %v2398_v35, %v14497_v26  ;;  %v10851_v38 = vpop.f32.mrb[42].mxu1  ;;  %v14604_v35 = vpack.c.bf16 %v14522_v20, %v14529_v44 }
 0x7e1   :  { %v2413_v32 = vadd.f32 %v10851_v38, %v9012_v31  ;;  %v2407_v51 = vpop.f32.mrb[43].mxu1 }
 0x7e2   :  { %v12253_v55 = vpack.c.bf16 %v2437_v36, %v2436_v37  ;;  %v2408_v6 = vadd.f32 %v9012_v31, %v2407_v51  ;;  %v14610_v36 = vpack.c.bf16 %v14537_v18, %v14542_v21 }
 0x7e3   :  { %v2439_v15 = vmul.f32 %v2413_v32, %v14506_v29 }
 0x7e4   :  { %v2438_v1 = vmul.f32 %v2408_v6, %v14513_v0  ;;  %v10854_v54 = vpop.f32.mrb[44].mxu1  ;;  %12255 = vmatprep.subr.msk.bf16.mxu1 %vm14198_vm1, %v12253_v55 }
 0x7e5   :  { %v2423_v9 = vadd.f32 %v10854_v54, %v9012_v31  ;;  %v2417_v24 = vpop.f32.mrb[45].mxu1  ;;  %12258 = vmatpush3.bf16.xpose.msk.msra.mxu1 %vm14198_vm1, %v12253_v55  ;;  %v9049_v54 = vld [vmem:[%s16889_s20 + $0x20] sm:$0xff] }
 0x7e6   :  { %v12259_v33 = vpack.c.bf16 %v2439_v15, %v2438_v1  ;;  %v2418_v2 = vadd.f32 %v9012_v31, %v2417_v24 }
 0x7e7   :  { %v2441_v10 = vmul.f32 %v2423_v9, %v14522_v20  ;;  %v9050_v9 = vld [vmem:[%s16889_s20 + $0x28] sm:$0xff] }
 0x7e8   :  { %v2440_v34 = vmul.f32 %v2418_v2, %v14529_v44  ;;  %v10857_v4 = vpop.f32.mrb[46].mxu1  ;;  %12261 = vmatprep.subr.msk.bf16.mxu1 %vm14198_vm1, %v12259_v33  ;;  %v12309_v24 = vpack.c.bf16 %v9050_v9, %v9049_v54  ;;  %v9052_v2 = vld [vmem:[%s16889_s20 + $0x38] sm:$0xff] }
 0x7e9   :  { %v2433_v57 = vadd.f32 %v10857_v4, %v9012_v31  ;;  %v2427_v59 = vpop.f32.mrb[47].mxu1 }
 0x7ea   :  { %v12265_v43 = vpack.c.bf16 %v2441_v10, %v2440_v34  ;;  %v2428_v40 = vadd.f32 %v9012_v31, %v2427_v59 }
 0x7eb   :  { %v2443_v25 = vmul.f32 %v2433_v57, %v14537_v18 }
 0x7ec   :  { %v2442_v16 = vmul.f32 %v2428_v40, %v14542_v21 }
 0x7ed   :  { %12264 = vmatpush3.bf16.xpose.msk.msra.mxu1 %vm14198_vm1, %v12259_v33  ;;  %v9051_v33 = vld [vmem:[%s16889_s20 + $0x30] sm:$0xff] }
 0x7ee   :  { %v12271_v19 = vpack.c.bf16 %v2443_v25, %v2442_v16  ;;  %12267 = vmatprep.subr.msk.bf16.mxu1 %vm14198_vm1, %v12265_v43  ;;  %v12313_v10 = vpack.c.bf16 %v9052_v2, %v9051_v33 }
 0x7f5   :  { %12270 = vmatpush3.bf16.xpose.msk.msra.mxu1 %vm14198_vm1, %v12265_v43 }
 0x7f6   :  { %12273 = vmatprep.subr.msk.bf16.mxu1 %vm14198_vm1, %v12271_v19 }
 0x7fd   :  { %12276 = vmatpush3.bf16.xpose.msk.msra.mxu1 %vm14198_vm1, %v12271_v19  ;;  %v9054_v19 = vld [vmem:[%s16890_s21 + $0x1] ss:$0 sm:$0xff] }
 0x7fe   :  { %12278 = vmatprep.subr.bf16.mxu1 %v14593_v13 }
 0x804   :  { %10895 = vmatmul.mubr.msk.f32.vlgmr.msra.gmra.mrb[48].mxu1 %vm98_vm0, %v14475_v5 }
 0x805   :  { %12280 = vmatpush3.bf16.msra.mxu1 %v14593_v13 }
 0x806   :  { %12282 = vmatprep.subr.bf16.mxu1 %v14599_v63 }
 0x809   :  { %12284 = vmatpush3.bf16.msra.mxu1 %v14599_v63 }
 0x80a   :  { %12286 = vmatprep.subr.bf16.mxu1 %v14604_v35 }
 0x80d   :  { %12288 = vmatpush3.bf16.msra.mxu1 %v14604_v35 }
 0x80e   :  { %12290 = vmatprep.subr.bf16.mxu1 %v14610_v36 }
 0x811   :  { %12292 = vmatpush3.bf16.msra.mxu1 %v14610_v36 }
 0x812   :  { %12310 = vmatprep.subr.bf16.mxu1 %v12309_v24 }
 0x8d7   :  { %v10896_v23 = vpop.f32.mrb[48].mxu1 }
 0x8d8   :  { %v2676_v30 = vmul.f32 0.35355338, %v10896_v23  ;;  %v2666_v39 = vpop.f32.mrb[49].mxu1 }
 0x8d9   :  { %v2675_v48 = vmul.f32 0.35355338, %v2666_v39  ;;  %v8992_v39 = vld [vmem:[%s16890_s21] ss:$0 sm:$0xff] }
 0x8da   :  { %v2678_v8 = vsub.f32 %v2676_v30, %v2215_v56 }
 0x8db   :  { %v2677_v31 = vsub.f32 %v2675_v48, %v2214_v52 }
 0x8dc   :  { %v2683_v61 = vsel %vm2679_vm2, %v2678_v8, -inf }
 0x8dd   :  { %2684 = vmax.xlane.f32.xlu1 %v2683_v61  ;;  %v2680_v5 = vsel %vm2679_vm2, %v2677_v31, -inf }
 0x8de   :  { %2681 = vmax.xlane.f32.xlu0 %v2680_v5 }
 0x96a   :  { %v2685_v37 = vpop.xlane.xlu1 %2684 }
 0x96b   :  { %v2687_v38 = vsub.f32 %v2678_v8, %v2685_v37  ;;  %v2682_v32 = vpop.xlane.xlu0 %2681  ;;  %v2110_v37 = vadd.f32 %v8992_v39, %v14548_v45  ;;  %v2125_v45 = vadd.f32 %v14550_v58, %v8992_v39 }
 0x96c   :  { %v2686_v51 = vsub.f32 %v2677_v31, %v2682_v32  ;;  %v2115_v31 = vadd.f32 %v14546_v17, %v8992_v39 }
 0x96d   :  { %v2690_v55 = vmul.f32 1.442695, %v2687_v38  ;;  %v14660_v32 = vadd.f32 %v2110_v37, %v13953_v41 }
 0x96e   :  { %v2688_v6 = vmul.f32 1.442695, %v2686_v51 }
 0x96f   :  { %v2150_v41 = vmul.f32 %v14660_v32, %v14660_v32 }
 0x970   :  { %13089 = vpow2.f32 %v2688_v6 }
 0x971   :  { %13091 = vpow2.f32 %v2690_v55  ;;  %v2154_v9 = vsel %vm98_vm0, %v2150_v41, 0.0 }
 0x97a   :  { %v13090_v15 = vpop.eup %13089 }
 0x97b   :  { %v13092_v1 = vpop.eup %13091  ;;  %10913 = vmatprep.mubr.msk.f32.mxu1 %vm2679_vm2, %v13090_v15  ;;  %10932 = vmatprep.mubr.msk.f32.mxu0 %vm2679_vm2, %v13090_v15  ;;  %v2134_v15 = vsel %vm98_vm0, %v14660_v32, 0.0 }
 0x97c   :  { %10914 = vmatmul.mubr.msk.f32.vlgmr.msra.gmra.mrb[50].mxu1 %vm2679_vm2, %v13092_v1  ;;  %10933 = vmatmul.mubr.msk.f32.vlgmr.msra.gmra.mrb[46].mxu0 %vm2679_vm2, %v13092_v1  ;;  %v14674_v1 = vadd.f32 %v2125_v45, %v14046_v11 }
 0x97d   :  { %12312 = vmatpush3.bf16.msra.mxu1 %v12309_v24 }
 0x97e   :  { %12314 = vmatprep.subr.bf16.mxu1 %v12313_v10  ;;  %v2153_v24 = vmul.f32 %v14674_v1, %v14674_v1 }
 0x981   :  { %12316 = vmatpush3.bf16.msra.mxu1 %v12313_v10  ;;  %v9071_v10 = vld [vmem:[%s16885_s16 + $0x40] sm:$0xff] }
 0xa4f   :  { %v10915_v34 = vpop.f32.mrb[50].mxu1  ;;  %v10934_v4 = vpop.f32.mrb[46].mxu0 }
 0xa50   :  { %13093 = vrcp.f32 %v10915_v34  ;;  %v2764_v57 = vpop.f32.mrb[51].mxu1  ;;  %v2839_v59 = vpop.f32.mrb[47].mxu0  ;;  %v9072_v34 = vld [vmem:[%s16885_s16 + $0x48] sm:$0xff] }
 0xa51   :  { %13095 = vrcp.f32 %v2764_v57  ;;  %v9073_v57 = vld [vmem:[%s16885_s16 + $0x50] sm:$0xff] }
 0xa5a   :  { %v13094_v43 = vpop.eup %13093 }
 0xa5b   :  { %v13096_v40 = vpop.eup %13095  ;;  %v2851_v25 = vmul.f32 %v13094_v43, %v10934_v4  ;;  %v12325_v4 = vpack.c.bf16 %v9072_v34, %v9071_v10 }
 0xa5c   :  { %v2850_v16 = vmul.f32 %v13096_v40, %v2839_v59  ;;  %v9074_v59 = vld [vmem:[%s16885_s16 + $0x58] sm:$0xff]  ;;  %v9061_v40 = vld [vmem:[%s16883_s14 + $0x40] sm:$0xff] }
 0xa5d   :  { %12326 = vmatprep.subr.bf16.mxu1 %v12325_v4  ;;  %v12329_v43 = vpack.c.bf16 %v9074_v59, %v9073_v57 }
 0xa5e   :  { %10943 = vmatprep.mubr.msk.f32.mxu1 %vm98_vm0, %v2850_v16 }
 0xa5f   :  { %10944 = vmatmul.mubr.msk.f32.vlgmr.msra.gmra.mrb[52].mxu1 %vm98_vm0, %v2851_v25  ;;  %v9062_v25 = vld [vmem:[%s16883_s14 + $0x48] sm:$0xff] }
 0xa60   :  { %12328 = vmatpush3.bf16.msra.mxu1 %v12325_v4  ;;  %v12317_v16 = vpack.c.bf16 %v9062_v25, %v9061_v40 }
 0xa61   :  { %12330 = vmatprep.subr.bf16.mxu1 %v12329_v43 }
 0xa62   :  { %12318 = vmatprep.subr.bf16.mxu0 %v12317_v16 }
 0xa63   :  { %12320 = vmatpush3.bf16.msra.mxu0 %v12317_v16 }
 0xa64   :  { %12332 = vmatpush3.bf16.msra.mxu1 %v12329_v43 }
 0xb32   :  { %v10945_v23 = vpop.f32.mrb[52].mxu1 }
 0xb33   :  { %v2943_v56 = vadd.f32 %v10945_v23, %v9054_v19  ;;  %v2937_v30 = vpop.f32.mrb[53].mxu1  ;;  %v9064_v23 = vld [vmem:[%s16883_s14 + $0x58] sm:$0xff] }
 0xb34   :  { %v2938_v52 = vadd.f32 %v9054_v19, %v2937_v30  ;;  %v9063_v19 = vld [vmem:[%s16883_s14 + $0x50] sm:$0xff]  ;;  %v9085_v30 = vld [vmem:[%s16887_s18 + $0x40] sm:$0xff] }
 0xb35   :  { %v14640_v48 = vadd.f32 %v2943_v56, %v14425_v14  ;;  %v12321_v56 = vpack.c.bf16 %v9064_v23, %v9063_v19 }
 0xb36   :  { %v14643_v8 = vadd.f32 %v2938_v52, %v14414_v28  ;;  %v14656_v28 = vadd.f32 %v2115_v31, %v13955_v42  ;;  %v2120_v42 = vadd.f32 %v8992_v39, %v14552_v50  ;;  %v2143_v50 = vsel %vm98_vm0, %v14674_v1, 0.0  ;;  %v9086_v39 = vld [vmem:[%s16887_s18 + $0x48] sm:$0xff] }
 0xb37   :  { %v2955_v61 = vsel %vm98_vm0, %v14640_v48, 0.0  ;;  %v2961_v5 = vmul.f32 %v14640_v48, %v14640_v48  ;;  %12322 = vmatprep.subr.bf16.mxu0 %v12321_v56  ;;  %v14721_v52 = vpack.c.bf16 %v9086_v39, %v9085_v30 }
 0xb38   :  { %2956 = vadd.xlane.f32.xlu1 %v2955_v61  ;;  %v2952_v38 = vsel %vm98_vm0, %v14643_v8, 0.0  ;;  %v2960_v14 = vmul.f32 %v14643_v8, %v14643_v8  ;;  %v2137_v55 = vsel %vm98_vm0, %v14656_v28, 0.0  ;;  %v2151_v6 = vmul.f32 %v14656_v28, %v14656_v28  ;;  %12324 = vmatpush3.bf16.msra.mxu0 %v12321_v56 }
 0xb39   :  { %2953 = vadd.xlane.f32.xlu0 %v2952_v38  ;;  %v2965_v17 = vsel %vm98_vm0, %v2961_v5, 0.0  ;;  %v14678_v54 = vadd.f32 %v2120_v42, %v14023_v7  ;;  %v2163_v7 = vsel %vm98_vm0, %v2153_v24, 0.0  ;;  %12334 = vmatprep.subr.bf16.mxu0 %v14721_v52 }
 0xb3a   :  { %v2962_v51 = vsel %vm98_vm0, %v2960_v14, 0.0  ;;  %v2157_v58 = vsel %vm98_vm0, %v2151_v6, 0.0 }
 0xb3b   :  { %v2140_v11 = vsel %vm98_vm0, %v14678_v54, 0.0  ;;  %v2152_v33 = vmul.f32 %v14678_v54, %v14678_v54 }
 0xb3c   :  { %2966 = vadd.xlane.f32.xlu1 %v2965_v17 }
 0xb3d   :  { %2963 = vadd.xlane.f32.xlu0 %v2962_v51  ;;  %v2160_v2 = vsel %vm98_vm0, %v2152_v33, 0.0 }
 0xb40   :  { %2138 = vadd.xlane.f32.xlu1 %v2137_v55 }
 0xb41   :  { %2135 = vadd.xlane.f32.xlu0 %v2134_v15 }
 0xb44   :  { %2158 = vadd.xlane.f32.xlu1 %v2157_v58 }
 0xb45   :  { %2155 = vadd.xlane.f32.xlu0 %v2154_v9 }
 0xb48   :  { %2144 = vadd.xlane.f32.xlu1 %v2143_v50 }
 0xb49   :  { %2141 = vadd.xlane.f32.xlu0 %v2140_v11 }
 0xb4c   :  { %2164 = vadd.xlane.f32.xlu1 %v2163_v7 }
 0xb4d   :  { %2161 = vadd.xlane.f32.xlu0 %v2160_v2 }
 0xbc5   :  { %v2957_v31 = vpop.xlane.xlu1 %2956 }
 0xbc6   :  { %v2959_v61 = vmul.f32 0.03125, %v2957_v31  ;;  %v2954_v5 = vpop.xlane.xlu0 %2953  ;;  %v9059_v31 = vld [vmem:[%s16891_s22 + $0x1] ss:$0 sm:$0xff] }
 0xbc7   :  { %v2958_v37 = vmul.f32 0.03125, %v2954_v5 }
 0xbc8   :  { %v2971_v14 = vmul.f32 %v2959_v61, %v2959_v61  ;;  %v2975_v23 = vsub.f32 %v14640_v48, %v2959_v61  ;;  %v9060_v48 = vld [vmem:[%s16892_s23 + $0x1] ss:$0 sm:$0xff] }
 0xbc9   :  { %v2967_v38 = vpop.xlane.xlu1 %2966  ;;  %v2970_v45 = vmul.f32 %v2958_v37, %v2958_v37  ;;  %v2974_v39 = vsub.f32 %v14643_v8, %v2958_v37 }
 0xbca   :  { %v2969_v17 = vmul.f32 0.03125, %v2967_v38  ;;  %v2964_v51 = vpop.xlane.xlu0 %2963 }
 0xbcb   :  { %v2968_v55 = vmul.f32 0.03125, %v2964_v51 }
 0xbcc   :  { %v2973_v6 = vsub.f32 %v2969_v17, %v2971_v14 }
 0xbcd   :  { %v2972_v42 = vsub.f32 %v2968_v55, %v2970_v45  ;;  %v2139_v15 = vpop.xlane.xlu1 %2138 }
 0xbce   :  { %v2977_v41 = vadd.f32 1e-05, %v2973_v6  ;;  %v2147_v58 = vmul.f32 0.03125, %v2139_v15  ;;  %v2136_v9 = vpop.xlane.xlu0 %2135 }
 0xbcf   :  { %v2976_v50 = vadd.f32 1e-05, %v2972_v42  ;;  %v2146_v24 = vmul.f32 0.03125, %v2136_v9 }
 0xbd0   :  { %13097 = vrsqrt.f32 %v2977_v41  ;;  %v2171_v33 = vmul.f32 %v2147_v58, %v2147_v58 }
 0xbd1   :  { %13099 = vrsqrt.f32 %v2976_v50  ;;  %v2159_v11 = vpop.xlane.xlu1 %2158  ;;  %v2170_v10 = vmul.f32 %v2146_v24, %v2146_v24 }
 0xbd2   :  { %v2167_v7 = vmul.f32 0.03125, %v2159_v11  ;;  %v2156_v2 = vpop.xlane.xlu0 %2155  ;;  %v2179_v11 = vsub.f32 %v14656_v28, %v2147_v58 }
 0xbd3   :  { %v2166_v34 = vmul.f32 0.03125, %v2156_v2  ;;  %v8997_v2 = vld [vmem:[%s16891_s22] ss:$0 sm:$0xff] }
 0xbd4   :  { %v2175_v4 = vsub.f32 %v2167_v7, %v2171_v33  ;;  %v2178_v7 = vsub.f32 %v14660_v32, %v2146_v24  ;;  %v8998_v32 = vld [vmem:[%s16892_s23] ss:$0 sm:$0xff] }
 0xbd5   :  { %v2174_v57 = vsub.f32 %v2166_v34, %v2170_v10  ;;  %v2145_v59 = vpop.xlane.xlu1 %2144 }
 0xbd6   :  { %v2183_v43 = vadd.f32 1e-05, %v2175_v4  ;;  %v2149_v40 = vmul.f32 0.03125, %v2145_v59  ;;  %v2142_v25 = vpop.xlane.xlu0 %2141  ;;  %v9087_v4 = vld [vmem:[%s16887_s18 + $0x50] sm:$0xff] }
 0xbd7   :  { %v2182_v16 = vadd.f32 1e-05, %v2174_v57  ;;  %v2148_v19 = vmul.f32 0.03125, %v2142_v25  ;;  %v9088_v57 = vld [vmem:[%s16887_s18 + $0x58] sm:$0xff] }
 0xbd8   :  { %13101 = vrsqrt.f32 %v2183_v43  ;;  %v2173_v5 = vmul.f32 %v2149_v40, %v2149_v40  ;;  %v2181_v43 = vsub.f32 %v14674_v1, %v2149_v40 }
 0xbd9   :  { %13103 = vrsqrt.f32 %v2182_v16  ;;  %v2165_v56 = vpop.xlane.xlu1 %2164  ;;  %v2172_v45 = vmul.f32 %v2148_v19, %v2148_v19  ;;  %v12337_v16 = vpack.c.bf16 %v9088_v57, %v9087_v4 }
 0xbda   :  { %v13098_v30 = vpop.eup %13097  ;;  %v2169_v38 = vmul.f32 0.03125, %v2165_v56  ;;  %v2162_v14 = vpop.xlane.xlu0 %2161  ;;  %v2180_v56 = vsub.f32 %v14678_v54, %v2148_v19 }
 0xbdb   :  { %v13100_v17 = vpop.eup %13099  ;;  %v2981_v51 = vmul.f32 %v13098_v30, %v2975_v23  ;;  %v2168_v55 = vmul.f32 0.03125, %v2162_v14 }
 0xbdc   :  { %v2980_v6 = vmul.f32 %v13100_v17, %v2974_v39  ;;  %v2177_v42 = vsub.f32 %v2169_v38, %v2173_v5 }
 0xbdd   :  { %v2989_v61 = vmul.f32 %v9059_v31, %v2981_v51  ;;  %v2176_v15 = vsub.f32 %v2168_v55, %v2172_v45 }
 0xbde   :  { %v2988_v8 = vmul.f32 %v9059_v31, %v2980_v6  ;;  %v2185_v37 = vadd.f32 1e-05, %v2177_v42 }
 0xbdf   :  { %v2184_v41 = vadd.f32 1e-05, %v2176_v15  ;;  %v14734_v50 = vadd.f32 %v9060_v48, %v2989_v61 }
 0xbe0   :  { %v14732_v9 = vadd.f32 %v9060_v48, %v2988_v8  ;;  %13105 = vrsqrt.f32 %v2185_v37  ;;  %v14818_v8 = vld [vmem:[%s16884_s15 + $0x2] ss:$0 sm:$0xff] }
 0xbe1   :  { %13107 = vrsqrt.f32 %v2184_v41 }
 0xbe2   :  { %v13102_v33 = vpop.eup %13101  ;;  %10968 = vmatprep.mubr.msk.f32.mxu1 %vm98_vm0, %v14732_v9 }
 0xbe3   :  { %v13104_v10 = vpop.eup %13103  ;;  %v2191_v34 = vmul.f32 %v13102_v33, %v2179_v11  ;;  %10969 = vmatmul.mubr.msk.f32.vlgmr.msra.gmra.mrb[54].mxu1 %vm98_vm0, %v14734_v50 }
 0xbe4   :  { %10971 = vmatprep.mubr.msk.f32.mxu1 %vm98_vm0, %v14732_v9  ;;  %v2190_v28 = vmul.f32 %v13104_v10, %v2178_v7 }
 0xbe5   :  { %v2201_v58 = vmul.f32 %v8997_v2, %v2191_v34 }
 0xbe6   :  { %v2200_v24 = vmul.f32 %v8997_v2, %v2190_v28 }
 0xbe7   :  { %10972 = vmatmul.mubr.msk.f32.gmra.mrb[56].mxu1 %vm98_vm0, %v14734_v50  ;;  %v14763_v25 = vadd.f32 %v8998_v32, %v2201_v58 }
 0xbe8   :  { %10974 = vmatprep.mubr.msk.f32.mxu1 %vm98_vm0, %v14732_v9  ;;  %v14760_v59 = vadd.f32 %v8998_v32, %v2200_v24 }
 0xbea   :  { %v13106_v23 = vpop.eup %13105  ;;  %10954 = vmatprep.mubr.msk.f32.mxu0 %vm98_vm0, %v14760_v59 }
 0xbeb   :  { %v13108_v30 = vpop.eup %13107  ;;  %10955 = vmatmul.mubr.msk.f32.vlgmr.msra.gmra.mrb[48].mxu0 %vm98_vm0, %v14763_v25  ;;  %10975 = vmatmul.mubr.msk.f32.gmra.mrb[58].mxu1 %vm98_vm0, %v14734_v50  ;;  %v2193_v39 = vmul.f32 %v13106_v23, %v2181_v43 }
 0xbec   :  { %10977 = vmatprep.mubr.msk.f32.mxu1 %vm98_vm0, %v14732_v9  ;;  %12336 = vmatpush3.bf16.msra.mxu0 %v14721_v52  ;;  %v2192_v1 = vmul.f32 %v13108_v30, %v2180_v56  ;;  %v9076_v52 = vld [vmem:[%s16886_s17 + $0x2] ss:$0 sm:$0xff] }
 0xbed   :  { %v2203_v40 = vmul.f32 %v8997_v2, %v2193_v39  ;;  %12338 = vmatprep.subr.bf16.mxu0 %v12337_v16 }
 0xbee   :  { %v2202_v54 = vmul.f32 %v8997_v2, %v2192_v1 }
 0xbef   :  { %10978 = vmatmul.mubr.msk.f32.gmra.mrb[60].mxu1 %vm98_vm0, %v14734_v50  ;;  %v14779_v31 = vadd.f32 %v8998_v32, %v2203_v40  ;;  %v9090_v40 = vld [vmem:[%s16888_s19 + $0x2] ss:$0 sm:$0xff] }
 0xbf0   :  { %v14777_v19 = vadd.f32 %v8998_v32, %v2202_v54  ;;  %12340 = vmatpush3.bf16.msra.mxu0 %v12337_v16 }
 0xbf1   :  { %12366 = vmatprep.subr.bf16.mxu0 %v14593_v13 }
 0xbf2   :  { %10957 = vmatprep.mubr.msk.f32.mxu0 %vm98_vm0, %v14777_v19 }
 0xbf3   :  { %10958 = vmatmul.mubr.msk.f32.gmra.mrb[50].mxu0 %vm98_vm0, %v14779_v31 }
 0xbf4   :  { %10988 = vmatprep.mubr.msk.f32.mxu0 %vm98_vm0, %v14732_v9 }
 0xbf7   :  { %10989 = vmatmul.mubr.msk.f32.vlgmr.msra.gmra.mrb[52].mxu0 %vm98_vm0, %v14734_v50 }
 0xbf8   :  { %10991 = vmatprep.mubr.msk.f32.mxu0 %vm98_vm0, %v14732_v9  ;;  %12368 = vmatpush3.bf16.msra.mxu0 %v14593_v13 }
 0xbf9   :  { %12370 = vmatprep.subr.bf16.mxu0 %v14599_v63 }
 0xbfb   :  { %10992 = vmatmul.mubr.msk.f32.gmra.mrb[54].mxu0 %vm98_vm0, %v14734_v50 }
 0xbfc   :  { %10994 = vmatprep.mubr.msk.f32.mxu0 %vm98_vm0, %v14732_v9  ;;  %12372 = vmatpush3.bf16.msra.mxu0 %v14599_v63 }
 0xbfd   :  { %12374 = vmatprep.subr.bf16.mxu0 %v14604_v35 }
 0xbff   :  { %10995 = vmatmul.mubr.msk.f32.gmra.mrb[56].mxu0 %vm98_vm0, %v14734_v50 }
 0xc00   :  { %10997 = vmatprep.mubr.msk.f32.mxu0 %vm98_vm0, %v14732_v9  ;;  %12376 = vmatpush3.bf16.msra.mxu0 %v14604_v35 }
 0xc01   :  { %12378 = vmatprep.subr.bf16.mxu0 %v14610_v36 }
 0xc03   :  { %10998 = vmatmul.mubr.msk.f32.gmra.mrb[58].mxu0 %vm98_vm0, %v14734_v50 }
 0xc04   :  { %12380 = vmatpush3.bf16.msra.mxu0 %v14610_v36 }
 0xcb6   :  { %v10970_v5 = vpop.f32.mrb[54].mxu1 }
 0xcb7   :  { %v3203_v38 = vadd.f32 %v10970_v5, %v9076_v52  ;;  %v3197_v14 = vpop.f32.mrb[55].mxu1 }
 0xcb8   :  { %v3198_v17 = vadd.f32 %v9076_v52, %v3197_v14 }
 0xcb9   :  { %v3237_v51 = vmul.f32 %v3203_v38, %v14490_v27 }
 0xcba   :  { %v3236_v45 = vmul.f32 %v3198_v17, %v14497_v26  ;;  %v10973_v55 = vpop.f32.mrb[56].mxu1 }
 0xcbb   :  { %v3213_v6 = vadd.f32 %v10973_v55, %v9076_v52  ;;  %v3207_v42 = vpop.f32.mrb[57].mxu1 }
 0xcbc   :  { %v12341_v48 = vpack.c.bf16 %v3237_v51, %v3236_v45  ;;  %v3208_v61 = vadd.f32 %v9076_v52, %v3207_v42 }
 0xcbd   :  { %v3239_v15 = vmul.f32 %v3213_v6, %v14506_v29 }
 0xcbe   :  { %v3238_v37 = vmul.f32 %v3208_v61, %v14513_v0  ;;  %v10956_v41 = vpop.f32.mrb[48].mxu0  ;;  %v10976_v11 = vpop.f32.mrb[58].mxu1  ;;  %12343 = vmatprep.subr.msk.bf16.mxu1 %vm14198_vm1, %v12341_v48 }
 0xcbf   :  { %v3223_v33 = vadd.f32 %v10976_v11, %v9076_v52  ;;  %v3093_v7 = vpop.f32.mrb[49].mxu0  ;;  %v3217_v2 = vpop.f32.mrb[59].mxu1  ;;  %12346 = vmatpush3.bf16.xpose.msk.msra.mxu1 %vm14198_vm1, %v12341_v48 }
 0xcc0   :  { %v12347_v10 = vpack.c.bf16 %v3239_v15, %v3238_v37  ;;  %v3094_v34 = vadd.f32 %v14818_v8, %v3093_v7  ;;  %v3218_v28 = vadd.f32 %v9076_v52, %v3217_v2 }
 0xcc1   :  { %v3241_v32 = vmul.f32 %v3223_v33, %v14522_v20 }
 0xcc2   :  { %v3240_v58 = vmul.f32 %v3218_v28, %v14529_v44  ;;  %v10979_v24 = vpop.f32.mrb[60].mxu1  ;;  %12349 = vmatprep.subr.msk.bf16.mxu1 %vm14198_vm1, %v12347_v10  ;;  %11016 = vmatprep.mubr.msk.f32.mxu1 %vm98_vm0, %v3094_v34 }
 0xcc3   :  { %v3233_v4 = vadd.f32 %v10979_v24, %v9076_v52  ;;  %v3227_v57 = vpop.f32.mrb[61].mxu1 }
 0xcc4   :  { %v12353_v43 = vpack.c.bf16 %v3241_v32, %v3240_v58  ;;  %v3228_v16 = vadd.f32 %v9076_v52, %v3227_v57  ;;  %v3099_v58 = vadd.f32 %v10956_v41, %v14818_v8  ;;  %v2998_v41 = vld [vmem:[%s16928_s4] sm:$0xff] }
 0xcc5   :  { %v3243_v23 = vmul.f32 %v3233_v4, %v14537_v18 }
 0xcc6   :  { %v3242_v56 = vmul.f32 %v3228_v16, %v14542_v21  ;;  %v10959_v30 = vpop.f32.mrb[50].mxu0 }
 0xcc7   :  { %v3103_v39 = vpop.f32.mrb[51].mxu0  ;;  %12352 = vmatpush3.bf16.xpose.msk.msra.mxu1 %vm14198_vm1, %v12347_v10 }
 0xcc8   :  { %v12359_v1 = vpack.c.bf16 %v3243_v23, %v3242_v56  ;;  %12355 = vmatprep.subr.msk.bf16.mxu1 %vm14198_vm1, %v12353_v43 }
 0xcca   :  { %v10990_v54 = vpop.f32.mrb[52].mxu0 }
 0xccb   :  { %v3329_v5 = vadd.f32 %v10990_v54, %v9090_v40  ;;  %v3323_v52 = vpop.f32.mrb[53].mxu0 }
 0xccc   :  { %v3324_v38 = vadd.f32 %v9090_v40, %v3323_v52 }
 0xccd   :  { %v3363_v14 = vmul.f32 %v3329_v5, %v14490_v27 }
 0xcce   :  { %v3362_v17 = vmul.f32 %v3324_v38, %v14497_v26  ;;  %v10993_v51 = vpop.f32.mrb[54].mxu0 }
 0xccf   :  { %v3339_v45 = vadd.f32 %v10993_v51, %v9090_v40  ;;  %v3333_v55 = vpop.f32.mrb[55].mxu0  ;;  %12358 = vmatpush3.bf16.xpose.msk.msra.mxu1 %vm14198_vm1, %v12353_v43 }
 0xcd0   :  { %v3334_v6 = vadd.f32 %v9090_v40, %v3333_v55  ;;  %12361 = vmatprep.subr.msk.bf16.mxu1 %vm14198_vm1, %v12359_v1  ;;  %v14846_v42 = vpack.c.bf16 %v3363_v14, %v3362_v17 }
 0xcd1   :  { %v3365_v48 = vmul.f32 %v3339_v45, %v14506_v29 }
 0xcd2   :  { %v3364_v61 = vmul.f32 %v3334_v6, %v14513_v0  ;;  %v10996_v15 = vpop.f32.mrb[56].mxu0  ;;  %12382 = vmatprep.subr.bf16.mxu0 %v14846_v42 }
 0xcd3   :  { %v3349_v27 = vadd.f32 %v10996_v15, %v9090_v40  ;;  %v3343_v26 = vpop.f32.mrb[57].mxu0 }
 0xcd4   :  { %v3344_v37 = vadd.f32 %v9090_v40, %v3343_v26  ;;  %v14851_v11 = vpack.c.bf16 %v3365_v48, %v3364_v61 }
 0xcd5   :  { %v3367_v33 = vmul.f32 %v3349_v27, %v14522_v20  ;;  %v3104_v20 = vadd.f32 %v14818_v8, %v3103_v39 }
 0xcd6   :  { %v3366_v7 = vmul.f32 %v3344_v37, %v14529_v44  ;;  %v10999_v2 = vpop.f32.mrb[58].mxu0  ;;  %v3109_v44 = vadd.f32 %v10959_v30, %v14818_v8  ;;  %v3001_v8 = vld [vmem:[%s16928_s4 + $0x18] sm:$0xff] }
 0xcd7   :  { %v3359_v10 = vadd.f32 %v10999_v2, %v9090_v40  ;;  %v3353_v34 = vpop.f32.mrb[59].mxu0  ;;  %12364 = vmatpush3.bf16.xpose.msk.msra.mxu1 %vm14198_vm1, %v12359_v1 }
 0xcd8   :  { %v3354_v29 = vadd.f32 %v9090_v40, %v3353_v34  ;;  %v14857_v0 = vpack.c.bf16 %v3367_v33, %v3366_v7  ;;  %v3000_v40 = vld [vmem:[%s16928_s4 + $0x10] sm:$0xff] }
 0xcd9   :  { %v3369_v28 = vmul.f32 %v3359_v10, %v14537_v18  ;;  %v2999_v18 = vld [vmem:[%s16928_s4 + $0x8] sm:$0xff] }
 0xcda   :  { %v3368_v32 = vmul.f32 %v3354_v29, %v14542_v21 }
 0xcdc   :  { %v14862_v24 = vpack.c.bf16 %v3369_v28, %v3368_v32  ;;  %v9133_v28 = vld [vmem:[%s16918_s6 + $0x80] sm:$0xff] }
 0xcde   :  { %11017 = vmatmul.mubr.msk.f32.vlgmr.msra.gmra.mrb[62].mxu1 %vm98_vm0, %v3099_v58  ;;  %v9136_v58 = vld [vmem:[%s16918_s6 + $0x98] sm:$0xff] }
 0xcdf   :  { %11019 = vmatprep.mubr.msk.f32.mxu1 %vm98_vm0, %v3104_v20 }
 0xce2   :  { %11020 = vmatmul.mubr.msk.f32.gmra.mrb[64].mxu1 %vm98_vm0, %v3109_v44  ;;  %v9163_v44 = vld [vmem:[%s16918_s6 + $0xa0] sm:$0xff] }
 0xdb1   :  { %v11018_v4 = vpop.f32.mrb[62].mxu1 }
 0xdb2   :  { %v3492_v21 = vmul.f32 0.35355338, %v11018_v4  ;;  %v3472_v57 = vpop.f32.mrb[63].mxu1 }
 0xdb3   :  { %v3491_v43 = vmul.f32 0.35355338, %v3472_v57  ;;  %v14931_v57 = vld [vmem:[%s16919_s28] sm:$0xff] }
 0xdb4   :  { %v3496_v16 = vsub.f32 %v3492_v21, %v2999_v18  ;;  %v9166_v18 = vld [vmem:[%s16918_s6 + $0xb8] sm:$0xff] }
 0xdb5   :  { %v11021_v23 = vpop.f32.mrb[64].mxu1  ;;  %v3495_v56 = vsub.f32 %v3491_v43, %v2998_v41  ;;  %v14938_v41 = vld [vmem:[%s16919_s28 + $0x8] sm:$0xff]  ;;  %v14945_v43 = vld [vmem:[%s16919_s28 + $0x10] sm:$0xff] }
 0xdb6   :  { %v3494_v30 = vmul.f32 0.35355338, %v11021_v23  ;;  %v3482_v39 = vpop.f32.mrb[65].mxu1  ;;  %v3502_v1 = vsel %vm2679_vm2, %v3496_v16, -inf  ;;  %v9173_v23 = vld [vmem:[%s16879_s10 + $0x280] sm:$0xff] }
 0xdb7   :  { %v3493_v54 = vmul.f32 0.35355338, %v3482_v39  ;;  %3503 = vmax.xlane.f32.xlu1 %v3502_v1  ;;  %v3499_v5 = vsel %vm2679_vm2, %v3495_v56, -inf  ;;  %v9176_v39 = vld [vmem:[%s16879_s10 + $0x298] sm:$0xff]  ;;  %v9119_v1 = vld [vmem:[%s16889_s20 + $0x40] sm:$0xff] }
 0xdb8   :  { %3500 = vmax.xlane.f32.xlu0 %v3499_v5  ;;  %v3498_v52 = vsub.f32 %v3494_v30, %v3001_v8  ;;  %v9175_v30 = vld [vmem:[%s16879_s10 + $0x290] sm:$0xff]  ;;  %v9177_v5 = vld [vmem:[%s16879_s10 + $0x2a0] sm:$0xff] }
 0xdb9   :  { %v3497_v38 = vsub.f32 %v3493_v54, %v3000_v40  ;;  %v12457_v40 = vpack.c.bf16 %v9176_v39, %v9175_v30  ;;  %v9120_v54 = vld [vmem:[%s16889_s20 + $0x48] sm:$0xff] }
 0xdba   :  { %v3508_v14 = vsel %vm2679_vm2, %v3498_v52, -inf }
 0xdbb   :  { %3509 = vmax.xlane.f32.xlu1 %v3508_v14  ;;  %v3505_v17 = vsel %vm2679_vm2, %v3497_v38, -inf }
 0xdbc   :  { %3506 = vmax.xlane.f32.xlu0 %v3505_v17  ;;  %v9121_v17 = vld [vmem:[%s16889_s20 + $0x50] sm:$0xff] }
 0xe44   :  { %v3504_v51 = vpop.xlane.xlu1 %3503 }
 0xe45   :  { %v3512_v45 = vsub.f32 %v3496_v16, %v3504_v51  ;;  %v3501_v55 = vpop.xlane.xlu0 %3500  ;;  %v14952_v16 = vld [vmem:[%s16919_s28 + $0x18] sm:$0xff] }
 0xe46   :  { %v3511_v6 = vsub.f32 %v3495_v56, %v3501_v55  ;;  %v9174_v56 = vld [vmem:[%s16879_s10 + $0x288] sm:$0xff]  ;;  %v9122_v51 = vld [vmem:[%s16889_s20 + $0x58] sm:$0xff]  ;;  %v9179_v55 = vld [vmem:[%s16879_s10 + $0x2b0] sm:$0xff] }
 0xe47   :  { %v3517_v48 = vmul.f32 1.442695, %v3512_v45  ;;  %v12453_v8 = vpack.c.bf16 %v9174_v56, %v9173_v23  ;;  %v12401_v45 = vpack.c.bf16 %v9122_v51, %v9121_v17  ;;  %v9138_v51 = vld [vmem:[%s16921_s30 + $0x4] ss:$0 sm:$0xff] }
 0xe48   :  { %v3515_v61 = vmul.f32 1.442695, %v3511_v6  ;;  %v3510_v15 = vpop.xlane.xlu1 %3509  ;;  %v9180_v6 = vld [vmem:[%s16879_s10 + $0x2b8] sm:$0xff] }
 0xe49   :  { %v3514_v27 = vsub.f32 %v3498_v52, %v3510_v15  ;;  %v3507_v26 = vpop.xlane.xlu0 %3506  ;;  %v9178_v52 = vld [vmem:[%s16879_s10 + $0x2a8] sm:$0xff] }
 0xe4a   :  { %13109 = vpow2.f32 %v3515_v61  ;;  %v3513_v37 = vsub.f32 %v3497_v38, %v3507_v26  ;;  %v12397_v38 = vpack.c.bf16 %v9120_v54, %v9119_v1  ;;  %v12461_v14 = vpack.c.bf16 %v9178_v52, %v9177_v5  ;;  %v9141_v61 = vld [vmem:[%s16879_s10 + $0x200] sm:$0xff]  ;;  %v9142_v15 = vld [vmem:[%s16879_s10 + $0x208] sm:$0xff] }
 0xe4b   :  { %13111 = vpow2.f32 %v3517_v48  ;;  %v3521_v33 = vmul.f32 1.442695, %v3514_v27  ;;  %v12465_v48 = vpack.c.bf16 %v9180_v6, %v9179_v55  ;;  %v12413_v27 = vpack.c.bf16 %v9142_v15, %v9141_v61  ;;  %v9181_v26 = vld [vmem:[%s16879_s10 + $0x2c0] sm:$0xff]  ;;  %v9146_v5 = vld [vmem:[%s16879_s10 + $0x228] sm:$0xff]  ;;  %v9147_v6 = vld [vmem:[%s16879_s10 + $0x230] sm:$0xff] }
 0xe4c   :  { %v3519_v7 = vmul.f32 1.442695, %v3513_v37  ;;  %12398 = vmatprep.subr.bf16.mxu1 %v12397_v38  ;;  %v9182_v37 = vld [vmem:[%s16879_s10 + $0x2c8] sm:$0xff]  ;;  %v9145_v54 = vld [vmem:[%s16879_s10 + $0x220] sm:$0xff] }
 0xe4d   :  { %12400 = vmatpush3.bf16.msra.mxu1 %v12397_v38 }
 0xe4e   :  { %13113 = vpow2.f32 %v3519_v7  ;;  %12402 = vmatprep.subr.bf16.mxu1 %v12401_v45  ;;  %v9183_v7 = vld [vmem:[%s16879_s10 + $0x2d0] sm:$0xff] }
 0xe4f   :  { %13115 = vpow2.f32 %v3521_v33  ;;  %v12469_v33 = vpack.c.bf16 %v9182_v37, %v9181_v26  ;;  %v9149_v37 = vld [vmem:[%s16879_s10 + $0x240] sm:$0xff] }
 0xe51   :  { %12404 = vmatpush3.bf16.msra.mxu1 %v12401_v45  ;;  %v12421_v45 = vpack.c.bf16 %v9146_v5, %v9145_v54  ;;  %v13243_v5 = vld [vmem:[%s16920_s9] sm:$0xff] }
 0xe52   :  { %12414 = vmatprep.subr.bf16.mxu1 %v12413_v27 }
 0xe54   :  { %v13110_v2 = vpop.eup %13109 }
 0xe55   :  { %v13112_v10 = vpop.eup %13111  ;;  %11038 = vmatprep.mubr.msk.f32.mxu0 %vm2679_vm2, %v13110_v2 }
 0xe56   :  { %11039 = vmatmul.mubr.msk.f32.vlgmr.msra.gmra.mrb[60].mxu0 %vm2679_vm2, %v13112_v10 }
 0xe57   :  { %12384 = vmatpush3.bf16.msra.mxu0 %v14846_v42  ;;  %v9134_v42 = vld [vmem:[%s16918_s6 + $0x88] sm:$0xff] }
 0xe58   :  { %v13114_v34 = vpop.eup %13113  ;;  %12386 = vmatprep.subr.bf16.mxu0 %v14851_v11  ;;  %v12405_v32 = vpack.c.bf16 %v9134_v42, %v9133_v28  ;;  %v9187_v42 = vld [vmem:[%s16879_s10 + $0x2f0] sm:$0xff] }
 0xe59   :  { %v13116_v29 = vpop.eup %13115  ;;  %11041 = vmatprep.mubr.msk.f32.mxu0 %vm2679_vm2, %v13114_v34 }
 0xe5a   :  { %11042 = vmatmul.mubr.msk.f32.gmra.mrb[62].mxu0 %vm2679_vm2, %v13116_v29 }
 0xe5b   :  { %12388 = vmatpush3.bf16.msra.mxu0 %v14851_v11  ;;  %11060 = vmatprep.mubr.msk.f32.mxu0 %vm2679_vm2, %v13110_v2  ;;  %v9135_v11 = vld [vmem:[%s16918_s6 + $0x90] sm:$0xff]  ;;  %v9184_v2 = vld [vmem:[%s16879_s10 + $0x2d8] sm:$0xff] }
 0xe5c   :  { %12390 = vmatprep.subr.bf16.mxu0 %v14857_v0  ;;  %v12409_v20 = vpack.c.bf16 %v9136_v58, %v9135_v11 }
 0xe5f   :  { %12392 = vmatpush3.bf16.msra.mxu0 %v14857_v0  ;;  %v9164_v0 = vld [vmem:[%s16918_s6 + $0xa8] sm:$0xff] }
 0xe60   :  { %12394 = vmatprep.subr.bf16.mxu0 %v14862_v24  ;;  %v12445_v4 = vpack.c.bf16 %v9164_v0, %v9163_v44 }
 0xe63   :  { %12396 = vmatpush3.bf16.msra.mxu0 %v14862_v24  ;;  %v9165_v24 = vld [vmem:[%s16918_s6 + $0xb0] sm:$0xff] }
 0xe64   :  { %12406 = vmatprep.subr.bf16.mxu0 %v12405_v32  ;;  %v12449_v21 = vpack.c.bf16 %v9166_v18, %v9165_v24  ;;  %v9143_v18 = vld [vmem:[%s16879_s10 + $0x210] sm:$0xff] }
 0xe66   :  { %11061 = vmatmul.mubr.msk.f32.vlgmr.msra.gmra.mrb[64].mxu0 %vm2679_vm2, %v13112_v10  ;;  %v12473_v10 = vpack.c.bf16 %v9184_v2, %v9183_v7  ;;  %v9168_v7 = vld [vmem:[%s16921_s30 + $0x5] ss:$0 sm:$0xff] }
 0xe67   :  { %11063 = vmatprep.mubr.msk.f32.mxu0 %vm2679_vm2, %v13114_v34  ;;  %12408 = vmatpush3.bf16.msra.mxu0 %v12405_v32  ;;  %v9185_v34 = vld [vmem:[%s16879_s10 + $0x2e0] sm:$0xff]  ;;  %v9188_v32 = vld [vmem:[%s16879_s10 + $0x2f8] sm:$0xff] }
 0xe68   :  { %12410 = vmatprep.subr.bf16.mxu0 %v12409_v20  ;;  %v12481_v11 = vpack.c.bf16 %v9188_v32, %v9187_v42 }
 0xe6a   :  { %11064 = vmatmul.mubr.msk.f32.gmra.mrb[66].mxu0 %vm2679_vm2, %v13116_v29  ;;  %v9186_v29 = vld [vmem:[%s16879_s10 + $0x2e8] sm:$0xff] }
 0xe6b   :  { %12412 = vmatpush3.bf16.msra.mxu0 %v12409_v20  ;;  %11088 = vmatprep.mubr.msk.f32.mxu0 %vm98_vm0, %v14732_v9  ;;  %v12477_v28 = vpack.c.bf16 %v9186_v29, %v9185_v34  ;;  %v9151_v34 = vld [vmem:[%s16879_s10 + $0x250] sm:$0xff]  ;;  %v9152_v29 = vld [vmem:[%s16879_s10 + $0x258] sm:$0xff] }
 0xe6c   :  { %12446 = vmatprep.subr.bf16.mxu0 %v12445_v4 }
 0xe6e   :  { %11089 = vmatmul.mubr.msk.f32.vlgmr.msra.gmra.mrb[68].mxu0 %vm98_vm0, %v14734_v50 }
 0xe6f   :  { %12448 = vmatpush3.bf16.msra.mxu0 %v12445_v4  ;;  %11134 = vmatprep.mubr.msk.f32.mxu0 %vm98_vm0, %v14931_v57 }
 0xe70   :  { %12450 = vmatprep.subr.bf16.mxu0 %v12449_v21 }
 0xe73   :  { %12452 = vmatpush3.bf16.msra.mxu0 %v12449_v21  ;;  %v9144_v21 = vld [vmem:[%s16879_s10 + $0x218] sm:$0xff] }
 0xe74   :  { %12454 = vmatprep.subr.bf16.mxu0 %v12453_v8  ;;  %v12417_v39 = vpack.c.bf16 %v9144_v21, %v9143_v18 }
 0xe76   :  { %11135 = vmatmul.mubr.msk.f32.vlgmr.msra.gmra.mrb[70].mxu0 %vm98_vm0, %v14938_v41 }
 0xe77   :  { %11137 = vmatprep.mubr.msk.f32.mxu0 %vm98_vm0, %v14945_v43  ;;  %12456 = vmatpush3.bf16.msra.mxu0 %v12453_v8 }
 0xe78   :  { %12458 = vmatprep.subr.bf16.mxu0 %v12457_v40 }
 0xe7a   :  { %11138 = vmatmul.mubr.msk.f32.gmra.mrb[72].mxu0 %vm98_vm0, %v14952_v16 }
 0xe7b   :  { %12460 = vmatpush3.bf16.msra.mxu0 %v12457_v40 }
 0xe7c   :  { %12462 = vmatprep.subr.bf16.mxu0 %v12461_v14 }
 0xe7f   :  { %12464 = vmatpush3.bf16.msra.mxu0 %v12461_v14 }
 0xe80   :  { %12466 = vmatprep.subr.bf16.mxu0 %v12465_v48 }
 0xe83   :  { %12468 = vmatpush3.bf16.msra.mxu0 %v12465_v48  ;;  %v9148_v48 = vld [vmem:[%s16879_s10 + $0x238] sm:$0xff] }
 0xe84   :  { %12470 = vmatprep.subr.bf16.mxu0 %v12469_v33 }
 0xe87   :  { %12472 = vmatpush3.bf16.msra.mxu0 %v12469_v33  ;;  %v9150_v33 = vld [vmem:[%s16879_s10 + $0x248] sm:$0xff] }
 0xe88   :  { %12474 = vmatprep.subr.bf16.mxu0 %v12473_v10  ;;  %v12429_v2 = vpack.c.bf16 %v9150_v33, %v9149_v37 }
 0xe8b   :  { %12476 = vmatpush3.bf16.msra.mxu0 %v12473_v10 }
 0xe8c   :  { %12478 = vmatprep.subr.bf16.mxu0 %v12477_v28 }
 0xe8f   :  { %12480 = vmatpush3.bf16.msra.mxu0 %v12477_v28 }
 0xe90   :  { %12482 = vmatprep.subr.bf16.mxu0 %v12481_v11 }
 0xe93   :  { %12484 = vmatpush3.bf16.msra.mxu0 %v12481_v11 }
 0xf29   :  { %v11040_v58 = vpop.f32.mrb[60].mxu0 }
 0xf2a   :  { %v3601_v20 = vpop.f32.mrb[61].mxu0  ;;  %13117 = vrcp.f32 %v11040_v58  ;;  %v12433_v58 = vpack.c.bf16 %v9152_v29, %v9151_v34 }
 0xf2b   :  { %13119 = vrcp.f32 %v3601_v20 }
 0xf2d   :  { %v11043_v44 = vpop.f32.mrb[62].mxu0 }
 0xf2e   :  { %v3611_v0 = vpop.f32.mrb[63].mxu0  ;;  %13121 = vrcp.f32 %v11043_v44  ;;  %v9153_v44 = vld [vmem:[%s16879_s10 + $0x260] sm:$0xff] }
 0xf2f   :  { %13123 = vrcp.f32 %v3611_v0  ;;  %v9154_v0 = vld [vmem:[%s16879_s10 + $0x268] sm:$0xff] }
 0xf34   :  { %v13118_v4 = vpop.eup %13117 }
 0xf35   :  { %v13120_v23 = vpop.eup %13119 }
 0xf38   :  { %v13122_v1 = vpop.eup %13121 }
 0xf39   :  { %v11062_v24 = vpop.f32.mrb[64].mxu0  ;;  %v13124_v52 = vpop.eup %13123 }
 0xf3a   :  { %v3710_v56 = vmul.f32 %v13118_v4, %v11062_v24  ;;  %v3686_v8 = vpop.f32.mrb[65].mxu0 }
 0xf3b   :  { %v3709_v30 = vmul.f32 %v13120_v23, %v3686_v8  ;;  %v12437_v23 = vpack.c.bf16 %v9154_v0, %v9153_v44  ;;  %v9155_v8 = vld [vmem:[%s16879_s10 + $0x270] sm:$0xff] }
 0xf3d   :  { %v11065_v40 = vpop.f32.mrb[66].mxu0  ;;  %11074 = vmatprep.mubr.msk.f32.mxu1 %vm98_vm0, %v3709_v30  ;;  %v9156_v30 = vld [vmem:[%s16879_s10 + $0x278] sm:$0xff] }
 0xf3e   :  { %v3712_v38 = vmul.f32 %v13122_v1, %v11065_v40  ;;  %v3696_v14 = vpop.f32.mrb[67].mxu0  ;;  %11075 = vmatmul.mubr.msk.f32.vlgmr.msra.gmra.mrb[66].mxu1 %vm98_vm0, %v3710_v56  ;;  %v12441_v1 = vpack.c.bf16 %v9156_v30, %v9155_v8 }
 0xf3f   :  { %v3711_v17 = vmul.f32 %v13124_v52, %v3696_v14  ;;  %12416 = vmatpush3.bf16.msra.mxu1 %v12413_v27  ;;  %v12425_v27 = vpack.c.bf16 %v9148_v48, %v9147_v6  ;;  %v9195_v52 = vld [vmem:[%s16918_s6 + $0xc0] sm:$0xff] }
 0xf40   :  { %12418 = vmatprep.subr.bf16.mxu1 %v12417_v39  ;;  %v9124_v6 = vld [vmem:[%s16890_s21 + $0x2] ss:$0 sm:$0xff] }
 0xf41   :  { %11077 = vmatprep.mubr.msk.f32.mxu1 %vm98_vm0, %v3711_v17  ;;  %v11090_v55 = vpop.f32.mrb[68].mxu0  ;;  %v9197_v17 = vld [vmem:[%s16918_s6 + $0xd0] sm:$0xff] }
 0xf42   :  { %11078 = vmatmul.mubr.msk.f32.gmra.mrb[68].mxu1 %vm98_vm0, %v3712_v38  ;;  %v3990_v61 = vpop.f32.mrb[69].mxu0  ;;  %v3996_v40 = vadd.f32 %v11090_v55, %v9138_v51  ;;  %v9196_v38 = vld [vmem:[%s16918_s6 + $0xc8] sm:$0xff] }
 0xf43   :  { %v3991_v15 = vadd.f32 %v9138_v51, %v3990_v61  ;;  %12420 = vmatpush3.bf16.msra.mxu1 %v12417_v39  ;;  %v12485_v14 = vpack.c.bf16 %v9196_v38, %v9195_v52  ;;  %v9198_v51 = vld [vmem:[%s16918_s6 + $0xd8] sm:$0xff]  ;;  %v13244_v55 = vld [vmem:[%s16920_s9 + $0x8] sm:$0xff] }
 0xf44   :  { %12422 = vmatprep.subr.bf16.mxu1 %v12421_v45  ;;  %v4000_v54 = vmax.f32 %v3996_v40, 0.0 }
 0xf45   :  { %v3999_v26 = vmax.f32 %v3991_v15, 0.0 }
 0xf47   :  { %12424 = vmatpush3.bf16.msra.mxu1 %v12421_v45  ;;  %11123 = vmatprep.mubr.f32.mxu1 %v3999_v26  ;;  %v12489_v45 = vpack.c.bf16 %v9198_v51, %v9197_v17  ;;  %v9158_v51 = vld [vmem:[%s16880_s11 + $0x4] ss:$0 sm:$0xff] }
 0xf48   :  { %12426 = vmatprep.subr.bf16.mxu1 %v12425_v27 }
 0xf49   :  { %v11136_v10 = vpop.f32.mrb[70].mxu0 }
 0xf4a   :  { %v4257_v28 = vadd.f32 %v11136_v10, %v9168_v7  ;;  %v4251_v42 = vpop.f32.mrb[71].mxu0 }
 0xf4b   :  { %12428 = vmatpush3.bf16.msra.mxu1 %v12425_v27  ;;  %v4252_v32 = vadd.f32 %v9168_v7, %v4251_v42 }
 0xf4c   :  { %v4271_v11 = vmax.f32 %v4257_v28, 0.0  ;;  %12430 = vmatprep.subr.bf16.mxu1 %v12429_v2 }
 0xf4d   :  { %v4270_v20 = vmax.f32 %v4252_v32, 0.0  ;;  %v11139_v4 = vpop.f32.mrb[72].mxu0 }
 0xf4e   :  { %v4267_v24 = vadd.f32 %v11139_v4, %v9168_v7  ;;  %v4261_v18 = vpop.f32.mrb[73].mxu0 }
 0xf4f   :  { %12432 = vmatpush3.bf16.msra.mxu1 %v12429_v2  ;;  %11172 = vmatprep.mubr.f32.mxu0 %v4270_v20  ;;  %v4262_v21 = vadd.f32 %v9168_v7, %v4261_v18  ;;  %v9190_v18 = vld [vmem:[%s16880_s11 + $0x5] ss:$0 sm:$0xff] }
 0xf50   :  { %11173 = vmatmul.mubr.f32.vlgmr.msra.gmra.mrb[74].mxu0 %v4271_v11  ;;  %12434 = vmatprep.subr.bf16.mxu1 %v12433_v58  ;;  %v4273_v56 = vmax.f32 %v4267_v24, 0.0 }
 0xf51   :  { %v4272_v39 = vmax.f32 %v4262_v21, 0.0 }
 0xf53   :  { %12436 = vmatpush3.bf16.msra.mxu1 %v12433_v58  ;;  %11175 = vmatprep.mubr.f32.mxu0 %v4272_v39 }
 0xf54   :  { %12438 = vmatprep.subr.bf16.mxu1 %v12437_v23  ;;  %11176 = vmatmul.mubr.f32.gmra.mrb[76].mxu0 %v4273_v56 }
 0xf57   :  { %12440 = vmatpush3.bf16.msra.mxu1 %v12437_v23 }
 0xf58   :  { %12442 = vmatprep.subr.bf16.mxu1 %v12441_v1 }
 0xf5b   :  { %12444 = vmatpush3.bf16.msra.mxu1 %v12441_v1 }
 0xf5c   :  { %12486 = vmatprep.subr.bf16.mxu1 %v12485_v14 }
 0xf5e   :  { %11124 = vmatmul.mubr.f32.vlgmr.msra.gmra.mrb[70].mxu1 %v4000_v54 }
 0xf5f   :  { %11186 = vmatprep.mubr.msk.f32.mxu1 %vm98_vm0, %v13243_v5  ;;  %12488 = vmatpush3.bf16.msra.mxu1 %v12485_v14 }
 0xf60   :  { %12490 = vmatprep.subr.bf16.mxu1 %v12489_v45 }
 0xf63   :  { %12492 = vmatpush3.bf16.msra.mxu1 %v12489_v45 }
 0xf66   :  { %11187 = vmatmul.mubr.msk.f32.vlgmr.msra.gmra.mrb[72].mxu1 %vm98_vm0, %v13244_v55 }
0x1011   :  { %v11076_v48 = vpop.f32.mrb[66].mxu1 }
0x1012   :  { %v3810_v61 = vadd.f32 %v11076_v48, %v9124_v6  ;;  %v3804_v15 = vpop.f32.mrb[67].mxu1 }
0x1013   :  { %v3805_v27 = vadd.f32 %v9124_v6, %v3804_v15 }
0x1014   :  { %v15098_v26 = vadd.f32 %v3810_v61, %v14763_v25 }
0x1015   :  { %v15101_v37 = vadd.f32 %v3805_v27, %v14760_v59  ;;  %v11079_v33 = vpop.f32.mrb[68].mxu1 }
0x1016   :  { %v3820_v7 = vadd.f32 %v11079_v33, %v9124_v6  ;;  %v3814_v2 = vpop.f32.mrb[69].mxu1  ;;  %v3834_v10 = vsel %vm98_vm0, %v15098_v26, 0.0  ;;  %v3848_v34 = vmul.f32 %v15098_v26, %v15098_v26 }
0x1017   :  { %v3815_v29 = vadd.f32 %v9124_v6, %v3814_v2  ;;  %3835 = vadd.xlane.f32.xlu1 %v3834_v10  ;;  %v3831_v28 = vsel %vm98_vm0, %v15101_v37, 0.0  ;;  %v3847_v42 = vmul.f32 %v15101_v37, %v15101_v37  ;;  %v9226_v10 = vld [vmem:[%s16918_s6 + $0xe8] sm:$0xff] }
0x1018   :  { %3832 = vadd.xlane.f32.xlu0 %v3831_v28  ;;  %v15112_v32 = vadd.f32 %v3820_v7, %v14779_v31  ;;  %v3854_v11 = vsel %vm98_vm0, %v3848_v34, 0.0 }
0x1019   :  { %v15116_v58 = vadd.f32 %v3815_v29, %v14777_v19  ;;  %v3851_v20 = vsel %vm98_vm0, %v3847_v42, 0.0  ;;  %v9227_v42 = vld [vmem:[%s16918_s6 + $0xf0] sm:$0xff] }
0x101a   :  { %v3840_v44 = vsel %vm98_vm0, %v15112_v32, 0.0  ;;  %v3850_v0 = vmul.f32 %v15112_v32, %v15112_v32 }
0x101b   :  { %3855 = vadd.xlane.f32.xlu1 %v3854_v11  ;;  %v3837_v4 = vsel %vm98_vm0, %v15116_v58, 0.0  ;;  %v3849_v24 = vmul.f32 %v15116_v58, %v15116_v58  ;;  %v9228_v11 = vld [vmem:[%s16918_s6 + $0xf8] sm:$0xff] }
0x101c   :  { %3852 = vadd.xlane.f32.xlu0 %v3851_v20  ;;  %v3860_v21 = vsel %vm98_vm0, %v3850_v0, 0.0  ;;  %v12529_v20 = vpack.c.bf16 %v9228_v11, %v9227_v42 }
0x101d   :  { %v3857_v56 = vsel %vm98_vm0, %v3849_v24, 0.0 }
0x101f   :  { %3841 = vadd.xlane.f32.xlu1 %v3840_v44 }
0x1020   :  { %3838 = vadd.xlane.f32.xlu0 %v3837_v4 }
0x1023   :  { %v11174_v23 = vpop.f32.mrb[74].mxu0  ;;  %3861 = vadd.xlane.f32.xlu1 %v3860_v21  ;;  %v9203_v21 = vld [vmem:[%s16879_s10 + $0x300] sm:$0xff] }
0x1024   :  { %v4371_v8 = vadd.f32 %v11174_v23, %v9190_v18  ;;  %3858 = vadd.xlane.f32.xlu0 %v3857_v56  ;;  %v4365_v30 = vpop.f32.mrb[75].mxu0  ;;  %v9204_v23 = vld [vmem:[%s16879_s10 + $0x308] sm:$0xff] }
0x1025   :  { %v4366_v39 = vadd.f32 %v9190_v18, %v4365_v30  ;;  %v12493_v56 = vpack.c.bf16 %v9204_v23, %v9203_v21  ;;  %v9206_v30 = vld [vmem:[%s16879_s10 + $0x318] sm:$0xff] }
0x1026   :  { %v15133_v1 = vadd.f32 %v14938_v41, %v4371_v8  ;;  %v9205_v8 = vld [vmem:[%s16879_s10 + $0x310] sm:$0xff] }
0x1027   :  { %v15136_v40 = vadd.f32 %v14931_v57, %v4366_v39  ;;  %v11177_v54 = vpop.f32.mrb[76].mxu0  ;;  %12494 = vmatprep.subr.bf16.mxu1 %v12493_v56  ;;  %v12497_v39 = vpack.c.bf16 %v9206_v30, %v9205_v8 }
0x1028   :  { %v4395_v5 = vsel %vm98_vm0, %v15133_v1, 0.0  ;;  %v4375_v52 = vpop.f32.mrb[77].mxu0  ;;  %v4409_v14 = vmul.f32 %v15133_v1, %v15133_v1  ;;  %v4381_v41 = vadd.f32 %v11177_v54, %v9190_v18  ;;  %12496 = vmatpush3.bf16.msra.mxu1 %v12493_v56  ;;  %v9207_v54 = vld [vmem:[%s16879_s10 + $0x320] sm:$0xff] }
0x1029   :  { %4396 = vadd.xlane.f32.xlu0 %v4395_v5  ;;  %v4392_v38 = vsel %vm98_vm0, %v15136_v40, 0.0  ;;  %v4408_v57 = vmul.f32 %v15136_v40, %v15136_v40  ;;  %v4376_v15 = vadd.f32 %v9190_v18, %v4375_v52  ;;  %12498 = vmatprep.subr.bf16.mxu1 %v12497_v39  ;;  %v9208_v5 = vld [vmem:[%s16879_s10 + $0x328] sm:$0xff] }
0x102a   :  { %v4415_v17 = vsel %vm98_vm0, %v4409_v14, 0.0  ;;  %v15153_v48 = vadd.f32 %v14952_v16, %v4381_v41  ;;  %v9225_v16 = vld [vmem:[%s16918_s6 + $0xe0] sm:$0xff]  ;;  %v12501_v52 = vpack.c.bf16 %v9208_v5, %v9207_v54  ;;  %v9210_v14 = vld [vmem:[%s16879_s10 + $0x338] sm:$0xff] }
0x102b   :  { %v4412_v61 = vsel %vm98_vm0, %v4408_v57, 0.0  ;;  %v15157_v27 = vadd.f32 %v14945_v43, %v4376_v15  ;;  %v12525_v43 = vpack.c.bf16 %v9226_v10, %v9225_v16  ;;  %v9211_v41 = vld [vmem:[%s16879_s10 + $0x340] sm:$0xff]  ;;  %v9212_v57 = vld [vmem:[%s16879_s10 + $0x348] sm:$0xff]  ;;  %v9218_v16 = vld [vmem:[%s16879_s10 + $0x378] sm:$0xff] }
0x102c   :  { %v4401_v33 = vsel %vm98_vm0, %v15153_v48, 0.0  ;;  %v4411_v29 = vmul.f32 %v15153_v48, %v15153_v48  ;;  %12500 = vmatpush3.bf16.msra.mxu1 %v12497_v39  ;;  %v9215_v15 = vld [vmem:[%s16879_s10 + $0x360] sm:$0xff] }
0x102d   :  { %4393 = vadd.xlane.f32.xlu0 %v4392_v38  ;;  %v4398_v7 = vsel %vm98_vm0, %v15157_v27, 0.0  ;;  %v4410_v2 = vmul.f32 %v15157_v27, %v15157_v27  ;;  %12526 = vmatprep.subr.bf16.mxu0 %v12525_v43  ;;  %v9209_v38 = vld [vmem:[%s16879_s10 + $0x330] sm:$0xff] }
0x102e   :  { %12528 = vmatpush3.bf16.msra.mxu0 %v12525_v43  ;;  %v4421_v44 = vsel %vm98_vm0, %v4411_v29, 0.0  ;;  %12502 = vmatprep.subr.bf16.mxu1 %v12501_v52  ;;  %v9200_v43 = vld [vmem:[%s16921_s30 + $0x6] ss:$0 sm:$0xff] }
0x102f   :  { %v4418_v34 = vsel %vm98_vm0, %v4410_v2, 0.0  ;;  %12530 = vmatprep.subr.bf16.mxu0 %v12529_v20  ;;  %v9217_v2 = vld [vmem:[%s16879_s10 + $0x370] sm:$0xff] }
0x1030   :  { %12504 = vmatpush3.bf16.msra.mxu1 %v12501_v52  ;;  %v12521_v10 = vpack.c.bf16 %v9218_v16, %v9217_v2 }
0x1031   :  { %v11125_v45 = vpop.f32.mrb[70].mxu1  ;;  %4416 = vadd.xlane.f32.xlu0 %v4415_v17  ;;  %v12505_v17 = vpack.c.bf16 %v9210_v14, %v9209_v38 }
0x1032   :  { %v15150_v55 = vadd.f32 %v11125_v45, %v9158_v51  ;;  %v4092_v6 = vpop.f32.mrb[71].mxu1  ;;  %12532 = vmatpush3.bf16.msra.mxu0 %v12529_v20  ;;  %v9213_v45 = vld [vmem:[%s16879_s10 + $0x350] sm:$0xff] }
0x1033   :  { %v4093_v28 = vadd.f32 %v9158_v51, %v4092_v6  ;;  %12506 = vmatprep.subr.bf16.mxu1 %v12505_v17  ;;  %v12509_v51 = vpack.c.bf16 %v9212_v57, %v9211_v41  ;;  %v9214_v6 = vld [vmem:[%s16879_s10 + $0x358] sm:$0xff] }
0x1034   :  { %12508 = vmatpush3.bf16.msra.mxu1 %v12505_v17 }
0x1035   :  { %4413 = vadd.xlane.f32.xlu0 %v4412_v61  ;;  %v15182_v0 = vadd.f32 %v4093_v28, %v14732_v9  ;;  %12510 = vmatprep.subr.bf16.mxu1 %v12509_v51  ;;  %v12513_v61 = vpack.c.bf16 %v9214_v6, %v9213_v45 }
0x1037   :  { %v4107_v4 = vsel %vm98_vm0, %v15182_v0, 0.0  ;;  %v4115_v24 = vmul.f32 %v15182_v0, %v15182_v0 }
0x1038   :  { %12512 = vmatpush3.bf16.msra.mxu1 %v12509_v51 }
0x1039   :  { %4402 = vadd.xlane.f32.xlu0 %v4401_v33  ;;  %v4117_v18 = vsel %vm98_vm0, %v4115_v24, 0.0  ;;  %v9216_v33 = vld [vmem:[%s16879_s10 + $0x368] sm:$0xff]  ;;  %12514 = vmatprep.subr.bf16.mxu1 %v12513_v61 }
0x103c   :  { %12516 = vmatpush3.bf16.msra.mxu1 %v12513_v61 }
0x103d   :  { %4399 = vadd.xlane.f32.xlu0 %v4398_v7  ;;  %v12517_v7 = vpack.c.bf16 %v9216_v33, %v9215_v15 }
0x103f   :  { %12518 = vmatprep.subr.bf16.mxu1 %v12517_v7 }
0x1040   :  { %12520 = vmatpush3.bf16.msra.mxu1 %v12517_v7 }
0x1041   :  { %4419 = vadd.xlane.f32.xlu0 %v4418_v34  ;;  %v11188_v34 = vpop.f32.mrb[72].mxu1  ;;  %12522 = vmatprep.subr.bf16.mxu1 %v12521_v10 }
0x1042   :  { %v4557_v29 = vadd.f32 %v11188_v34, %v9200_v43  ;;  %v4551_v28 = vpop.f32.mrb[73].mxu1 }
0x1043   :  { %v4552_v42 = vadd.f32 %v9200_v43, %v4551_v28 }
0x1044   :  { %v4561_v11 = vmax.f32 %v4557_v29, 0.0  ;;  %12524 = vmatpush3.bf16.msra.mxu1 %v12521_v10 }
0x1045   :  { %4422 = vadd.xlane.f32.xlu0 %v4421_v44  ;;  %v4560_v20 = vmax.f32 %v4552_v42, 0.0  ;;  %v9235_v44 = vld [vmem:[%s16879_s10 + $0x380] sm:$0xff] }
0x1047   :  { %11221 = vmatprep.mubr.f32.mxu1 %v4560_v20 }
0x1048   :  { %11222 = vmatmul.mubr.f32.vlgmr.msra.gmra.mrb[74].mxu1 %v4561_v11 }
0x1049   :  { %4108 = vadd.xlane.f32.xlu0 %v4107_v4  ;;  %v9236_v4 = vld [vmem:[%s16879_s10 + $0x388] sm:$0xff] }
0x104a   :  { %v15246_v24 = vpack.c.bf16 %v9236_v4, %v9235_v44  ;;  %v9131_v4 = vld [vmem:[%s16891_s22 + $0x2] ss:$0 sm:$0xff] }
0x104c   :  { %12534 = vmatprep.subr.bf16.mxu0 %v15246_v24 }
0x104d   :  { %4118 = vadd.xlane.f32.xlu0 %v4117_v18 }
0x10a4   :  { %v3836_v18 = vpop.xlane.xlu1 %3835 }
0x10a5   :  { %v3844_v21 = vmul.f32 0.03125, %v3836_v18  ;;  %v3833_v23 = vpop.xlane.xlu0 %3832 }
0x10a6   :  { %v3843_v56 = vmul.f32 0.03125, %v3833_v23 }
0x10a7   :  { %v3868_v30 = vmul.f32 %v3844_v21, %v3844_v21  ;;  %v3876_v42 = vsub.f32 %v15098_v26, %v3844_v21 }
0x10a8   :  { %v3856_v8 = vpop.xlane.xlu1 %3855  ;;  %v3867_v5 = vmul.f32 %v3843_v56, %v3843_v56  ;;  %v3875_v20 = vsub.f32 %v15101_v37, %v3843_v56 }
0x10a9   :  { %v3864_v39 = vmul.f32 0.03125, %v3856_v8  ;;  %v3853_v54 = vpop.xlane.xlu0 %3852 }
0x10aa   :  { %v3863_v52 = vmul.f32 0.03125, %v3853_v54 }
0x10ab   :  { %v3872_v38 = vsub.f32 %v3864_v39, %v3868_v30  ;;  %v9132_v30 = vld [vmem:[%s16892_s23 + $0x2] ss:$0 sm:$0xff] }
0x10ac   :  { %v3871_v14 = vsub.f32 %v3863_v52, %v3867_v5  ;;  %v3842_v17 = vpop.xlane.xlu1 %3841 }
0x10ad   :  { %v3880_v41 = vadd.f32 1e-05, %v3872_v38  ;;  %v3846_v57 = vmul.f32 0.03125, %v3842_v17  ;;  %v3839_v51 = vpop.xlane.xlu0 %3838 }
0x10ae   :  { %v3879_v45 = vadd.f32 1e-05, %v3871_v14  ;;  %v3845_v6 = vmul.f32 0.03125, %v3839_v51 }
0x10af   :  { %13125 = vrsqrt.f32 %v3880_v41  ;;  %v3870_v15 = vmul.f32 %v3846_v57, %v3846_v57  ;;  %v3878_v14 = vsub.f32 %v15112_v32, %v3846_v57 }
0x10b0   :  { %13127 = vrsqrt.f32 %v3879_v45  ;;  %v3862_v61 = vpop.xlane.xlu1 %3861  ;;  %v3869_v2 = vmul.f32 %v3845_v6, %v3845_v6  ;;  %v3877_v51 = vsub.f32 %v15116_v58, %v3845_v6 }
0x10b1   :  { %v3866_v33 = vmul.f32 0.03125, %v3862_v61  ;;  %v3859_v7 = vpop.xlane.xlu0 %3858 }
0x10b2   :  { %v3865_v16 = vmul.f32 0.03125, %v3859_v7  ;;  %v9238_v7 = vld [vmem:[%s16879_s10 + $0x398] sm:$0xff] }
0x10b3   :  { %v3874_v10 = vsub.f32 %v3866_v33, %v3870_v15  ;;  %v9237_v33 = vld [vmem:[%s16879_s10 + $0x390] sm:$0xff] }
0x10b4   :  { %v3873_v43 = vsub.f32 %v3865_v16, %v3869_v2 }
0x10b5   :  { %v3882_v34 = vadd.f32 1e-05, %v3874_v10 }
0x10b6   :  { %v3881_v29 = vadd.f32 1e-05, %v3873_v43  ;;  %v4397_v28 = vpop.xlane.xlu0 %4396 }
0x10b7   :  { %13129 = vrsqrt.f32 %v3882_v34  ;;  %v15251_v44 = vmul.f32 0.03125, %v4397_v28  ;;  %v9239_v28 = vld [vmem:[%s16879_s10 + $0x3a0] sm:$0xff] }
0x10b8   :  { %13131 = vrsqrt.f32 %v3881_v29 }
0x10b9   :  { %v13126_v11 = vpop.eup %13125  ;;  %v4429_v26 = vmul.f32 %v15251_v44, %v15251_v44 }
0x10ba   :  { %v13128_v18 = vpop.eup %13127  ;;  %v3888_v23 = vmul.f32 %v13126_v11, %v3876_v42  ;;  %v4394_v8 = vpop.xlane.xlu0 %4393  ;;  %v9240_v42 = vld [vmem:[%s16879_s10 + $0x3a8] sm:$0xff] }
0x10bb   :  { %v3887_v39 = vmul.f32 %v13128_v18, %v3875_v20  ;;  %v15261_v21 = vmul.f32 0.03125, %v4394_v8 }
0x10bc   :  { %v3898_v54 = vmul.f32 %v9131_v4, %v3888_v23 }
0x10bd   :  { %v3897_v37 = vmul.f32 %v9131_v4, %v3887_v39  ;;  %v4428_v45 = vmul.f32 %v15261_v21, %v15261_v21 }
0x10be   :  { %v4417_v56 = vpop.xlane.xlu0 %4416  ;;  %v3908_v5 = vadd.f32 %v9132_v30, %v3898_v54  ;;  %v9241_v54 = vld [vmem:[%s16879_s10 + $0x3b0] sm:$0xff] }
0x10bf   :  { %v4425_v52 = vmul.f32 0.03125, %v4417_v56  ;;  %v3907_v38 = vadd.f32 %v9132_v30, %v3897_v37 }
0x10c0   :  { %v4158_v17 = vadd.f32 %v3908_v5, %v14763_v25 }
0x10c1   :  { %v13130_v41 = vpop.eup %13129  ;;  %v4433_v61 = vsub.f32 %v4425_v52, %v4429_v26  ;;  %v4157_v15 = vadd.f32 %v3907_v38, %v14760_v59  ;;  %v12537_v59 = vpack.c.bf16 %v9238_v7, %v9237_v33  ;;  %v9242_v26 = vld [vmem:[%s16879_s10 + $0x3b8] sm:$0xff]  ;;  %v9243_v38 = vld [vmem:[%s16879_s10 + $0x3c0] sm:$0xff]  ;;  %v9245_v33 = vld [vmem:[%s16879_s10 + $0x3d0] sm:$0xff] }
0x10c2   :  { %v13132_v32 = vpop.eup %13131  ;;  %v4414_v57 = vpop.xlane.xlu0 %4413  ;;  %v3890_v25 = vmul.f32 %v13130_v41, %v3878_v14  ;;  %v15277_v10 = vmul.f32 0.5, %v4158_v17  ;;  %v9244_v14 = vld [vmem:[%s16879_s10 + $0x3c8] sm:$0xff]  ;;  %v4436_v41 = vsub.f32 %v15136_v40, %v15261_v21  ;;  %v9246_v7 = vld [vmem:[%s16879_s10 + $0x3d8] sm:$0xff] }
0x10c3   :  { %v4441_v2 = vadd.f32 1e-05, %v4433_v61  ;;  %v4424_v16 = vmul.f32 0.03125, %v4414_v57  ;;  %v15275_v58 = vmul.f32 0.5, %v4157_v15  ;;  %v3889_v6 = vmul.f32 %v13132_v32, %v3877_v51 }
0x10c4   :  { %v3900_v43 = vmul.f32 %v9131_v4, %v3890_v25  ;;  %v12553_v21 = vpack.c.bf16 %v9246_v7, %v9245_v33 }
0x10c5   :  { %13133 = vrsqrt.f32 %v4441_v2  ;;  %v4432_v34 = vsub.f32 %v4424_v16, %v4428_v45  ;;  %11232 = vmatprep.mubr.msk.f32.mxu0 %vm98_vm0, %v15275_v58  ;;  %v3899_v29 = vmul.f32 %v9131_v4, %v3889_v6  ;;  %v12541_v4 = vpack.c.bf16 %v9240_v42, %v9239_v28  ;;  %v9247_v6 = vld [vmem:[%s16879_s10 + $0x3e0] sm:$0xff] }
0x10c6   :  { %11233 = vmatmul.mubr.msk.f32.vlgmr.msra.gmra.mrb[78].mxu0 %vm98_vm0, %v15277_v10  ;;  %v4403_v11 = vpop.xlane.xlu0 %4402  ;;  %v3910_v20 = vadd.f32 %v9132_v30, %v3900_v43  ;;  %v12549_v45 = vpack.c.bf16 %v9244_v14, %v9243_v38  ;;  %v9248_v43 = vld [vmem:[%s16879_s10 + $0x3e8] sm:$0xff] }
0x10c7   :  { %v4440_v18 = vadd.f32 1e-05, %v4432_v34  ;;  %v3909_v23 = vadd.f32 %v9132_v30, %v3899_v29  ;;  %12536 = vmatpush3.bf16.msra.mxu0 %v15246_v24  ;;  %v4407_v5 = vmul.f32 0.03125, %v4403_v11  ;;  %v12557_v28 = vpack.c.bf16 %v9248_v43, %v9247_v6 }
0x10c8   :  { %v4160_v8 = vadd.f32 %v3910_v20, %v14779_v31  ;;  %12538 = vmatprep.subr.bf16.mxu0 %v12537_v59  ;;  %v4437_v31 = vsub.f32 %v15133_v1, %v15251_v44 }
0x10c9   :  { %13135 = vrsqrt.f32 %v4440_v18  ;;  %v4159_v39 = vadd.f32 %v3909_v23, %v14777_v19  ;;  %v12545_v19 = vpack.c.bf16 %v9242_v26, %v9241_v54  ;;  %v4431_v61 = vmul.f32 %v4407_v5, %v4407_v5 }
0x10ca   :  { %v4400_v37 = vpop.xlane.xlu0 %4399  ;;  %v15302_v24 = vmul.f32 0.5, %v4160_v8 }
0x10cb   :  { %v4406_v56 = vmul.f32 0.03125, %v4400_v37  ;;  %v15298_v30 = vmul.f32 0.5, %v4159_v39  ;;  %12540 = vmatpush3.bf16.msra.mxu0 %v12537_v59  ;;  %v4439_v39 = vsub.f32 %v15153_v48, %v4407_v5 }
0x10cc   :  { %12542 = vmatprep.subr.bf16.mxu0 %v12541_v4 }
0x10cd   :  { %v4430_v52 = vmul.f32 %v4406_v56, %v4406_v56  ;;  %11235 = vmatprep.mubr.msk.f32.mxu0 %vm98_vm0, %v15298_v30  ;;  %v4438_v18 = vsub.f32 %v15157_v27, %v4406_v56  ;;  %v15342_v27 = vld [vmem:[%s16881_s12 + $0x4] ss:$0 sm:$0xff] }
0x10ce   :  { %11236 = vmatmul.mubr.msk.f32.gmra.mrb[80].mxu0 %vm98_vm0, %v15302_v24  ;;  %v4420_v1 = vpop.xlane.xlu0 %4419 }
0x10cf   :  { %v13134_v44 = vpop.eup %13133  ;;  %v4426_v17 = vmul.f32 0.03125, %v4420_v1  ;;  %12544 = vmatpush3.bf16.msra.mxu0 %v12541_v4  ;;  %v9250_v1 = vld [vmem:[%s16879_s10 + $0x3f8] sm:$0xff] }
0x10d0   :  { %v15316_v51 = vmul.f32 %v13134_v44, %v4437_v31  ;;  %12546 = vmatprep.subr.bf16.mxu0 %v12545_v19 }
0x10d1   :  { %v4434_v15 = vsub.f32 %v4426_v17, %v4430_v52  ;;  %v15347_v52 = vld [vmem:[%s16882_s13 + $0x4] ss:$0 sm:$0xff] }
0x10d2   :  { %v4423_v32 = vpop.xlane.xlu0 %4422 }
0x10d3   :  { %v13136_v57 = vpop.eup %13135  ;;  %v4442_v25 = vadd.f32 1e-05, %v4434_v15  ;;  %v4427_v2 = vmul.f32 0.03125, %v4423_v32  ;;  %12548 = vmatpush3.bf16.msra.mxu0 %v12545_v19 }
0x10d4   :  { %v15324_v40 = vmul.f32 %v13136_v57, %v4436_v41  ;;  %12550 = vmatprep.subr.bf16.mxu0 %v12549_v45 }
0x10d5   :  { %13137 = vrsqrt.f32 %v4442_v25  ;;  %v4435_v16 = vsub.f32 %v4427_v2, %v4431_v61 }
0x10d6   :  { %v4109_v59 = vpop.xlane.xlu0 %4108 }
0x10d7   :  { %v4443_v34 = vadd.f32 1e-05, %v4435_v16  ;;  %v4113_v29 = vmul.f32 0.03125, %v4109_v59  ;;  %12552 = vmatpush3.bf16.msra.mxu0 %v12549_v45  ;;  %v9252_v16 = vld [vmem:[%s16880_s11 + $0x7] ss:$0 sm:$0xff] }
0x10d8   :  { %12554 = vmatprep.subr.bf16.mxu0 %v12553_v21 }
0x10d9   :  { %13139 = vrsqrt.f32 %v4443_v34  ;;  %v4125_v11 = vmul.f32 %v4113_v29, %v4113_v29  ;;  %v4129_v31 = vsub.f32 %v15182_v0, %v4113_v29  ;;  %v9249_v0 = vld [vmem:[%s16879_s10 + $0x3f0] sm:$0xff] }
0x10da   :  { %v4119_v42 = vpop.xlane.xlu0 %4118  ;;  %v12561_v44 = vpack.c.bf16 %v9250_v1, %v9249_v0 }
0x10db   :  { %v4123_v20 = vmul.f32 0.03125, %v4119_v42  ;;  %12556 = vmatpush3.bf16.msra.mxu0 %v12553_v21 }
0x10dc   :  { %12558 = vmatprep.subr.bf16.mxu0 %v12557_v28 }
0x10dd   :  { %v4127_v23 = vsub.f32 %v4123_v20, %v4125_v11 }
0x10df   :  { %v13138_v8 = vpop.eup %13137  ;;  %v4131_v4 = vadd.f32 1e-05, %v4127_v23  ;;  %12560 = vmatpush3.bf16.msra.mxu0 %v12557_v28 }
0x10e0   :  { %v15334_v54 = vmul.f32 %v13138_v8, %v4438_v18  ;;  %12562 = vmatprep.subr.bf16.mxu0 %v12561_v44 }
0x10e1   :  { %13141 = vrsqrt.f32 %v4131_v4 }
0x10e3   :  { %v13140_v26 = vpop.eup %13139  ;;  %12564 = vmatpush3.bf16.msra.mxu0 %v12561_v44 }
0x10e4   :  { %v15336_v37 = vmul.f32 %v13140_v26, %v4439_v39 }
0x10eb   :  { %v13142_v19 = vpop.eup %13141 }
0x10ec   :  { %v4135_v56 = vmul.f32 %v13142_v19, %v4129_v31 }
0x10ee   :  { %v4143_v48 = vmul.f32 %v15342_v27, %v4135_v56 }
0x10f0   :  { %v4151_v5 = vadd.f32 %v15347_v52, %v4143_v48 }
0x10f2   :  { %v4168_v38 = vadd.f32 %v4151_v5, %v14732_v9  ;;  %v9230_v9 = vld [vmem:[%s16921_s30 + $0x7] ss:$0 sm:$0xff] }
0x10f4   :  { %v15352_v14 = vmul.f32 0.5, %v4168_v38 }
0x10f6   :  { %11284 = vmatprep.mubr.msk.f32.mxu1 %vm98_vm0, %v15352_v14 }
0x1199   :  { %v11234_v17 = vpop.f32.mrb[78].mxu0 }
0x119a   :  { %v4811_v41 = vadd.f32 %v11234_v17, %v9230_v9  ;;  %v4805_v45 = vpop.f32.mrb[79].mxu0 }
0x119b   :  { %v4806_v61 = vadd.f32 %v9230_v9, %v4805_v45  ;;  %v9290_v45 = vld [vmem:[%s16883_s14 + $0x78] sm:$0xff] }
0x119c   :  { %v4825_v33 = vmax.f32 %v4811_v41, 0.0  ;;  %v9289_v41 = vld [vmem:[%s16883_s14 + $0x70] sm:$0xff] }
0x119d   :  { %v4824_v15 = vmax.f32 %v4806_v61, 0.0  ;;  %v12609_v61 = vpack.c.bf16 %v9290_v45, %v9289_v41  ;;  %v9193_v45 = vld [vmem:[%s16881_s12 + $0x5] ss:$0 sm:$0xff] }
0x119f   :  { %11270 = vmatprep.mubr.f32.mxu0 %v4824_v15  ;;  %v9297_v15 = vld [vmem:[%s16885_s16 + $0x60] sm:$0xff] }
0x11a0   :  { %11271 = vmatmul.mubr.f32.vlgmr.msra.gmra.mrb[82].mxu0 %v4825_v33  ;;  %v9298_v33 = vld [vmem:[%s16885_s16 + $0x68] sm:$0xff] }
0x11a1   :  { %v11237_v7 = vpop.f32.mrb[80].mxu0 }
0x11a2   :  { %v4821_v32 = vadd.f32 %v11237_v7, %v9230_v9  ;;  %v4815_v57 = vpop.f32.mrb[81].mxu0  ;;  %v15427_v7 = vpack.c.bf16 %v9298_v33, %v9297_v15 }
0x11a3   :  { %v4816_v25 = vadd.f32 %v9230_v9, %v4815_v57  ;;  %v9287_v9 = vld [vmem:[%s16883_s14 + $0x60] sm:$0xff]  ;;  %v9258_v57 = vld [vmem:[%s16918_s6 + $0x108] sm:$0xff] }
0x11a4   :  { %v4827_v21 = vmax.f32 %v4821_v32, 0.0  ;;  %v9257_v32 = vld [vmem:[%s16918_s6 + $0x100] sm:$0xff] }
0x11a5   :  { %v4826_v2 = vmax.f32 %v4816_v25, 0.0  ;;  %v12565_v25 = vpack.c.bf16 %v9258_v57, %v9257_v32 }
0x11a7   :  { %11273 = vmatprep.mubr.f32.mxu0 %v4826_v2  ;;  %v9259_v2 = vld [vmem:[%s16918_s6 + $0x110] sm:$0xff]  ;;  %12566 = vmatprep.subr.bf16.mxu1 %v12565_v25 }
0x11a8   :  { %11274 = vmatmul.mubr.f32.gmra.mrb[84].mxu0 %v4827_v21  ;;  %v9260_v21 = vld [vmem:[%s16918_s6 + $0x118] sm:$0xff]  ;;  %12568 = vmatpush3.bf16.msra.mxu1 %v12565_v25 }
0x1273   :  { %v11272_v6 = vpop.f32.mrb[82].mxu0 }
0x1274   :  { %v4925_v43 = vadd.f32 %v11272_v6, %v9252_v16  ;;  %v4919_v59 = vpop.f32.mrb[83].mxu0  ;;  %v9265_v6 = vld [vmem:[%s16879_s10 + $0x400] sm:$0xff] }
0x1275   :  { %v4920_v34 = vadd.f32 %v9252_v16, %v4919_v59 }
0x1276   :  { %v15369_v29 = vadd.f32 %v4925_v43, %v15277_v10  ;;  %v9266_v43 = vld [vmem:[%s16879_s10 + $0x408] sm:$0xff] }
0x1277   :  { %v15372_v28 = vadd.f32 %v4920_v34, %v15275_v58  ;;  %v15448_v59 = vpack.c.bf16 %v9266_v43, %v9265_v6  ;;  %v9194_v43 = vld [vmem:[%s16882_s13 + $0x5] ss:$0 sm:$0xff] }
0x1278   :  { %v4949_v42 = vsel %vm98_vm0, %v15369_v29, 0.0  ;;  %v4963_v23 = vmul.f32 %v15369_v29, %v15369_v29 }
0x1279   :  { %4950 = vadd.xlane.f32.xlu1 %v4949_v42  ;;  %v4946_v18 = vsel %vm98_vm0, %v15372_v28, 0.0  ;;  %v4962_v58 = vmul.f32 %v15372_v28, %v15372_v28 }
0x127a   :  { %v4969_v10 = vsel %vm98_vm0, %v4963_v23, 0.0 }
0x127b   :  { %v11275_v11 = vpop.f32.mrb[84].mxu0  ;;  %v4966_v26 = vsel %vm98_vm0, %v4962_v58, 0.0 }
0x127c   :  { %v4929_v20 = vpop.f32.mrb[85].mxu0  ;;  %v4935_v8 = vadd.f32 %v11275_v11, %v9252_v16 }
0x127d   :  { %4947 = vadd.xlane.f32.xlu1 %v4946_v18  ;;  %v4930_v39 = vadd.f32 %v9252_v16, %v4929_v20  ;;  %v12569_v16 = vpack.c.bf16 %v9260_v21, %v9259_v2  ;;  %v4459_v2 = vmul.f32 %v9193_v45, %v15316_v51 }
0x127e   :  { %v15384_v4 = vadd.f32 %v4935_v8, %v15302_v24 }
0x127f   :  { %v15388_v31 = vadd.f32 %v4930_v39, %v15298_v30  ;;  %v15401_v30 = vadd.f32 %v15150_v55, %v14734_v50  ;;  %v9288_v55 = vld [vmem:[%s16883_s14 + $0x68] sm:$0xff]  ;;  %12570 = vmatprep.subr.bf16.mxu1 %v12569_v16 }
0x1280   :  { %v4955_v19 = vsel %vm98_vm0, %v15384_v4, 0.0  ;;  %v4965_v5 = vmul.f32 %v15384_v4, %v15384_v4  ;;  %v12605_v17 = vpack.c.bf16 %v9288_v55, %v9287_v9  ;;  %12572 = vmatpush3.bf16.msra.mxu1 %v12569_v16  ;;  %v9255_v9 = vld [vmem:[%s16881_s12 + $0x7] ss:$0 sm:$0xff] }
0x1281   :  { %4970 = vadd.xlane.f32.xlu1 %v4969_v10  ;;  %v4952_v56 = vsel %vm98_vm0, %v15388_v31, 0.0  ;;  %v4964_v48 = vmul.f32 %v15388_v31, %v15388_v31  ;;  %v4110_v0 = vsel %vm98_vm0, %v15401_v30, 0.0  ;;  %v4116_v1 = vmul.f32 %v15401_v30, %v15401_v30  ;;  %12574 = vmatprep.subr.bf16.mxu1 %v15448_v59 }
0x1282   :  { %v4975_v38 = vsel %vm98_vm0, %v4965_v5, 0.0  ;;  %12606 = vmatprep.subr.bf16.mxu0 %v12605_v17 }
0x1283   :  { %v4972_v24 = vsel %vm98_vm0, %v4964_v48, 0.0  ;;  %v4120_v44 = vsel %vm98_vm0, %v4116_v1, 0.0  ;;  %12608 = vmatpush3.bf16.msra.mxu0 %v12605_v17 }
0x1284   :  { %12610 = vmatprep.subr.bf16.mxu0 %v12609_v61 }
0x1285   :  { %4967 = vadd.xlane.f32.xlu1 %v4966_v26 }
0x1287   :  { %12612 = vmatpush3.bf16.msra.mxu0 %v12609_v61 }
0x1288   :  { %12614 = vmatprep.subr.bf16.mxu0 %v15427_v7 }
0x1289   :  { %4956 = vadd.xlane.f32.xlu1 %v4955_v19 }
0x128d   :  { %4953 = vadd.xlane.f32.xlu1 %v4952_v56 }
0x1291   :  { %4973 = vadd.xlane.f32.xlu1 %v4972_v24 }
0x1295   :  { %4976 = vadd.xlane.f32.xlu1 %v4975_v38 }
0x1299   :  { %4111 = vadd.xlane.f32.xlu1 %v4110_v0 }
0x129d   :  { %4121 = vadd.xlane.f32.xlu1 %v4120_v44 }
0x1306   :  { %v4951_v34 = vpop.xlane.xlu1 %4950 }
0x1307   :  { %v4959_v11 = vmul.f32 0.03125, %v4951_v34  ;;  %v4458_v34 = vmul.f32 %v9193_v45, %v15324_v40  ;;  %v9300_v40 = vld [vmem:[%s16885_s16 + $0x78] sm:$0xff] }
0x1309   :  { %v4983_v18 = vmul.f32 %v4959_v11, %v4959_v11  ;;  %v4991_v0 = vsub.f32 %v15369_v29, %v4959_v11  ;;  %v9256_v29 = vld [vmem:[%s16882_s13 + $0x7] ss:$0 sm:$0xff] }
0x130a   :  { %v4948_v42 = vpop.xlane.xlu1 %4947 }
0x130b   :  { %v4958_v23 = vmul.f32 0.03125, %v4948_v42 }
0x130d   :  { %v4982_v39 = vmul.f32 %v4958_v23, %v4958_v23  ;;  %v4990_v33 = vsub.f32 %v15372_v28, %v4958_v23  ;;  %v4469_v23 = vadd.f32 %v9194_v43, %v4459_v2 }
0x130e   :  { %v4971_v20 = vpop.xlane.xlu1 %4970 }
0x130f   :  { %v4979_v8 = vmul.f32 0.03125, %v4971_v20 }
0x1311   :  { %v4987_v10 = vsub.f32 %v4979_v8, %v4983_v18 }
0x1312   :  { %v4968_v58 = vpop.xlane.xlu1 %4967 }
0x1313   :  { %v4995_v26 = vadd.f32 1e-05, %v4987_v10  ;;  %v4978_v19 = vmul.f32 0.03125, %v4968_v58  ;;  %v4468_v58 = vadd.f32 %v9194_v43, %v4458_v34 }
0x1315   :  { %13143 = vrsqrt.f32 %v4995_v26  ;;  %v4986_v56 = vsub.f32 %v4978_v19, %v4982_v39 }
0x1316   :  { %v4957_v48 = vpop.xlane.xlu1 %4956 }
0x1317   :  { %v4994_v24 = vadd.f32 1e-05, %v4986_v56  ;;  %v4961_v55 = vmul.f32 0.03125, %v4957_v48  ;;  %v9299_v56 = vld [vmem:[%s16885_s16 + $0x70] sm:$0xff] }
0x1319   :  { %13145 = vrsqrt.f32 %v4994_v24  ;;  %v4985_v21 = vmul.f32 %v4961_v55, %v4961_v55 }
0x131a   :  { %v4954_v5 = vpop.xlane.xlu1 %4953 }
0x131b   :  { %v4960_v38 = vmul.f32 0.03125, %v4954_v5 }
0x131d   :  { %v4984_v17 = vmul.f32 %v4960_v38, %v4960_v38 }
0x131e   :  { %v4974_v1 = vpop.xlane.xlu1 %4973 }
0x131f   :  { %v13144_v44 = vpop.eup %13143  ;;  %v4980_v41 = vmul.f32 0.03125, %v4974_v1 }
0x1320   :  { %v5003_v61 = vmul.f32 %v13144_v44, %v4991_v0  ;;  %v12617_v44 = vpack.c.bf16 %v9300_v40, %v9299_v56  ;;  %v9278_v56 = vld [vmem:[%s16879_s10 + $0x468] sm:$0xff] }
0x1321   :  { %v4988_v15 = vsub.f32 %v4980_v41, %v4984_v17  ;;  %v4992_v17 = vsub.f32 %v15388_v31, %v4960_v38  ;;  %v4461_v38 = vmul.f32 %v9193_v45, %v15336_v37 }
0x1322   :  { %v5013_v32 = vmul.f32 %v9255_v9, %v5003_v61  ;;  %v4977_v57 = vpop.xlane.xlu1 %4976 }
0x1323   :  { %v13146_v25 = vpop.eup %13145  ;;  %v4996_v16 = vadd.f32 1e-05, %v4988_v15  ;;  %v4981_v6 = vmul.f32 0.03125, %v4977_v57  ;;  %v4460_v15 = vmul.f32 %v9193_v45, %v15334_v54  ;;  %v4471_v34 = vadd.f32 %v9194_v43, %v4461_v38 }
0x1324   :  { %v5002_v42 = vmul.f32 %v13146_v25, %v4990_v33  ;;  %v5023_v28 = vadd.f32 %v9256_v29, %v5013_v32  ;;  %v4993_v32 = vsub.f32 %v15384_v4, %v4961_v55 }
0x1325   :  { %13147 = vrsqrt.f32 %v4996_v16  ;;  %v4989_v11 = vsub.f32 %v4981_v6, %v4985_v21  ;;  %v4470_v31 = vadd.f32 %v9194_v43, %v4460_v15 }
0x1326   :  { %v5012_v20 = vmul.f32 %v9255_v9, %v5002_v42  ;;  %v4112_v18 = vpop.xlane.xlu1 %4111  ;;  %v5275_v39 = vadd.f32 %v5023_v28, %v4469_v23 }
0x1327   :  { %v4997_v8 = vadd.f32 1e-05, %v4989_v11  ;;  %v4114_v10 = vmul.f32 0.03125, %v4112_v18  ;;  %v9272_v18 = vld [vmem:[%s16879_s10 + $0x438] sm:$0xff] }
0x1328   :  { %v5022_v51 = vadd.f32 %v9256_v29, %v5012_v20  ;;  %v15475_v0 = vmul.f32 0.5, %v5275_v39  ;;  %v9271_v20 = vld [vmem:[%s16879_s10 + $0x430] sm:$0xff]  ;;  %v9276_v39 = vld [vmem:[%s16879_s10 + $0x458] sm:$0xff] }
0x1329   :  { %13149 = vrsqrt.f32 %v4997_v8  ;;  %v4126_v48 = vmul.f32 %v4114_v10, %v4114_v10  ;;  %v12585_v23 = vpack.c.bf16 %v9272_v18, %v9271_v20  ;;  %v9273_v8 = vld [vmem:[%s16879_s10 + $0x440] sm:$0xff] }
0x132a   :  { %v5274_v26 = vadd.f32 %v5022_v51, %v4468_v58  ;;  %v4122_v19 = vpop.xlane.xlu1 %4121  ;;  %v9275_v51 = vld [vmem:[%s16879_s10 + $0x450] sm:$0xff] }
0x132b   :  { %v4124_v24 = vmul.f32 0.03125, %v4122_v19  ;;  %v9277_v19 = vld [vmem:[%s16879_s10 + $0x460] sm:$0xff] }
0x132c   :  { %v15473_v5 = vmul.f32 0.5, %v5274_v26  ;;  %v12593_v26 = vpack.c.bf16 %v9276_v39, %v9275_v51  ;;  %v12597_v40 = vpack.c.bf16 %v9278_v56, %v9277_v19 }
0x132d   :  { %v4128_v1 = vsub.f32 %v4124_v24, %v4126_v48  ;;  %v15571_v48 = vpop.f32.mrb[74].mxu1 }
0x132e   :  { %11330 = vmatprep.mubr.msk.f32.mxu0 %vm98_vm0, %v15473_v5  ;;  %v15573_v24 = vpop.f32.mrb[75].mxu1 }
0x132f   :  { %v13148_v41 = vpop.eup %13147  ;;  %v4132_v61 = vadd.f32 1e-05, %v4128_v1  ;;  %11331 = vmatmul.mubr.msk.f32.vlgmr.msra.gmra.mrb[86].mxu0 %vm98_vm0, %v15475_v0  ;;  %v9279_v1 = vld [vmem:[%s16879_s10 + $0x470] sm:$0xff] }
0x1330   :  { %v5004_v33 = vmul.f32 %v13148_v41, %v4992_v17  ;;  %12616 = vmatpush3.bf16.msra.mxu0 %v15427_v7  ;;  %v4130_v7 = vsub.f32 %v15401_v30, %v4114_v10  ;;  %v9274_v10 = vld [vmem:[%s16879_s10 + $0x448] sm:$0xff]  ;;  %v9319_v41 = vld [vmem:[%s16887_s18 + $0x60] sm:$0xff] }
0x1331   :  { %13151 = vrsqrt.f32 %v4132_v61  ;;  %12618 = vmatprep.subr.bf16.mxu0 %v12617_v44  ;;  %v12589_v58 = vpack.c.bf16 %v9274_v10, %v9273_v8  ;;  %v9320_v61 = vld [vmem:[%s16887_s18 + $0x68] sm:$0xff]  ;;  %v9321_v8 = vld [vmem:[%s16887_s18 + $0x70] sm:$0xff]  ;;  %v9322_v10 = vld [vmem:[%s16887_s18 + $0x78] sm:$0xff] }
0x1332   :  { %v5014_v57 = vmul.f32 %v9255_v9, %v5004_v33  ;;  %v12621_v15 = vpack.c.bf16 %v9320_v61, %v9319_v41  ;;  %v9292_v33 = vld [vmem:[%s16884_s15 + $0x3] ss:$0 sm:$0xff] }
0x1333   :  { %v13150_v25 = vpop.eup %13149 }
0x1334   :  { %v5024_v2 = vadd.f32 %v9256_v29, %v5014_v57  ;;  %v5005_v21 = vmul.f32 %v13150_v25, %v4993_v32  ;;  %12620 = vmatpush3.bf16.msra.mxu0 %v12617_v44  ;;  %v9280_v44 = vld [vmem:[%s16879_s10 + $0x478] sm:$0xff] }
0x1335   :  { %v12601_v17 = vpack.c.bf16 %v9280_v44, %v9279_v1 }
0x1336   :  { %v5276_v16 = vadd.f32 %v5024_v2, %v4470_v31  ;;  %v5015_v6 = vmul.f32 %v9255_v9, %v5005_v21 }
0x1338   :  { %v15486_v42 = vmul.f32 0.5, %v5276_v16  ;;  %v5025_v54 = vadd.f32 %v9256_v29, %v5015_v6  ;;  %v9270_v29 = vld [vmem:[%s16879_s10 + $0x428] sm:$0xff]  ;;  %v15600_v6 = vld [vmem:[%s16886_s17 + $0x3] ss:$0 sm:$0xff] }
0x133a   :  { %v5277_v28 = vadd.f32 %v5025_v54, %v4471_v34  ;;  %11333 = vmatprep.mubr.msk.f32.mxu0 %vm98_vm0, %v15486_v42 }
0x133b   :  { %v13152_v4 = vpop.eup %13151 }
0x133c   :  { %v15491_v55 = vmul.f32 0.5, %v5277_v28  ;;  %v4136_v11 = vmul.f32 %v13152_v4, %v4130_v7  ;;  %v9262_v4 = vld [vmem:[%s16921_s30 + $0x8] ss:$0 sm:$0xff] }
0x133e   :  { %11334 = vmatmul.mubr.msk.f32.gmra.mrb[88].mxu0 %vm98_vm0, %v15491_v55  ;;  %v4144_v37 = vmul.f32 %v15342_v27, %v4136_v11  ;;  %v9268_v27 = vld [vmem:[%s16879_s10 + $0x418] sm:$0xff]  ;;  %v15610_v11 = vld [vmem:[%s16922_s5 + $0x8] sm:$0xff] }
0x133f   :  { %11344 = vmatprep.mubr.msk.f32.mxu0 %vm98_vm0, %v15473_v5 }
0x1340   :  { %v4152_v9 = vadd.f32 %v15347_v52, %v4144_v37 }
0x1342   :  { %11345 = vmatmul.mubr.msk.f32.vlgmr.msra.gmra.mrb[90].mxu0 %vm98_vm0, %v15475_v0  ;;  %v4169_v30 = vadd.f32 %v4152_v9, %v14734_v50  ;;  %v9267_v50 = vld [vmem:[%s16879_s10 + $0x410] sm:$0xff]  ;;  %v15616_v9 = vld [vmem:[%s16922_s5] sm:$0xff] }
0x1343   :  { %11347 = vmatprep.mubr.msk.f32.mxu0 %vm98_vm0, %v15486_v42  ;;  %v12577_v52 = vpack.c.bf16 %v9268_v27, %v9267_v50 }
0x1344   :  { %v15504_v45 = vmul.f32 0.5, %v4169_v30 }
0x1346   :  { %11285 = vmatmul.mubr.msk.f32.vlgmr.msra.gmra.mrb[76].mxu1 %vm98_vm0, %v15504_v45  ;;  %11348 = vmatmul.mubr.msk.f32.gmra.mrb[92].mxu0 %vm98_vm0, %v15491_v55 }
0x1347   :  { %11350 = vmatprep.mubr.msk.f32.mxu0 %vm98_vm0, %v15473_v5  ;;  %12576 = vmatpush3.bf16.msra.mxu1 %v15448_v59  ;;  %v9269_v59 = vld [vmem:[%s16879_s10 + $0x420] sm:$0xff] }
0x1348   :  { %12578 = vmatprep.subr.bf16.mxu1 %v12577_v52  ;;  %v12581_v43 = vpack.c.bf16 %v9270_v29, %v9269_v59 }
0x134a   :  { %11351 = vmatmul.mubr.msk.f32.gmra.mrb[94].mxu0 %vm98_vm0, %v15475_v0 }
0x134b   :  { %11353 = vmatprep.mubr.msk.f32.mxu0 %vm98_vm0, %v15486_v42  ;;  %12580 = vmatpush3.bf16.msra.mxu1 %v12577_v52 }
0x134c   :  { %12582 = vmatprep.subr.bf16.mxu1 %v12581_v43 }
0x134e   :  { %11354 = vmatmul.mubr.msk.f32.gmra.mrb[96].mxu0 %vm98_vm0, %v15491_v55 }
0x134f   :  { %11356 = vmatprep.mubr.msk.f32.mxu0 %vm98_vm0, %v15473_v5  ;;  %12584 = vmatpush3.bf16.msra.mxu1 %v12581_v43 }
0x1350   :  { %12586 = vmatprep.subr.bf16.mxu1 %v12585_v23 }
0x1352   :  { %11357 = vmatmul.mubr.msk.f32.gmra.mrb[98].mxu0 %vm98_vm0, %v15475_v0 }
0x1353   :  { %11359 = vmatprep.mubr.msk.f32.mxu0 %vm98_vm0, %v15486_v42  ;;  %12588 = vmatpush3.bf16.msra.mxu1 %v12585_v23 }
0x1354   :  { %12590 = vmatprep.subr.bf16.mxu1 %v12589_v58 }
0x1356   :  { %11360 = vmatmul.mubr.msk.f32.gmra.mrb[100].mxu0 %vm98_vm0, %v15491_v55 }
0x1357   :  { %11362 = vmatprep.mubr.msk.f32.mxu0 %vm98_vm0, %v15473_v5  ;;  %12592 = vmatpush3.bf16.msra.mxu1 %v12589_v58  ;;  %v15630_v58 = vld [vmem:[%s16922_s5 + $0x18] sm:$0xff] }
0x1358   :  { %12594 = vmatprep.subr.bf16.mxu1 %v12593_v26 }
0x135a   :  { %11363 = vmatmul.mubr.msk.f32.gmra.mrb[102].mxu0 %vm98_vm0, %v15475_v0 }
0x135b   :  { %11365 = vmatprep.mubr.msk.f32.mxu0 %vm98_vm0, %v15486_v42  ;;  %12596 = vmatpush3.bf16.msra.mxu1 %v12593_v26  ;;  %v15636_v26 = vld [vmem:[%s16922_s5 + $0x10] sm:$0xff] }
0x135c   :  { %12598 = vmatprep.subr.bf16.mxu1 %v12597_v40 }
0x135e   :  { %11366 = vmatmul.mubr.msk.f32.gmra.mrb[104].mxu0 %vm98_vm0, %v15491_v55 }
0x135f   :  { %12600 = vmatpush3.bf16.msra.mxu1 %v12597_v40 }
0x1360   :  { %12602 = vmatprep.subr.bf16.mxu1 %v12601_v17 }
0x1363   :  { %12604 = vmatpush3.bf16.msra.mxu1 %v12601_v17  ;;  %v12625_v17 = vpack.c.bf16 %v9322_v10, %v9321_v8 }
0x1364   :  { %12622 = vmatprep.subr.bf16.mxu1 %v12621_v15 }
0x1402   :  { %v11332_v32 = vpop.f32.mrb[86].mxu0 }
0x1403   :  { %v15590_v57 = vadd.f32 %v11332_v32, %v9292_v33  ;;  %v5377_v25 = vpop.f32.mrb[87].mxu0 }
0x1404   :  { %v5378_v31 = vadd.f32 %v9292_v33, %v5377_v25  ;;  %v15654_v25 = vld [vmem:[%s16922_s5 + $0x20] sm:$0xff] }
0x1406   :  { %11432 = vmatprep.mubr.msk.f32.mxu0 %vm98_vm0, %v5378_v31 }
0x1411   :  { %v11335_v38 = vpop.f32.mrb[88].mxu0 }
0x1412   :  { %v15593_v2 = vadd.f32 %v11335_v38, %v9292_v33  ;;  %v5387_v21 = vpop.f32.mrb[89].mxu0 }
0x1413   :  { %v15595_v16 = vadd.f32 %v9292_v33, %v5387_v21  ;;  %v15648_v33 = vld [vmem:[%s16922_s5 + $0x28] sm:$0xff] }
0x1415   :  { %v11346_v34 = vpop.f32.mrb[90].mxu0 }
0x1416   :  { %v5481_v54 = vadd.f32 %v11346_v34, %v15600_v6  ;;  %v5475_v28 = vpop.f32.mrb[91].mxu0 }
0x1417   :  { %v5476_v7 = vadd.f32 %v15600_v6, %v5475_v28 }
0x1418   :  { %v5555_v37 = vmul.f32 %v15610_v11, %v5481_v54 }
0x1419   :  { %v5554_v30 = vmul.f32 %v15616_v9, %v5476_v7  ;;  %v11286_v50 = vpop.f32.mrb[76].mxu1  ;;  %v11349_v27 = vpop.f32.mrb[92].mxu0  ;;  %v15666_v7 = vld [vmem:[%s16922_s5 + $0x38] sm:$0xff] }
0x141a   :  { %v5117_v52 = vadd.f32 %v11286_v50, %v9262_v4  ;;  %v5491_v59 = vadd.f32 %v11349_v27, %v15600_v6  ;;  %v5111_v29 = vpop.f32.mrb[77].mxu1  ;;  %v5485_v43 = vpop.f32.mrb[93].mxu0 }
0x141b   :  { %v12629_v20 = vpack.c.bf16 %v5555_v37, %v5554_v30  ;;  %v5112_v18 = vadd.f32 %v9262_v4, %v5111_v29  ;;  %v5486_v23 = vadd.f32 %v15600_v6, %v5485_v43  ;;  %v15672_v4 = vld [vmem:[%s16922_s5 + $0x30] sm:$0xff]  ;;  %v15685_v29 = vld [vmem:[%s16922_s5 + $0x48] sm:$0xff] }
0x141c   :  { %v5557_v51 = vmul.f32 %v15630_v58, %v5491_v59  ;;  %v5121_v40 = vmax.f32 %v5117_v52, 0.0 }
0x141d   :  { %v5120_v39 = vmax.f32 %v5112_v18, 0.0  ;;  %v5556_v19 = vmul.f32 %v15636_v26, %v5486_v23  ;;  %v11352_v56 = vpop.f32.mrb[94].mxu0  ;;  %12631 = vmatprep.subr.msk.bf16.mxu0 %vm14198_vm1, %v12629_v20 }
0x141e   :  { %v5501_v1 = vadd.f32 %v11352_v56, %v15600_v6  ;;  %v5495_v44 = vpop.f32.mrb[95].mxu0  ;;  %12634 = vmatpush3.bf16.xpose.msk.msra.mxu0 %vm14198_vm1, %v12629_v20  ;;  %v15693_v20 = vld [vmem:[%s16922_s5 + $0x40] sm:$0xff] }
0x141f   :  { %v12635_v41 = vpack.c.bf16 %v5557_v51, %v5556_v19  ;;  %v5496_v61 = vadd.f32 %v15600_v6, %v5495_v44  ;;  %11319 = vmatprep.mubr.f32.mxu1 %v5120_v39  ;;  %v15705_v19 = vld [vmem:[%s16922_s5 + $0x58] sm:$0xff] }
0x1420   :  { %v5559_v32 = vmul.f32 %v15648_v33, %v5501_v1  ;;  %11320 = vmatmul.mubr.f32.vlgmr.msra.gmra.mrb[78].mxu1 %v5121_v40 }
0x1421   :  { %v5558_v31 = vmul.f32 %v15654_v25, %v5496_v61  ;;  %12624 = vmatpush3.bf16.msra.mxu1 %v12621_v15  ;;  %v11355_v38 = vpop.f32.mrb[96].mxu0  ;;  %11376 = vmatprep.mubr.msk.f32.mxu1 %vm98_vm0, %v15473_v5 }
0x1422   :  { %v5511_v21 = vadd.f32 %v11355_v38, %v15600_v6  ;;  %12637 = vmatprep.subr.msk.bf16.mxu0 %vm14198_vm1, %v12635_v41  ;;  %v5505_v34 = vpop.f32.mrb[97].mxu0  ;;  %12626 = vmatprep.subr.bf16.mxu1 %v12625_v17 }
0x1423   :  { %v12641_v54 = vpack.c.bf16 %v5559_v32, %v5558_v31  ;;  %v5506_v28 = vadd.f32 %v15600_v6, %v5505_v34  ;;  %v15729_v32 = vld [vmem:[%s16922_s5 + $0x68] sm:$0xff]  ;;  %v15737_v31 = vld [vmem:[%s16922_s5 + $0x60] sm:$0xff] }
0x1424   :  { %v5561_v15 = vmul.f32 %v15666_v7, %v5511_v21 }
0x1425   :  { %v5560_v37 = vmul.f32 %v15672_v4, %v5506_v28  ;;  %12628 = vmatpush3.bf16.msra.mxu1 %v12625_v17  ;;  %v11358_v30 = vpop.f32.mrb[98].mxu0 }
0x1426   :  { %v5521_v50 = vadd.f32 %v11358_v30, %v15600_v6  ;;  %v5515_v27 = vpop.f32.mrb[99].mxu0  ;;  %12640 = vmatpush3.bf16.xpose.msk.msra.mxu0 %vm14198_vm1, %v12635_v41  ;;  %12678 = vmatprep.subr.bf16.mxu1 %v13888_v62 }
0x1427   :  { %v12647_v52 = vpack.c.bf16 %v5561_v15, %v5560_v37  ;;  %v5516_v59 = vadd.f32 %v15600_v6, %v5515_v27  ;;  %12643 = vmatprep.subr.msk.bf16.mxu0 %vm14198_vm1, %v12641_v54  ;;  %v15749_v37 = vld [vmem:[%s16922_s5 + $0x78] sm:$0xff] }
0x1428   :  { %v5563_v43 = vmul.f32 %v15685_v29, %v5521_v50  ;;  %11377 = vmatmul.mubr.msk.f32.vlgmr.msra.gmra.mrb[80].mxu1 %vm98_vm0, %v15475_v0 }
0x1429   :  { %v5562_v18 = vmul.f32 %v15693_v20, %v5516_v59  ;;  %11379 = vmatprep.mubr.msk.f32.mxu1 %vm98_vm0, %v15486_v42  ;;  %v11361_v23 = vpop.f32.mrb[100].mxu0  ;;  %12680 = vmatpush3.bf16.msra.mxu1 %v13888_v62  ;;  %v15713_v62 = vld [vmem:[%s16922_s5 + $0x50] sm:$0xff] }
0x142a   :  { %v5531_v8 = vadd.f32 %v11361_v23, %v15600_v6  ;;  %v5525_v10 = vpop.f32.mrb[101].mxu0  ;;  %12682 = vmatprep.subr.bf16.mxu1 %v13959_v46 }
0x142b   :  { %v12653_v51 = vpack.c.bf16 %v5563_v43, %v5562_v18  ;;  %v5526_v39 = vadd.f32 %v15600_v6, %v5525_v10 }
0x142c   :  { %v5565_v56 = vmul.f32 %v15705_v19, %v5531_v8  ;;  %11380 = vmatmul.mubr.msk.f32.gmra.mrb[82].mxu1 %vm98_vm0, %v15491_v55 }
0x142d   :  { %v5564_v40 = vmul.f32 %v15713_v62, %v5526_v39  ;;  %11382 = vmatprep.mubr.msk.f32.mxu1 %vm98_vm0, %v15473_v5  ;;  %v11364_v1 = vpop.f32.mrb[102].mxu0  ;;  %12684 = vmatpush3.bf16.msra.mxu1 %v13959_v46 }
0x142e   :  { %v5541_v44 = vadd.f32 %v11364_v1, %v15600_v6  ;;  %v5535_v17 = vpop.f32.mrb[103].mxu0  ;;  %12646 = vmatpush3.bf16.xpose.msk.msra.mxu0 %vm14198_vm1, %v12641_v54  ;;  %12686 = vmatprep.subr.bf16.mxu1 %v13989_v53 }
0x142f   :  { %v12659_v41 = vpack.c.bf16 %v5565_v56, %v5564_v40  ;;  %v5536_v61 = vadd.f32 %v15600_v6, %v5535_v17  ;;  %12649 = vmatprep.subr.msk.bf16.mxu0 %vm14198_vm1, %v12647_v52 }
0x1430   :  { %v5567_v46 = vmul.f32 %v15729_v32, %v5541_v44  ;;  %11383 = vmatmul.mubr.msk.f32.gmra.mrb[84].mxu1 %vm98_vm0, %v15475_v0 }
0x1431   :  { %v5566_v38 = vmul.f32 %v15737_v31, %v5536_v61  ;;  %11385 = vmatprep.mubr.msk.f32.mxu1 %vm98_vm0, %v15486_v42  ;;  %v11367_v21 = vpop.f32.mrb[104].mxu0  ;;  %12688 = vmatpush3.bf16.msra.mxu1 %v13989_v53  ;;  %v15757_v53 = vld [vmem:[%s16922_s5 + $0x70] sm:$0xff] }
0x1432   :  { %v5551_v34 = vadd.f32 %v11367_v21, %v15600_v6  ;;  %v5545_v54 = vpop.f32.mrb[105].mxu0  ;;  %12690 = vmatprep.subr.bf16.mxu1 %v14010_v60 }
0x1433   :  { %v12665_v28 = vpack.c.bf16 %v5567_v46, %v5566_v38  ;;  %v5546_v15 = vadd.f32 %v15600_v6, %v5545_v54 }
0x1434   :  { %v5569_v30 = vmul.f32 %v15749_v37, %v5551_v34  ;;  %11386 = vmatmul.mubr.msk.f32.gmra.mrb[86].mxu1 %vm98_vm0, %v15491_v55 }
0x1435   :  { %v5568_v50 = vmul.f32 %v15757_v53, %v5546_v15  ;;  %11388 = vmatprep.mubr.msk.f32.mxu1 %vm98_vm0, %v15473_v5  ;;  %12692 = vmatpush3.bf16.msra.mxu1 %v14010_v60 }
0x1436   :  { %12652 = vmatpush3.bf16.xpose.msk.msra.mxu0 %vm14198_vm1, %v12647_v52  ;;  %12694 = vmatprep.subr.bf16.mxu1 %v14030_v3 }
0x1437   :  { %v12671_v6 = vpack.c.bf16 %v5569_v30, %v5568_v50  ;;  %12655 = vmatprep.subr.msk.bf16.mxu0 %vm14198_vm1, %v12653_v51 }
0x1438   :  { %11389 = vmatmul.mubr.msk.f32.gmra.mrb[88].mxu1 %vm98_vm0, %v15475_v0 }
0x1439   :  { %11391 = vmatprep.mubr.msk.f32.mxu1 %vm98_vm0, %v15486_v42  ;;  %12696 = vmatpush3.bf16.msra.mxu1 %v14030_v3 }
0x143a   :  { %12698 = vmatprep.subr.bf16.mxu1 %v14052_v12 }
0x143c   :  { %11392 = vmatmul.mubr.msk.f32.gmra.mrb[90].mxu1 %vm98_vm0, %v15491_v55 }
0x143d   :  { %11394 = vmatprep.mubr.msk.f32.mxu1 %vm98_vm0, %v15473_v5  ;;  %12700 = vmatpush3.bf16.msra.mxu1 %v14052_v12  ;;  %v9324_v12 = vld [vmem:[%s16888_s19 + $0x3] ss:$0 sm:$0xff] }
0x143e   :  { %12658 = vmatpush3.bf16.xpose.msk.msra.mxu0 %vm14198_vm1, %v12653_v51  ;;  %12702 = vmatprep.subr.bf16.mxu1 %v14133_v49 }
0x143f   :  { %12661 = vmatprep.subr.msk.bf16.mxu0 %vm14198_vm1, %v12659_v41 }
0x1440   :  { %11395 = vmatmul.mubr.msk.f32.gmra.mrb[92].mxu1 %vm98_vm0, %v15475_v0 }
0x1441   :  { %11397 = vmatprep.mubr.msk.f32.mxu1 %vm98_vm0, %v15486_v42  ;;  %12704 = vmatpush3.bf16.msra.mxu1 %v14133_v49 }
0x1442   :  { %12706 = vmatprep.subr.bf16.mxu1 %v14149_v22 }
0x1444   :  { %11398 = vmatmul.mubr.msk.f32.gmra.mrb[94].mxu1 %vm98_vm0, %v15491_v55 }
0x1445   :  { %12708 = vmatpush3.bf16.msra.mxu1 %v14149_v22 }
0x1446   :  { %12664 = vmatpush3.bf16.xpose.msk.msra.mxu0 %vm14198_vm1, %v12659_v41 }
0x1447   :  { %12667 = vmatprep.subr.msk.bf16.mxu0 %vm14198_vm1, %v12665_v28 }
0x144e   :  { %12670 = vmatpush3.bf16.xpose.msk.msra.mxu0 %vm14198_vm1, %v12665_v28 }
0x144f   :  { %12673 = vmatprep.subr.msk.bf16.mxu0 %vm14198_vm1, %v12671_v6 }
0x1456   :  { %12676 = vmatpush3.bf16.xpose.msk.msra.mxu0 %vm14198_vm1, %v12671_v6 }
0x145d   :  { %11433 = vmatmul.mubr.msk.f32.vlgmr.msra.gmra.mrb[106].mxu0 %vm98_vm0, %v15590_v57 }
0x145e   :  { %11435 = vmatprep.mubr.msk.f32.mxu0 %vm98_vm0, %v15595_v16 }
0x1461   :  { %11436 = vmatmul.mubr.msk.f32.gmra.mrb[108].mxu0 %vm98_vm0, %v15593_v2 }
0x14f3   :  { %v15809_v60 = vpop.f32.mrb[78].mxu1 }
0x14f4   :  { %v15811_v3 = vpop.f32.mrb[79].mxu1 }
0x14fb   :  { %v11378_v49 = vpop.f32.mrb[80].mxu1 }
0x14fc   :  { %v5655_v22 = vadd.f32 %v11378_v49, %v9324_v12  ;;  %v5649_v27 = vpop.f32.mrb[81].mxu1 }
0x14fd   :  { %v5650_v52 = vadd.f32 %v9324_v12, %v5649_v27 }
0x14fe   :  { %v5729_v57 = vmul.f32 %v15610_v11, %v5655_v22 }
0x14ff   :  { %v5728_v59 = vmul.f32 %v15616_v9, %v5650_v52  ;;  %v11381_v16 = vpop.f32.mrb[82].mxu1 }
0x1500   :  { %v5665_v43 = vadd.f32 %v11381_v16, %v9324_v12  ;;  %v5659_v18 = vpop.f32.mrb[83].mxu1 }
0x1501   :  { %v5660_v2 = vadd.f32 %v9324_v12, %v5659_v18  ;;  %v15818_v23 = vpack.c.bf16 %v5729_v57, %v5728_v59 }
0x1502   :  { %v5731_v8 = vmul.f32 %v15630_v58, %v5665_v43 }
0x1503   :  { %v5730_v10 = vmul.f32 %v15636_v26, %v5660_v2  ;;  %v11384_v51 = vpop.f32.mrb[84].mxu1  ;;  %12710 = vmatprep.subr.bf16.mxu1 %v15818_v23 }
0x1504   :  { %v5675_v39 = vadd.f32 %v11384_v51, %v9324_v12  ;;  %v5669_v56 = vpop.f32.mrb[85].mxu1 }
0x1505   :  { %v5670_v40 = vadd.f32 %v9324_v12, %v5669_v56  ;;  %v15823_v1 = vpack.c.bf16 %v5731_v8, %v5730_v10 }
0x1506   :  { %v5733_v11 = vmul.f32 %v15648_v33, %v5675_v39  ;;  %v9282_v39 = vld [vmem:[%s16880_s11 + $0x8] ss:$0 sm:$0xff] }
0x1507   :  { %v5732_v9 = vmul.f32 %v15654_v25, %v5670_v40  ;;  %v11387_v44 = vpop.f32.mrb[86].mxu1 }
0x1508   :  { %v5685_v17 = vadd.f32 %v11387_v44, %v9324_v12  ;;  %v5679_v41 = vpop.f32.mrb[87].mxu1 }
0x1509   :  { %v5680_v61 = vadd.f32 %v9324_v12, %v5679_v41  ;;  %v15827_v46 = vpack.c.bf16 %v5733_v11, %v5732_v9  ;;  %v13262_v9 = vld [vmem:[%s16925_s7] sm:$0xff] }
0x150a   :  { %v5735_v58 = vmul.f32 %v15666_v7, %v5685_v17 }
0x150b   :  { %v5734_v26 = vmul.f32 %v15672_v4, %v5680_v61  ;;  %v11390_v38 = vpop.f32.mrb[88].mxu1 }
0x150c   :  { %v5695_v21 = vadd.f32 %v11390_v38, %v9324_v12  ;;  %v5689_v34 = vpop.f32.mrb[89].mxu1 }
0x150d   :  { %v5690_v54 = vadd.f32 %v9324_v12, %v5689_v34  ;;  %v15831_v28 = vpack.c.bf16 %v5735_v58, %v5734_v26  ;;  %v13263_v26 = vld [vmem:[%s16925_s7 + $0x18] sm:$0xff]  ;;  %v13264_v34 = vld [vmem:[%s16925_s7 + $0x10] sm:$0xff] }
0x150e   :  { %v5737_v33 = vmul.f32 %v15685_v29, %v5695_v21 }
0x150f   :  { %v5736_v25 = vmul.f32 %v15693_v20, %v5690_v54  ;;  %v11393_v15 = vpop.f32.mrb[90].mxu1 }
0x1510   :  { %v5705_v30 = vadd.f32 %v11393_v15, %v9324_v12  ;;  %v5699_v50 = vpop.f32.mrb[91].mxu1  ;;  %v13266_v15 = vld [vmem:[%s16920_s9 + $0x8] sm:$0xff] }
0x1511   :  { %v5700_v6 = vadd.f32 %v9324_v12, %v5699_v50  ;;  %v15835_v49 = vpack.c.bf16 %v5737_v33, %v5736_v25  ;;  %v13265_v33 = vld [vmem:[%s16920_s9] sm:$0xff] }
0x1512   :  { %v5739_v7 = vmul.f32 %v15705_v19, %v5705_v30 }
0x1513   :  { %v5738_v4 = vmul.f32 %v15713_v62, %v5700_v6  ;;  %v11396_v22 = vpop.f32.mrb[92].mxu1 }
0x1514   :  { %v5715_v27 = vadd.f32 %v11396_v22, %v9324_v12  ;;  %v5709_v52 = vpop.f32.mrb[93].mxu1 }
0x1515   :  { %v5710_v57 = vadd.f32 %v9324_v12, %v5709_v52  ;;  %v15839_v59 = vpack.c.bf16 %v5739_v7, %v5738_v4 }
0x1516   :  { %v5741_v29 = vmul.f32 %v15729_v32, %v5715_v27 }
0x1517   :  { %v5740_v20 = vmul.f32 %v15737_v31, %v5710_v57  ;;  %v11399_v16 = vpop.f32.mrb[94].mxu1  ;;  %v9220_v31 = vld [vmem:[%s16880_s11 + $0x6] ss:$0 sm:$0xff] }
0x1518   :  { %v5725_v43 = vadd.f32 %v11399_v16, %v9324_v12  ;;  %v5719_v18 = vpop.f32.mrb[95].mxu1  ;;  %v4654_v17 = vadd.f32 %v9220_v31, %v15573_v24  ;;  %v4659_v54 = vadd.f32 %v15571_v48, %v9220_v31 }
0x1519   :  { %v5720_v2 = vadd.f32 %v9324_v12, %v5719_v18  ;;  %v15843_v8 = vpack.c.bf16 %v5741_v29, %v5740_v20 }
0x151a   :  { %v5743_v19 = vmul.f32 %v15749_v37, %v5725_v43  ;;  %v13261_v37 = vld [vmem:[%s16925_s7 + $0x8] sm:$0xff]  ;;  %v15877_v25 = vadd.f32 %v13265_v33, %v4654_v17  ;;  %v15887_v30 = vadd.f32 %v13266_v15, %v4659_v54 }
0x151b   :  { %v5742_v62 = vmul.f32 %v15757_v53, %v5720_v2  ;;  %v5214_v53 = vadd.f32 %v9282_v39, %v15811_v3  ;;  %v5219_v3 = vadd.f32 %v15809_v60, %v9282_v39 }
0x151c   :  { %v4668_v48 = vsel %vm98_vm0, %v15877_v25, 0.0  ;;  %v4671_v6 = vsel %vm98_vm0, %v15887_v30, 0.0  ;;  %v4676_v7 = vmul.f32 %v15877_v25, %v15877_v25  ;;  %v4677_v52 = vmul.f32 %v15887_v30, %v15887_v30 }
0x151d   :  { %v15847_v10 = vpack.c.bf16 %v5743_v19, %v5742_v62  ;;  %v15868_v21 = vadd.f32 %v5214_v53, %v15352_v14  ;;  %v15880_v60 = vadd.f32 %v5219_v3, %v15504_v45 }
0x151e   :  { %v4678_v27 = vsel %vm98_vm0, %v4676_v7, 0.0  ;;  %v4681_v29 = vsel %vm98_vm0, %v4677_v52, 0.0 }
0x151f   :  { %v5228_v14 = vsel %vm98_vm0, %v15868_v21, 0.0  ;;  %v5231_v50 = vsel %vm98_vm0, %v15880_v60, 0.0  ;;  %v5236_v45 = vmul.f32 %v15868_v21, %v15868_v21  ;;  %v5237_v22 = vmul.f32 %v15880_v60, %v15880_v60 }
0x1521   :  { %v5238_v4 = vsel %vm98_vm0, %v5236_v45, 0.0  ;;  %v5241_v57 = vsel %vm98_vm0, %v5237_v22, 0.0 }
0x1530   :  { %v11434_v51 = vpop.f32.mrb[106].mxu0 }
0x1531   :  { %v5890_v32 = vmul.f32 0.35355338, %v11434_v51  ;;  %v5870_v56 = vpop.f32.mrb[107].mxu0 }
0x1532   :  { %v5889_v12 = vmul.f32 0.35355338, %v5870_v56 }
0x1533   :  { %v5894_v40 = vsub.f32 %v5890_v32, %v13261_v37 }
0x1534   :  { %v11437_v11 = vpop.f32.mrb[108].mxu0  ;;  %v5893_v44 = vsub.f32 %v5889_v12, %v13262_v9 }
0x1535   :  { %v5892_v41 = vmul.f32 0.35355338, %v11437_v11  ;;  %5899 = vmax.xlane.f32.xlu1 %v5894_v40  ;;  %v5880_v61 = vpop.f32.mrb[109].mxu0 }
0x1536   :  { %v5891_v58 = vmul.f32 0.35355338, %v5880_v61  ;;  %5897 = vmax.xlane.f32.xlu0 %v5893_v44 }
0x1537   :  { %v5896_v38 = vsub.f32 %v5892_v41, %v13263_v26 }
0x1538   :  { %v5895_v24 = vsub.f32 %v5891_v58, %v13264_v34 }
0x1539   :  { %5903 = vmax.xlane.f32.xlu1 %v5896_v38 }
0x153a   :  { %5901 = vmax.xlane.f32.xlu0 %v5895_v24 }
0x153d   :  { %5229 = vadd.xlane.f32.xlu1 %v5228_v14 }
0x153e   :  { %4669 = vadd.xlane.f32.xlu0 %v4668_v48 }
0x1541   :  { %5232 = vadd.xlane.f32.xlu1 %v5231_v50 }
0x1542   :  { %4672 = vadd.xlane.f32.xlu0 %v4671_v6 }
0x1545   :  { %5239 = vadd.xlane.f32.xlu1 %v5238_v4 }
0x1546   :  { %4679 = vadd.xlane.f32.xlu0 %v4678_v27 }
0x1549   :  { %5242 = vadd.xlane.f32.xlu1 %v5241_v57 }
0x154a   :  { %4682 = vadd.xlane.f32.xlu0 %v4681_v29 }
0x15c2   :  { %v5900_v20 = vpop.xlane.xlu1 %5899 }
0x15c3   :  { %v5906_v16 = vsub.f32 %v5894_v40, %v5900_v20  ;;  %v5898_v43 = vpop.xlane.xlu0 %5897 }
0x15c4   :  { %v5905_v18 = vsub.f32 %v5893_v44, %v5898_v43 }
0x15c5   :  { %v5911_v2 = vmul.f32 1.442695, %v5906_v16 }
0x15c6   :  { %v5909_v19 = vmul.f32 1.442695, %v5905_v18  ;;  %v5904_v62 = vpop.xlane.xlu1 %5903 }
0x15c7   :  { %v5908_v51 = vsub.f32 %v5896_v38, %v5904_v62  ;;  %v5902_v39 = vpop.xlane.xlu0 %5901 }
0x15c8   :  { %13153 = vpow2.f32 %v5909_v19  ;;  %v5907_v32 = vsub.f32 %v5895_v24, %v5902_v39 }
0x15c9   :  { %13155 = vpow2.f32 %v5911_v2  ;;  %v5915_v56 = vmul.f32 1.442695, %v5908_v51  ;;  %v9285_v51 = vld [vmem:[%s16881_s12 + $0x8] ss:$0 sm:$0xff] }
0x15ca   :  { %v5913_v31 = vmul.f32 1.442695, %v5907_v32  ;;  %v5230_v12 = vpop.xlane.xlu1 %5229 }
0x15cb   :  { %v4670_v37 = vpop.xlane.xlu0 %4669  ;;  %v5234_v11 = vmul.f32 0.03125, %v5230_v12 }
0x15cc   :  { %13157 = vpow2.f32 %v5913_v31  ;;  %v4674_v40 = vmul.f32 0.03125, %v4670_v37 }
0x15cd   :  { %13159 = vpow2.f32 %v5915_v56  ;;  %v5246_v61 = vmul.f32 %v5234_v11, %v5234_v11  ;;  %v9286_v56 = vld [vmem:[%s16882_s13 + $0x8] ss:$0 sm:$0xff] }
0x15ce   :  { %v5233_v53 = vpop.xlane.xlu1 %5232  ;;  %v4686_v3 = vmul.f32 %v4674_v40, %v4674_v40  ;;  %v4690_v43 = vsub.f32 %v15877_v25, %v4674_v40  ;;  %v9400_v40 = vld [vmem:[%s16887_s18 + $0x98] sm:$0xff] }
0x15cf   :  { %v4673_v9 = vpop.xlane.xlu0 %4672  ;;  %v5235_v58 = vmul.f32 0.03125, %v5233_v53 }
0x15d0   :  { %v4675_v34 = vmul.f32 0.03125, %v4673_v9  ;;  %v9399_v9 = vld [vmem:[%s16887_s18 + $0x90] sm:$0xff] }
0x15d1   :  { %v5247_v50 = vmul.f32 %v5235_v58, %v5235_v58  ;;  %v5251_v62 = vsub.f32 %v15880_v60, %v5235_v58  ;;  %v9397_v60 = vld [vmem:[%s16887_s18 + $0x80] sm:$0xff] }
0x15d2   :  { %v13154_v17 = vpop.eup %13153  ;;  %v5240_v44 = vpop.xlane.xlu1 %5239  ;;  %v4687_v4 = vmul.f32 %v4675_v34, %v4675_v34 }
0x15d3   :  { %v15907_v41 = vpop.eup %13155  ;;  %v5244_v26 = vmul.f32 0.03125, %v5240_v44  ;;  %11470 = vmatprep.mubr.f32.mxu1 %v13154_v17  ;;  %v4680_v38 = vpop.xlane.xlu0 %4679 }
0x15d4   :  { %v4684_v24 = vmul.f32 0.03125, %v4680_v38  ;;  %11471 = vmatmul.mubr.f32.vlgmr.msra.gmra.mrb[96].mxu1 %v15907_v41  ;;  %v9362_v38 = vld [vmem:[%s16889_s20 + $0x68] sm:$0xff] }
0x15d5   :  { %v5248_v54 = vsub.f32 %v5244_v26, %v5246_v61  ;;  %12712 = vmatpush3.bf16.msra.mxu1 %v15818_v23 }
0x15d6   :  { %v15911_v33 = vpop.eup %13157  ;;  %v4688_v14 = vsub.f32 %v4684_v24, %v4686_v3  ;;  %12714 = vmatprep.subr.bf16.mxu1 %v15823_v1  ;;  %v5243_v15 = vpop.xlane.xlu1 %5242  ;;  %v9364_v24 = vld [vmem:[%s16889_s20 + $0x78] sm:$0xff] }
0x15d7   :  { %v15914_v48 = vpop.eup %13159  ;;  %v5252_v45 = vadd.f32 1e-05, %v5248_v54  ;;  %v5245_v6 = vmul.f32 0.03125, %v5243_v15  ;;  %11473 = vmatprep.mubr.f32.mxu1 %v15911_v33  ;;  %v4683_v7 = vpop.xlane.xlu0 %4682 }
0x15d8   :  { %v4692_v22 = vadd.f32 1e-05, %v4688_v14  ;;  %v4685_v27 = vmul.f32 0.03125, %v4683_v7  ;;  %11474 = vmatmul.mubr.f32.gmra.mrb[98].mxu1 %v15914_v48  ;;  %v9376_v14 = vld [vmem:[%s16883_s14 + $0x88] sm:$0xff] }
0x15d9   :  { %13161 = vrsqrt.f32 %v5252_v45  ;;  %v5249_v23 = vsub.f32 %v5245_v6, %v5247_v50  ;;  %12716 = vmatpush3.bf16.msra.mxu1 %v15823_v1  ;;  %11508 = vmatprep.mubr.f32.mxu1 %v13154_v17  ;;  %v5250_v1 = vsub.f32 %v15868_v21, %v5234_v11  ;;  %v9223_v21 = vld [vmem:[%s16881_s12 + $0x6] ss:$0 sm:$0xff] }
0x15da   :  { %13163 = vrsqrt.f32 %v4692_v22  ;;  %v4689_v52 = vsub.f32 %v4685_v27, %v4687_v4  ;;  %12718 = vmatprep.subr.bf16.mxu1 %v15827_v46  ;;  %v9377_v22 = vld [vmem:[%s16883_s14 + $0x90] sm:$0xff]  ;;  %v9378_v27 = vld [vmem:[%s16883_s14 + $0x98] sm:$0xff] }
0x15db   :  { %v5253_v57 = vadd.f32 1e-05, %v5249_v23 }
0x15dc   :  { %v4693_v29 = vadd.f32 1e-05, %v4689_v52 }
0x15dd   :  { %13165 = vrsqrt.f32 %v5253_v57  ;;  %12720 = vmatpush3.bf16.msra.mxu1 %v15827_v46 }
0x15de   :  { %13167 = vrsqrt.f32 %v4693_v29  ;;  %12722 = vmatprep.subr.bf16.mxu1 %v15831_v28 }
0x15e1   :  { %12724 = vmatpush3.bf16.msra.mxu1 %v15831_v28  ;;  %v4691_v28 = vsub.f32 %v15887_v30, %v4675_v34  ;;  %v9398_v30 = vld [vmem:[%s16887_s18 + $0x88] sm:$0xff]  ;;  %v9363_v34 = vld [vmem:[%s16889_s20 + $0x70] sm:$0xff] }
0x15e2   :  { %12726 = vmatprep.subr.bf16.mxu1 %v15835_v49  ;;  %v12765_v37 = vpack.c.bf16 %v9398_v30, %v9397_v60  ;;  %v12745_v54 = vpack.c.bf16 %v9364_v24, %v9363_v34  ;;  %v16038_v30 = vld [vmem:[%s16926_s27 + $0x8] sm:$0xff] }
0x15e3   :  { %v13162_v20 = vpop.eup %13161  ;;  %v16071_v24 = vld [vmem:[%s16926_s27 + $0x28] sm:$0xff] }
0x15e4   :  { %v13164_v16 = vpop.eup %13163  ;;  %v5256_v2 = vmul.f32 %v13162_v20, %v5250_v1  ;;  %v12753_v20 = vpack.c.bf16 %v9378_v27, %v9377_v22  ;;  %v16095_v22 = vld [vmem:[%s16926_s27 + $0x30] sm:$0xff] }
0x15e5   :  { %12728 = vmatpush3.bf16.msra.mxu1 %v15835_v49  ;;  %v4696_v46 = vmul.f32 %v13164_v16, %v4690_v43  ;;  %v9383_v43 = vld [vmem:[%s16885_s16 + $0x80] sm:$0xff] }
0x15e6   :  { %12730 = vmatprep.subr.bf16.mxu1 %v15839_v59  ;;  %v5264_v39 = vmul.f32 %v9285_v51, %v5256_v2 }
0x15e7   :  { %v13166_v18 = vpop.eup %13165  ;;  %v4704_v32 = vmul.f32 %v9223_v21, %v4696_v46 }
0x15e8   :  { %v13168_v19 = vpop.eup %13167  ;;  %v5257_v49 = vmul.f32 %v13166_v18, %v5251_v62  ;;  %v5272_v53 = vadd.f32 %v9286_v56, %v5264_v39  ;;  %v9384_v18 = vld [vmem:[%s16885_s16 + $0x88] sm:$0xff] }
0x15e9   :  { %12732 = vmatpush3.bf16.msra.mxu1 %v15839_v59  ;;  %v4697_v25 = vmul.f32 %v13168_v19, %v4691_v28  ;;  %v9224_v59 = vld [vmem:[%s16882_s13 + $0x6] ss:$0 sm:$0xff]  ;;  %v9402_v28 = vld [vmem:[%s16888_s19 + $0x4] ss:$0 sm:$0xff] }
0x15ea   :  { %12734 = vmatprep.subr.bf16.mxu1 %v15843_v8  ;;  %v5265_v31 = vmul.f32 %v9285_v51, %v5257_v49  ;;  %v4712_v11 = vadd.f32 %v9224_v59, %v4704_v32  ;;  %v12757_v51 = vpack.c.bf16 %v9384_v18, %v9383_v43  ;;  %v9385_v49 = vld [vmem:[%s16885_s16 + $0x90] sm:$0xff] }
0x15eb   :  { %v4705_v12 = vmul.f32 %v9223_v21, %v4697_v25  ;;  %v9386_v25 = vld [vmem:[%s16885_s16 + $0x98] sm:$0xff] }
0x15ec   :  { %v5273_v17 = vadd.f32 %v9286_v56, %v5265_v31  ;;  %v5282_v61 = vadd.f32 %v5272_v53, %v4712_v11  ;;  %v16044_v31 = vld [vmem:[%s16926_s27] sm:$0xff] }
0x15ed   :  { %12736 = vmatpush3.bf16.msra.mxu1 %v15843_v8  ;;  %v4713_v44 = vadd.f32 %v9224_v59, %v4705_v12  ;;  %v12769_v8 = vpack.c.bf16 %v9400_v40, %v9399_v9  ;;  %v12761_v59 = vpack.c.bf16 %v9386_v25, %v9385_v49 }
0x15ee   :  { %12738 = vmatprep.subr.bf16.mxu1 %v15847_v10  ;;  %v15961_v26 = vmul.f32 0.5, %v5282_v61 }
0x15ef   :  { %v5283_v58 = vadd.f32 %v5273_v17, %v4713_v44  ;;  %v16056_v17 = vld [vmem:[%s16926_s27 + $0x18] sm:$0xff] }
0x15f1   :  { %12740 = vmatpush3.bf16.msra.mxu1 %v15847_v10  ;;  %v15966_v10 = vmul.f32 0.5, %v5283_v58 }
0x15f2   :  { %12766 = vmatprep.subr.bf16.mxu1 %v12765_v37 }
0x15f4   :  { %11509 = vmatmul.mubr.f32.vlgmr.msra.gmra.mrb[100].mxu1 %v15907_v41  ;;  %v9361_v41 = vld [vmem:[%s16889_s20 + $0x60] sm:$0xff] }
0x15f5   :  { %11511 = vmatprep.mubr.f32.mxu1 %v15911_v33  ;;  %12768 = vmatpush3.bf16.msra.mxu1 %v12765_v37  ;;  %v12741_v3 = vpack.c.bf16 %v9362_v38, %v9361_v41  ;;  %v9375_v33 = vld [vmem:[%s16883_s14 + $0x80] sm:$0xff] }
0x15f6   :  { %12770 = vmatprep.subr.bf16.mxu1 %v12769_v8  ;;  %v12749_v15 = vpack.c.bf16 %v9376_v14, %v9375_v33  ;;  %v16077_v33 = vld [vmem:[%s16926_s27 + $0x20] sm:$0xff] }
0x15f7   :  { %12742 = vmatprep.subr.bf16.mxu0 %v12741_v3 }
0x15f8   :  { %11512 = vmatmul.mubr.f32.gmra.mrb[102].mxu1 %v15914_v48  ;;  %12744 = vmatpush3.bf16.msra.mxu0 %v12741_v3 }
0x15f9   :  { %12772 = vmatpush3.bf16.msra.mxu1 %v12769_v8  ;;  %11567 = vmatprep.mubr.msk.f32.mxu1 %vm98_vm0, %v15961_v26  ;;  %v16062_v8 = vld [vmem:[%s16926_s27 + $0x10] sm:$0xff] }
0x15fa   :  { %12798 = vmatprep.subr.bf16.mxu1 %v14593_v13  ;;  %12746 = vmatprep.subr.bf16.mxu0 %v12745_v54 }
0x15fc   :  { %11568 = vmatmul.mubr.msk.f32.vlgmr.msra.gmra.mrb[104].mxu1 %vm98_vm0, %v15966_v10  ;;  %12748 = vmatpush3.bf16.msra.mxu0 %v12745_v54 }
0x15fd   :  { %11570 = vmatprep.mubr.msk.f32.mxu1 %vm98_vm0, %v15961_v26  ;;  %12800 = vmatpush3.bf16.msra.mxu1 %v14593_v13 }
0x15fe   :  { %12802 = vmatprep.subr.bf16.mxu1 %v14599_v63  ;;  %12750 = vmatprep.subr.bf16.mxu0 %v12749_v15 }
0x1600   :  { %11571 = vmatmul.mubr.msk.f32.gmra.mrb[106].mxu1 %vm98_vm0, %v15966_v10 }
0x1601   :  { %11573 = vmatprep.mubr.msk.f32.mxu1 %vm98_vm0, %v15961_v26  ;;  %12804 = vmatpush3.bf16.msra.mxu1 %v14599_v63 }
0x1602   :  { %12806 = vmatprep.subr.bf16.mxu1 %v14604_v35 }
0x1604   :  { %11574 = vmatmul.mubr.msk.f32.gmra.mrb[108].mxu1 %vm98_vm0, %v15966_v10 }
0x1605   :  { %11576 = vmatprep.mubr.msk.f32.mxu1 %vm98_vm0, %v15961_v26  ;;  %12808 = vmatpush3.bf16.msra.mxu1 %v14604_v35 }
0x1606   :  { %12810 = vmatprep.subr.bf16.mxu1 %v14610_v36 }
0x1608   :  { %11577 = vmatmul.mubr.msk.f32.gmra.mrb[110].mxu1 %vm98_vm0, %v15966_v10 }
0x1609   :  { %12812 = vmatpush3.bf16.msra.mxu1 %v14610_v36 }
0x16a7   :  { %v11472_v48 = vpop.f32.mrb[96].mxu1 }
0x16a8   :  { %v5983_v50 = vpop.f32.mrb[97].mxu1  ;;  %13169 = vrcp.f32 %v11472_v48 }
0x16a9   :  { %13171 = vrcp.f32 %v5983_v50 }
0x16ab   :  { %v11475_v45 = vpop.f32.mrb[98].mxu1 }
0x16ac   :  { %v5993_v6 = vpop.f32.mrb[99].mxu1  ;;  %13173 = vrcp.f32 %v11475_v45 }
0x16ad   :  { %13175 = vrcp.f32 %v5993_v6 }
0x16b2   :  { %v13170_v7 = vpop.eup %13169 }
0x16b3   :  { %v13172_v23 = vpop.eup %13171 }
0x16b6   :  { %v13174_v16 = vpop.eup %13173 }
0x16b7   :  { %v13176_v2 = vpop.eup %13175 }
0x16c7   :  { %v11510_v4 = vpop.f32.mrb[100].mxu1 }
0x16c8   :  { %v6092_v52 = vmul.f32 %v13170_v7, %v11510_v4  ;;  %v6068_v57 = vpop.f32.mrb[101].mxu1  ;;  %v16089_v7 = vld [vmem:[%s16926_s27 + $0x38] sm:$0xff] }
0x16c9   :  { %v6091_v29 = vmul.f32 %v13172_v23, %v6068_v57 }
0x16cb   :  { %v11513_v1 = vpop.f32.mrb[102].mxu1  ;;  %11522 = vmatprep.mubr.msk.f32.mxu0 %vm98_vm0, %v6091_v29 }
0x16cc   :  { %v6094_v46 = vmul.f32 %v13174_v16, %v11513_v1  ;;  %v6078_v19 = vpop.f32.mrb[103].mxu1  ;;  %11523 = vmatmul.mubr.msk.f32.vlgmr.msra.gmra.mrb[110].mxu0 %vm98_vm0, %v6092_v52  ;;  %v9380_v16 = vld [vmem:[%s16884_s15 + $0x4] ss:$0 sm:$0xff] }
0x16cd   :  { %v6093_v62 = vmul.f32 %v13176_v2, %v6078_v19  ;;  %12752 = vmatpush3.bf16.msra.mxu0 %v12749_v15  ;;  %v9388_v2 = vld [vmem:[%s16886_s17 + $0x4] ss:$0 sm:$0xff] }
0x16ce   :  { %12754 = vmatprep.subr.bf16.mxu0 %v12753_v20 }
0x16cf   :  { %11525 = vmatprep.mubr.msk.f32.mxu0 %vm98_vm0, %v6093_v62  ;;  %v11569_v21 = vpop.f32.mrb[104].mxu1 }
0x16d0   :  { %v6598_v39 = vadd.f32 %v11569_v21, %v9402_v28  ;;  %11526 = vmatmul.mubr.msk.f32.gmra.mrb[112].mxu0 %vm98_vm0, %v6094_v46  ;;  %v6592_v32 = vpop.f32.mrb[105].mxu1 }
0x16d1   :  { %12756 = vmatpush3.bf16.msra.mxu0 %v12753_v20  ;;  %v6593_v60 = vadd.f32 %v9402_v28, %v6592_v32  ;;  %11536 = vmatprep.mubr.msk.f32.mxu0 %vm98_vm0, %v15961_v26 }
0x16d2   :  { %v6632_v56 = vmul.f32 %v16038_v30, %v6598_v39  ;;  %12758 = vmatprep.subr.bf16.mxu0 %v12757_v51 }
0x16d3   :  { %v6631_v12 = vmul.f32 %v16044_v31, %v6593_v60  ;;  %v11572_v37 = vpop.f32.mrb[106].mxu1 }
0x16d4   :  { %v6608_v53 = vadd.f32 %v11572_v37, %v9402_v28  ;;  %11537 = vmatmul.mubr.msk.f32.vlgmr.msra.gmra.mrb[114].mxu0 %vm98_vm0, %v15966_v10  ;;  %v6602_v11 = vpop.f32.mrb[107].mxu1 }
0x16d5   :  { %12760 = vmatpush3.bf16.msra.mxu0 %v12757_v51  ;;  %v6603_v9 = vadd.f32 %v9402_v28, %v6602_v11  ;;  %11547 = vmatprep.mubr.msk.f32.mxu0 %vm98_vm0, %v15961_v26  ;;  %v16051_v40 = vpack.c.bf16 %v6632_v56, %v6631_v12 }
0x16d6   :  { %v6634_v44 = vmul.f32 %v16056_v17, %v6608_v53  ;;  %12762 = vmatprep.subr.bf16.mxu0 %v12761_v59 }
0x16d7   :  { %v6633_v61 = vmul.f32 %v16062_v8, %v6603_v9  ;;  %v11575_v58 = vpop.f32.mrb[108].mxu1  ;;  %12814 = vmatprep.subr.bf16.mxu1 %v16051_v40 }
0x16d8   :  { %v6618_v41 = vadd.f32 %v11575_v58, %v9402_v28  ;;  %v6612_v38 = vpop.f32.mrb[109].mxu1 }
0x16d9   :  { %12764 = vmatpush3.bf16.msra.mxu0 %v12761_v59  ;;  %v6613_v3 = vadd.f32 %v9402_v28, %v6612_v38  ;;  %v16066_v34 = vpack.c.bf16 %v6634_v44, %v6633_v61 }
0x16da   :  { %v6636_v54 = vmul.f32 %v16071_v24, %v6618_v41 }
0x16db   :  { %v6635_v14 = vmul.f32 %v16077_v33, %v6613_v3  ;;  %v11578_v15 = vpop.f32.mrb[110].mxu1 }
0x16dc   :  { %11548 = vmatmul.mubr.msk.f32.vlgmr.msra.gmra.mrb[116].mxu0 %vm98_vm0, %v15966_v10  ;;  %v6628_v48 = vadd.f32 %v11578_v15, %v9402_v28  ;;  %v6622_v50 = vpop.f32.mrb[111].mxu1 }
0x16dd   :  { %11550 = vmatprep.mubr.msk.f32.mxu0 %vm98_vm0, %v15961_v26  ;;  %v6623_v45 = vadd.f32 %v9402_v28, %v6622_v50  ;;  %v16084_v6 = vpack.c.bf16 %v6636_v54, %v6635_v14 }
0x16de   :  { %v6638_v4 = vmul.f32 %v16089_v7, %v6628_v48 }
0x16df   :  { %v6637_v27 = vmul.f32 %v16095_v22, %v6623_v45 }
0x16e0   :  { %11551 = vmatmul.mubr.msk.f32.gmra.mrb[118].mxu0 %vm98_vm0, %v15966_v10 }
0x16e1   :  { %11553 = vmatprep.mubr.msk.f32.mxu0 %vm98_vm0, %v15961_v26  ;;  %v16102_v23 = vpack.c.bf16 %v6638_v4, %v6637_v27 }
0x16e4   :  { %11554 = vmatmul.mubr.msk.f32.gmra.mrb[120].mxu0 %vm98_vm0, %v15966_v10 }
0x16e5   :  { %11556 = vmatprep.mubr.msk.f32.mxu0 %vm98_vm0, %v15961_v26 }
0x16e8   :  { %11557 = vmatmul.mubr.msk.f32.gmra.mrb[122].mxu0 %vm98_vm0, %v15966_v10 }
0x179f   :  { %v16110_v52 = vpop.f32.mrb[110].mxu0 }
0x17a0   :  { %v16112_v57 = vpop.f32.mrb[111].mxu0 }
0x17a3   :  { %v16114_v29 = vpop.f32.mrb[112].mxu0 }
0x17a4   :  { %v16116_v20 = vpop.f32.mrb[113].mxu0 }
0x17a7   :  { %v11538_v1 = vpop.f32.mrb[114].mxu0 }
0x17a8   :  { %v6378_v43 = vpop.f32.mrb[115].mxu0  ;;  %v6384_v50 = vadd.f32 %v11538_v1, %v9380_v16 }
0x17a9   :  { %v6379_v18 = vadd.f32 %v9380_v16, %v6378_v43 }
0x17ab   :  { %11595 = vmatprep.mubr.msk.f32.mxu0 %vm98_vm0, %v6379_v18  ;;  %v13275_v18 = vld [vmem:[%s16927_s29 + $0x8] sm:$0xff] }
0x17af   :  { %v11549_v46 = vpop.f32.mrb[116].mxu0 }
0x17b0   :  { %v6472_v19 = vadd.f32 %v11549_v46, %v9388_v2  ;;  %v6466_v62 = vpop.f32.mrb[117].mxu0  ;;  %v13276_v46 = vld [vmem:[%s16927_s29] sm:$0xff]  ;;  %s16929_s29 = sld [smem:[#allocation11_spill]] }
0x17b1   :  { %v6467_v28 = vadd.f32 %v9388_v2, %v6466_v62 }
0x17b2   :  { %v6506_v51 = vmul.f32 %v16038_v30, %v6472_v19 }
0x17b3   :  { %v6505_v21 = vmul.f32 %v16044_v31, %v6467_v28  ;;  %v11552_v49 = vpop.f32.mrb[118].mxu0 }
0x17b4   :  { %v6482_v25 = vadd.f32 %v11552_v49, %v9388_v2  ;;  %v6476_v39 = vpop.f32.mrb[119].mxu0 }
0x17b5   :  { %v12773_v32 = vpack.c.bf16 %v6506_v51, %v6505_v21  ;;  %v6477_v60 = vadd.f32 %v9388_v2, %v6476_v39 }
0x17b6   :  { %v6508_v56 = vmul.f32 %v16056_v17, %v6482_v25 }
0x17b7   :  { %v6507_v59 = vmul.f32 %v16062_v8, %v6477_v60  ;;  %v11555_v12 = vpop.f32.mrb[120].mxu0  ;;  %12775 = vmatprep.subr.msk.bf16.mxu0 %vm14198_vm1, %v12773_v32  ;;  %v9426_v60 = vld [vmem:[%s16889_s20 + $0x88] sm:$0xff] }
0x17b8   :  { %v6492_v37 = vadd.f32 %v11555_v12, %v9388_v2  ;;  %v6486_v53 = vpop.f32.mrb[121].mxu0  ;;  %12778 = vmatpush3.bf16.xpose.msk.msra.mxu0 %vm14198_vm1, %v12773_v32 }
0x17b9   :  { %v12779_v11 = vpack.c.bf16 %v6508_v56, %v6507_v59  ;;  %v6487_v9 = vadd.f32 %v9388_v2, %v6486_v53 }
0x17ba   :  { %v6510_v44 = vmul.f32 %v16071_v24, %v6492_v37 }
0x17bb   :  { %v6509_v61 = vmul.f32 %v16077_v33, %v6487_v9  ;;  %v11558_v58 = vpop.f32.mrb[122].mxu0  ;;  %12781 = vmatprep.subr.msk.bf16.mxu0 %vm14198_vm1, %v12779_v11 }
0x17bc   :  { %v6502_v41 = vadd.f32 %v11558_v58, %v9388_v2  ;;  %v6496_v38 = vpop.f32.mrb[123].mxu0  ;;  %v9430_v58 = vld [vmem:[%s16890_s21 + $0x4] ss:$0 sm:$0xff] }
0x17bd   :  { %v12785_v3 = vpack.c.bf16 %v6510_v44, %v6509_v61  ;;  %v6497_v54 = vadd.f32 %v9388_v2, %v6496_v38 }
0x17be   :  { %v6512_v14 = vmul.f32 %v16089_v7, %v6502_v41 }
0x17bf   :  { %v6511_v15 = vmul.f32 %v16095_v22, %v6497_v54  ;;  %v9366_v54 = vld [vmem:[%s16890_s21 + $0x3] ss:$0 sm:$0xff] }
0x17c0   :  { %12784 = vmatpush3.bf16.xpose.msk.msra.mxu0 %vm14198_vm1, %v12779_v11 }
0x17c1   :  { %v12791_v48 = vpack.c.bf16 %v6512_v14, %v6511_v15  ;;  %12787 = vmatprep.subr.msk.bf16.mxu0 %vm14198_vm1, %v12785_v3 }
0x17c8   :  { %12790 = vmatpush3.bf16.xpose.msk.msra.mxu0 %vm14198_vm1, %v12785_v3 }
0x17c9   :  { %12793 = vmatprep.subr.msk.bf16.mxu0 %vm14198_vm1, %v12791_v48 }
0x17d0   :  { %12796 = vmatpush3.bf16.xpose.msk.msra.mxu0 %vm14198_vm1, %v12791_v48 }
0x17d7   :  { %11596 = vmatmul.mubr.msk.f32.vlgmr.msra.gmra.mrb[124].mxu0 %vm98_vm0, %v6384_v50  ;;  %v6192_v50 = vadd.f32 %v16110_v52, %v9366_v54 }
0x18aa   :  { %v11597_v45 = vpop.f32.mrb[124].mxu0 }
0x18ab   :  { %v6745_v4 = vmul.f32 0.35355338, %v11597_v45  ;;  %v6735_v27 = vpop.f32.mrb[125].mxu0 }
0x18ac   :  { %v6744_v43 = vmul.f32 0.35355338, %v6735_v27  ;;  %v6187_v27 = vadd.f32 %v9366_v54, %v16112_v57  ;;  %v6202_v57 = vadd.f32 %v16114_v29, %v9366_v54 }
0x18ad   :  { %v6747_v2 = vsub.f32 %v6745_v4, %v13275_v18 }
0x18ae   :  { %v6746_v19 = vsub.f32 %v6744_v43, %v13276_v46  ;;  %v16210_v18 = vadd.f32 %v6187_v27, %v15473_v5 }
0x18af   :  { %v6751_v62 = vsel %vm2679_vm2, %v6747_v2, -inf }
0x18b0   :  { %6752 = vmax.xlane.f32.xlu1 %v6751_v62  ;;  %v6748_v16 = vsel %vm2679_vm2, %v6746_v19, -inf  ;;  %v6213_v62 = vsel %vm98_vm0, %v16210_v18, 0.0  ;;  %v6229_v5 = vmul.f32 %v16210_v18, %v16210_v18 }
0x18b1   :  { %6749 = vmax.xlane.f32.xlu0 %v6748_v16  ;;  %v16224_v16 = vadd.f32 %v6202_v57, %v15491_v55 }
0x193d   :  { %v6753_v1 = vpop.xlane.xlu1 %6752 }
0x193e   :  { %v6755_v28 = vsub.f32 %v6747_v2, %v6753_v1  ;;  %v6750_v51 = vpop.xlane.xlu0 %6749 }
0x193f   :  { %v6754_v21 = vsub.f32 %v6746_v19, %v6750_v51  ;;  %v6232_v51 = vmul.f32 %v16224_v16, %v16224_v16 }
0x1940   :  { %v6758_v49 = vmul.f32 1.442695, %v6755_v28  ;;  %v6233_v28 = vsel %vm98_vm0, %v6229_v5, 0.0 }
0x1941   :  { %v6756_v25 = vmul.f32 1.442695, %v6754_v21 }
0x1943   :  { %13177 = vpow2.f32 %v6756_v25  ;;  %v9447_v25 = vld [vmem:[%s16885_s16 + $0xa0] sm:$0xff] }
0x1944   :  { %13179 = vpow2.f32 %v6758_v49 }
0x194d   :  { %v13178_v39 = vpop.eup %13177 }
0x194e   :  { %v13180_v32 = vpop.eup %13179  ;;  %11614 = vmatprep.mubr.msk.f32.mxu1 %vm2679_vm2, %v13178_v39 }
0x194f   :  { %11615 = vmatmul.mubr.msk.f32.vlgmr.msra.gmra.mrb[112].mxu1 %vm2679_vm2, %v13180_v32 }
0x1950   :  { %12816 = vmatpush3.bf16.msra.mxu1 %v16051_v40  ;;  %11633 = vmatprep.mubr.msk.f32.mxu1 %vm2679_vm2, %v13178_v39  ;;  %v9425_v40 = vld [vmem:[%s16889_s20 + $0x80] sm:$0xff]  ;;  %v9448_v39 = vld [vmem:[%s16885_s16 + $0xa8] sm:$0xff] }
0x1951   :  { %12818 = vmatprep.subr.bf16.mxu1 %v16066_v34  ;;  %v12829_v56 = vpack.c.bf16 %v9426_v60, %v9425_v40  ;;  %v9449_v40 = vld [vmem:[%s16885_s16 + $0xb0] sm:$0xff]  ;;  %v9450_v60 = vld [vmem:[%s16885_s16 + $0xb8] sm:$0xff] }
0x1953   :  { %12830 = vmatprep.subr.bf16.mxu0 %v12829_v56 }
0x1954   :  { %12820 = vmatpush3.bf16.msra.mxu1 %v16066_v34  ;;  %12832 = vmatpush3.bf16.msra.mxu0 %v12829_v56  ;;  %v9427_v34 = vld [vmem:[%s16889_s20 + $0x90] sm:$0xff]  ;;  %v12849_v56 = vpack.c.bf16 %v9450_v60, %v9449_v40 }
0x1955   :  { %12822 = vmatprep.subr.bf16.mxu1 %v16084_v6 }
0x1958   :  { %12824 = vmatpush3.bf16.msra.mxu1 %v16084_v6  ;;  %v9428_v6 = vld [vmem:[%s16889_s20 + $0x98] sm:$0xff] }
0x1959   :  { %12826 = vmatprep.subr.bf16.mxu1 %v16102_v23 }
0x195c   :  { %12828 = vmatpush3.bf16.msra.mxu1 %v16102_v23  ;;  %v12833_v23 = vpack.c.bf16 %v9428_v6, %v9427_v34  ;;  %v9437_v34 = vld [vmem:[%s16883_s14 + $0xa0] sm:$0xff]  ;;  %v9438_v6 = vld [vmem:[%s16883_s14 + $0xa8] sm:$0xff] }
0x195e   :  { %12834 = vmatprep.subr.bf16.mxu0 %v12833_v23 }
0x195f   :  { %11634 = vmatmul.mubr.msk.f32.vlgmr.msra.gmra.mrb[114].mxu1 %vm2679_vm2, %v13180_v32  ;;  %12836 = vmatpush3.bf16.msra.mxu0 %v12833_v23  ;;  %v12845_v32 = vpack.c.bf16 %v9448_v39, %v9447_v25  ;;  %v12837_v23 = vpack.c.bf16 %v9438_v6, %v9437_v34  ;;  %v9435_v34 = vld [vmem:[%s16891_s22 + $0x4] ss:$0 sm:$0xff] }
0x1961   :  { %12846 = vmatprep.subr.bf16.mxu0 %v12845_v32  ;;  %12838 = vmatprep.subr.bf16.mxu1 %v12837_v23 }
0x1962   :  { %12840 = vmatpush3.bf16.msra.mxu1 %v12837_v23 }
0x1a22   :  { %v11616_v59 = vpop.f32.mrb[112].mxu1 }
0x1a23   :  { %v6832_v12 = vpop.f32.mrb[113].mxu1  ;;  %13181 = vrcp.f32 %v11616_v59  ;;  %v9439_v59 = vld [vmem:[%s16883_s14 + $0xb0] sm:$0xff] }
0x1a24   :  { %13183 = vrcp.f32 %v6832_v12  ;;  %v9440_v12 = vld [vmem:[%s16883_s14 + $0xb8] sm:$0xff] }
0x1a2d   :  { %v13182_v37 = vpop.eup %13181 }
0x1a2e   :  { %v13184_v11 = vpop.eup %13183 }
0x1a32   :  { %v11635_v53 = vpop.f32.mrb[114].mxu1 }
0x1a33   :  { %v6919_v9 = vmul.f32 %v13182_v37, %v11635_v53  ;;  %v6907_v44 = vpop.f32.mrb[115].mxu1  ;;  %v12841_v37 = vpack.c.bf16 %v9440_v12, %v9439_v59  ;;  %v9461_v53 = vld [vmem:[%s16887_s18 + $0xa0] sm:$0xff] }
0x1a34   :  { %v6918_v61 = vmul.f32 %v13184_v11, %v6907_v44  ;;  %v9462_v11 = vld [vmem:[%s16887_s18 + $0xa8] sm:$0xff] }
0x1a35   :  { %12842 = vmatprep.subr.bf16.mxu1 %v12841_v37 }
0x1a36   :  { %11644 = vmatprep.mubr.msk.f32.mxu0 %vm98_vm0, %v6918_v61  ;;  %12844 = vmatpush3.bf16.msra.mxu1 %v12841_v37 }
0x1a37   :  { %11645 = vmatmul.mubr.msk.f32.vlgmr.msra.gmra.mrb[126].mxu0 %vm98_vm0, %v6919_v9  ;;  %v16271_v9 = vpack.c.bf16 %v9462_v11, %v9461_v53 }
0x1a38   :  { %12848 = vmatpush3.bf16.msra.mxu0 %v12845_v32 }
0x1a39   :  { %12850 = vmatprep.subr.bf16.mxu0 %v12849_v56  ;;  %12854 = vmatprep.subr.bf16.mxu1 %v16271_v9 }
0x1a3c   :  { %12852 = vmatpush3.bf16.msra.mxu0 %v12849_v56 }
0x1b0a   :  { %v11646_v41 = vpop.f32.mrb[126].mxu0 }
0x1b0b   :  { %v7011_v38 = vadd.f32 %v11646_v41, %v9430_v58  ;;  %v7005_v3 = vpop.f32.mrb[127].mxu0 }
0x1b0c   :  { %v7006_v14 = vadd.f32 %v9430_v58, %v7005_v3 }
0x1b0d   :  { %v16190_v15 = vadd.f32 %v7011_v38, %v15966_v10 }
0x1b0e   :  { %v16193_v48 = vadd.f32 %v7006_v14, %v15961_v26  ;;  %v16206_v26 = vadd.f32 %v6192_v50, %v15475_v0  ;;  %v6197_v0 = vadd.f32 %v9366_v54, %v16116_v20  ;;  %v6222_v20 = vsel %vm98_vm0, %v16224_v16, 0.0 }
0x1b0f   :  { %v7023_v45 = vsel %vm98_vm0, %v16190_v15, 0.0  ;;  %v7029_v4 = vmul.f32 %v16190_v15, %v16190_v15 }
0x1b10   :  { %7024 = vadd.xlane.f32.xlu1 %v7023_v45  ;;  %v7020_v43 = vsel %vm98_vm0, %v16193_v48, 0.0  ;;  %v7028_v10 = vmul.f32 %v16193_v48, %v16193_v48  ;;  %v6216_v46 = vsel %vm98_vm0, %v16206_v26, 0.0  ;;  %v6230_v19 = vmul.f32 %v16206_v26, %v16206_v26 }
0x1b11   :  { %7021 = vadd.xlane.f32.xlu0 %v7020_v43  ;;  %v7033_v52 = vsel %vm98_vm0, %v7029_v4, 0.0  ;;  %v16228_v1 = vadd.f32 %v6197_v0, %v15486_v42  ;;  %v6242_v42 = vsel %vm98_vm0, %v6232_v51, 0.0 }
0x1b12   :  { %v7030_v2 = vsel %vm98_vm0, %v7028_v10, 0.0  ;;  %v6236_v29 = vsel %vm98_vm0, %v6230_v19, 0.0 }
0x1b13   :  { %v6219_v55 = vsel %vm98_vm0, %v16228_v1, 0.0  ;;  %v6231_v21 = vmul.f32 %v16228_v1, %v16228_v1 }
0x1b14   :  { %7034 = vadd.xlane.f32.xlu1 %v7033_v52 }
0x1b15   :  { %7031 = vadd.xlane.f32.xlu0 %v7030_v2  ;;  %v6239_v49 = vsel %vm98_vm0, %v6231_v21, 0.0 }
0x1b18   :  { %6217 = vadd.xlane.f32.xlu1 %v6216_v46 }
0x1b19   :  { %6214 = vadd.xlane.f32.xlu0 %v6213_v62 }
0x1b1c   :  { %6237 = vadd.xlane.f32.xlu1 %v6236_v29 }
0x1b1d   :  { %6234 = vadd.xlane.f32.xlu0 %v6233_v28 }
0x1b20   :  { %6223 = vadd.xlane.f32.xlu1 %v6222_v20 }
0x1b21   :  { %6220 = vadd.xlane.f32.xlu0 %v6219_v55 }
0x1b24   :  { %6243 = vadd.xlane.f32.xlu1 %v6242_v42 }
0x1b25   :  { %6240 = vadd.xlane.f32.xlu0 %v6239_v49 }
0x1b9d   :  { %v7025_v44 = vpop.xlane.xlu1 %7024 }
0x1b9e   :  { %v7027_v61 = vmul.f32 0.03125, %v7025_v44  ;;  %v7022_v58 = vpop.xlane.xlu0 %7021 }
0x1b9f   :  { %v7026_v41 = vmul.f32 0.03125, %v7022_v58 }
0x1ba0   :  { %v7039_v3 = vmul.f32 %v7027_v61, %v7027_v61  ;;  %v7043_v32 = vsub.f32 %v16190_v15, %v7027_v61  ;;  %v9436_v15 = vld [vmem:[%s16892_s23 + $0x4] ss:$0 sm:$0xff] }
0x1ba1   :  { %v7035_v38 = vpop.xlane.xlu1 %7034  ;;  %v7038_v50 = vmul.f32 %v7026_v41, %v7026_v41  ;;  %v7042_v56 = vsub.f32 %v16193_v48, %v7026_v41 }
0x1ba2   :  { %v7037_v54 = vmul.f32 0.03125, %v7035_v38  ;;  %v7032_v14 = vpop.xlane.xlu0 %7031 }
0x1ba3   :  { %v7036_v45 = vmul.f32 0.03125, %v7032_v14 }
0x1ba4   :  { %v7041_v4 = vsub.f32 %v7037_v54, %v7039_v3 }
0x1ba5   :  { %v7040_v27 = vsub.f32 %v7036_v45, %v7038_v50  ;;  %v6218_v43 = vpop.xlane.xlu1 %6217 }
0x1ba6   :  { %v7045_v10 = vadd.f32 1e-05, %v7041_v4  ;;  %v6226_v52 = vmul.f32 0.03125, %v6218_v43  ;;  %v6215_v2 = vpop.xlane.xlu0 %6214 }
0x1ba7   :  { %v7044_v57 = vadd.f32 1e-05, %v7040_v27  ;;  %v6225_v46 = vmul.f32 0.03125, %v6215_v2  ;;  %v9373_v27 = vld [vmem:[%s16891_s22 + $0x3] ss:$0 sm:$0xff] }
0x1ba8   :  { %13185 = vrsqrt.f32 %v7045_v10  ;;  %v6250_v0 = vmul.f32 %v6226_v52, %v6226_v52  ;;  %v6258_v50 = vsub.f32 %v16206_v26, %v6226_v52 }
0x1ba9   :  { %13187 = vrsqrt.f32 %v7044_v57  ;;  %v6238_v19 = vpop.xlane.xlu1 %6237  ;;  %v6249_v29 = vmul.f32 %v6225_v46, %v6225_v46  ;;  %v6257_v4 = vsub.f32 %v16210_v18, %v6225_v46  ;;  %v9374_v18 = vld [vmem:[%s16892_s23 + $0x3] ss:$0 sm:$0xff]  ;;  %v9463_v57 = vld [vmem:[%s16887_s18 + $0xb0] sm:$0xff]  ;;  %v9464_v46 = vld [vmem:[%s16887_s18 + $0xb8] sm:$0xff]  ;;  %s13329_s18 = smov [#allocation2]  }
0x1baa   :  { %v6246_v62 = vmul.f32 0.03125, %v6238_v19  ;;  %v6235_v5 = vpop.xlane.xlu0 %6234 }
0x1bab   :  { %v6245_v28 = vmul.f32 0.03125, %v6235_v5  ;;  %v12857_v5 = vpack.c.bf16 %v9464_v46, %v9463_v57 }
0x1bac   :  { %v6254_v20 = vsub.f32 %v6246_v62, %v6250_v0 }
0x1bad   :  { %v6253_v51 = vsub.f32 %v6245_v28, %v6249_v29  ;;  %v6224_v55 = vpop.xlane.xlu1 %6223 }
0x1bae   :  { %v6262_v21 = vadd.f32 1e-05, %v6254_v20  ;;  %v6228_v42 = vmul.f32 0.03125, %v6224_v55  ;;  %v6221_v49 = vpop.xlane.xlu0 %6220 }
0x1baf   :  { %v6261_v25 = vadd.f32 1e-05, %v6253_v51  ;;  %v6227_v39 = vmul.f32 0.03125, %v6221_v49 }
0x1bb0   :  { %13189 = vrsqrt.f32 %v6262_v21  ;;  %v6252_v6 = vmul.f32 %v6228_v42, %v6228_v42  ;;  %v6260_v0 = vsub.f32 %v16224_v16, %v6228_v42 }
0x1bb1   :  { %13191 = vrsqrt.f32 %v6261_v25  ;;  %v6244_v40 = vpop.xlane.xlu1 %6243  ;;  %v6251_v53 = vmul.f32 %v6227_v39, %v6227_v39  ;;  %v6259_v28 = vsub.f32 %v16228_v1, %v6227_v39 }
0x1bb2   :  { %v13186_v60 = vpop.eup %13185  ;;  %v6248_v23 = vmul.f32 0.03125, %v6244_v40  ;;  %v6241_v59 = vpop.xlane.xlu0 %6240 }
0x1bb3   :  { %v13188_v12 = vpop.eup %13187  ;;  %v7049_v37 = vmul.f32 %v13186_v60, %v7043_v32  ;;  %v6247_v11 = vmul.f32 0.03125, %v6241_v59 }
0x1bb4   :  { %v7048_v44 = vmul.f32 %v13188_v12, %v7042_v56  ;;  %v6256_v58 = vsub.f32 %v6248_v23, %v6252_v6 }
0x1bb5   :  { %v7057_v61 = vmul.f32 %v9435_v34, %v7049_v37  ;;  %v6255_v38 = vsub.f32 %v6247_v11, %v6251_v53 }
0x1bb6   :  { %v7056_v48 = vmul.f32 %v9435_v34, %v7048_v44  ;;  %v6264_v41 = vadd.f32 1e-05, %v6256_v58 }
0x1bb7   :  { %v6263_v3 = vadd.f32 1e-05, %v6255_v38  ;;  %v16284_v14 = vadd.f32 %v9436_v15, %v7057_v61 }
0x1bb8   :  { %v16282_v54 = vadd.f32 %v9436_v15, %v7056_v48  ;;  %13193 = vrsqrt.f32 %v6264_v41 }
0x1bb9   :  { %13195 = vrsqrt.f32 %v6263_v3 }
0x1bba   :  { %v13190_v45 = vpop.eup %13189  ;;  %11669 = vmatprep.mubr.msk.f32.mxu0 %vm98_vm0, %v16282_v54 }
0x1bbb   :  { %v13192_v43 = vpop.eup %13191  ;;  %v6270_v10 = vmul.f32 %v13190_v45, %v6258_v50  ;;  %11670 = vmatmul.mubr.msk.f32.vlgmr.msra.gmra.mrb[128].mxu0 %vm98_vm0, %v16284_v14 }
0x1bbc   :  { %11672 = vmatprep.mubr.msk.f32.mxu0 %vm98_vm0, %v16282_v54  ;;  %v6269_v26 = vmul.f32 %v13192_v43, %v6257_v4 }
0x1bbd   :  { %v6280_v52 = vmul.f32 %v9373_v27, %v6270_v10 }
0x1bbe   :  { %v6279_v2 = vmul.f32 %v9373_v27, %v6269_v26 }
0x1bbf   :  { %11673 = vmatmul.mubr.msk.f32.gmra.mrb[130].mxu0 %vm98_vm0, %v16284_v14  ;;  %v16313_v62 = vadd.f32 %v9374_v18, %v6280_v52 }
0x1bc0   :  { %11675 = vmatprep.mubr.msk.f32.mxu0 %vm98_vm0, %v16282_v54  ;;  %v16310_v19 = vadd.f32 %v9374_v18, %v6279_v2 }
0x1bc2   :  { %v13194_v29 = vpop.eup %13193  ;;  %11655 = vmatprep.mubr.msk.f32.mxu1 %vm98_vm0, %v16310_v19 }
0x1bc3   :  { %v13196_v20 = vpop.eup %13195  ;;  %11656 = vmatmul.mubr.msk.f32.vlgmr.msra.gmra.mrb[116].mxu1 %vm98_vm0, %v16313_v62  ;;  %11676 = vmatmul.mubr.msk.f32.gmra.mrb[132].mxu0 %vm98_vm0, %v16284_v14  ;;  %v6272_v51 = vmul.f32 %v13194_v29, %v6260_v0 }
0x1bc4   :  { %11678 = vmatprep.mubr.msk.f32.mxu0 %vm98_vm0, %v16282_v54  ;;  %12856 = vmatpush3.bf16.msra.mxu1 %v16271_v9  ;;  %v6271_v16 = vmul.f32 %v13196_v20, %v6259_v28 }
0x1bc5   :  { %v6282_v55 = vmul.f32 %v9373_v27, %v6272_v51  ;;  %12858 = vmatprep.subr.bf16.mxu1 %v12857_v5 }
0x1bc6   :  { %v6281_v1 = vmul.f32 %v9373_v27, %v6271_v16 }
0x1bc7   :  { %11679 = vmatmul.mubr.msk.f32.gmra.mrb[134].mxu0 %vm98_vm0, %v16284_v14  ;;  %v16329_v42 = vadd.f32 %v9374_v18, %v6282_v55 }
0x1bc8   :  { %v16327_v21 = vadd.f32 %v9374_v18, %v6281_v1  ;;  %12860 = vmatpush3.bf16.msra.mxu1 %v12857_v5  ;;  %v9466_v18 = vld [vmem:[%s16888_s19 + $0x5] ss:$0 sm:$0xff] }
0x1bc9   :  { %12886 = vmatprep.subr.bf16.mxu1 %v14593_v13 }
0x1bca   :  { %11658 = vmatprep.mubr.msk.f32.mxu1 %vm98_vm0, %v16327_v21 }
0x1bcb   :  { %11659 = vmatmul.mubr.msk.f32.gmra.mrb[118].mxu1 %vm98_vm0, %v16329_v42 }
0x1bcc   :  { %11689 = vmatprep.mubr.msk.f32.mxu1 %vm98_vm0, %v16282_v54 }
0x1bcf   :  { %11690 = vmatmul.mubr.msk.f32.vlgmr.msra.gmra.mrb[120].mxu1 %vm98_vm0, %v16284_v14 }
0x1bd0   :  { %11692 = vmatprep.mubr.msk.f32.mxu1 %vm98_vm0, %v16282_v54  ;;  %12888 = vmatpush3.bf16.msra.mxu1 %v14593_v13  ;;  %v9452_v13 = vld [vmem:[%s16886_s17 + $0x5] ss:$0 sm:$0xff] }
0x1bd1   :  { %12890 = vmatprep.subr.bf16.mxu1 %v14599_v63 }
0x1bd3   :  { %11693 = vmatmul.mubr.msk.f32.gmra.mrb[122].mxu1 %vm98_vm0, %v16284_v14 }
0x1bd4   :  { %11695 = vmatprep.mubr.msk.f32.mxu1 %vm98_vm0, %v16282_v54  ;;  %12892 = vmatpush3.bf16.msra.mxu1 %v14599_v63 }
0x1bd5   :  { %12894 = vmatprep.subr.bf16.mxu1 %v14604_v35 }
0x1bd7   :  { %11696 = vmatmul.mubr.msk.f32.gmra.mrb[124].mxu1 %vm98_vm0, %v16284_v14 }
0x1bd8   :  { %11698 = vmatprep.mubr.msk.f32.mxu1 %vm98_vm0, %v16282_v54  ;;  %12896 = vmatpush3.bf16.msra.mxu1 %v14604_v35 }
0x1bd9   :  { %12898 = vmatprep.subr.bf16.mxu1 %v14610_v36 }
0x1bdb   :  { %11699 = vmatmul.mubr.msk.f32.gmra.mrb[126].mxu1 %vm98_vm0, %v16284_v14 }
0x1bdc   :  { %12900 = vmatpush3.bf16.msra.mxu1 %v14610_v36  ;;  %v16368_v36 = vld [vmem:[%s16884_s15 + $0x5] ss:$0 sm:$0xff] }
0x1c8e   :  { %v11671_v63 = vpop.f32.mrb[128].mxu0 }
0x1c8f   :  { %v7267_v9 = vadd.f32 %v11671_v63, %v9452_v13  ;;  %v7261_v49 = vpop.f32.mrb[129].mxu0 }
0x1c90   :  { %v7262_v25 = vadd.f32 %v9452_v13, %v7261_v49 }
0x1c91   :  { %v7301_v39 = vmul.f32 %v16038_v30, %v7267_v9 }
0x1c92   :  { %v7300_v32 = vmul.f32 %v16044_v31, %v7262_v25  ;;  %v11674_v35 = vpop.f32.mrb[130].mxu0 }
0x1c93   :  { %v7277_v40 = vadd.f32 %v11674_v35, %v9452_v13  ;;  %v7271_v60 = vpop.f32.mrb[131].mxu0 }
0x1c94   :  { %v12861_v56 = vpack.c.bf16 %v7301_v39, %v7300_v32  ;;  %v7272_v34 = vadd.f32 %v9452_v13, %v7271_v60 }
0x1c95   :  { %v7303_v6 = vmul.f32 %v16056_v17, %v7277_v40 }
0x1c96   :  { %v7302_v23 = vmul.f32 %v16062_v8, %v7272_v34  ;;  %v11657_v59 = vpop.f32.mrb[116].mxu1  ;;  %v11677_v12 = vpop.f32.mrb[132].mxu0  ;;  %12863 = vmatprep.subr.msk.bf16.mxu0 %vm14198_vm1, %v12861_v56 }
0x1c97   :  { %v7287_v37 = vadd.f32 %v11677_v12, %v9452_v13  ;;  %v7157_v53 = vpop.f32.mrb[117].mxu1  ;;  %v7281_v11 = vpop.f32.mrb[133].mxu0  ;;  %12866 = vmatpush3.bf16.xpose.msk.msra.mxu0 %vm14198_vm1, %v12861_v56  ;;  %v7163_v56 = vadd.f32 %v11657_v59, %v16368_v36  ;;  %v13278_v12 = vld [vmem:[%s16929_s29] sm:$0xff] }
0x1c98   :  { %v12867_v44 = vpack.c.bf16 %v7303_v6, %v7302_v23  ;;  %v7158_v58 = vadd.f32 %v16368_v36, %v7157_v53  ;;  %v7282_v15 = vadd.f32 %v9452_v13, %v7281_v11 }
0x1c99   :  { %v7305_v61 = vmul.f32 %v16071_v24, %v7287_v37 }
0x1c9a   :  { %v7304_v38 = vmul.f32 %v16077_v33, %v7282_v15  ;;  %v11680_v48 = vpop.f32.mrb[134].mxu0  ;;  %12869 = vmatprep.subr.msk.bf16.mxu0 %vm14198_vm1, %v12867_v44  ;;  %11717 = vmatprep.mubr.msk.f32.mxu0 %vm98_vm0, %v7158_v58 }
0x1c9b   :  { %v7297_v41 = vadd.f32 %v11680_v48, %v9452_v13  ;;  %v7291_v3 = vpop.f32.mrb[135].mxu0  ;;  %v13280_v48 = vld [vmem:[%s16929_s29 + $0x10] sm:$0xff] }
0x1c9c   :  { %v12873_v50 = vpack.c.bf16 %v7305_v61, %v7304_v38  ;;  %v7292_v45 = vadd.f32 %v9452_v13, %v7291_v3  ;;  %v13279_v61 = vld [vmem:[%s16929_s29 + $0x18] sm:$0xff] }
0x1c9d   :  { %v7307_v4 = vmul.f32 %v16089_v7, %v7297_v41 }
0x1c9e   :  { %v7306_v27 = vmul.f32 %v16095_v22, %v7292_v45  ;;  %v11660_v43 = vpop.f32.mrb[118].mxu1 }
0x1c9f   :  { %v7167_v10 = vpop.f32.mrb[119].mxu1  ;;  %12872 = vmatpush3.bf16.xpose.msk.msra.mxu0 %vm14198_vm1, %v12867_v44  ;;  %v7173_v47 = vadd.f32 %v11660_v43, %v16368_v36 }
0x1ca0   :  { %v12879_v26 = vpack.c.bf16 %v7307_v4, %v7306_v27  ;;  %12875 = vmatprep.subr.msk.bf16.mxu0 %vm14198_vm1, %v12873_v50 }
0x1ca2   :  { %v11691_v52 = vpop.f32.mrb[120].mxu1 }
0x1ca3   :  { %v7393_v2 = vadd.f32 %v11691_v52, %v9466_v18  ;;  %v7387_v57 = vpop.f32.mrb[121].mxu1 }
0x1ca4   :  { %v7388_v46 = vadd.f32 %v9466_v18, %v7387_v57 }
0x1ca5   :  { %v7427_v0 = vmul.f32 %v16038_v30, %v7393_v2 }
0x1ca6   :  { %v7426_v5 = vmul.f32 %v16044_v31, %v7388_v46  ;;  %v11694_v29 = vpop.f32.mrb[122].mxu1 }
0x1ca7   :  { %v7403_v28 = vadd.f32 %v11694_v29, %v9466_v18  ;;  %v7397_v20 = vpop.f32.mrb[123].mxu1  ;;  %12878 = vmatpush3.bf16.xpose.msk.msra.mxu0 %vm14198_vm1, %v12873_v50 }
0x1ca8   :  { %v7398_v51 = vadd.f32 %v9466_v18, %v7397_v20  ;;  %12881 = vmatprep.subr.msk.bf16.mxu0 %vm14198_vm1, %v12879_v26  ;;  %v16396_v16 = vpack.c.bf16 %v7427_v0, %v7426_v5 }
0x1ca9   :  { %v7429_v55 = vmul.f32 %v16056_v17, %v7403_v28 }
0x1caa   :  { %v7428_v1 = vmul.f32 %v16062_v8, %v7398_v51  ;;  %v11697_v13 = vpop.f32.mrb[124].mxu1  ;;  %12902 = vmatprep.subr.bf16.mxu1 %v16396_v16  ;;  %v9509_v51 = vld [vmem:[%s16918_s6 + $0x120] sm:$0xff] }
0x1cab   :  { %v7413_v30 = vadd.f32 %v11697_v13, %v9466_v18  ;;  %v7407_v31 = vpop.f32.mrb[125].mxu1  ;;  %v9512_v13 = vld [vmem:[%s16918_s6 + $0x138] sm:$0xff] }
0x1cac   :  { %v7408_v63 = vadd.f32 %v9466_v18, %v7407_v31  ;;  %v16401_v9 = vpack.c.bf16 %v7429_v55, %v7428_v1  ;;  %v9511_v1 = vld [vmem:[%s16918_s6 + $0x130] sm:$0xff]  ;;  %v9495_v31 = vld [vmem:[%s16889_s20 + $0xa0] sm:$0xff] }
0x1cad   :  { %v7431_v49 = vmul.f32 %v16071_v24, %v7413_v30  ;;  %v7168_v24 = vadd.f32 %v16368_v36, %v7167_v10  ;;  %v12929_v30 = vpack.c.bf16 %v9512_v13, %v9511_v1 }
0x1cae   :  { %v7430_v25 = vmul.f32 %v16077_v33, %v7408_v63  ;;  %v11700_v39 = vpop.f32.mrb[126].mxu1  ;;  %v9496_v63 = vld [vmem:[%s16889_s20 + $0xa8] sm:$0xff] }
0x1caf   :  { %v7423_v32 = vadd.f32 %v11700_v39, %v9466_v18  ;;  %v7417_v35 = vpop.f32.mrb[127].mxu1  ;;  %12884 = vmatpush3.bf16.xpose.msk.msra.mxu0 %vm14198_vm1, %v12879_v26 }
0x1cb0   :  { %v7418_v17 = vadd.f32 %v9466_v18, %v7417_v35  ;;  %v16407_v8 = vpack.c.bf16 %v7431_v49, %v7430_v25  ;;  %v9497_v49 = vld [vmem:[%s16889_s20 + $0xb0] sm:$0xff]  ;;  %v9498_v25 = vld [vmem:[%s16889_s20 + $0xb8] sm:$0xff]  ;;  %v9518_v35 = vld [vmem:[%s16879_s10 + $0x488] sm:$0xff] }
0x1cb1   :  { %v7433_v40 = vmul.f32 %v16089_v7, %v7423_v32  ;;  %v12921_v39 = vpack.c.bf16 %v9498_v25, %v9497_v49  ;;  %v9517_v32 = vld [vmem:[%s16879_s10 + $0x480] sm:$0xff] }
0x1cb2   :  { %v7432_v60 = vmul.f32 %v16095_v22, %v7418_v17  ;;  %v13277_v22 = vld [vmem:[%s16929_s29 + $0x8] sm:$0xff]  ;;  %v12933_v17 = vpack.c.bf16 %v9518_v35, %v9517_v32 }
0x1cb4   :  { %v16412_v34 = vpack.c.bf16 %v7433_v40, %v7432_v60 }
0x1cb6   :  { %11718 = vmatmul.mubr.msk.f32.vlgmr.msra.gmra.mrb[136].mxu0 %vm98_vm0, %v7163_v56 }
0x1cb7   :  { %11720 = vmatprep.mubr.msk.f32.mxu0 %vm98_vm0, %v7168_v24 }
0x1cba   :  { %11721 = vmatmul.mubr.msk.f32.gmra.mrb[138].mxu0 %vm98_vm0, %v7173_v47  ;;  %v9519_v47 = vld [vmem:[%s16879_s10 + $0x490] sm:$0xff] }
0x1d89   :  { %v11719_v33 = vpop.f32.mrb[136].mxu0 }
0x1d8a   :  { %v7556_v6 = vmul.f32 0.35355338, %v11719_v33  ;;  %v7536_v23 = vpop.f32.mrb[137].mxu0  ;;  %v9520_v33 = vld [vmem:[%s16879_s10 + $0x498] sm:$0xff] }
0x1d8b   :  { %v7555_v7 = vmul.f32 0.35355338, %v7536_v23 }
0x1d8c   :  { %v7560_v59 = vsub.f32 %v7556_v6, %v13277_v22 }
0x1d8d   :  { %v7559_v37 = vsub.f32 %v7555_v7, %v13278_v12  ;;  %v11722_v53 = vpop.f32.mrb[138].mxu0 }
0x1d8e   :  { %v7558_v11 = vmul.f32 0.35355338, %v11722_v53  ;;  %v7546_v44 = vpop.f32.mrb[139].mxu0  ;;  %v7566_v36 = vsel %vm2679_vm2, %v7560_v59, -inf  ;;  %v9521_v53 = vld [vmem:[%s16879_s10 + $0x4a0] sm:$0xff] }
0x1d8f   :  { %v7557_v58 = vmul.f32 0.35355338, %v7546_v44  ;;  %7567 = vmax.xlane.f32.xlu1 %v7566_v36  ;;  %v7563_v15 = vsel %vm2679_vm2, %v7559_v37, -inf }
0x1d90   :  { %v7562_v38 = vsub.f32 %v7558_v11, %v13279_v61  ;;  %7564 = vmax.xlane.f32.xlu0 %v7563_v15  ;;  %v9522_v11 = vld [vmem:[%s16879_s10 + $0x4a8] sm:$0xff] }
0x1d91   :  { %v7561_v41 = vsub.f32 %v7557_v58, %v13280_v48  ;;  %v9514_v61 = vld [vmem:[%s16921_s30 + $0x9] ss:$0 sm:$0xff] }
0x1d92   :  { %v7572_v3 = vsel %vm2679_vm2, %v7562_v38, -inf }
0x1d93   :  { %7573 = vmax.xlane.f32.xlu1 %v7572_v3  ;;  %v7569_v50 = vsel %vm2679_vm2, %v7561_v41, -inf  ;;  %v9524_v3 = vld [vmem:[%s16879_s10 + $0x4b8] sm:$0xff] }
0x1d94   :  { %7570 = vmax.xlane.f32.xlu0 %v7569_v50 }
0x1e1c   :  { %v7568_v45 = vpop.xlane.xlu1 %7567 }
0x1e1d   :  { %v7576_v4 = vsub.f32 %v7560_v59, %v7568_v45  ;;  %v7565_v27 = vpop.xlane.xlu0 %7564  ;;  %v12937_v59 = vpack.c.bf16 %v9520_v33, %v9519_v47 }
0x1e1e   :  { %v7575_v43 = vsub.f32 %v7559_v37, %v7565_v27 }
0x1e1f   :  { %v7581_v10 = vmul.f32 1.442695, %v7576_v4 }
0x1e20   :  { %v7579_v26 = vmul.f32 1.442695, %v7575_v43  ;;  %v7574_v18 = vpop.xlane.xlu1 %7573  ;;  %v9525_v43 = vld [vmem:[%s16879_s10 + $0x4c0] sm:$0xff] }
0x1e21   :  { %v7578_v52 = vsub.f32 %v7562_v38, %v7574_v18  ;;  %v7571_v2 = vpop.xlane.xlu0 %7570  ;;  %v12941_v38 = vpack.c.bf16 %v9522_v11, %v9521_v53  ;;  %v9527_v18 = vld [vmem:[%s16879_s10 + $0x4d0] sm:$0xff] }
0x1e22   :  { %13197 = vpow2.f32 %v7579_v26  ;;  %v7577_v57 = vsub.f32 %v7561_v41, %v7571_v2  ;;  %v9523_v41 = vld [vmem:[%s16879_s10 + $0x4b0] sm:$0xff] }
0x1e23   :  { %13199 = vpow2.f32 %v7581_v10  ;;  %v7585_v46 = vmul.f32 1.442695, %v7578_v52  ;;  %v12945_v4 = vpack.c.bf16 %v9524_v3, %v9523_v41  ;;  %v9526_v10 = vld [vmem:[%s16879_s10 + $0x4c8] sm:$0xff]  ;;  %v9528_v52 = vld [vmem:[%s16879_s10 + $0x4d8] sm:$0xff] }
0x1e24   :  { %v7583_v0 = vmul.f32 1.442695, %v7577_v57  ;;  %v12949_v26 = vpack.c.bf16 %v9526_v10, %v9525_v43  ;;  %v12953_v2 = vpack.c.bf16 %v9528_v52, %v9527_v18  ;;  %v9529_v57 = vld [vmem:[%s16879_s10 + $0x4e0] sm:$0xff]  ;;  %v9572_v10 = vld [vmem:[%s16918_s6 + $0x168] sm:$0xff]  ;;  %v9573_v18 = vld [vmem:[%s16918_s6 + $0x170] sm:$0xff] }
0x1e25   :  { %v9571_v43 = vld [vmem:[%s16918_s6 + $0x160] sm:$0xff]  ;;  %v9574_v52 = vld [vmem:[%s16918_s6 + $0x178] sm:$0xff] }
0x1e26   :  { %13201 = vpow2.f32 %v7583_v0 }
0x1e27   :  { %13203 = vpow2.f32 %v7585_v46  ;;  %v9530_v46 = vld [vmem:[%s16879_s10 + $0x4e8] sm:$0xff] }
0x1e28   :  { %v12957_v0 = vpack.c.bf16 %v9530_v46, %v9529_v57  ;;  %v9549_v57 = vld [vmem:[%s16879_s10 + $0x500] sm:$0xff]  ;;  %v9550_v46 = vld [vmem:[%s16879_s10 + $0x508] sm:$0xff] }
0x1e2c   :  { %v13198_v5 = vpop.eup %13197 }
0x1e2d   :  { %v13200_v29 = vpop.eup %13199  ;;  %11739 = vmatprep.mubr.msk.f32.mxu1 %vm2679_vm2, %v13198_v5 }
0x1e2e   :  { %11740 = vmatmul.mubr.msk.f32.vlgmr.msra.gmra.mrb[128].mxu1 %vm2679_vm2, %v13200_v29 }
0x1e2f   :  { %12904 = vmatpush3.bf16.msra.mxu1 %v16396_v16  ;;  %v9510_v16 = vld [vmem:[%s16918_s6 + $0x128] sm:$0xff] }
0x1e30   :  { %v13202_v28 = vpop.eup %13201  ;;  %12906 = vmatprep.subr.bf16.mxu1 %v16401_v9  ;;  %v12925_v55 = vpack.c.bf16 %v9510_v16, %v9509_v51  ;;  %v9500_v16 = vld [vmem:[%s16890_s21 + $0x5] ss:$0 sm:$0xff] }
0x1e31   :  { %v13204_v20 = vpop.eup %13203  ;;  %11742 = vmatprep.mubr.msk.f32.mxu1 %vm2679_vm2, %v13202_v28 }
0x1e32   :  { %11743 = vmatmul.mubr.msk.f32.gmra.mrb[130].mxu1 %vm2679_vm2, %v13204_v20 }
0x1e33   :  { %12908 = vmatpush3.bf16.msra.mxu1 %v16401_v9  ;;  %11761 = vmatprep.mubr.msk.f32.mxu1 %vm2679_vm2, %v13198_v5  ;;  %v12917_v9 = vpack.c.bf16 %v9496_v63, %v9495_v31  ;;  %v9531_v5 = vld [vmem:[%s16879_s10 + $0x4f0] sm:$0xff] }
0x1e34   :  { %12910 = vmatprep.subr.bf16.mxu1 %v16407_v8 }
0x1e35   :  { %12918 = vmatprep.subr.bf16.mxu0 %v12917_v9 }
0x1e36   :  { %12920 = vmatpush3.bf16.msra.mxu0 %v12917_v9 }
0x1e37   :  { %12912 = vmatpush3.bf16.msra.mxu1 %v16407_v8  ;;  %12922 = vmatprep.subr.bf16.mxu0 %v12921_v39 }
0x1e38   :  { %12914 = vmatprep.subr.bf16.mxu1 %v16412_v34 }
0x1e3a   :  { %12924 = vmatpush3.bf16.msra.mxu0 %v12921_v39 }
0x1e3b   :  { %12916 = vmatpush3.bf16.msra.mxu1 %v16412_v34  ;;  %12934 = vmatprep.subr.bf16.mxu0 %v12933_v17 }
0x1e3c   :  { %12926 = vmatprep.subr.bf16.mxu1 %v12925_v55 }
0x1e3e   :  { %11762 = vmatmul.mubr.msk.f32.vlgmr.msra.gmra.mrb[132].mxu1 %vm2679_vm2, %v13200_v29  ;;  %v9532_v29 = vld [vmem:[%s16879_s10 + $0x4f8] sm:$0xff] }
0x1e3f   :  { %11764 = vmatprep.mubr.msk.f32.mxu1 %vm2679_vm2, %v13202_v28  ;;  %12928 = vmatpush3.bf16.msra.mxu1 %v12925_v55  ;;  %v12961_v28 = vpack.c.bf16 %v9532_v29, %v9531_v5 }
0x1e40   :  { %12930 = vmatprep.subr.bf16.mxu1 %v12929_v30 }
0x1e42   :  { %11765 = vmatmul.mubr.msk.f32.gmra.mrb[134].mxu1 %vm2679_vm2, %v13204_v20 }
0x1e43   :  { %12932 = vmatpush3.bf16.msra.mxu1 %v12929_v30  ;;  %11789 = vmatprep.mubr.msk.f32.mxu1 %vm98_vm0, %v16282_v54 }
0x1e46   :  { %11790 = vmatmul.mubr.msk.f32.vlgmr.msra.gmra.mrb[136].mxu1 %vm98_vm0, %v16284_v14 }
0x1f01   :  { %v11741_v8 = vpop.f32.mrb[128].mxu1 }
0x1f02   :  { %v7665_v40 = vpop.f32.mrb[129].mxu1  ;;  %13205 = vrcp.f32 %v11741_v8 }
0x1f03   :  { %13207 = vrcp.f32 %v7665_v40 }
0x1f05   :  { %v11744_v60 = vpop.f32.mrb[130].mxu1 }
0x1f06   :  { %v7675_v56 = vpop.f32.mrb[131].mxu1  ;;  %13209 = vrcp.f32 %v11744_v60 }
0x1f07   :  { %13211 = vrcp.f32 %v7675_v56 }
0x1f0c   :  { %v13206_v34 = vpop.eup %13205 }
0x1f0d   :  { %v13208_v6 = vpop.eup %13207 }
0x1f10   :  { %v13210_v12 = vpop.eup %13209 }
0x1f11   :  { %v11763_v24 = vpop.f32.mrb[132].mxu1  ;;  %v13212_v44 = vpop.eup %13211 }
0x1f12   :  { %v7774_v23 = vmul.f32 %v13206_v34, %v11763_v24  ;;  %v7750_v7 = vpop.f32.mrb[133].mxu1 }
0x1f13   :  { %v7773_v22 = vmul.f32 %v13208_v6, %v7750_v7 }
0x1f15   :  { %v11766_v37 = vpop.f32.mrb[134].mxu1  ;;  %11775 = vmatprep.mubr.msk.f32.mxu0 %vm98_vm0, %v7773_v22  ;;  %v9534_v22 = vld [vmem:[%s16880_s11 + $0x9] ss:$0 sm:$0xff] }
0x1f16   :  { %v7776_v36 = vmul.f32 %v13210_v12, %v11766_v37  ;;  %v7760_v58 = vpop.f32.mrb[135].mxu1  ;;  %11776 = vmatmul.mubr.msk.f32.vlgmr.msra.gmra.mrb[140].mxu0 %vm98_vm0, %v7774_v23 }
0x1f17   :  { %v7775_v15 = vmul.f32 %v13212_v44, %v7760_v58  ;;  %12936 = vmatpush3.bf16.msra.mxu0 %v12933_v17 }
0x1f18   :  { %12938 = vmatprep.subr.bf16.mxu0 %v12937_v59 }
0x1f19   :  { %11778 = vmatprep.mubr.msk.f32.mxu0 %vm98_vm0, %v7775_v15  ;;  %v11791_v48 = vpop.f32.mrb[136].mxu1 }
0x1f1a   :  { %11779 = vmatmul.mubr.msk.f32.gmra.mrb[142].mxu0 %vm98_vm0, %v7776_v36  ;;  %v8054_v50 = vpop.f32.mrb[137].mxu1  ;;  %v8060_v20 = vadd.f32 %v11791_v48, %v9514_v61 }
0x1f1b   :  { %v8055_v45 = vadd.f32 %v9514_v61, %v8054_v50  ;;  %12940 = vmatpush3.bf16.msra.mxu0 %v12937_v59  ;;  %v9539_v61 = vld [vmem:[%s16918_s6 + $0x140] sm:$0xff]  ;;  %v9541_v50 = vld [vmem:[%s16918_s6 + $0x150] sm:$0xff] }
0x1f1c   :  { %12942 = vmatprep.subr.bf16.mxu0 %v12941_v38  ;;  %v8064_v51 = vmax.f32 %v8060_v20, 0.0 }
0x1f1d   :  { %v8063_v27 = vmax.f32 %v8055_v45, 0.0  ;;  %v9542_v45 = vld [vmem:[%s16918_s6 + $0x158] sm:$0xff] }
0x1f1f   :  { %12944 = vmatpush3.bf16.msra.mxu0 %v12941_v38  ;;  %11824 = vmatprep.mubr.f32.mxu0 %v8063_v27  ;;  %v9540_v38 = vld [vmem:[%s16918_s6 + $0x148] sm:$0xff]  ;;  %s8806_s6 = sshll.u32 %s13329_s18, 4  ;;  %s8807_s6 = int_to_ptr.vmem [resolvable:$true] %s8806_s6 }
0x1f20   :  { %12946 = vmatprep.subr.bf16.mxu0 %v12945_v4  ;;  %v12965_v48 = vpack.c.bf16 %v9540_v38, %v9539_v61  ;;  %s13281_s16 = scalar_lea.vmem %s8807_s6, 512  ;;  %p13286_p1 = scmp.lt.s32.totalorder %s8807_s6, %s8807_s6 }
0x1f21   :  { %p13282_p0 = scmp.ne.s32.totalorder %s8807_s6, %s13281_s16  ;;  %p13287_p2 = scmp.lt.s32.totalorder %s13281_s16, %s13281_s16 }
0x1f22   :  { %12966 = vmatprep.subr.bf16.mxu1 %v12965_v48 }
0x1f23   :  { %12948 = vmatpush3.bf16.msra.mxu0 %v12945_v4  ;;  %12968 = vmatpush3.bf16.msra.mxu1 %v12965_v48  ;;  %v12969_v4 = vpack.c.bf16 %v9542_v45, %v9541_v50  ;;  %v9551_v45 = vld [vmem:[%s16879_s10 + $0x510] sm:$0xff]  ;;  %p13288_p3 = por %p13287_p2, %p13286_p1 }
0x1f24   :  { %12950 = vmatprep.subr.bf16.mxu0 %v12949_v26 }
0x1f25   :  { %12970 = vmatprep.subr.bf16.mxu1 %v12969_v4  ;;  %p13289_p4 = pnand %p13288_p3, %p13282_p0 }
0x1f27   :  { %12952 = vmatpush3.bf16.msra.mxu0 %v12949_v26  ;;  %12972 = vmatpush3.bf16.msra.mxu1 %v12969_v4  ;;  %v13005_v26 = vpack.c.bf16 %v9572_v10, %v9571_v43  ;;  %v9552_v4 = vld [vmem:[%s16879_s10 + $0x518] sm:$0xff] }
0x1f28   :  { %12954 = vmatprep.subr.bf16.mxu0 %v12953_v2 }
0x1f2b   :  { %12956 = vmatpush3.bf16.msra.mxu0 %v12953_v2  ;;  %v13009_v2 = vpack.c.bf16 %v9574_v52, %v9573_v18 }
0x1f2c   :  { %12958 = vmatprep.subr.bf16.mxu0 %v12957_v0 }
0x1f2f   :  { %12960 = vmatpush3.bf16.msra.mxu0 %v12957_v0  ;;  %v12973_v0 = vpack.c.bf16 %v9550_v46, %v9549_v57 }
0x1f30   :  { %12962 = vmatprep.subr.bf16.mxu0 %v12961_v28 }
0x1f31   :  { %12974 = vmatprep.subr.bf16.mxu1 %v12973_v0 }
0x1f33   :  { %12964 = vmatpush3.bf16.msra.mxu0 %v12961_v28 }
0x1f34   :  { %13006 = vmatprep.subr.bf16.mxu0 %v13005_v26 }
0x1f36   :  { %11825 = vmatmul.mubr.f32.vlgmr.msra.gmra.mrb[144].mxu0 %v8064_v51 }
0x1f37   :  { %13008 = vmatpush3.bf16.msra.mxu0 %v13005_v26  ;;  %v12977_v26 = vpack.c.bf16 %v9552_v4, %v9551_v45 }
0x1f38   :  { %13010 = vmatprep.subr.bf16.mxu0 %v13009_v2 }
0x1f3b   :  { %13012 = vmatpush3.bf16.msra.mxu0 %v13009_v2 }
0x1fe9   :  { %v11777_v55 = vpop.f32.mrb[140].mxu0 }
0x1fea   :  { %v7874_v1 = vadd.f32 %v11777_v55, %v9500_v16  ;;  %v7868_v13 = vpop.f32.mrb[141].mxu0 }
0x1feb   :  { %v7869_v30 = vadd.f32 %v9500_v16, %v7868_v13 }
0x1fec   :  { %v16537_v31 = vadd.f32 %v7874_v1, %v16313_v62 }
0x1fed   :  { %v16540_v63 = vadd.f32 %v7869_v30, %v16310_v19  ;;  %v11780_v9 = vpop.f32.mrb[142].mxu0 }
0x1fee   :  { %v7878_v49 = vpop.f32.mrb[143].mxu0  ;;  %v7898_v25 = vsel %vm98_vm0, %v16537_v31, 0.0  ;;  %v7912_v39 = vmul.f32 %v16537_v31, %v16537_v31  ;;  %v7884_v32 = vadd.f32 %v11780_v9, %v9500_v16 }
0x1fef   :  { %7899 = vadd.xlane.f32.xlu1 %v7898_v25  ;;  %v7895_v35 = vsel %vm98_vm0, %v16540_v63, 0.0  ;;  %v7911_v17 = vmul.f32 %v16540_v63, %v16540_v63  ;;  %v7879_v60 = vadd.f32 %v9500_v16, %v7878_v49 }
0x1ff0   :  { %7896 = vadd.xlane.f32.xlu0 %v7895_v35  ;;  %v7918_v8 = vsel %vm98_vm0, %v7912_v39, 0.0  ;;  %v16552_v40 = vadd.f32 %v7884_v32, %v16329_v42 }
0x1ff1   :  { %v7915_v56 = vsel %vm98_vm0, %v7911_v17, 0.0  ;;  %v16556_v34 = vadd.f32 %v7879_v60, %v16327_v21 }
0x1ff2   :  { %v7904_v24 = vsel %vm98_vm0, %v16552_v40, 0.0  ;;  %v7914_v23 = vmul.f32 %v16552_v40, %v16552_v40 }
0x1ff3   :  { %7919 = vadd.xlane.f32.xlu1 %v7918_v8  ;;  %v7901_v47 = vsel %vm98_vm0, %v16556_v34, 0.0  ;;  %v7913_v33 = vmul.f32 %v16556_v34, %v16556_v34 }
0x1ff4   :  { %7916 = vadd.xlane.f32.xlu0 %v7915_v56  ;;  %v7924_v7 = vsel %vm98_vm0, %v7914_v23, 0.0 }
0x1ff5   :  { %v7921_v6 = vsel %vm98_vm0, %v7913_v33, 0.0 }
0x1ff8   :  { %7905 = vadd.xlane.f32.xlu0 %v7904_v24 }
0x1ffc   :  { %7902 = vadd.xlane.f32.xlu0 %v7901_v47 }
0x2000   :  { %7922 = vadd.xlane.f32.xlu0 %v7921_v6 }
0x2004   :  { %7925 = vadd.xlane.f32.xlu0 %v7924_v7 }
0x2009   :  { %v11826_v59 = vpop.f32.mrb[144].mxu0 }
0x200a   :  { %v8162_v12 = vadd.f32 %v11826_v59, %v9534_v22  ;;  %v8156_v37 = vpop.f32.mrb[145].mxu0 }
0x200b   :  { %v8157_v53 = vadd.f32 %v9534_v22, %v8156_v37  ;;  %v9507_v22 = vld [vmem:[%s16891_s22 + $0x5] ss:$0 sm:$0xff] }
0x200c   :  { %v16572_v11 = vadd.f32 %v8162_v12, %v16284_v14 }
0x200d   :  { %v16575_v44 = vadd.f32 %v8157_v53, %v16282_v54 }
0x200e   :  { %v8174_v36 = vsel %vm98_vm0, %v16572_v11, 0.0  ;;  %v8180_v3 = vmul.f32 %v16572_v11, %v16572_v11 }
0x200f   :  { %8175 = vadd.xlane.f32.xlu1 %v8174_v36  ;;  %v8171_v58 = vsel %vm98_vm0, %v16575_v44, 0.0  ;;  %v8179_v15 = vmul.f32 %v16575_v44, %v16575_v44 }
0x2010   :  { %v8184_v27 = vsel %vm98_vm0, %v8180_v3, 0.0 }
0x2011   :  { %v8181_v41 = vsel %vm98_vm0, %v8179_v15, 0.0 }
0x2013   :  { %8172 = vadd.xlane.f32.xlu1 %v8171_v58  ;;  %v9508_v58 = vld [vmem:[%s16892_s23 + $0x5] ss:$0 sm:$0xff] }
0x2017   :  { %8182 = vadd.xlane.f32.xlu1 %v8181_v41 }
0x201b   :  { %8185 = vadd.xlane.f32.xlu1 %v8184_v27 }
0x207c   :  { %v7900_v5 = vpop.xlane.xlu1 %7899 }
0x207d   :  { %v7908_v29 = vmul.f32 0.03125, %v7900_v5  ;;  %v7897_v28 = vpop.xlane.xlu0 %7896 }
0x207e   :  { %v7907_v20 = vmul.f32 0.03125, %v7897_v28  ;;  %v9555_v28 = vld [vmem:[%s16879_s10 + $0x530] sm:$0xff] }
0x207f   :  { %v7932_v16 = vmul.f32 %v7908_v29, %v7908_v29  ;;  %v7940_v47 = vsub.f32 %v16537_v31, %v7908_v29 }
0x2080   :  { %v7920_v51 = vpop.xlane.xlu1 %7919  ;;  %v7931_v13 = vmul.f32 %v7907_v20, %v7907_v20  ;;  %v7939_v23 = vsub.f32 %v16540_v63, %v7907_v20  ;;  %v9556_v20 = vld [vmem:[%s16879_s10 + $0x538] sm:$0xff] }
0x2081   :  { %v7928_v55 = vmul.f32 0.03125, %v7920_v51  ;;  %v7917_v1 = vpop.xlane.xlu0 %7916 }
0x2082   :  { %v7927_v30 = vmul.f32 0.03125, %v7917_v1 }
0x2083   :  { %v7936_v9 = vsub.f32 %v7928_v55, %v7932_v16 }
0x2084   :  { %v7935_v49 = vsub.f32 %v7927_v30, %v7931_v13  ;;  %v12985_v13 = vpack.c.bf16 %v9556_v20, %v9555_v28  ;;  %v9587_v28 = vld [vmem:[%s16879_s10 + $0x5c0] sm:$0xff] }
0x2085   :  { %v7944_v25 = vadd.f32 1e-05, %v7936_v9  ;;  %v7906_v39 = vpop.xlane.xlu0 %7905 }
0x2086   :  { %v7943_v32 = vadd.f32 1e-05, %v7935_v49  ;;  %v7910_v60 = vmul.f32 0.03125, %v7906_v39  ;;  %v9558_v39 = vld [vmem:[%s16879_s10 + $0x548] sm:$0xff] }
0x2087   :  { %13213 = vrsqrt.f32 %v7944_v25  ;;  %v9557_v25 = vld [vmem:[%s16879_s10 + $0x540] sm:$0xff] }
0x2088   :  { %13215 = vrsqrt.f32 %v7943_v32  ;;  %v7934_v37 = vmul.f32 %v7910_v60, %v7910_v60  ;;  %v7942_v46 = vsub.f32 %v16552_v40, %v7910_v60  ;;  %v12989_v60 = vpack.c.bf16 %v9558_v39, %v9557_v25  ;;  %v9544_v39 = vld [vmem:[%s16921_s30 + $0xa] ss:$0 sm:$0xff] }
0x2089   :  { %v7903_v35 = vpop.xlane.xlu0 %7902 }
0x208a   :  { %v7909_v17 = vmul.f32 0.03125, %v7903_v35 }
0x208c   :  { %v7933_v56 = vmul.f32 %v7909_v17, %v7909_v17  ;;  %v7941_v18 = vsub.f32 %v16556_v34, %v7909_v17 }
0x208d   :  { %v7923_v8 = vpop.xlane.xlu0 %7922 }
0x208e   :  { %v7929_v24 = vmul.f32 0.03125, %v7923_v8 }
0x2090   :  { %v7937_v33 = vsub.f32 %v7929_v24, %v7933_v56 }
0x2091   :  { %v13214_v6 = vpop.eup %13213  ;;  %v7926_v7 = vpop.xlane.xlu0 %7925 }
0x2092   :  { %v13216_v59 = vpop.eup %13215  ;;  %v7952_v12 = vmul.f32 %v13214_v6, %v7940_v47  ;;  %v7945_v53 = vadd.f32 1e-05, %v7937_v33  ;;  %v7930_v36 = vmul.f32 0.03125, %v7926_v7  ;;  %v9559_v33 = vld [vmem:[%s16879_s10 + $0x550] sm:$0xff]  ;;  %v9560_v6 = vld [vmem:[%s16879_s10 + $0x558] sm:$0xff] }
0x2093   :  { %v7951_v15 = vmul.f32 %v13216_v59, %v7939_v23 }
0x2094   :  { %13217 = vrsqrt.f32 %v7945_v53  ;;  %v7938_v31 = vsub.f32 %v7930_v36, %v7934_v37  ;;  %v7962_v61 = vmul.f32 %v9507_v22, %v7952_v12  ;;  %v9562_v12 = vld [vmem:[%s16879_s10 + $0x568] sm:$0xff] }
0x2095   :  { %v7961_v38 = vmul.f32 %v9507_v22, %v7951_v15 }
0x2096   :  { %v7946_v63 = vadd.f32 1e-05, %v7938_v31  ;;  %v7972_v48 = vadd.f32 %v9508_v58, %v7962_v61  ;;  %v9538_v31 = vld [vmem:[%s16882_s13 + $0x9] ss:$0 sm:$0xff] }
0x2097   :  { %v7971_v41 = vadd.f32 %v9508_v58, %v7961_v38 }
0x2098   :  { %13219 = vrsqrt.f32 %v7946_v63  ;;  %v8222_v3 = vadd.f32 %v7972_v48, %v16313_v62  ;;  %v9554_v62 = vld [vmem:[%s16879_s10 + $0x528] sm:$0xff] }
0x2099   :  { %v8221_v50 = vadd.f32 %v7971_v41, %v16310_v19  ;;  %v9553_v19 = vld [vmem:[%s16879_s10 + $0x520] sm:$0xff] }
0x209a   :  { %v16635_v10 = vmul.f32 0.5, %v8222_v3  ;;  %v12981_v34 = vpack.c.bf16 %v9554_v62, %v9553_v19  ;;  %v9581_v62 = vld [vmem:[%s16879_s10 + $0x590] sm:$0xff] }
0x209b   :  { %v16633_v27 = vmul.f32 0.5, %v8221_v50 }
0x209c   :  { %v8176_v43 = vpop.xlane.xlu1 %8175 }
0x209d   :  { %11835 = vmatprep.mubr.msk.f32.mxu1 %vm98_vm0, %v16633_v27 }
0x209e   :  { %v13218_v52 = vpop.eup %13217  ;;  %11836 = vmatmul.mubr.msk.f32.vlgmr.msra.gmra.mrb[138].mxu1 %vm98_vm0, %v16635_v10 }
0x209f   :  { %v7953_v2 = vmul.f32 %v13218_v52, %v7941_v18  ;;  %12976 = vmatpush3.bf16.msra.mxu1 %v12973_v0  ;;  %v8178_v0 = vmul.f32 0.03125, %v8176_v43  ;;  %v9580_v18 = vld [vmem:[%s16879_s10 + $0x588] sm:$0xff]  ;;  %v9582_v52 = vld [vmem:[%s16879_s10 + $0x598] sm:$0xff] }
0x20a0   :  { %v8173_v57 = vpop.xlane.xlu1 %8172  ;;  %12978 = vmatprep.subr.bf16.mxu1 %v12977_v26 }
0x20a1   :  { %v8177_v5 = vmul.f32 0.03125, %v8173_v57  ;;  %v7963_v29 = vmul.f32 %v9507_v22, %v7953_v2  ;;  %v8190_v56 = vmul.f32 %v8178_v0, %v8178_v0  ;;  %v8194_v61 = vsub.f32 %v16572_v11, %v8178_v0  ;;  %v9563_v11 = vld [vmem:[%s16879_s10 + $0x570] sm:$0xff]  ;;  %v9583_v57 = vld [vmem:[%s16879_s10 + $0x5a0] sm:$0xff]  ;;  %v9590_v0 = vld [vmem:[%s16879_s10 + $0x5d8] sm:$0xff] }
0x20a2   :  { %v13220_v51 = vpop.eup %13219  ;;  %v13017_v2 = vpack.c.bf16 %v9582_v52, %v9581_v62 }
0x20a3   :  { %v7973_v16 = vadd.f32 %v9508_v58, %v7963_v29  ;;  %v7954_v55 = vmul.f32 %v13220_v51, %v7942_v46  ;;  %12980 = vmatpush3.bf16.msra.mxu1 %v12977_v26  ;;  %v8189_v30 = vmul.f32 %v8177_v5, %v8177_v5  ;;  %v8193_v53 = vsub.f32 %v16575_v44, %v8177_v5  ;;  %v9585_v5 = vld [vmem:[%s16879_s10 + $0x5b0] sm:$0xff]  ;;  %v9586_v29 = vld [vmem:[%s16879_s10 + $0x5b8] sm:$0xff]  ;;  %v9588_v51 = vld [vmem:[%s16879_s10 + $0x5c8] sm:$0xff] }
0x20a4   :  { %v8183_v1 = vpop.xlane.xlu1 %8182  ;;  %12982 = vmatprep.subr.bf16.mxu1 %v12981_v34  ;;  %v13025_v20 = vpack.c.bf16 %v9586_v29, %v9585_v5 }
0x20a5   :  { %v8187_v40 = vmul.f32 0.03125, %v8183_v1  ;;  %v8223_v9 = vadd.f32 %v7973_v16, %v16327_v21  ;;  %v7964_v49 = vmul.f32 %v9507_v22, %v7954_v55  ;;  %v12993_v22 = vpack.c.bf16 %v9560_v6, %v9559_v33  ;;  %v9589_v55 = vld [vmem:[%s16879_s10 + $0x5d0] sm:$0xff] }
0x20a6   :  { %v13029_v16 = vpack.c.bf16 %v9588_v51, %v9587_v28  ;;  %v13033_v1 = vpack.c.bf16 %v9590_v0, %v9589_v55 }
0x20a7   :  { %v8191_v32 = vsub.f32 %v8187_v40, %v8189_v30  ;;  %v16662_v35 = vmul.f32 0.5, %v8223_v9  ;;  %v7974_v17 = vadd.f32 %v9508_v58, %v7964_v49  ;;  %12984 = vmatpush3.bf16.msra.mxu1 %v12981_v34  ;;  %v9537_v58 = vld [vmem:[%s16881_s12 + $0x9] ss:$0 sm:$0xff]  ;;  %v9593_v9 = vld [vmem:[%s16879_s10 + $0x5f0] sm:$0xff]  ;;  %v9594_v49 = vld [vmem:[%s16879_s10 + $0x5f8] sm:$0xff] }
0x20a8   :  { %v8186_v8 = vpop.xlane.xlu1 %8185  ;;  %12986 = vmatprep.subr.bf16.mxu1 %v12985_v13  ;;  %v9584_v34 = vld [vmem:[%s16879_s10 + $0x5a8] sm:$0xff]  ;;  %v13041_v25 = vpack.c.bf16 %v9594_v49, %v9593_v9 }
0x20a9   :  { %v8195_v24 = vadd.f32 1e-05, %v8191_v32  ;;  %v8188_v21 = vmul.f32 0.03125, %v8186_v8  ;;  %11838 = vmatprep.mubr.msk.f32.mxu1 %vm98_vm0, %v16662_v35  ;;  %v8224_v47 = vadd.f32 %v7974_v17, %v16329_v42  ;;  %v9561_v42 = vld [vmem:[%s16879_s10 + $0x560] sm:$0xff]  ;;  %v13021_v46 = vpack.c.bf16 %v9584_v34, %v9583_v57  ;;  %v9592_v30 = vld [vmem:[%s16879_s10 + $0x5e8] sm:$0xff] }
0x20aa   :  { %v12997_v37 = vpack.c.bf16 %v9562_v12, %v9561_v42  ;;  %v9596_v34 = vld [vmem:[%s16880_s11 + $0xb] ss:$0 sm:$0xff] }
0x20ab   :  { %13221 = vrsqrt.f32 %v8195_v24  ;;  %v8192_v23 = vsub.f32 %v8188_v21, %v8190_v56  ;;  %v16673_v7 = vmul.f32 0.5, %v8224_v47  ;;  %12988 = vmatpush3.bf16.msra.mxu1 %v12985_v13  ;;  %v9591_v13 = vld [vmem:[%s16879_s10 + $0x5e0] sm:$0xff] }
0x20ac   :  { %12990 = vmatprep.subr.bf16.mxu1 %v12989_v60  ;;  %v13037_v40 = vpack.c.bf16 %v9592_v30, %v9591_v13 }
0x20ad   :  { %v8196_v59 = vadd.f32 1e-05, %v8192_v23  ;;  %11839 = vmatmul.mubr.msk.f32.gmra.mrb[140].mxu1 %vm98_vm0, %v16673_v7 }
0x20af   :  { %13223 = vrsqrt.f32 %v8196_v59  ;;  %12992 = vmatpush3.bf16.msra.mxu1 %v12989_v60  ;;  %v9576_v59 = vld [vmem:[%s16921_s30 + $0xb] ss:$0 sm:$0xff] }
0x20b0   :  { %12994 = vmatprep.subr.bf16.mxu1 %v12993_v22 }
0x20b3   :  { %12996 = vmatpush3.bf16.msra.mxu1 %v12993_v22 }
0x20b4   :  { %12998 = vmatprep.subr.bf16.mxu1 %v12997_v37 }
0x20b5   :  { %v13222_v36 = vpop.eup %13221 }
0x20b6   :  { %v8199_v15 = vmul.f32 %v13222_v36, %v8193_v53 }
0x20b7   :  { %13000 = vmatpush3.bf16.msra.mxu1 %v12997_v37 }
0x20b8   :  { %v8207_v38 = vmul.f32 %v9537_v58, %v8199_v15  ;;  %v9566_v15 = vld [vmem:[%s16880_s11 + $0xa] ss:$0 sm:$0xff] }
0x20b9   :  { %v13224_v63 = vpop.eup %13223 }
0x20ba   :  { %v8200_v48 = vmul.f32 %v13224_v63, %v8194_v61  ;;  %v8215_v41 = vadd.f32 %v9538_v31, %v8207_v38 }
0x20bc   :  { %v8208_v3 = vmul.f32 %v9537_v58, %v8200_v48  ;;  %v8231_v44 = vadd.f32 %v8215_v41, %v16282_v54  ;;  %v9564_v54 = vld [vmem:[%s16879_s10 + $0x578] sm:$0xff] }
0x20bd   :  { %v13001_v26 = vpack.c.bf16 %v9564_v54, %v9563_v11 }
0x20be   :  { %v8216_v50 = vadd.f32 %v9538_v31, %v8208_v3  ;;  %v16692_v45 = vmul.f32 0.5, %v8231_v44 }
0x20bf   :  { %13002 = vmatprep.subr.bf16.mxu1 %v13001_v26 }
0x20c0   :  { %11887 = vmatprep.mubr.msk.f32.mxu0 %vm98_vm0, %v16692_v45  ;;  %v8232_v4 = vadd.f32 %v8216_v50, %v16284_v14  ;;  %13004 = vmatpush3.bf16.msra.mxu1 %v13001_v26  ;;  %v9579_v14 = vld [vmem:[%s16879_s10 + $0x580] sm:$0xff] }
0x20c1   :  { %v13013_v19 = vpack.c.bf16 %v9580_v18, %v9579_v14 }
0x20c2   :  { %v16697_v43 = vmul.f32 0.5, %v8232_v4 }
0x20c3   :  { %13014 = vmatprep.subr.bf16.mxu0 %v13013_v19 }
0x20c4   :  { %11888 = vmatmul.mubr.msk.f32.vlgmr.msra.gmra.mrb[146].mxu0 %vm98_vm0, %v16697_v43 }
0x20c5   :  { %13016 = vmatpush3.bf16.msra.mxu0 %v13013_v19 }
0x20c6   :  { %13018 = vmatprep.subr.bf16.mxu0 %v13017_v2 }
0x20c9   :  { %13020 = vmatpush3.bf16.msra.mxu0 %v13017_v2 }
0x20ca   :  { %13022 = vmatprep.subr.bf16.mxu0 %v13021_v46 }
0x20cd   :  { %13024 = vmatpush3.bf16.msra.mxu0 %v13021_v46 }
0x20ce   :  { %13026 = vmatprep.subr.bf16.mxu0 %v13025_v20 }
0x20d1   :  { %13028 = vmatpush3.bf16.msra.mxu0 %v13025_v20 }
0x20d2   :  { %13030 = vmatprep.subr.bf16.mxu0 %v13029_v16 }
0x20d5   :  { %13032 = vmatpush3.bf16.msra.mxu0 %v13029_v16 }
0x20d6   :  { %13034 = vmatprep.subr.bf16.mxu0 %v13033_v1 }
0x20d9   :  { %13036 = vmatpush3.bf16.msra.mxu0 %v13033_v1 }
0x20da   :  { %13038 = vmatprep.subr.bf16.mxu0 %v13037_v40 }
0x20dd   :  { %13040 = vmatpush3.bf16.msra.mxu0 %v13037_v40 }
0x20de   :  { %13042 = vmatprep.subr.bf16.mxu0 %v13041_v25 }
0x20e1   :  { %13044 = vmatpush3.bf16.msra.mxu0 %v13041_v25 }
0x2171   :  { %v11837_v32 = vpop.f32.mrb[138].mxu1 }
0x2172   :  { %v8332_v17 = vadd.f32 %v11837_v32, %v9544_v39  ;;  %v8326_v8 = vpop.f32.mrb[139].mxu1 }
0x2173   :  { %v8327_v60 = vadd.f32 %v9544_v39, %v8326_v8 }
0x2174   :  { %v8346_v24 = vmax.f32 %v8332_v17, 0.0 }
0x2175   :  { %v8345_v56 = vmax.f32 %v8327_v60, 0.0 }
0x2177   :  { %11873 = vmatprep.mubr.f32.mxu1 %v8345_v56 }
0x2178   :  { %11874 = vmatmul.mubr.f32.vlgmr.msra.gmra.mrb[142].mxu1 %v8346_v24 }
0x2180   :  { %v11840_v21 = vpop.f32.mrb[140].mxu1 }
0x2181   :  { %v8342_v47 = vadd.f32 %v11840_v21, %v9544_v39  ;;  %v8336_v33 = vpop.f32.mrb[141].mxu1 }
0x2182   :  { %v8337_v6 = vadd.f32 %v9544_v39, %v8336_v33 }
0x2183   :  { %v8348_v22 = vmax.f32 %v8342_v47, 0.0 }
0x2184   :  { %v8347_v23 = vmax.f32 %v8337_v6, 0.0 }
0x2186   :  { %11876 = vmatprep.mubr.f32.mxu1 %v8347_v23 }
0x2187   :  { %11877 = vmatmul.mubr.f32.gmra.mrb[144].mxu1 %v8348_v22 }
0x2197   :  { %v11889_v42 = vpop.f32.mrb[146].mxu0 }
0x2198   :  { %v8642_v12 = vadd.f32 %v11889_v42, %v9576_v59  ;;  %v8636_v37 = vpop.f32.mrb[147].mxu0 }
0x2199   :  { %v8637_v53 = vadd.f32 %v9576_v59, %v8636_v37 }
0x219a   :  { %v8646_v58 = vmax.f32 %v8642_v12, 0.0 }
0x219b   :  { %v8645_v36 = vmax.f32 %v8637_v53, 0.0 }
0x219d   :  { %11922 = vmatprep.mubr.f32.mxu0 %v8645_v36 }
0x219e   :  { %11923 = vmatmul.mubr.f32.vlgmr.msra.gmra.mrb[148].mxu0 %v8646_v58 }
0x224b   :  { %v11875_v31 = vpop.f32.mrb[142].mxu1 }
0x224c   :  { %v8446_v61 = vadd.f32 %v11875_v31, %v9566_v15  ;;  %v8440_v38 = vpop.f32.mrb[143].mxu1  ;;  %v9569_v31 = vld [vmem:[%s16881_s12 + $0xa] ss:$0 sm:$0xff] }
0x224d   :  { %v8441_v63 = vadd.f32 %v9566_v15, %v8440_v38 }
0x224e   :  { %v16765_v48 = vadd.f32 %v8446_v61, %v16635_v10 }
0x224f   :  { %v16768_v41 = vadd.f32 %v8441_v63, %v16633_v27 }
0x2250   :  { %v8470_v3 = vsel %vm98_vm0, %v16765_v48, 0.0  ;;  %v8484_v44 = vmul.f32 %v16765_v48, %v16765_v48 }
0x2251   :  { %8471 = vadd.xlane.f32.xlu1 %v8470_v3  ;;  %v8467_v50 = vsel %vm98_vm0, %v16768_v41, 0.0  ;;  %v8483_v4 = vmul.f32 %v16768_v41, %v16768_v41 }
0x2252   :  { %8468 = vadd.xlane.f32.xlu0 %v8467_v50  ;;  %v8490_v10 = vsel %vm98_vm0, %v8484_v44, 0.0 }
0x2253   :  { %v8487_v27 = vsel %vm98_vm0, %v8483_v4, 0.0 }
0x2255   :  { %8491 = vadd.xlane.f32.xlu1 %v8490_v10 }
0x2256   :  { %8488 = vadd.xlane.f32.xlu0 %v8487_v27 }
0x225a   :  { %v11878_v11 = vpop.f32.mrb[144].mxu1 }
0x225b   :  { %v8456_v54 = vadd.f32 %v11878_v11, %v9566_v15  ;;  %v8450_v26 = vpop.f32.mrb[145].mxu1 }
0x225c   :  { %v8451_v14 = vadd.f32 %v9566_v15, %v8450_v26 }
0x225d   :  { %v16781_v18 = vadd.f32 %v8456_v54, %v16673_v7 }
0x225e   :  { %v16784_v19 = vadd.f32 %v8451_v14, %v16662_v35 }
0x225f   :  { %v8476_v62 = vsel %vm98_vm0, %v16781_v18, 0.0  ;;  %v8486_v52 = vmul.f32 %v16781_v18, %v16781_v18 }
0x2260   :  { %8477 = vadd.xlane.f32.xlu1 %v8476_v62  ;;  %v8473_v2 = vsel %vm98_vm0, %v16784_v19, 0.0  ;;  %v8485_v57 = vmul.f32 %v16784_v19, %v16784_v19 }
0x2261   :  { %8474 = vadd.xlane.f32.xlu0 %v8473_v2  ;;  %v8496_v7 = vsel %vm98_vm0, %v8486_v52, 0.0 }
0x2262   :  { %v8493_v35 = vsel %vm98_vm0, %v8485_v57, 0.0 }
0x2264   :  { %8497 = vadd.xlane.f32.xlu1 %v8496_v7 }
0x2265   :  { %8494 = vadd.xlane.f32.xlu0 %v8493_v35 }
0x2271   :  { %v11924_v46 = vpop.f32.mrb[148].mxu0 }
0x2272   :  { %v8744_v5 = vadd.f32 %v11924_v46, %v9596_v34  ;;  %v8738_v29 = vpop.f32.mrb[149].mxu0 }
0x2273   :  { %v8739_v28 = vadd.f32 %v9596_v34, %v8738_v29 }
0x2274   :  { %v16800_v20 = vadd.f32 %v8744_v5, %v16697_v43 }
0x2275   :  { %v16803_v51 = vadd.f32 %v8739_v28, %v16692_v45 }
0x2276   :  { %v8756_v16 = vsel %vm98_vm0, %v16800_v20, 0.0  ;;  %v8762_v55 = vmul.f32 %v16800_v20, %v16800_v20 }
0x2277   :  { %8757 = vadd.xlane.f32.xlu1 %v8756_v16  ;;  %v8753_v0 = vsel %vm98_vm0, %v16803_v51, 0.0  ;;  %v8761_v1 = vmul.f32 %v16803_v51, %v16803_v51 }
0x2278   :  { %8754 = vadd.xlane.f32.xlu0 %v8753_v0  ;;  %v8766_v43 = vsel %vm98_vm0, %v8762_v55, 0.0 }
0x2279   :  { %v8763_v45 = vsel %vm98_vm0, %v8761_v1, 0.0 }
0x227b   :  { %8767 = vadd.xlane.f32.xlu1 %v8766_v43 }
0x227c   :  { %8764 = vadd.xlane.f32.xlu0 %v8763_v45 }
0x22de   :  { %v8472_v13 = vpop.xlane.xlu1 %8471 }
0x22df   :  { %v8480_v30 = vmul.f32 0.03125, %v8472_v13  ;;  %v8469_v40 = vpop.xlane.xlu0 %8468 }
0x22e0   :  { %v8479_v9 = vmul.f32 0.03125, %v8469_v40 }
0x22e1   :  { %v8504_v25 = vmul.f32 %v8480_v30, %v8480_v30  ;;  %v8512_v59 = vsub.f32 %v16765_v48, %v8480_v30  ;;  %v9570_v48 = vld [vmem:[%s16882_s13 + $0xa] ss:$0 sm:$0xff] }
0x22e2   :  { %v8492_v49 = vpop.xlane.xlu1 %8491  ;;  %v8503_v17 = vmul.f32 %v8479_v9, %v8479_v9  ;;  %v8511_v36 = vsub.f32 %v16768_v41, %v8479_v9 }
0x22e3   :  { %v8500_v39 = vmul.f32 0.03125, %v8492_v49  ;;  %v8489_v32 = vpop.xlane.xlu0 %8488 }
0x22e4   :  { %v8499_v8 = vmul.f32 0.03125, %v8489_v32 }
0x22e5   :  { %v8508_v60 = vsub.f32 %v8500_v39, %v8504_v25 }
0x22e6   :  { %v8507_v56 = vsub.f32 %v8499_v8, %v8503_v17 }
0x22e7   :  { %v8516_v24 = vadd.f32 1e-05, %v8508_v60 }
0x22e8   :  { %v8515_v21 = vadd.f32 1e-05, %v8507_v56 }
0x22e9   :  { %13225 = vrsqrt.f32 %v8516_v24 }
0x22ea   :  { %13227 = vrsqrt.f32 %v8515_v21 }
0x22ed   :  { %v8478_v47 = vpop.xlane.xlu1 %8477 }
0x22ee   :  { %v8482_v33 = vmul.f32 0.03125, %v8478_v47  ;;  %v8475_v6 = vpop.xlane.xlu0 %8474 }
0x22ef   :  { %v8481_v23 = vmul.f32 0.03125, %v8475_v6 }
0x22f0   :  { %v8506_v42 = vmul.f32 %v8482_v33, %v8482_v33  ;;  %v8514_v54 = vsub.f32 %v16781_v18, %v8482_v33 }
0x22f1   :  { %v8498_v22 = vpop.xlane.xlu1 %8497  ;;  %v8505_v58 = vmul.f32 %v8481_v23, %v8481_v23  ;;  %v8513_v14 = vsub.f32 %v16784_v19, %v8481_v23 }
0x22f2   :  { %v8502_v12 = vmul.f32 0.03125, %v8498_v22  ;;  %v8495_v37 = vpop.xlane.xlu0 %8494 }
0x22f3   :  { %v13226_v53 = vpop.eup %13225  ;;  %v8501_v15 = vmul.f32 0.03125, %v8495_v37 }
0x22f4   :  { %v13228_v61 = vpop.eup %13227  ;;  %v8524_v38 = vmul.f32 %v13226_v53, %v8512_v59  ;;  %v8510_v63 = vsub.f32 %v8502_v12, %v8506_v42 }
0x22f5   :  { %v8523_v3 = vmul.f32 %v13228_v61, %v8511_v36  ;;  %v8509_v44 = vsub.f32 %v8501_v15, %v8505_v58 }
0x22f6   :  { %v8518_v50 = vadd.f32 1e-05, %v8510_v63  ;;  %v8534_v4 = vmul.f32 %v9569_v31, %v8524_v38 }
0x22f7   :  { %v8517_v10 = vadd.f32 1e-05, %v8509_v44  ;;  %v8533_v27 = vmul.f32 %v9569_v31, %v8523_v3 }
0x22f8   :  { %13229 = vrsqrt.f32 %v8518_v50  ;;  %v8544_v41 = vadd.f32 %v9570_v48, %v8534_v4 }
0x22f9   :  { %13231 = vrsqrt.f32 %v8517_v10  ;;  %v8543_v11 = vadd.f32 %v9570_v48, %v8533_v27 }
0x22fa   :  { %8548 = vst.msk [vmem:[#allocation2 + $0x8] sm:$0xff] %vm98_vm0, %v8544_v41 }
0x22fb   :  { %8547 = vst.msk [vmem:[#allocation2] sm:$0xff] %vm98_vm0, %v8543_v11 }
0x2302   :  { %v13230_v26 = vpop.eup %13229 }
0x2303   :  { %v13232_v62 = vpop.eup %13231  ;;  %v8526_v52 = vmul.f32 %v13230_v26, %v8514_v54 }
0x2304   :  { %v8525_v2 = vmul.f32 %v13232_v62, %v8513_v14  ;;  %v8758_v57 = vpop.xlane.xlu1 %8757 }
0x2305   :  { %v8760_v7 = vmul.f32 0.03125, %v8758_v57  ;;  %v8755_v35 = vpop.xlane.xlu0 %8754  ;;  %v8536_v34 = vmul.f32 %v9569_v31, %v8526_v52 }
0x2306   :  { %v8759_v46 = vmul.f32 0.03125, %v8755_v35  ;;  %v8535_v5 = vmul.f32 %v9569_v31, %v8525_v2 }
0x2307   :  { %v8546_v29 = vadd.f32 %v9570_v48, %v8536_v34  ;;  %v8772_v55 = vmul.f32 %v8760_v7, %v8760_v7 }
0x2308   :  { %v8768_v28 = vpop.xlane.xlu1 %8767  ;;  %v8545_v16 = vadd.f32 %v9570_v48, %v8535_v5  ;;  %v8771_v19 = vmul.f32 %v8759_v46, %v8759_v46 }
0x2309   :  { %v8770_v18 = vmul.f32 0.03125, %v8768_v28  ;;  %v8765_v0 = vpop.xlane.xlu0 %8764  ;;  %8550 = vst.msk [vmem:[#allocation2 + $0x18] sm:$0xff] %vm98_vm0, %v8546_v29 }
0x230a   :  { %v8769_v1 = vmul.f32 0.03125, %v8765_v0  ;;  %8549 = vst.msk [vmem:[#allocation2 + $0x10] sm:$0xff] %vm98_vm0, %v8545_v16 }
0x230b   :  { %v8774_v43 = vsub.f32 %v8770_v18, %v8772_v55 }
0x230c   :  { %13292 = shalt.err (!%p13289_p4)
}
0x230d   :  { %s16930_s22 = sld [smem:[#allocation17_spill]] }
0x2313   :  { %s13293_s24 = scalar_lea.hbm %s16930_s22, 512 }
0x2314   :  { %p13294_p5 = scmp.ne.s32.totalorder %s16930_s22, %s13293_s24  ;;  %p13297_p6 = scmp.lt.u32.totalorder %s13293_s24, %s16930_s22 }
0x2316   :  { %p13299_p7 = pnand %p13297_p6, %p13294_p5 }
0x2318   :  { %13302 = shalt.err (!%p13299_p7)
}
0x2319   :  { %s13330_s26 = smov 128   ;;  %s13331_s29 = smov 8   ;;  %v8773_v45 = vsub.f32 %v8769_v1, %v8771_v19  ;;  %v8778_v13 = vadd.f32 1e-05, %v8774_v43  ;;  %v8776_v40 = vsub.f32 %v16800_v20, %v8760_v7  ;;  %v8775_v49 = vsub.f32 %v16803_v51, %v8759_v46  ;;  %v9599_v25 = vld [vmem:[%s16881_s12 + $0xb] ss:$0 sm:$0xff] }
0x231a   :  { %8812 = dma.vmem_to_hbm [thread:$0]  %s8807_s6, 512, %s16930_s22, [#allocation3], %s13330_s26, %s13330_s26, %s13331_s29  }
0x231b   :  { %v8777_v30 = vadd.f32 1e-05, %v8773_v45  ;;  %13233 = vrsqrt.f32 %v8778_v13  ;;  %v9600_v8 = vld [vmem:[%s16882_s13 + $0xb] ss:$0 sm:$0xff]  ;;  %s13332_s10 = smov [#allocation4]  }
0x231c   :  { %s8818_s28 = sshll.u32 %s13332_s10, 4  ;;  %s8819_s28 = int_to_ptr.vmem [resolvable:$true] %s8818_s28 }
0x231d   :  { %13235 = vrsqrt.f32 %v8777_v30  ;;  %s13303_s1 = scalar_lea.vmem %s8819_s28, 256  ;;  %p13308_p9 = scmp.lt.s32.totalorder %s8819_s28, %s8819_s28 }
0x231e   :  { %p13304_p8 = scmp.ne.s32.totalorder %s8819_s28, %s13303_s1  ;;  %p13309_p10 = scmp.lt.s32.totalorder %s13303_s1, %s13303_s1 }
0x2320   :  { %p13310_p11 = por %p13309_p10, %p13308_p9 }
0x2322   :  { %p13311_p12 = pnand %p13310_p11, %p13304_p8 }
0x2325   :  { %v13234_v9 = vpop.eup %13233 }
0x2326   :  { %v8782_v32 = vmul.f32 %v13234_v9, %v8776_v40 }
0x2327   :  { %v13236_v39 = vpop.eup %13235 }
0x2328   :  { %v8781_v17 = vmul.f32 %v13236_v39, %v8775_v49  ;;  %v8790_v60 = vmul.f32 %v9599_v25, %v8782_v32 }
0x232a   :  { %v8789_v56 = vmul.f32 %v9599_v25, %v8781_v17  ;;  %v8798_v24 = vadd.f32 %v9600_v8, %v8790_v60 }
0x232c   :  { %v8797_v20 = vadd.f32 %v9600_v8, %v8789_v56  ;;  %8800 = vst.msk [vmem:[#allocation4 + $0x8] sm:$0xff] %vm98_vm0, %v8798_v24 }
0x232e   :  { %8799 = vst.msk [vmem:[#allocation4] sm:$0xff] %vm98_vm0, %v8797_v20 }
0x232f   :  { %13314 = shalt.err (!%p13311_p12)
}
0x2330   :  { %s16931_s27 = sld [smem:[#allocation18_spill]] }
0x2336   :  { %s13315_s30 = scalar_lea.hbm %s16931_s27, 256 }
0x2337   :  { %p13316_p13 = scmp.ne.s32.totalorder %s16931_s27, %s13315_s30  ;;  %p13319_p0 = scmp.lt.u32.totalorder %s13315_s30, %s16931_s27 }
0x2339   :  { %p13321_p1 = pnand %p13319_p0, %p13316_p13 }
0x233b   :  { %13324 = shalt.err (!%p13321_p1)
}
0x233c   :  { %8824 = dma.vmem_to_hbm [thread:$0]  %s8819_s28, 256, %s16931_s27, [#allocation5], %s13330_s26, %s13330_s26, %s13331_s29  }
0x233d   :  { %13325 = dma.done.wait [#allocation3], 512  }
0x233e   :  { %13326 = vsyncadd [#allocation3], 4294966784 }
0x233f   :  { %13327 = dma.done.wait [#allocation5], 256  }
0x2340   :  { %13328 = vsyncadd [#allocation5], 4294967040 }
0x2341   :  { %8831 = vsyncpa [#allocation3], 1 }
0x2342   :  { %8832 = vsyncpa [#allocation5], 1 }

</bundles_post_ra>
